<compile_context>
chip_gen: v6e
topology: v6e:2x2x1
jax: 0.10.0
libtpu: 0.0.40
codegen_flags: <defaults>
</compile_context>

<pallas_src>
import functools

import jax
import jax.numpy as jnp
import numpy as np
from jax import lax
from jax.experimental import pallas as pl
from jax.experimental.pallas import tpu as pltpu

LEAK = 0.2
EPS = 1e-5
VMEM_LIMIT = 64 * 1024 * 1024


def _leaky(v):
    return jnp.where(v > 0, v, LEAK * v)


def _row_tile(M, cap=2048):
    """Largest row tile <= cap that divides M exactly; full-M block otherwise."""
    if M <= cap:
        return M
    for t in (2048, 1024, 512, 256, 128, 64, 32, 16):
        if M % t == 0:
            return t
    return M


# --------------------------------------------------------------------------------------
# Kernel 1: matmul (+ optional LeakyReLU epilogue), row-tiled grid.
# --------------------------------------------------------------------------------------
def _matmul_act_kernel(a_ref, w_ref, o_ref, *, act):
    y = jnp.dot(a_ref[...], w_ref[...], preferred_element_type=jnp.float32)
    if act:
        y = _leaky(y)
    o_ref[...] = y.astype(o_ref.dtype)


def matmul_act(patches, w_mat, *, act, out_dtype=jnp.bfloat16):
    M, K = patches.shape
    K2, C = w_mat.shape
    assert K == K2
    tm = _row_tile(M)
    grid = (M // tm,)
    return pl.pallas_call(
        functools.partial(_matmul_act_kernel, act=act),
        out_shape=jax.ShapeDtypeStruct((M, C), out_dtype),
        grid=grid,
        in_specs=[pl.BlockSpec((tm, K), lambda i: (i, 0)),
                  pl.BlockSpec((K, C), lambda i: (0, 0))],
        out_specs=pl.BlockSpec((tm, C), lambda i: (i, 0)),
        compiler_params=pltpu.CompilerParams(
            dimension_semantics=("parallel",), vmem_limit_bytes=VMEM_LIMIT),
    )(patches, w_mat)


# --------------------------------------------------------------------------------------
# Kernel 2: matmul -> train-mode BatchNorm (batch stats in-kernel) -> LeakyReLU.
# Whole layer resident in one grid step, so mean / centered variance are exact two-pass.
# --------------------------------------------------------------------------------------
def _conv_bn_lrelu_kernel(a_ref, w_ref, g_ref, b_ref, o_ref):
    y = jnp.dot(a_ref[...], w_ref[...], preferred_element_type=jnp.float32)
    mean = jnp.mean(y, axis=0, keepdims=True)
    var = jnp.mean((y - mean) * (y - mean), axis=0, keepdims=True)
    scale = g_ref[...] * lax.rsqrt(var + EPS)
    o_ref[...] = _leaky((y - mean) * scale + b_ref[...]).astype(o_ref.dtype)


def conv_bn_lrelu(patches, w_mat, gamma, beta, out_dtype=jnp.bfloat16):
    M, K = patches.shape
    K2, C = w_mat.shape
    assert K == K2
    return pl.pallas_call(
        _conv_bn_lrelu_kernel,
        out_shape=jax.ShapeDtypeStruct((M, C), out_dtype),
        grid=(1,),
        in_specs=[pl.BlockSpec((M, K), lambda i: (0, 0)),
                  pl.BlockSpec((K, C), lambda i: (0, 0)),
                  pl.BlockSpec((1, C), lambda i: (0, 0)),
                  pl.BlockSpec((1, C), lambda i: (0, 0))],
        out_specs=pl.BlockSpec((M, C), lambda i: (0, 0)),
        compiler_params=pltpu.CompilerParams(
            dimension_semantics=("arbitrary",), vmem_limit_bytes=VMEM_LIMIT),
    )(patches, w_mat, gamma.reshape(1, C).astype(jnp.float32),
      beta.reshape(1, C).astype(jnp.float32))


# --------------------------------------------------------------------------------------
# Kernel 3: conv4 matmul -> BN4 -> LeakyReLU -> conv5 (full per-image contraction),
# all in one resident grid step.  conv5's 4x4 valid conv over the 4x4 conv4 map is
# y5[n] = sum_{h,w,c} x4a[n,h,w,c] * w5[h,w,c]; expressed as an elementwise product with
# a per-row-tiled w5 followed by a per-image segment-sum (tiny MXU dot with `seg`).
# --------------------------------------------------------------------------------------
def _conv4_bn_conv5_kernel(a_ref, w4_ref, g_ref, b_ref, w5_ref, seg_ref, o_ref):
    y4 = jnp.dot(a_ref[...], w4_ref[...], preferred_element_type=jnp.float32)
    mean = jnp.mean(y4, axis=0, keepdims=True)
    var = jnp.mean((y4 - mean) * (y4 - mean), axis=0, keepdims=True)
    scale = g_ref[...] * lax.rsqrt(var + EPS)
    x4a = _leaky((y4 - mean) * scale + b_ref[...])          # (M4, C4) f32
    prod = x4a * w5_ref[...]                                 # conv5 weights, f32
    per_img = jnp.dot(seg_ref[...], prod, preferred_element_type=jnp.float32)  # (N, C4)
    o_ref[...] = jnp.sum(per_img, axis=1, keepdims=True)     # (N, 1)


def conv4_bn_conv5(p4, w4_mat, gamma, beta, w5t, seg):
    M, K = p4.shape
    K2, C = w4_mat.shape
    assert K == K2
    N = seg.shape[0]
    return pl.pallas_call(
        _conv4_bn_conv5_kernel,
        out_shape=jax.ShapeDtypeStruct((N, 1), jnp.float32),
        grid=(1,),
        in_specs=[pl.BlockSpec((M, K), lambda i: (0, 0)),
                  pl.BlockSpec((K, C), lambda i: (0, 0)),
                  pl.BlockSpec((1, C), lambda i: (0, 0)),
                  pl.BlockSpec((1, C), lambda i: (0, 0)),
                  pl.BlockSpec((M, C), lambda i: (0, 0)),
                  pl.BlockSpec((N, M), lambda i: (0, 0))],
        out_specs=pl.BlockSpec((N, 1), lambda i: (0, 0)),
        compiler_params=pltpu.CompilerParams(
            dimension_semantics=("arbitrary",), vmem_limit_bytes=VMEM_LIMIT),
    )(p4, w4_mat, gamma.reshape(1, C).astype(jnp.float32),
      beta.reshape(1, C).astype(jnp.float32), w5t, seg)


# --------------------------------------------------------------------------------------
# Glue: im2col, weight reshaping, parameter init
# --------------------------------------------------------------------------------------
def extract_patches(x_nhwc, kh, kw, stride, pad):
    """im2col: rows ordered (n, oh, ow); columns ordered (kh, kw, cin)."""
    N, H, W, C = x_nhwc.shape
    xp = jnp.pad(x_nhwc, ((0, 0), (pad, pad), (pad, pad), (0, 0))) if pad > 0 else x_nhwc
    OH = (H + 2 * pad - kh) // stride + 1
    OW = (W + 2 * pad - kw) // stride + 1
    cols = []
    for i in range(kh):
        for j in range(kw):
            cols.append(xp[:, i:i + stride * (OH - 1) + 1:stride,
                              j:j + stride * (OW - 1) + 1:stride, :])
    patches = jnp.stack(cols, axis=3).reshape(N * OH * OW, kh * kw * C)
    return patches, OH, OW


def w_to_mat(w_oihw, dtype=jnp.bfloat16):
    """PyTorch (Cout, Cin, KH, KW) -> (KH*KW*Cin, Cout), matching patch column order."""
    cout, cin, kh, kw = w_oihw.shape
    return jnp.transpose(w_oihw, (2, 3, 1, 0)).reshape(kh * kw * cin, cout).astype(dtype)


def init_params(key, ndf):
    ks = jax.random.split(key, 5)

    def w(k, cout, cin, kh, kw):
        return 0.05 * jax.random.normal(k, (cout, cin, kh, kw), jnp.float32)

    return {
        "w1": w(ks[0], ndf, 3, 5, 5),
        "w2": w(ks[1], ndf * 2, ndf, 4, 4),
        "w3": w(ks[2], ndf * 4, ndf * 2, 4, 4),
        "w4": w(ks[3], ndf * 8, ndf * 4, 4, 4),
        "w5": w(ks[4], 1, ndf * 8, 4, 4),
        # BatchNorm affine params at PyTorch defaults (weight=1, bias=0)
        "g2": jnp.ones((ndf * 2,), jnp.float32), "b2": jnp.zeros((ndf * 2,), jnp.float32),
        "g3": jnp.ones((ndf * 4,), jnp.float32), "b3": jnp.zeros((ndf * 4,), jnp.float32),
        "g4": jnp.ones((ndf * 8,), jnp.float32), "b4": jnp.zeros((ndf * 8,), jnp.float32),
    }


# --------------------------------------------------------------------------------------
# Forward pass
# --------------------------------------------------------------------------------------
def netd_forward(x_nchw, params):
    x = jnp.transpose(x_nchw, (0, 2, 3, 1)).astype(jnp.bfloat16)   # NCHW -> NHWC, bf16
    N = x.shape[0]

    # conv1 + LeakyReLU (epilogue).  K=75 stays unpadded (full-K block).
    p1, OH, OW = extract_patches(x, 5, 5, 3, 1)
    x1 = matmul_act(p1, w_to_mat(params["w1"]), act=True).reshape(N, OH, OW, -1)

    # conv2 + BatchNorm2 (batch stats) + LeakyReLU, one kernel.
    p2, OH, OW = extract_patches(x1, 4, 4, 2, 1)
    x2 = conv_bn_lrelu(p2, w_to_mat(params["w2"]),
                       params["g2"], params["b2"]).reshape(N, OH, OW, -1)

    # conv3 + BatchNorm3 + LeakyReLU, one kernel.
    p3, OH, OW = extract_patches(x2, 4, 4, 2, 1)
    x3 = conv_bn_lrelu(p3, w_to_mat(params["w3"]),
                       params["g3"], params["b3"]).reshape(N, OH, OW, -1)

    # conv4 + BatchNorm4 + LeakyReLU + conv5, one fused kernel (conv4 map is 4x4, so
    # conv5 is a full per-image contraction).  Output matches x.view(-1).
    p4, OH, OW = extract_patches(x3, 4, 4, 2, 1)
    C4 = params["w4"].shape[0]
    if OH == 4 and OW == 4:
        w5t = jnp.tile(jnp.transpose(params["w5"][0], (1, 2, 0)).reshape(16, C4),
                       (N, 1)).astype(jnp.float32)                  # (N*16, C4)
        seg = jnp.repeat(jnp.eye(N, dtype=jnp.float32), 16, axis=1)  # (N, N*16)
        y5 = conv4_bn_conv5(p4, w_to_mat(params["w4"]),
                            params["g4"], params["b4"], w5t, seg)
        return y5.reshape(-1)

    # General input sizes (conv4 map larger than 4x4): unfused conv4 then plain conv5.
    x4 = conv_bn_lrelu(p4, w_to_mat(params["w4"]),
                       params["g4"], params["b4"]).reshape(N, OH, OW, -1)
    p5, _, _ = extract_patches(x4, 4, 4, 1, 0)
    y5 = matmul_act(p5, w_to_mat(params["w5"]), act=False, out_dtype=jnp.float32)
    return y5.reshape(-1)


netd_forward = jax.jit(netd_forward)


# --------------------------------------------------------------------------------------
# Pure-JAX f32 reference (for correctness verification)
# --------------------------------------------------------------------------------------
def reference_forward(x_nchw, params):
    x = jnp.transpose(x_nchw, (0, 2, 3, 1)).astype(jnp.float32)

    def conv(x, w, s, p):
        wh = jnp.transpose(w, (2, 3, 1, 0))  # HWIO
        return jax.lax.conv_general_dilated(
            x, wh, (s, s), [(p, p), (p, p)],
            dimension_numbers=("NHWC", "HWIO", "NHWC"))

    def lrelu(v):
        return jnp.where(v > 0, v, LEAK * v)

    def bn(v, g, b):
        mean = jnp.mean(v, axis=(0, 1, 2))
        var = jnp.var(v, axis=(0, 1, 2))
        return (v - mean) / jnp.sqrt(var + EPS) * g + b

    x = lrelu(conv(x, params["w1"], 3, 1))
    x = lrelu(bn(conv(x, params["w2"], 2, 1), params["g2"], params["b2"]))
    x = lrelu(bn(conv(x, params["w3"], 2, 1), params["g3"], params["b3"]))
    x = lrelu(bn(conv(x, params["w4"], 2, 1), params["g4"], params["b4"]))
    x = conv(x, params["w5"], 1, 0)
    return x.reshape(-1)


if __name__ == "__main__":
    key = jax.random.PRNGKey(0)
    k_x, k_w = jax.random.split(key)

    ndf = 8
    # 96x96 input is the smallest the architecture admits (conv5 reduces 4x4 -> 1x1).
    x = jax.random.normal(k_x, (2, 3, 96, 96), jnp.float32)
    params = init_params(k_w, ndf)

    out = jax.block_until_ready(netd_forward(x, params))
    ref = jax.block_until_ready(reference_forward(x, params))

    assert out.shape == (2,), out.shape
    max_diff = float(jnp.max(jnp.abs(out.astype(jnp.float32) - ref)))
    # Tolerance reflects bf16 MXU inputs (f32 accumulation) vs. the pure-f32 reference.
    assert np.isfinite(max_diff) and max_diff < 1e-1, f"max diff {max_diff}"

    print("KERNEL_OK")
</pallas_src>

<mosaic_0001>
module attributes {stable_mosaic.version = 11 : i64} {
  func.func @_matmul_act_kernel(%arg0: i32, %arg1: memref<2048x75xbf16, #tpu.memory_space<vmem>>, %arg2: memref<75x8xbf16, #tpu.memory_space<vmem>>, %arg3: memref<2048x8xbf16, #tpu.memory_space<vmem>>) attributes {dimension_semantics = [#tpu.dimension_semantics<parallel>], iteration_bounds = array<i64: 1>, scalar_prefetch = 0 : i64, scratch_operands = 0 : i64, tpu.core_type = #tpu.core_type<tc>, window_params = [{transform_indices = @transform_0, window_bounds = array<i64: 2048, 75>}, {pipeline_mode = #tpu.pipeline_mode<synchronous>, transform_indices = @transform_1, window_bounds = array<i64: 75, 8>}, {transform_indices = @transform_2, window_bounds = array<i64: 2048, 8>}]} {
    %c0 = arith.constant 0 : index
    %c0_0 = arith.constant 0 : index
    %0 = vector.load %arg1[%c0, %c0_0] : memref<2048x75xbf16, #tpu.memory_space<vmem>>, vector<2048x75xbf16>
    %c0_1 = arith.constant 0 : index
    %c0_2 = arith.constant 0 : index
    %1 = vector.load %arg2[%c0_1, %c0_2] : memref<75x8xbf16, #tpu.memory_space<vmem>>, vector<75x8xbf16>
    %cst = arith.constant dense<0.000000e+00> : vector<2048x8xf32>
    %2 = tpu.matmul %0, %1, %cst {dimension_numbers = #tpu.dot_dimension_numbers<[1], [0], [0], [1], [0, 0, 1, 1], [], []>} : vector<2048x75xbf16>, vector<75x8xbf16>, vector<2048x8xf32> -> vector<2048x8xf32>
    %cst_3 = arith.constant 0.000000e+00 : f32
    %3 = vector.broadcast %cst_3 : f32 to vector<2048x8xf32>
    %4 = arith.cmpf ogt, %2, %3 : vector<2048x8xf32>
    %cst_4 = arith.constant 2.000000e-01 : f32
    %5 = vector.broadcast %cst_4 : f32 to vector<2048x8xf32>
    %6 = arith.mulf %5, %2 : vector<2048x8xf32>
    %7 = arith.select %4, %2, %6 : vector<2048x8xi1>, vector<2048x8xf32>
    %8 = arith.truncf %7 : vector<2048x8xf32> to vector<2048x8xbf16>
    %c0_5 = arith.constant 0 : index
    %c0_6 = arith.constant 0 : index
    %9 = vector.load %arg3[%c0_5, %c0_6] : memref<2048x8xbf16, #tpu.memory_space<vmem>>, vector<2048x8xbf16>
    tpu.vector_store %arg3[%c0_5, %c0_6], %8 {strides = array<i32>} : memref<2048x8xbf16, #tpu.memory_space<vmem>>, vector<2048x8xbf16>,
    return
  }
  func.func @transform_0(%arg0: i32) -> (i32, i32) {
    %c0_i32 = arith.constant 0 : i32
    %c0_i32_0 = arith.constant 0 : i32
    return %arg0, %c0_i32 : i32, i32
  }
  func.func @transform_1(%arg0: i32) -> (i32, i32) {
    %c0_i32 = arith.constant 0 : i32
    %c0_i32_0 = arith.constant 0 : i32
    %c0_i32_1 = arith.constant 0 : i32
    return %c0_i32, %c0_i32_0 : i32, i32
  }
  func.func @transform_2(%arg0: i32) -> (i32, i32) {
    %c0_i32 = arith.constant 0 : i32
    %c0_i32_0 = arith.constant 0 : i32
    return %arg0, %c0_i32 : i32, i32
  }
}

module attributes {stable_mosaic.version = 11 : i64} {
  func.func @_conv_bn_lrelu_kernel(%arg0: i32, %arg1: memref<512x128xbf16, #tpu.memory_space<vmem>>, %arg2: memref<128x16xbf16, #tpu.memory_space<vmem>>, %arg3: memref<1x16xf32, #tpu.memory_space<vmem>>, %arg4: memref<1x16xf32, #tpu.memory_space<vmem>>, %arg5: memref<512x16xbf16, #tpu.memory_space<vmem>>) attributes {dimension_semantics = [#tpu.dimension_semantics<arbitrary>], iteration_bounds = array<i64: 1>, scalar_prefetch = 0 : i64, scratch_operands = 0 : i64, tpu.core_type = #tpu.core_type<tc>, window_params = [{pipeline_mode = #tpu.pipeline_mode<synchronous>, transform_indices = @transform_0, window_bounds = array<i64: 512, 128>}, {pipeline_mode = #tpu.pipeline_mode<synchronous>, transform_indices = @transform_1, window_bounds = array<i64: 128, 16>}, {pipeline_mode = #tpu.pipeline_mode<synchronous>, transform_indices = @transform_2, window_bounds = array<i64: 1, 16>}, {pipeline_mode = #tpu.pipeline_mode<synchronous>, transform_indices = @transform_3, window_bounds = array<i64: 1, 16>}, {pipeline_mode = #tpu.pipeline_mode<synchronous>, transform_indices = @transform_4, window_bounds = array<i64: 512, 16>}]} {
    %c0 = arith.constant 0 : index
    %c0_0 = arith.constant 0 : index
    %0 = vector.load %arg1[%c0, %c0_0] : memref<512x128xbf16, #tpu.memory_space<vmem>>, vector<512x128xbf16>
    %c0_1 = arith.constant 0 : index
    %c0_2 = arith.constant 0 : index
    %1 = vector.load %arg2[%c0_1, %c0_2] : memref<128x16xbf16, #tpu.memory_space<vmem>>, vector<128x16xbf16>
    %cst = arith.constant dense<0.000000e+00> : vector<512x16xf32>
    %2 = tpu.matmul %0, %1, %cst {dimension_numbers = #tpu.dot_dimension_numbers<[1], [0], [0], [1], [0, 0, 1, 1], [], []>} : vector<512x128xbf16>, vector<128x16xbf16>, vector<512x16xf32> -> vector<512x16xf32>
    %cst_3 = arith.constant dense<0.000000e+00> : vector<16xf32>
    %3 = vector.multi_reduction <add>, %2, %cst_3 [0] : vector<512x16xf32> to vector<16xf32>
    %4 = vector.shape_cast %3 : vector<16xf32> to vector<1x16xf32>
    %cst_4 = arith.constant 5.120000e+02 : f32
    %5 = vector.broadcast %cst_4 : f32 to vector<1x16xf32>
    %6 = arith.divf %4, %5 : vector<1x16xf32>
    %7 = vector.broadcast %6 : vector<1x16xf32> to vector<512x16xf32>
    %8 = arith.subf %2, %7 : vector<512x16xf32>
    %9 = vector.broadcast %6 : vector<1x16xf32> to vector<512x16xf32>
    %10 = arith.subf %2, %9 : vector<512x16xf32>
    %11 = arith.mulf %8, %10 : vector<512x16xf32>
    %cst_5 = arith.constant dense<0.000000e+00> : vector<16xf32>
    %12 = vector.multi_reduction <add>, %11, %cst_5 [0] : vector<512x16xf32> to vector<16xf32>
    %13 = vector.shape_cast %12 : vector<16xf32> to vector<1x16xf32>
    %cst_6 = arith.constant 5.120000e+02 : f32
    %14 = vector.broadcast %cst_6 : f32 to vector<1x16xf32>
    %15 = arith.divf %13, %14 : vector<1x16xf32>
    %c0_7 = arith.constant 0 : index
    %c0_8 = arith.constant 0 : index
    %16 = vector.load %arg3[%c0_7, %c0_8] : memref<1x16xf32, #tpu.memory_space<vmem>>, vector<1x16xf32>
    %cst_9 = arith.constant 9.99999974E-6 : f32
    %17 = vector.broadcast %cst_9 : f32 to vector<1x16xf32>
    %18 = arith.addf %15, %17 : vector<1x16xf32>
    %19 = math.rsqrt %18 : vector<1x16xf32>
    %20 = arith.mulf %16, %19 : vector<1x16xf32>
    %21 = vector.broadcast %6 : vector<1x16xf32> to vector<512x16xf32>
    %22 = arith.subf %2, %21 : vector<512x16xf32>
    %23 = vector.broadcast %20 : vector<1x16xf32> to vector<512x16xf32>
    %24 = arith.mulf %22, %23 : vector<512x16xf32>
    %c0_10 = arith.constant 0 : index
    %c0_11 = arith.constant 0 : index
    %25 = vector.load %arg4[%c0_10, %c0_11] : memref<1x16xf32, #tpu.memory_space<vmem>>, vector<1x16xf32>
    %26 = vector.broadcast %25 : vector<1x16xf32> to vector<512x16xf32>
    %27 = arith.addf %24, %26 : vector<512x16xf32>
    %cst_12 = arith.constant 0.000000e+00 : f32
    %28 = vector.broadcast %cst_12 : f32 to vector<512x16xf32>
    %29 = arith.cmpf ogt, %27, %28 : vector<512x16xf32>
    %cst_13 = arith.constant 2.000000e-01 : f32
    %30 = vector.broadcast %cst_13 : f32 to vector<512x16xf32>
    %31 = arith.mulf %30, %27 : vector<512x16xf32>
    %32 = arith.select %29, %27, %31 : vector<512x16xi1>, vector<512x16xf32>
    %33 = arith.truncf %32 : vector<512x16xf32> to vector<512x16xbf16>
    %c0_14 = arith.constant 0 : index
    %c0_15 = arith.constant 0 : index
    %34 = vector.load %arg5[%c0_14, %c0_15] : memref<512x16xbf16, #tpu.memory_space<vmem>>, vector<512x16xbf16>
    tpu.vector_store %arg5[%c0_14, %c0_15], %33 {strides = array<i32>} : memref<512x16xbf16, #tpu.memory_space<vmem>>, vector<512x16xbf16>,
    return
  }
  func.func @transform_0(%arg0: i32) -> (i32, i32) {
    %c0_i32 = arith.constant 0 : i32
    %c0_i32_0 = arith.constant 0 : i32
    %c0_i32_1 = arith.constant 0 : i32
    return %c0_i32, %c0_i32_0 : i32, i32
  }
  func.func @transform_1(%arg0: i32) -> (i32, i32) {
    %c0_i32 = arith.constant 0 : i32
    %c0_i32_0 = arith.constant 0 : i32
    %c0_i32_1 = arith.constant 0 : i32
    return %c0_i32, %c0_i32_0 : i32, i32
  }
  func.func @transform_2(%arg0: i32) -> (i32, i32) {
    %c0_i32 = arith.constant 0 : i32
    %c0_i32_0 = arith.constant 0 : i32
    %c0_i32_1 = arith.constant 0 : i32
    return %c0_i32, %c0_i32_0 : i32, i32
  }
  func.func @transform_3(%arg0: i32) -> (i32, i32) {
    %c0_i32 = arith.constant 0 : i32
    %c0_i32_0 = arith.constant 0 : i32
    %c0_i32_1 = arith.constant 0 : i32
    return %c0_i32, %c0_i32_0 : i32, i32
  }
  func.func @transform_4(%arg0: i32) -> (i32, i32) {
    %c0_i32 = arith.constant 0 : i32
    %c0_i32_0 = arith.constant 0 : i32
    %c0_i32_1 = arith.constant 0 : i32
    return %c0_i32, %c0_i32_0 : i32, i32
  }
}

module attributes {stable_mosaic.version = 11 : i64} {
  func.func @_conv_bn_lrelu_kernel(%arg0: i32, %arg1: memref<128x256xbf16, #tpu.memory_space<vmem>>, %arg2: memref<256x32xbf16, #tpu.memory_space<vmem>>, %arg3: memref<1x32xf32, #tpu.memory_space<vmem>>, %arg4: memref<1x32xf32, #tpu.memory_space<vmem>>, %arg5: memref<128x32xbf16, #tpu.memory_space<vmem>>) attributes {dimension_semantics = [#tpu.dimension_semantics<arbitrary>], iteration_bounds = array<i64: 1>, scalar_prefetch = 0 : i64, scratch_operands = 0 : i64, tpu.core_type = #tpu.core_type<tc>, window_params = [{pipeline_mode = #tpu.pipeline_mode<synchronous>, transform_indices = @transform_0, window_bounds = array<i64: 128, 256>}, {pipeline_mode = #tpu.pipeline_mode<synchronous>, transform_indices = @transform_1, window_bounds = array<i64: 256, 32>}, {pipeline_mode = #tpu.pipeline_mode<synchronous>, transform_indices = @transform_2, window_bounds = array<i64: 1, 32>}, {pipeline_mode = #tpu.pipeline_mode<synchronous>, transform_indices = @transform_3, window_bounds = array<i64: 1, 32>}, {pipeline_mode = #tpu.pipeline_mode<synchronous>, transform_indices = @transform_4, window_bounds = array<i64: 128, 32>}]} {
    %c0 = arith.constant 0 : index
    %c0_0 = arith.constant 0 : index
    %0 = vector.load %arg1[%c0, %c0_0] : memref<128x256xbf16, #tpu.memory_space<vmem>>, vector<128x256xbf16>
    %c0_1 = arith.constant 0 : index
    %c0_2 = arith.constant 0 : index
    %1 = vector.load %arg2[%c0_1, %c0_2] : memref<256x32xbf16, #tpu.memory_space<vmem>>, vector<256x32xbf16>
    %cst = arith.constant dense<0.000000e+00> : vector<128x32xf32>
    %2 = tpu.matmul %0, %1, %cst {dimension_numbers = #tpu.dot_dimension_numbers<[1], [0], [0], [1], [0, 0, 1, 1], [], []>} : vector<128x256xbf16>, vector<256x32xbf16>, vector<128x32xf32> -> vector<128x32xf32>
    %cst_3 = arith.constant dense<0.000000e+00> : vector<32xf32>
    %3 = vector.multi_reduction <add>, %2, %cst_3 [0] : vector<128x32xf32> to vector<32xf32>
    %4 = vector.shape_cast %3 : vector<32xf32> to vector<1x32xf32>
    %cst_4 = arith.constant 1.280000e+02 : f32
    %5 = vector.broadcast %cst_4 : f32 to vector<1x32xf32>
    %6 = arith.divf %4, %5 : vector<1x32xf32>
    %7 = vector.broadcast %6 : vector<1x32xf32> to vector<128x32xf32>
    %8 = arith.subf %2, %7 : vector<128x32xf32>
    %9 = vector.broadcast %6 : vector<1x32xf32> to vector<128x32xf32>
    %10 = arith.subf %2, %9 : vector<128x32xf32>
    %11 = arith.mulf %8, %10 : vector<128x32xf32>
    %cst_5 = arith.constant dense<0.000000e+00> : vector<32xf32>
    %12 = vector.multi_reduction <add>, %11, %cst_5 [0] : vector<128x32xf32> to vector<32xf32>
    %13 = vector.shape_cast %12 : vector<32xf32> to vector<1x32xf32>
    %cst_6 = arith.constant 1.280000e+02 : f32
    %14 = vector.broadcast %cst_6 : f32 to vector<1x32xf32>
    %15 = arith.divf %13, %14 : vector<1x32xf32>
    %c0_7 = arith.constant 0 : index
    %c0_8 = arith.constant 0 : index
    %16 = vector.load %arg3[%c0_7, %c0_8] : memref<1x32xf32, #tpu.memory_space<vmem>>, vector<1x32xf32>
    %cst_9 = arith.constant 9.99999974E-6 : f32
    %17 = vector.broadcast %cst_9 : f32 to vector<1x32xf32>
    %18 = arith.addf %15, %17 : vector<1x32xf32>
    %19 = math.rsqrt %18 : vector<1x32xf32>
    %20 = arith.mulf %16, %19 : vector<1x32xf32>
    %21 = vector.broadcast %6 : vector<1x32xf32> to vector<128x32xf32>
    %22 = arith.subf %2, %21 : vector<128x32xf32>
    %23 = vector.broadcast %20 : vector<1x32xf32> to vector<128x32xf32>
    %24 = arith.mulf %22, %23 : vector<128x32xf32>
    %c0_10 = arith.constant 0 : index
    %c0_11 = arith.constant 0 : index
    %25 = vector.load %arg4[%c0_10, %c0_11] : memref<1x32xf32, #tpu.memory_space<vmem>>, vector<1x32xf32>
    %26 = vector.broadcast %25 : vector<1x32xf32> to vector<128x32xf32>
    %27 = arith.addf %24, %26 : vector<128x32xf32>
    %cst_12 = arith.constant 0.000000e+00 : f32
    %28 = vector.broadcast %cst_12 : f32 to vector<128x32xf32>
    %29 = arith.cmpf ogt, %27, %28 : vector<128x32xf32>
    %cst_13 = arith.constant 2.000000e-01 : f32
    %30 = vector.broadcast %cst_13 : f32 to vector<128x32xf32>
    %31 = arith.mulf %30, %27 : vector<128x32xf32>
    %32 = arith.select %29, %27, %31 : vector<128x32xi1>, vector<128x32xf32>
    %33 = arith.truncf %32 : vector<128x32xf32> to vector<128x32xbf16>
    %c0_14 = arith.constant 0 : index
    %c0_15 = arith.constant 0 : index
    %34 = vector.load %arg5[%c0_14, %c0_15] : memref<128x32xbf16, #tpu.memory_space<vmem>>, vector<128x32xbf16>
    tpu.vector_store %arg5[%c0_14, %c0_15], %33 {strides = array<i32>} : memref<128x32xbf16, #tpu.memory_space<vmem>>, vector<128x32xbf16>,
    return
  }
  func.func @transform_0(%arg0: i32) -> (i32, i32) {
    %c0_i32 = arith.constant 0 : i32
    %c0_i32_0 = arith.constant 0 : i32
    %c0_i32_1 = arith.constant 0 : i32
    return %c0_i32, %c0_i32_0 : i32, i32
  }
  func.func @transform_1(%arg0: i32) -> (i32, i32) {
    %c0_i32 = arith.constant 0 : i32
    %c0_i32_0 = arith.constant 0 : i32
    %c0_i32_1 = arith.constant 0 : i32
    return %c0_i32, %c0_i32_0 : i32, i32
  }
  func.func @transform_2(%arg0: i32) -> (i32, i32) {
    %c0_i32 = arith.constant 0 : i32
    %c0_i32_0 = arith.constant 0 : i32
    %c0_i32_1 = arith.constant 0 : i32
    return %c0_i32, %c0_i32_0 : i32, i32
  }
  func.func @transform_3(%arg0: i32) -> (i32, i32) {
    %c0_i32 = arith.constant 0 : i32
    %c0_i32_0 = arith.constant 0 : i32
    %c0_i32_1 = arith.constant 0 : i32
    return %c0_i32, %c0_i32_0 : i32, i32
  }
  func.func @transform_4(%arg0: i32) -> (i32, i32) {
    %c0_i32 = arith.constant 0 : i32
    %c0_i32_0 = arith.constant 0 : i32
    %c0_i32_1 = arith.constant 0 : i32
    return %c0_i32, %c0_i32_0 : i32, i32
  }
}

module attributes {stable_mosaic.version = 11 : i64} {
  func.func @_conv4_bn_conv5_kernel(%arg0: i32, %arg1: memref<32x512xbf16, #tpu.memory_space<vmem>>, %arg2: memref<512x64xbf16, #tpu.memory_space<vmem>>, %arg3: memref<1x64xf32, #tpu.memory_space<vmem>>, %arg4: memref<1x64xf32, #tpu.memory_space<vmem>>, %arg5: memref<32x64xf32, #tpu.memory_space<vmem>>, %arg6: memref<2x32xf32, #tpu.memory_space<vmem>>, %arg7: memref<2x1xf32, #tpu.memory_space<vmem>>) attributes {dimension_semantics = [#tpu.dimension_semantics<arbitrary>], iteration_bounds = array<i64: 1>, scalar_prefetch = 0 : i64, scratch_operands = 0 : i64, tpu.core_type = #tpu.core_type<tc>, window_params = [{pipeline_mode = #tpu.pipeline_mode<synchronous>, transform_indices = @transform_0, window_bounds = array<i64: 32, 512>}, {pipeline_mode = #tpu.pipeline_mode<synchronous>, transform_indices = @transform_1, window_bounds = array<i64: 512, 64>}, {pipeline_mode = #tpu.pipeline_mode<synchronous>, transform_indices = @transform_2, window_bounds = array<i64: 1, 64>}, {pipeline_mode = #tpu.pipeline_mode<synchronous>, transform_indices = @transform_3, window_bounds = array<i64: 1, 64>}, {pipeline_mode = #tpu.pipeline_mode<synchronous>, transform_indices = @transform_4, window_bounds = array<i64: 32, 64>}, {pipeline_mode = #tpu.pipeline_mode<synchronous>, transform_indices = @transform_5, window_bounds = array<i64: 2, 32>}, {pipeline_mode = #tpu.pipeline_mode<synchronous>, transform_indices = @transform_6, window_bounds = array<i64: 2, 1>}]} {
    %c0 = arith.constant 0 : index
    %c0_0 = arith.constant 0 : index
    %0 = vector.load %arg1[%c0, %c0_0] : memref<32x512xbf16, #tpu.memory_space<vmem>>, vector<32x512xbf16>
    %c0_1 = arith.constant 0 : index
    %c0_2 = arith.constant 0 : index
    %1 = vector.load %arg2[%c0_1, %c0_2] : memref<512x64xbf16, #tpu.memory_space<vmem>>, vector<512x64xbf16>
    %cst = arith.constant dense<0.000000e+00> : vector<32x64xf32>
    %2 = tpu.matmul %0, %1, %cst {dimension_numbers = #tpu.dot_dimension_numbers<[1], [0], [0], [1], [0, 0, 1, 1], [], []>} : vector<32x512xbf16>, vector<512x64xbf16>, vector<32x64xf32> -> vector<32x64xf32>
    %cst_3 = arith.constant dense<0.000000e+00> : vector<64xf32>
    %3 = vector.multi_reduction <add>, %2, %cst_3 [0] : vector<32x64xf32> to vector<64xf32>
    %4 = vector.shape_cast %3 : vector<64xf32> to vector<1x64xf32>
    %cst_4 = arith.constant 3.200000e+01 : f32
    %5 = vector.broadcast %cst_4 : f32 to vector<1x64xf32>
    %6 = arith.divf %4, %5 : vector<1x64xf32>
    %7 = vector.broadcast %6 : vector<1x64xf32> to vector<32x64xf32>
    %8 = arith.subf %2, %7 : vector<32x64xf32>
    %9 = vector.broadcast %6 : vector<1x64xf32> to vector<32x64xf32>
    %10 = arith.subf %2, %9 : vector<32x64xf32>
    %11 = arith.mulf %8, %10 : vector<32x64xf32>
    %cst_5 = arith.constant dense<0.000000e+00> : vector<64xf32>
    %12 = vector.multi_reduction <add>, %11, %cst_5 [0] : vector<32x64xf32> to vector<64xf32>
    %13 = vector.shape_cast %12 : vector<64xf32> to vector<1x64xf32>
    %cst_6 = arith.constant 3.200000e+01 : f32
    %14 = vector.broadcast %cst_6 : f32 to vector<1x64xf32>
    %15 = arith.divf %13, %14 : vector<1x64xf32>
    %c0_7 = arith.constant 0 : index
    %c0_8 = arith.constant 0 : index
    %16 = vector.load %arg3[%c0_7, %c0_8] : memref<1x64xf32, #tpu.memory_space<vmem>>, vector<1x64xf32>
    %cst_9 = arith.constant 9.99999974E-6 : f32
    %17 = vector.broadcast %cst_9 : f32 to vector<1x64xf32>
    %18 = arith.addf %15, %17 : vector<1x64xf32>
    %19 = math.rsqrt %18 : vector<1x64xf32>
    %20 = arith.mulf %16, %19 : vector<1x64xf32>
    %21 = vector.broadcast %6 : vector<1x64xf32> to vector<32x64xf32>
    %22 = arith.subf %2, %21 : vector<32x64xf32>
    %23 = vector.broadcast %20 : vector<1x64xf32> to vector<32x64xf32>
    %24 = arith.mulf %22, %23 : vector<32x64xf32>
    %c0_10 = arith.constant 0 : index
    %c0_11 = arith.constant 0 : index
    %25 = vector.load %arg4[%c0_10, %c0_11] : memref<1x64xf32, #tpu.memory_space<vmem>>, vector<1x64xf32>
    %26 = vector.broadcast %25 : vector<1x64xf32> to vector<32x64xf32>
    %27 = arith.addf %24, %26 : vector<32x64xf32>
    %cst_12 = arith.constant 0.000000e+00 : f32
    %28 = vector.broadcast %cst_12 : f32 to vector<32x64xf32>
    %29 = arith.cmpf ogt, %27, %28 : vector<32x64xf32>
    %cst_13 = arith.constant 2.000000e-01 : f32
    %30 = vector.broadcast %cst_13 : f32 to vector<32x64xf32>
    %31 = arith.mulf %30, %27 : vector<32x64xf32>
    %32 = arith.select %29, %27, %31 : vector<32x64xi1>, vector<32x64xf32>
    %c0_14 = arith.constant 0 : index
    %c0_15 = arith.constant 0 : index
    %33 = vector.load %arg5[%c0_14, %c0_15] : memref<32x64xf32, #tpu.memory_space<vmem>>, vector<32x64xf32>
    %34 = arith.mulf %32, %33 : vector<32x64xf32>
    %c0_16 = arith.constant 0 : index
    %c0_17 = arith.constant 0 : index
    %35 = vector.load %arg6[%c0_16, %c0_17] : memref<2x32xf32, #tpu.memory_space<vmem>>, vector<2x32xf32>
    %cst_18 = arith.constant dense<0.000000e+00> : vector<2x64xf32>
    %36 = tpu.matmul %35, %34, %cst_18 {dimension_numbers = #tpu.dot_dimension_numbers<[1], [0], [0], [1], [0, 0, 1, 1], [], []>} : vector<2x32xf32>, vector<32x64xf32>, vector<2x64xf32> -> vector<2x64xf32>
    %cst_19 = arith.constant dense<0.000000e+00> : vector<2xf32>
    %37 = vector.multi_reduction <add>, %36, %cst_19 [1] : vector<2x64xf32> to vector<2xf32>
    %38 = vector.shape_cast %37 : vector<2xf32> to vector<2x1xf32>
    %c0_20 = arith.constant 0 : index
    %c0_21 = arith.constant 0 : index
    %39 = vector.load %arg7[%c0_20, %c0_21] : memref<2x1xf32, #tpu.memory_space<vmem>>, vector<2x1xf32>
    tpu.vector_store %arg7[%c0_20, %c0_21], %38 {strides = array<i32>} : memref<2x1xf32, #tpu.memory_space<vmem>>, vector<2x1xf32>,
    return
  }
  func.func @transform_0(%arg0: i32) -> (i32, i32) {
    %c0_i32 = arith.constant 0 : i32
    %c0_i32_0 = arith.constant 0 : i32
    %c0_i32_1 = arith.constant 0 : i32
    return %c0_i32, %c0_i32_0 : i32, i32
  }
  func.func @transform_1(%arg0: i32) -> (i32, i32) {
    %c0_i32 = arith.constant 0 : i32
    %c0_i32_0 = arith.constant 0 : i32
    %c0_i32_1 = arith.constant 0 : i32
    return %c0_i32, %c0_i32_0 : i32, i32
  }
  func.func @transform_2(%arg0: i32) -> (i32, i32) {
    %c0_i32 = arith.constant 0 : i32
    %c0_i32_0 = arith.constant 0 : i32
    %c0_i32_1 = arith.constant 0 : i32
    return %c0_i32, %c0_i32_0 : i32, i32
  }
  func.func @transform_3(%arg0: i32) -> (i32, i32) {
    %c0_i32 = arith.constant 0 : i32
    %c0_i32_0 = arith.constant 0 : i32
    %c0_i32_1 = arith.constant 0 : i32
    return %c0_i32, %c0_i32_0 : i32, i32
  }
  func.func @transform_4(%arg0: i32) -> (i32, i32) {
    %c0_i32 = arith.constant 0 : i32
    %c0_i32_0 = arith.constant 0 : i32
    %c0_i32_1 = arith.constant 0 : i32
    return %c0_i32, %c0_i32_0 : i32, i32
  }
  func.func @transform_5(%arg0: i32) -> (i32, i32) {
    %c0_i32 = arith.constant 0 : i32
    %c0_i32_0 = arith.constant 0 : i32
    %c0_i32_1 = arith.constant 0 : i32
    return %c0_i32, %c0_i32_0 : i32, i32
  }
  func.func @transform_6(%arg0: i32) -> (i32, i32) {
    %c0_i32 = arith.constant 0 : i32
    %c0_i32_0 = arith.constant 0 : i32
    %c0_i32_1 = arith.constant 0 : i32
    return %c0_i32, %c0_i32_0 : i32, i32
  }
}

</mosaic_0001>

<bundles_post_ra>
// kernel: netd_forward.4
= control target key start
LH: loop header
LB: loop body
LE: loop exit
PB: predicated region body
PF: predicated region fallthrough
CT: control target
= control target key end

     0   :  { %vm1332_vm0 = vcmask 1044480   ;;  %vm1333_vm1 = vcmask 1045504   ;;  %v5765_v1 = vmov 65535   ;;  %vm947_vm2 = vcmask 613376   ;;  %s7333_s1 = inlined_call_operand.vmem [shape: bf16[75,8], index: 1, kind: input, shape index: {}]   ;;  %s7334_s0 = inlined_call_operand.vmem [shape: bf16[2048,75], index: 0, kind: input, shape index: {}]   ;;  %s7335_s2 = inlined_call_operand.vmem [shape: bf16[2048,8], index: 2, kind: output, shape index: {}]  }
   0x1   :  { %v5632_v0 = vld [vmem:[%s7333_s1 + $0x20] sm:$0x3f]   ;;  %v1334_v2 = vsel %vm1332_vm0, 4294967295, %v5765_v1  ;;  %v5633_v5 = vld [vmem:[%s7333_s1 + $0x18] sm:$0xff]   ;;  %v5634_v8 = vld [vmem:[%s7333_s1 + $0x10] sm:$0xff]   ;;  %vm4188_vm5 = vcmask 60416  }
   0x2   :  { %v1335_v3 = vsel %vm1333_vm1, %v1334_v2, 0  ;;  %v5637_v6 = vld [vmem:[%s7334_s0] sm:$0xff]   ;;  %v5635_v9 = vld [vmem:[%s7333_s1 + $0x8] sm:$0xff]   ;;  %v5641_v13 = vld [vmem:[%s7334_s0 + $0x10] sm:$0xff]  }
   0x3   :  { %v1337_v4 = vand.u32 %v5632_v0, %v1335_v3  ;;  %v5638_v7 = vld [vmem:[%s7334_s0 + $0x200] sm:$0xff]   ;;  %5365 = vmatprep.mubr.msk.bf16.mxu0 %vm947_vm2, %v5637_v6  ;;  %v5639_v11 = vld [vmem:[%s7334_s0 + $0x8] sm:$0xff]   ;;  %v5642_v14 = vld [vmem:[%s7334_s0 + $0x210] sm:$0xff]  }
   0x4   :  { %5493 = vmatprep.mubr.msk.bf16.mxu1 %vm947_vm2, %v5638_v7  ;;  %v5636_v10 = vld [vmem:[%s7333_s1] sm:$0xff]   ;;  %v5640_v12 = vld [vmem:[%s7334_s0 + $0x208] sm:$0xff]   ;;  %v5643_v15 = vld [vmem:[%s7334_s0 + $0x18] sm:$0xff]  }
   0x5   :  { %5355 = vmatprep.subr.bf16.mxu0 %v1337_v4  ;;  %5621 = vmatprep.subr.bf16.mxu1 %v1337_v4  ;;  %v5644_v16 = vld [vmem:[%s7334_s0 + $0x218] sm:$0xff]   ;;  %v5645_v17 = vld [vmem:[%s7334_s0 + $0x20] sm:$0xff]   ;;  %v5647_v19 = vld [vmem:[%s7334_s0 + $0x28] sm:$0xff]  }
   0x6   :  { %5356 = vmatpush3.bf16.msra.mxu0 %v1337_v4  ;;  %5626 = vmatpush3.bf16.msra.mxu1 %v1337_v4  ;;  %v5646_v18 = vld [vmem:[%s7334_s0 + $0x220] sm:$0xff]   ;;  %v5648_v20 = vld [vmem:[%s7334_s0 + $0x228] sm:$0xff]   ;;  %v5649_v21 = vld [vmem:[%s7334_s0 + $0x30] sm:$0xff]  }
   0x7   :  { %5357 = vmatprep.subr.bf16.mxu0 %v5633_v5  ;;  %5622 = vmatprep.subr.bf16.mxu1 %v5633_v5  ;;  %v5650_v22 = vld [vmem:[%s7334_s0 + $0x230] sm:$0xff]   ;;  %v5651_v23 = vld [vmem:[%s7334_s0 + $0x38] sm:$0xff]   ;;  %v5653_v25 = vld [vmem:[%s7334_s0 + $0x40] sm:$0xff]  }
   0x8   :  { %v5652_v24 = vld [vmem:[%s7334_s0 + $0x238] sm:$0xff]   ;;  %v5654_v26 = vld [vmem:[%s7334_s0 + $0x240] sm:$0xff]   ;;  %v5655_v27 = vld [vmem:[%s7334_s0 + $0x48] sm:$0xff]  }
   0x9   :  { %v5656_v28 = vld [vmem:[%s7334_s0 + $0x248] sm:$0xff]   ;;  %v5657_v29 = vld [vmem:[%s7334_s0 + $0x50] sm:$0xff]   ;;  %v5659_v31 = vld [vmem:[%s7334_s0 + $0x58] sm:$0xff]  }
   0xa   :  { %5358 = vmatpush3.bf16.msra.mxu0 %v5633_v5  ;;  %5627 = vmatpush3.bf16.msra.mxu1 %v5633_v5  ;;  %v5658_v30 = vld [vmem:[%s7334_s0 + $0x250] sm:$0xff]   ;;  %v5660_v32 = vld [vmem:[%s7334_s0 + $0x258] sm:$0xff]   ;;  %v5661_v33 = vld [vmem:[%s7334_s0 + $0x60] sm:$0xff]  }
   0xb   :  { %5359 = vmatprep.subr.bf16.mxu0 %v5634_v8  ;;  %5623 = vmatprep.subr.bf16.mxu1 %v5634_v8  ;;  %v5662_v34 = vld [vmem:[%s7334_s0 + $0x260] sm:$0xff]   ;;  %v5663_v35 = vld [vmem:[%s7334_s0 + $0x68] sm:$0xff]   ;;  %v5665_v37 = vld [vmem:[%s7334_s0 + $0x70] sm:$0xff]  }
   0xc   :  { %v5664_v36 = vld [vmem:[%s7334_s0 + $0x268] sm:$0xff]   ;;  %v5666_v38 = vld [vmem:[%s7334_s0 + $0x270] sm:$0xff]   ;;  %v5667_v39 = vld [vmem:[%s7334_s0 + $0x78] sm:$0xff]  }
   0xd   :  { %v5668_v40 = vld [vmem:[%s7334_s0 + $0x278] sm:$0xff]   ;;  %v5669_v41 = vld [vmem:[%s7334_s0 + $0x80] sm:$0xff]   ;;  %v5671_v43 = vld [vmem:[%s7334_s0 + $0x88] sm:$0xff]  }
   0xe   :  { %5360 = vmatpush3.bf16.msra.mxu0 %v5634_v8  ;;  %5628 = vmatpush3.bf16.msra.mxu1 %v5634_v8  ;;  %v5670_v42 = vld [vmem:[%s7334_s0 + $0x280] sm:$0xff]   ;;  %v5672_v44 = vld [vmem:[%s7334_s0 + $0x288] sm:$0xff]   ;;  %v5673_v45 = vld [vmem:[%s7334_s0 + $0x90] sm:$0xff]  }
   0xf   :  { %5361 = vmatprep.subr.bf16.mxu0 %v5635_v9  ;;  %5624 = vmatprep.subr.bf16.mxu1 %v5635_v9  ;;  %v5674_v46 = vld [vmem:[%s7334_s0 + $0x290] sm:$0xff]   ;;  %v5675_v47 = vld [vmem:[%s7334_s0 + $0x98] sm:$0xff]   ;;  %v5677_v49 = vld [vmem:[%s7334_s0 + $0xa0] sm:$0xff]  }
  0x10   :  { %v5676_v48 = vld [vmem:[%s7334_s0 + $0x298] sm:$0xff]   ;;  %v5678_v50 = vld [vmem:[%s7334_s0 + $0x2a0] sm:$0xff]   ;;  %v5679_v51 = vld [vmem:[%s7334_s0 + $0xa8] sm:$0xff]  }
  0x11   :  { %v5680_v52 = vld [vmem:[%s7334_s0 + $0x2a8] sm:$0xff]   ;;  %v5681_v53 = vld [vmem:[%s7334_s0 + $0xb0] sm:$0xff]   ;;  %v5683_v55 = vld [vmem:[%s7334_s0 + $0xb8] sm:$0xff]  }
  0x12   :  { %5362 = vmatpush3.bf16.msra.mxu0 %v5635_v9  ;;  %5629 = vmatpush3.bf16.msra.mxu1 %v5635_v9  ;;  %v5682_v54 = vld [vmem:[%s7334_s0 + $0x2b0] sm:$0xff]   ;;  %v5684_v56 = vld [vmem:[%s7334_s0 + $0x2b8] sm:$0xff]   ;;  %v5685_v57 = vld [vmem:[%s7334_s0 + $0xc0] sm:$0xff]  }
  0x13   :  { %5363 = vmatprep.subr.bf16.mxu0 %v5636_v10  ;;  %5625 = vmatprep.subr.bf16.mxu1 %v5636_v10  ;;  %v5686_v58 = vld [vmem:[%s7334_s0 + $0x2c0] sm:$0xff]   ;;  %v5687_v59 = vld [vmem:[%s7334_s0 + $0xc8] sm:$0xff]   ;;  %v5689_v61 = vld [vmem:[%s7334_s0 + $0xd0] sm:$0xff]  }
  0x14   :  { %v5688_v60 = vld [vmem:[%s7334_s0 + $0x2c8] sm:$0xff]   ;;  %v5690_v62 = vld [vmem:[%s7334_s0 + $0x2d0] sm:$0xff]   ;;  %v5691_v63 = vld [vmem:[%s7334_s0 + $0xd8] sm:$0xff]  }
  0x15   :  { %v5692_v0 = vld [vmem:[%s7334_s0 + $0x2d8] sm:$0xff]   ;;  %v5693_v1 = vld [vmem:[%s7334_s0 + $0xe0] sm:$0xff]   ;;  %v5695_v3 = vld [vmem:[%s7334_s0 + $0xe8] sm:$0xff]  }
  0x16   :  { %5364 = vmatpush3.bf16.msra.mxu0 %v5636_v10  ;;  %5630 = vmatpush3.bf16.msra.mxu1 %v5636_v10  ;;  %v5694_v2 = vld [vmem:[%s7334_s0 + $0x2e0] sm:$0xff]   ;;  %v5696_v4 = vld [vmem:[%s7334_s0 + $0x2e8] sm:$0xff]   ;;  %v5697_v5 = vld [vmem:[%s7334_s0 + $0xf0] sm:$0xff]  }
  0x17   :  { %v5698_v6 = vld [vmem:[%s7334_s0 + $0x2f0] sm:$0xff]   ;;  %v5699_v7 = vld [vmem:[%s7334_s0 + $0xf8] sm:$0xff]   ;;  %v5701_v9 = vld [vmem:[%s7334_s0 + $0x100] sm:$0xff]  }
  0x18   :  { %v5700_v8 = vld [vmem:[%s7334_s0 + $0x2f8] sm:$0xff]   ;;  %v5702_v10 = vld [vmem:[%s7334_s0 + $0x300] sm:$0xff]  }
  0x19   :  { %5366 = vmatmul.mubr.msk.bf16.vlgmr.msra.gmra.mxu0 %vm947_vm2, %v5639_v11  ;;  %5494 = vmatmul.mubr.msk.bf16.vlgmr.msra.gmra.mxu1 %vm947_vm2, %v5640_v12  ;;  %v5703_v11 = vld [vmem:[%s7334_s0 + $0x108] sm:$0xff]  }
  0x1a   :  { %5369 = vmatprep.mubr.msk.bf16.mxu0 %vm947_vm2, %v5641_v13  ;;  %5497 = vmatprep.mubr.msk.bf16.mxu1 %vm947_vm2, %v5642_v14  ;;  %v5704_v12 = vld [vmem:[%s7334_s0 + $0x308] sm:$0xff]   ;;  %v5705_v13 = vld [vmem:[%s7334_s0 + $0x110] sm:$0xff]  }
  0x1b   :  { %v5706_v14 = vld [vmem:[%s7334_s0 + $0x310] sm:$0xff]  }
  0x21   :  { %5370 = vmatmul.mubr.msk.bf16.gmra.mxu0 %vm947_vm2, %v5643_v15  ;;  %5498 = vmatmul.mubr.msk.bf16.gmra.mxu1 %vm947_vm2, %v5644_v16  ;;  %v5707_v15 = vld [vmem:[%s7334_s0 + $0x118] sm:$0xff]  }
  0x22   :  { %5373 = vmatprep.mubr.msk.bf16.mxu0 %vm947_vm2, %v5645_v17  ;;  %5501 = vmatprep.mubr.msk.bf16.mxu1 %vm947_vm2, %v5646_v18  ;;  %v5708_v16 = vld [vmem:[%s7334_s0 + $0x318] sm:$0xff]   ;;  %v5709_v17 = vld [vmem:[%s7334_s0 + $0x120] sm:$0xff]  }
  0x23   :  { %v5710_v18 = vld [vmem:[%s7334_s0 + $0x320] sm:$0xff]  }
  0x29   :  { %5374 = vmatmul.mubr.msk.bf16.gmra.mxu0 %vm947_vm2, %v5647_v19  ;;  %5502 = vmatmul.mubr.msk.bf16.gmra.mxu1 %vm947_vm2, %v5648_v20  ;;  %v5711_v19 = vld [vmem:[%s7334_s0 + $0x128] sm:$0xff]  }
  0x2a   :  { %5377 = vmatprep.mubr.msk.bf16.mxu0 %vm947_vm2, %v5649_v21  ;;  %5505 = vmatprep.mubr.msk.bf16.mxu1 %vm947_vm2, %v5650_v22  ;;  %v5712_v20 = vld [vmem:[%s7334_s0 + $0x328] sm:$0xff]   ;;  %v5713_v21 = vld [vmem:[%s7334_s0 + $0x130] sm:$0xff]  }
  0x2b   :  { %v5714_v22 = vld [vmem:[%s7334_s0 + $0x330] sm:$0xff]  }
  0x31   :  { %5378 = vmatmul.mubr.msk.bf16.gmra.mxu0 %vm947_vm2, %v5651_v23  ;;  %5506 = vmatmul.mubr.msk.bf16.gmra.mxu1 %vm947_vm2, %v5652_v24  ;;  %v5715_v23 = vld [vmem:[%s7334_s0 + $0x138] sm:$0xff]  }
  0x32   :  { %5381 = vmatprep.mubr.msk.bf16.mxu0 %vm947_vm2, %v5653_v25  ;;  %5509 = vmatprep.mubr.msk.bf16.mxu1 %vm947_vm2, %v5654_v26  ;;  %v5716_v24 = vld [vmem:[%s7334_s0 + $0x338] sm:$0xff]   ;;  %v5717_v25 = vld [vmem:[%s7334_s0 + $0x140] sm:$0xff]  }
  0x33   :  { %v5718_v26 = vld [vmem:[%s7334_s0 + $0x340] sm:$0xff]  }
  0x39   :  { %5382 = vmatmul.mubr.msk.bf16.gmra.mxu0 %vm947_vm2, %v5655_v27  ;;  %5510 = vmatmul.mubr.msk.bf16.gmra.mxu1 %vm947_vm2, %v5656_v28  ;;  %v5719_v27 = vld [vmem:[%s7334_s0 + $0x148] sm:$0xff]  }
  0x3a   :  { %5385 = vmatprep.mubr.msk.bf16.mxu0 %vm947_vm2, %v5657_v29  ;;  %5513 = vmatprep.mubr.msk.bf16.mxu1 %vm947_vm2, %v5658_v30  ;;  %v5720_v28 = vld [vmem:[%s7334_s0 + $0x348] sm:$0xff]   ;;  %v5721_v29 = vld [vmem:[%s7334_s0 + $0x150] sm:$0xff]  }
  0x3b   :  { %v5722_v30 = vld [vmem:[%s7334_s0 + $0x350] sm:$0xff]  }
  0x41   :  { %5386 = vmatmul.mubr.msk.bf16.gmra.mxu0 %vm947_vm2, %v5659_v31  ;;  %5514 = vmatmul.mubr.msk.bf16.gmra.mxu1 %vm947_vm2, %v5660_v32  ;;  %v5723_v31 = vld [vmem:[%s7334_s0 + $0x158] sm:$0xff]  }
  0x42   :  { %5389 = vmatprep.mubr.msk.bf16.mxu0 %vm947_vm2, %v5661_v33  ;;  %5517 = vmatprep.mubr.msk.bf16.mxu1 %vm947_vm2, %v5662_v34  ;;  %v5724_v32 = vld [vmem:[%s7334_s0 + $0x358] sm:$0xff]   ;;  %v5725_v33 = vld [vmem:[%s7334_s0 + $0x160] sm:$0xff]  }
  0x43   :  { %v5726_v34 = vld [vmem:[%s7334_s0 + $0x360] sm:$0xff]  }
  0x49   :  { %5390 = vmatmul.mubr.msk.bf16.gmra.mxu0 %vm947_vm2, %v5663_v35  ;;  %5518 = vmatmul.mubr.msk.bf16.gmra.mxu1 %vm947_vm2, %v5664_v36  ;;  %v5727_v35 = vld [vmem:[%s7334_s0 + $0x168] sm:$0xff]  }
  0x4a   :  { %5393 = vmatprep.mubr.msk.bf16.mxu0 %vm947_vm2, %v5665_v37  ;;  %5521 = vmatprep.mubr.msk.bf16.mxu1 %vm947_vm2, %v5666_v38  ;;  %v5728_v36 = vld [vmem:[%s7334_s0 + $0x368] sm:$0xff]   ;;  %v5729_v37 = vld [vmem:[%s7334_s0 + $0x170] sm:$0xff]  }
  0x4b   :  { %v5730_v38 = vld [vmem:[%s7334_s0 + $0x370] sm:$0xff]  }
  0x51   :  { %5394 = vmatmul.mubr.msk.bf16.gmra.mxu0 %vm947_vm2, %v5667_v39  ;;  %5522 = vmatmul.mubr.msk.bf16.gmra.mxu1 %vm947_vm2, %v5668_v40  ;;  %v5731_v39 = vld [vmem:[%s7334_s0 + $0x178] sm:$0xff]  }
  0x52   :  { %5397 = vmatprep.mubr.msk.bf16.mxu0 %vm947_vm2, %v5669_v41  ;;  %5525 = vmatprep.mubr.msk.bf16.mxu1 %vm947_vm2, %v5670_v42  ;;  %v5732_v40 = vld [vmem:[%s7334_s0 + $0x378] sm:$0xff]   ;;  %v5733_v41 = vld [vmem:[%s7334_s0 + $0x180] sm:$0xff]  }
  0x53   :  { %v5734_v42 = vld [vmem:[%s7334_s0 + $0x380] sm:$0xff]  }
  0x59   :  { %5398 = vmatmul.mubr.msk.bf16.gmra.mxu0 %vm947_vm2, %v5671_v43  ;;  %5526 = vmatmul.mubr.msk.bf16.gmra.mxu1 %vm947_vm2, %v5672_v44  ;;  %v5735_v43 = vld [vmem:[%s7334_s0 + $0x188] sm:$0xff]  }
  0x5a   :  { %5401 = vmatprep.mubr.msk.bf16.mxu0 %vm947_vm2, %v5673_v45  ;;  %5529 = vmatprep.mubr.msk.bf16.mxu1 %vm947_vm2, %v5674_v46  ;;  %v5736_v44 = vld [vmem:[%s7334_s0 + $0x388] sm:$0xff]   ;;  %v5737_v45 = vld [vmem:[%s7334_s0 + $0x190] sm:$0xff]  }
  0x5b   :  { %v5738_v46 = vld [vmem:[%s7334_s0 + $0x390] sm:$0xff]  }
  0x61   :  { %5402 = vmatmul.mubr.msk.bf16.gmra.mxu0 %vm947_vm2, %v5675_v47  ;;  %5530 = vmatmul.mubr.msk.bf16.gmra.mxu1 %vm947_vm2, %v5676_v48 }
  0x62   :  { %5405 = vmatprep.mubr.msk.bf16.mxu0 %vm947_vm2, %v5677_v49  ;;  %5533 = vmatprep.mubr.msk.bf16.mxu1 %vm947_vm2, %v5678_v50 }
  0x69   :  { %5406 = vmatmul.mubr.msk.bf16.gmra.mxu0 %vm947_vm2, %v5679_v51  ;;  %5534 = vmatmul.mubr.msk.bf16.gmra.mxu1 %vm947_vm2, %v5680_v52 }
  0x6a   :  { %5409 = vmatprep.mubr.msk.bf16.mxu0 %vm947_vm2, %v5681_v53  ;;  %5537 = vmatprep.mubr.msk.bf16.mxu1 %vm947_vm2, %v5682_v54 }
  0x71   :  { %5410 = vmatmul.mubr.msk.bf16.gmra.mxu0 %vm947_vm2, %v5683_v55  ;;  %5538 = vmatmul.mubr.msk.bf16.gmra.mxu1 %vm947_vm2, %v5684_v56 }
  0x72   :  { %5413 = vmatprep.mubr.msk.bf16.mxu0 %vm947_vm2, %v5685_v57  ;;  %5541 = vmatprep.mubr.msk.bf16.mxu1 %vm947_vm2, %v5686_v58 }
  0x79   :  { %5414 = vmatmul.mubr.msk.bf16.gmra.mxu0 %vm947_vm2, %v5687_v59  ;;  %5542 = vmatmul.mubr.msk.bf16.gmra.mxu1 %vm947_vm2, %v5688_v60 }
  0x7a   :  { %5417 = vmatprep.mubr.msk.bf16.mxu0 %vm947_vm2, %v5689_v61  ;;  %5545 = vmatprep.mubr.msk.bf16.mxu1 %vm947_vm2, %v5690_v62  ;;  %v5739_v61 = vld [vmem:[%s7334_s0 + $0x198] sm:$0xff]  }
  0x7b   :  { %v5740_v62 = vld [vmem:[%s7334_s0 + $0x398] sm:$0xff]  }
  0x81   :  { %5418 = vmatmul.mubr.msk.bf16.gmra.mxu0 %vm947_vm2, %v5691_v63  ;;  %5546 = vmatmul.mubr.msk.bf16.gmra.mxu1 %vm947_vm2, %v5692_v0 }
  0x82   :  { %5421 = vmatprep.mubr.msk.bf16.mxu0 %vm947_vm2, %v5693_v1  ;;  %5549 = vmatprep.mubr.msk.bf16.mxu1 %vm947_vm2, %v5694_v2  ;;  %v5741_v1 = vld [vmem:[%s7334_s0 + $0x1a0] sm:$0xff]  }
  0x83   :  { %v5742_v2 = vld [vmem:[%s7334_s0 + $0x3a0] sm:$0xff]  }
  0x89   :  { %5422 = vmatmul.mubr.msk.bf16.gmra.mxu0 %vm947_vm2, %v5695_v3  ;;  %5550 = vmatmul.mubr.msk.bf16.gmra.mxu1 %vm947_vm2, %v5696_v4 }
  0x8a   :  { %5425 = vmatprep.mubr.msk.bf16.mxu0 %vm947_vm2, %v5697_v5  ;;  %5553 = vmatprep.mubr.msk.bf16.mxu1 %vm947_vm2, %v5698_v6 }
  0x91   :  { %5426 = vmatmul.mubr.msk.bf16.gmra.mxu0 %vm947_vm2, %v5699_v7  ;;  %5554 = vmatmul.mubr.msk.bf16.gmra.mxu1 %vm947_vm2, %v5700_v8 }
  0x92   :  { %5429 = vmatprep.mubr.msk.bf16.mxu0 %vm947_vm2, %v5701_v9  ;;  %5557 = vmatprep.mubr.msk.bf16.mxu1 %vm947_vm2, %v5702_v10 }
  0x99   :  { %5430 = vmatmul.mubr.msk.bf16.gmra.mxu0 %vm947_vm2, %v5703_v11  ;;  %5558 = vmatmul.mubr.msk.bf16.gmra.mxu1 %vm947_vm2, %v5704_v12 }
  0x9a   :  { %5433 = vmatprep.mubr.msk.bf16.mxu0 %vm947_vm2, %v5705_v13  ;;  %5561 = vmatprep.mubr.msk.bf16.mxu1 %vm947_vm2, %v5706_v14 }
  0xa1   :  { %5434 = vmatmul.mubr.msk.bf16.gmra.mxu0 %vm947_vm2, %v5707_v15  ;;  %5562 = vmatmul.mubr.msk.bf16.gmra.mxu1 %vm947_vm2, %v5708_v16 }
  0xa2   :  { %5437 = vmatprep.mubr.msk.bf16.mxu0 %vm947_vm2, %v5709_v17  ;;  %5565 = vmatprep.mubr.msk.bf16.mxu1 %vm947_vm2, %v5710_v18 }
  0xa9   :  { %5438 = vmatmul.mubr.msk.bf16.gmra.mxu0 %vm947_vm2, %v5711_v19  ;;  %5566 = vmatmul.mubr.msk.bf16.gmra.mxu1 %vm947_vm2, %v5712_v20 }
  0xaa   :  { %5441 = vmatprep.mubr.msk.bf16.mxu0 %vm947_vm2, %v5713_v21  ;;  %5569 = vmatprep.mubr.msk.bf16.mxu1 %vm947_vm2, %v5714_v22 }
  0xb1   :  { %5442 = vmatmul.mubr.msk.bf16.gmra.mxu0 %vm947_vm2, %v5715_v23  ;;  %5570 = vmatmul.mubr.msk.bf16.gmra.mxu1 %vm947_vm2, %v5716_v24 }
  0xb2   :  { %5445 = vmatprep.mubr.msk.bf16.mxu0 %vm947_vm2, %v5717_v25  ;;  %5573 = vmatprep.mubr.msk.bf16.mxu1 %vm947_vm2, %v5718_v26 }
  0xb9   :  { %5446 = vmatmul.mubr.msk.bf16.gmra.mxu0 %vm947_vm2, %v5719_v27  ;;  %5574 = vmatmul.mubr.msk.bf16.gmra.mxu1 %vm947_vm2, %v5720_v28 }
  0xba   :  { %5449 = vmatprep.mubr.msk.bf16.mxu0 %vm947_vm2, %v5721_v29  ;;  %5577 = vmatprep.mubr.msk.bf16.mxu1 %vm947_vm2, %v5722_v30 }
  0xc1   :  { %5450 = vmatmul.mubr.msk.bf16.gmra.mxu0 %vm947_vm2, %v5723_v31  ;;  %5578 = vmatmul.mubr.msk.bf16.gmra.mxu1 %vm947_vm2, %v5724_v32  ;;  %v5743_v32 = vld [vmem:[%s7334_s0 + $0x1a8] sm:$0xff]  }
  0xc2   :  { %5453 = vmatprep.mubr.msk.bf16.mxu0 %vm947_vm2, %v5725_v33  ;;  %5581 = vmatprep.mubr.msk.bf16.mxu1 %vm947_vm2, %v5726_v34  ;;  %v5744_v33 = vld [vmem:[%s7334_s0 + $0x3a8] sm:$0xff]  }
  0xc9   :  { %5454 = vmatmul.mubr.msk.bf16.gmra.mxu0 %vm947_vm2, %v5727_v35  ;;  %5582 = vmatmul.mubr.msk.bf16.gmra.mxu1 %vm947_vm2, %v5728_v36 }
  0xca   :  { %5457 = vmatprep.mubr.msk.bf16.mxu0 %vm947_vm2, %v5729_v37  ;;  %5585 = vmatprep.mubr.msk.bf16.mxu1 %vm947_vm2, %v5730_v38  ;;  %v5745_v37 = vld [vmem:[%s7334_s0 + $0x1b0] sm:$0xff]  }
  0xcb   :  { %v5746_v38 = vld [vmem:[%s7334_s0 + $0x3b0] sm:$0xff]  }
  0xd1   :  { %5458 = vmatmul.mubr.msk.bf16.gmra.mxu0 %vm947_vm2, %v5731_v39  ;;  %5586 = vmatmul.mubr.msk.bf16.gmra.mxu1 %vm947_vm2, %v5732_v40 }
  0xd2   :  { %5461 = vmatprep.mubr.msk.bf16.mxu0 %vm947_vm2, %v5733_v41  ;;  %5589 = vmatprep.mubr.msk.bf16.mxu1 %vm947_vm2, %v5734_v42 }
  0xd9   :  { %v5367_v47 = vpop.f32.mrf.mxu0  ;;  %5462 = vmatmul.mubr.msk.bf16.gmra.mxu0 %vm947_vm2, %v5735_v43  ;;  %v5495_v48 = vpop.f32.mrf.mxu1  ;;  %5590 = vmatmul.mubr.msk.bf16.gmra.mxu1 %vm947_vm2, %v5736_v44 }
  0xda   :  { %vm2398_vm3 = vcmp.gt.f32.partialorder %v5367_v47, 0.0  ;;  %v2654_v49 = vmul.f32 0.2, %v5367_v47  ;;  %vm2526_vm4 = vcmp.gt.f32.partialorder %v5495_v48, 0.0  ;;  %v2782_v50 = vmul.f32 0.2, %v5495_v48  ;;  %5465 = vmatprep.mubr.msk.bf16.mxu0 %vm947_vm2, %v5737_v45  ;;  %5593 = vmatprep.mubr.msk.bf16.mxu1 %vm947_vm2, %v5738_v46 }
  0xdb   :  { %v1373_v51 = vpop.f32.mrf.mxu0  ;;  %v1885_v52 = vpop.f32.mrf.mxu1 }
  0xdc   :  { %v2910_v53 = vsel %vm2398_vm3, %v5367_v47, %v2654_v49  ;;  %v3038_v54 = vsel %vm2526_vm4, %v5495_v48, %v2782_v50  ;;  %vm2396_vm6 = vcmp.gt.f32.partialorder %v1373_v51, 0.0  ;;  %v2652_v55 = vmul.f32 0.2, %v1373_v51 }
  0xdd   :  { %v4968_v56 = vpack.c.bf16 %v2910_v53, %v2910_v53  ;;  %v5096_v57 = vpack.c.bf16 %v3038_v54, %v3038_v54  ;;  %vm2524_vm7 = vcmp.gt.f32.partialorder %v1885_v52, 0.0  ;;  %v2780_v58 = vmul.f32 0.2, %v1885_v52  ;;  %v5368_v59 = vpop.f32.mrf.mxu0  ;;  %v5496_v60 = vpop.f32.mrf.mxu1 }
  0xde   :  { %v2908_v63 = vsel %vm2396_vm6, %v1373_v51, %v2652_v55  ;;  %vm2399_vm8 = vcmp.gt.f32.partialorder %v5368_v59, 0.0  ;;  %v2655_v0 = vmul.f32 0.2, %v5368_v59  ;;  %vm2527_vm9 = vcmp.gt.f32.partialorder %v5496_v60, 0.0 }
  0xdf   :  { %4191 = vst.msk [vmem:[%s7335_s2 + $0x8] sm:$0xf] %vm4188_vm5, %v4968_v56  ;;  %4319 = vst.msk [vmem:[%s7335_s2 + $0x208] sm:$0xf] %vm4188_vm5, %v5096_v57  ;;  %v4966_v3 = vpack.c.bf16 %v2908_v63, %v2908_v63  ;;  %v3036_v4 = vsel %vm2524_vm7, %v1885_v52, %v2780_v58  ;;  %v2783_v5 = vmul.f32 0.2, %v5496_v60  ;;  %v1376_v6 = vpop.f32.mrf.mxu0  ;;  %v1888_v7 = vpop.f32.mrf.mxu1 }
  0xe0   :  { %v5094_v8 = vpack.c.bf16 %v3036_v4, %v3036_v4  ;;  %v2911_v9 = vsel %vm2399_vm8, %v5368_v59, %v2655_v0  ;;  %vm2397_vm10 = vcmp.gt.f32.partialorder %v1376_v6, 0.0  ;;  %v2653_v10 = vmul.f32 0.2, %v1376_v6  ;;  %v5747_v4 = vld [vmem:[%s7334_s0 + $0x1b8] sm:$0xff]  }
  0xe1   :  { %4189 = vst.msk [vmem:[%s7335_s2] sm:$0xf] %vm4188_vm5, %v4966_v3  ;;  %v4969_v11 = vpack.c.bf16 %v2911_v9, %v2911_v9  ;;  %v3039_v12 = vsel %vm2527_vm9, %v5496_v60, %v2783_v5  ;;  %vm2525_vm11 = vcmp.gt.f32.partialorder %v1888_v7, 0.0  ;;  %v2781_v13 = vmul.f32 0.2, %v1888_v7  ;;  %v5371_v14 = vpop.f32.mrf.mxu0  ;;  %5466 = vmatmul.mubr.msk.bf16.gmra.mxu0 %vm947_vm2, %v5739_v61  ;;  %v5499_v15 = vpop.f32.mrf.mxu1  ;;  %5594 = vmatmul.mubr.msk.bf16.gmra.mxu1 %vm947_vm2, %v5740_v62  ;;  %v5748_v5 = vld [vmem:[%s7334_s0 + $0x3b8] sm:$0xff]  }
  0xe2   :  { %4317 = vst.msk [vmem:[%s7335_s2 + $0x200] sm:$0xf] %vm4188_vm5, %v5094_v8  ;;  %v5097_v16 = vpack.c.bf16 %v3039_v12, %v3039_v12  ;;  %v2909_v17 = vsel %vm2397_vm10, %v1376_v6, %v2653_v10  ;;  %vm2402_vm12 = vcmp.gt.f32.partialorder %v5371_v14, 0.0  ;;  %v2658_v18 = vmul.f32 0.2, %v5371_v14  ;;  %5469 = vmatprep.mubr.msk.bf16.mxu0 %vm947_vm2, %v5741_v1  ;;  %5597 = vmatprep.mubr.msk.bf16.mxu1 %vm947_vm2, %v5742_v2  ;;  %v5749_v9 = vld [vmem:[%s7334_s0 + $0x1c0] sm:$0xff]  }
  0xe3   :  { %4192 = vst.msk [vmem:[%s7335_s2 + $0xc] sm:$0xf] %vm4188_vm5, %v4969_v11  ;;  %v4967_v19 = vpack.c.bf16 %v2909_v17, %v2909_v17  ;;  %v3037_v20 = vsel %vm2525_vm11, %v1888_v7, %v2781_v13  ;;  %vm2530_vm13 = vcmp.gt.f32.partialorder %v5499_v15, 0.0  ;;  %v2786_v21 = vmul.f32 0.2, %v5499_v15  ;;  %v1389_v22 = vpop.f32.mrf.mxu0  ;;  %v1901_v23 = vpop.f32.mrf.mxu1  ;;  %v5750_v10 = vld [vmem:[%s7334_s0 + $0x3c0] sm:$0xff]  }
  0xe4   :  { %4320 = vst.msk [vmem:[%s7335_s2 + $0x20c] sm:$0xf] %vm4188_vm5, %v5097_v16  ;;  %v5095_v24 = vpack.c.bf16 %v3037_v20, %v3037_v20  ;;  %v2914_v25 = vsel %vm2402_vm12, %v5371_v14, %v2658_v18  ;;  %vm2400_vm14 = vcmp.gt.f32.partialorder %v1389_v22, 0.0  ;;  %v2656_v26 = vmul.f32 0.2, %v1389_v22 }
  0xe5   :  { %4190 = vst.msk [vmem:[%s7335_s2 + $0x4] sm:$0xf] %vm4188_vm5, %v4967_v19  ;;  %v4972_v27 = vpack.c.bf16 %v2914_v25, %v2914_v25  ;;  %v3042_v28 = vsel %vm2530_vm13, %v5499_v15, %v2786_v21  ;;  %vm2528_vm15 = vcmp.gt.f32.partialorder %v1901_v23, 0.0  ;;  %v2784_v29 = vmul.f32 0.2, %v1901_v23  ;;  %v5372_v30 = vpop.f32.mrf.mxu0  ;;  %v5500_v31 = vpop.f32.mrf.mxu1 }
  0xe6   :  { %4318 = vst.msk [vmem:[%s7335_s2 + $0x204] sm:$0xf] %vm4188_vm5, %v5095_v24  ;;  %v5100_v34 = vpack.c.bf16 %v3042_v28, %v3042_v28  ;;  %v2912_v35 = vsel %vm2400_vm14, %v1389_v22, %v2656_v26  ;;  %vm2403_vm0 = vcmp.gt.f32.partialorder %v5372_v30, 0.0  ;;  %v2659_v36 = vmul.f32 0.2, %v5372_v30 }
  0xe7   :  { %4195 = vst.msk [vmem:[%s7335_s2 + $0x18] sm:$0xf] %vm4188_vm5, %v4972_v27  ;;  %v4970_v39 = vpack.c.bf16 %v2912_v35, %v2912_v35  ;;  %v3040_v40 = vsel %vm2528_vm15, %v1901_v23, %v2784_v29  ;;  %vm2531_vm1 = vcmp.gt.f32.partialorder %v5500_v31, 0.0  ;;  %v2787_v41 = vmul.f32 0.2, %v5500_v31  ;;  %v1392_v42 = vpop.f32.mrf.mxu0  ;;  %v1904_v43 = vpop.f32.mrf.mxu1 }
  0xe8   :  { %4323 = vst.msk [vmem:[%s7335_s2 + $0x218] sm:$0xf] %vm4188_vm5, %v5100_v34  ;;  %v5098_v44 = vpack.c.bf16 %v3040_v40, %v3040_v40  ;;  %v2915_v45 = vsel %vm2403_vm0, %v5372_v30, %v2659_v36  ;;  %vm2401_vm3 = vcmp.gt.f32.partialorder %v1392_v42, 0.0  ;;  %v2657_v46 = vmul.f32 0.2, %v1392_v42  ;;  %v5751_v40 = vld [vmem:[%s7334_s0 + $0x1c8] sm:$0xff]  }
  0xe9   :  { %4193 = vst.msk [vmem:[%s7335_s2 + $0x10] sm:$0xf] %vm4188_vm5, %v4970_v39  ;;  %v4973_v47 = vpack.c.bf16 %v2915_v45, %v2915_v45  ;;  %v3043_v48 = vsel %vm2531_vm1, %v5500_v31, %v2787_v41  ;;  %vm2529_vm4 = vcmp.gt.f32.partialorder %v1904_v43, 0.0  ;;  %v2785_v49 = vmul.f32 0.2, %v1904_v43  ;;  %v5375_v50 = vpop.f32.mrf.mxu0  ;;  %5470 = vmatmul.mubr.msk.bf16.gmra.mxu0 %vm947_vm2, %v5743_v32  ;;  %v5503_v51 = vpop.f32.mrf.mxu1  ;;  %5598 = vmatmul.mubr.msk.bf16.gmra.mxu1 %vm947_vm2, %v5744_v33  ;;  %v5752_v41 = vld [vmem:[%s7334_s0 + $0x3c8] sm:$0xff]  }
  0xea   :  { %4321 = vst.msk [vmem:[%s7335_s2 + $0x210] sm:$0xf] %vm4188_vm5, %v5098_v44  ;;  %v5101_v52 = vpack.c.bf16 %v3043_v48, %v3043_v48  ;;  %v2913_v53 = vsel %vm2401_vm3, %v1392_v42, %v2657_v46  ;;  %vm2406_vm6 = vcmp.gt.f32.partialorder %v5375_v50, 0.0  ;;  %v2662_v54 = vmul.f32 0.2, %v5375_v50  ;;  %5473 = vmatprep.mubr.msk.bf16.mxu0 %vm947_vm2, %v5745_v37  ;;  %5601 = vmatprep.mubr.msk.bf16.mxu1 %vm947_vm2, %v5746_v38  ;;  %v5753_v45 = vld [vmem:[%s7334_s0 + $0x1d0] sm:$0xff]  }
  0xeb   :  { %4196 = vst.msk [vmem:[%s7335_s2 + $0x1c] sm:$0xf] %vm4188_vm5, %v4973_v47  ;;  %v4971_v55 = vpack.c.bf16 %v2913_v53, %v2913_v53  ;;  %v3041_v56 = vsel %vm2529_vm4, %v1904_v43, %v2785_v49  ;;  %vm2534_vm7 = vcmp.gt.f32.partialorder %v5503_v51, 0.0  ;;  %v2790_v57 = vmul.f32 0.2, %v5503_v51  ;;  %v1405_v58 = vpop.f32.mrf.mxu0  ;;  %v1917_v59 = vpop.f32.mrf.mxu1  ;;  %v5754_v46 = vld [vmem:[%s7334_s0 + $0x3d0] sm:$0xff]  }
  0xec   :  { %4324 = vst.msk [vmem:[%s7335_s2 + $0x21c] sm:$0xf] %vm4188_vm5, %v5101_v52  ;;  %v5099_v60 = vpack.c.bf16 %v3041_v56, %v3041_v56  ;;  %v2918_v61 = vsel %vm2406_vm6, %v5375_v50, %v2662_v54  ;;  %vm2404_vm8 = vcmp.gt.f32.partialorder %v1405_v58, 0.0  ;;  %v2660_v62 = vmul.f32 0.2, %v1405_v58 }
  0xed   :  { %4194 = vst.msk [vmem:[%s7335_s2 + $0x14] sm:$0xf] %vm4188_vm5, %v4971_v55  ;;  %v4976_v63 = vpack.c.bf16 %v2918_v61, %v2918_v61  ;;  %v3046_v0 = vsel %vm2534_vm7, %v5503_v51, %v2790_v57  ;;  %vm2532_vm9 = vcmp.gt.f32.partialorder %v1917_v59, 0.0  ;;  %v2788_v1 = vmul.f32 0.2, %v1917_v59  ;;  %v5376_v2 = vpop.f32.mrf.mxu0  ;;  %v5504_v3 = vpop.f32.mrf.mxu1 }
  0xee   :  { %4322 = vst.msk [vmem:[%s7335_s2 + $0x214] sm:$0xf] %vm4188_vm5, %v5099_v60  ;;  %v5104_v6 = vpack.c.bf16 %v3046_v0, %v3046_v0  ;;  %v2916_v7 = vsel %vm2404_vm8, %v1405_v58, %v2660_v62  ;;  %vm2407_vm10 = vcmp.gt.f32.partialorder %v5376_v2, 0.0  ;;  %v2663_v8 = vmul.f32 0.2, %v5376_v2 }
  0xef   :  { %4199 = vst.msk [vmem:[%s7335_s2 + $0x28] sm:$0xf] %vm4188_vm5, %v4976_v63  ;;  %v4974_v11 = vpack.c.bf16 %v2916_v7, %v2916_v7  ;;  %v3044_v12 = vsel %vm2532_vm9, %v1917_v59, %v2788_v1  ;;  %vm2535_vm11 = vcmp.gt.f32.partialorder %v5504_v3, 0.0  ;;  %v2791_v13 = vmul.f32 0.2, %v5504_v3  ;;  %v1408_v14 = vpop.f32.mrf.mxu0  ;;  %v1920_v15 = vpop.f32.mrf.mxu1 }
  0xf0   :  { %4327 = vst.msk [vmem:[%s7335_s2 + $0x228] sm:$0xf] %vm4188_vm5, %v5104_v6  ;;  %v5102_v16 = vpack.c.bf16 %v3044_v12, %v3044_v12  ;;  %v2919_v17 = vsel %vm2407_vm10, %v5376_v2, %v2663_v8  ;;  %vm2405_vm12 = vcmp.gt.f32.partialorder %v1408_v14, 0.0  ;;  %v2661_v18 = vmul.f32 0.2, %v1408_v14  ;;  %v5755_v12 = vld [vmem:[%s7334_s0 + $0x1d8] sm:$0xff]  }
  0xf1   :  { %4197 = vst.msk [vmem:[%s7335_s2 + $0x20] sm:$0xf] %vm4188_vm5, %v4974_v11  ;;  %v4977_v19 = vpack.c.bf16 %v2919_v17, %v2919_v17  ;;  %v3047_v20 = vsel %vm2535_vm11, %v5504_v3, %v2791_v13  ;;  %vm2533_vm13 = vcmp.gt.f32.partialorder %v1920_v15, 0.0  ;;  %v2789_v21 = vmul.f32 0.2, %v1920_v15  ;;  %v5379_v22 = vpop.f32.mrf.mxu0  ;;  %5474 = vmatmul.mubr.msk.bf16.gmra.mxu0 %vm947_vm2, %v5747_v4  ;;  %v5507_v23 = vpop.f32.mrf.mxu1  ;;  %5602 = vmatmul.mubr.msk.bf16.gmra.mxu1 %vm947_vm2, %v5748_v5  ;;  %v5756_v13 = vld [vmem:[%s7334_s0 + $0x3d8] sm:$0xff]  }
  0xf2   :  { %4325 = vst.msk [vmem:[%s7335_s2 + $0x220] sm:$0xf] %vm4188_vm5, %v5102_v16  ;;  %v5105_v24 = vpack.c.bf16 %v3047_v20, %v3047_v20  ;;  %v2917_v25 = vsel %vm2405_vm12, %v1408_v14, %v2661_v18  ;;  %vm2410_vm14 = vcmp.gt.f32.partialorder %v5379_v22, 0.0  ;;  %v2666_v26 = vmul.f32 0.2, %v5379_v22  ;;  %5477 = vmatprep.mubr.msk.bf16.mxu0 %vm947_vm2, %v5749_v9  ;;  %5605 = vmatprep.mubr.msk.bf16.mxu1 %vm947_vm2, %v5750_v10  ;;  %v5757_v17 = vld [vmem:[%s7334_s0 + $0x1e0] sm:$0xff]  }
  0xf3   :  { %4200 = vst.msk [vmem:[%s7335_s2 + $0x2c] sm:$0xf] %vm4188_vm5, %v4977_v19  ;;  %v4975_v27 = vpack.c.bf16 %v2917_v25, %v2917_v25  ;;  %v3045_v28 = vsel %vm2533_vm13, %v1920_v15, %v2789_v21  ;;  %vm2538_vm15 = vcmp.gt.f32.partialorder %v5507_v23, 0.0  ;;  %v2794_v29 = vmul.f32 0.2, %v5507_v23  ;;  %v1421_v30 = vpop.f32.mrf.mxu0  ;;  %v1933_v31 = vpop.f32.mrf.mxu1  ;;  %v5758_v18 = vld [vmem:[%s7334_s0 + $0x3e0] sm:$0xff]  }
  0xf4   :  { %4328 = vst.msk [vmem:[%s7335_s2 + $0x22c] sm:$0xf] %vm4188_vm5, %v5105_v24  ;;  %v5103_v32 = vpack.c.bf16 %v3045_v28, %v3045_v28  ;;  %v2922_v33 = vsel %vm2410_vm14, %v5379_v22, %v2666_v26  ;;  %vm2408_vm0 = vcmp.gt.f32.partialorder %v1421_v30, 0.0  ;;  %v2664_v34 = vmul.f32 0.2, %v1421_v30 }
  0xf5   :  { %4198 = vst.msk [vmem:[%s7335_s2 + $0x24] sm:$0xf] %vm4188_vm5, %v4975_v27  ;;  %v4980_v35 = vpack.c.bf16 %v2922_v33, %v2922_v33  ;;  %v3050_v36 = vsel %vm2538_vm15, %v5507_v23, %v2794_v29  ;;  %vm2536_vm1 = vcmp.gt.f32.partialorder %v1933_v31, 0.0  ;;  %v2792_v37 = vmul.f32 0.2, %v1933_v31  ;;  %v5380_v38 = vpop.f32.mrf.mxu0  ;;  %v5508_v39 = vpop.f32.mrf.mxu1 }
  0xf6   :  { %4326 = vst.msk [vmem:[%s7335_s2 + $0x224] sm:$0xf] %vm4188_vm5, %v5103_v32  ;;  %v5108_v42 = vpack.c.bf16 %v3050_v36, %v3050_v36  ;;  %v2920_v43 = vsel %vm2408_vm0, %v1421_v30, %v2664_v34  ;;  %vm2411_vm3 = vcmp.gt.f32.partialorder %v5380_v38, 0.0  ;;  %v2667_v44 = vmul.f32 0.2, %v5380_v38 }
  0xf7   :  { %4203 = vst.msk [vmem:[%s7335_s2 + $0x38] sm:$0xf] %vm4188_vm5, %v4980_v35  ;;  %v4978_v47 = vpack.c.bf16 %v2920_v43, %v2920_v43  ;;  %v3048_v48 = vsel %vm2536_vm1, %v1933_v31, %v2792_v37  ;;  %vm2539_vm4 = vcmp.gt.f32.partialorder %v5508_v39, 0.0  ;;  %v2795_v49 = vmul.f32 0.2, %v5508_v39  ;;  %v1424_v50 = vpop.f32.mrf.mxu0  ;;  %v1936_v51 = vpop.f32.mrf.mxu1 }
  0xf8   :  { %4331 = vst.msk [vmem:[%s7335_s2 + $0x238] sm:$0xf] %vm4188_vm5, %v5108_v42  ;;  %v5106_v52 = vpack.c.bf16 %v3048_v48, %v3048_v48  ;;  %v2923_v53 = vsel %vm2411_vm3, %v5380_v38, %v2667_v44  ;;  %vm2409_vm6 = vcmp.gt.f32.partialorder %v1424_v50, 0.0  ;;  %v2665_v54 = vmul.f32 0.2, %v1424_v50  ;;  %v5759_v48 = vld [vmem:[%s7334_s0 + $0x1e8] sm:$0xff]  }
  0xf9   :  { %4201 = vst.msk [vmem:[%s7335_s2 + $0x30] sm:$0xf] %vm4188_vm5, %v4978_v47  ;;  %v4981_v55 = vpack.c.bf16 %v2923_v53, %v2923_v53  ;;  %v3051_v56 = vsel %vm2539_vm4, %v5508_v39, %v2795_v49  ;;  %vm2537_vm7 = vcmp.gt.f32.partialorder %v1936_v51, 0.0  ;;  %v2793_v57 = vmul.f32 0.2, %v1936_v51  ;;  %v5383_v58 = vpop.f32.mrf.mxu0  ;;  %5478 = vmatmul.mubr.msk.bf16.gmra.mxu0 %vm947_vm2, %v5751_v40  ;;  %v5511_v59 = vpop.f32.mrf.mxu1  ;;  %5606 = vmatmul.mubr.msk.bf16.gmra.mxu1 %vm947_vm2, %v5752_v41  ;;  %v5760_v49 = vld [vmem:[%s7334_s0 + $0x3e8] sm:$0xff]  }
  0xfa   :  { %4329 = vst.msk [vmem:[%s7335_s2 + $0x230] sm:$0xf] %vm4188_vm5, %v5106_v52  ;;  %v5109_v60 = vpack.c.bf16 %v3051_v56, %v3051_v56  ;;  %v2921_v61 = vsel %vm2409_vm6, %v1424_v50, %v2665_v54  ;;  %vm2414_vm8 = vcmp.gt.f32.partialorder %v5383_v58, 0.0  ;;  %v2670_v62 = vmul.f32 0.2, %v5383_v58  ;;  %5481 = vmatprep.mubr.msk.bf16.mxu0 %vm947_vm2, %v5753_v45  ;;  %5609 = vmatprep.mubr.msk.bf16.mxu1 %vm947_vm2, %v5754_v46  ;;  %v5761_v53 = vld [vmem:[%s7334_s0 + $0x1f0] sm:$0xff]  }
  0xfb   :  { %4204 = vst.msk [vmem:[%s7335_s2 + $0x3c] sm:$0xf] %vm4188_vm5, %v4981_v55  ;;  %v4979_v63 = vpack.c.bf16 %v2921_v61, %v2921_v61  ;;  %v3049_v0 = vsel %vm2537_vm7, %v1936_v51, %v2793_v57  ;;  %vm2542_vm9 = vcmp.gt.f32.partialorder %v5511_v59, 0.0  ;;  %v2798_v1 = vmul.f32 0.2, %v5511_v59  ;;  %v1437_v2 = vpop.f32.mrf.mxu0  ;;  %v1949_v3 = vpop.f32.mrf.mxu1  ;;  %v5762_v54 = vld [vmem:[%s7334_s0 + $0x3f0] sm:$0xff]  }
  0xfc   :  { %4332 = vst.msk [vmem:[%s7335_s2 + $0x23c] sm:$0xf] %vm4188_vm5, %v5109_v60  ;;  %v5107_v4 = vpack.c.bf16 %v3049_v0, %v3049_v0  ;;  %v2926_v5 = vsel %vm2414_vm8, %v5383_v58, %v2670_v62  ;;  %vm2412_vm10 = vcmp.gt.f32.partialorder %v1437_v2, 0.0  ;;  %v2668_v6 = vmul.f32 0.2, %v1437_v2 }
  0xfd   :  { %4202 = vst.msk [vmem:[%s7335_s2 + $0x34] sm:$0xf] %vm4188_vm5, %v4979_v63  ;;  %v4984_v7 = vpack.c.bf16 %v2926_v5, %v2926_v5  ;;  %v3054_v8 = vsel %vm2542_vm9, %v5511_v59, %v2798_v1  ;;  %vm2540_vm11 = vcmp.gt.f32.partialorder %v1949_v3, 0.0  ;;  %v2796_v9 = vmul.f32 0.2, %v1949_v3  ;;  %v5384_v10 = vpop.f32.mrf.mxu0  ;;  %v5512_v11 = vpop.f32.mrf.mxu1 }
  0xfe   :  { %4330 = vst.msk [vmem:[%s7335_s2 + $0x234] sm:$0xf] %vm4188_vm5, %v5107_v4  ;;  %v5112_v14 = vpack.c.bf16 %v3054_v8, %v3054_v8  ;;  %v2924_v15 = vsel %vm2412_vm10, %v1437_v2, %v2668_v6  ;;  %vm2415_vm12 = vcmp.gt.f32.partialorder %v5384_v10, 0.0  ;;  %v2671_v16 = vmul.f32 0.2, %v5384_v10 }
  0xff   :  { %4207 = vst.msk [vmem:[%s7335_s2 + $0x48] sm:$0xf] %vm4188_vm5, %v4984_v7  ;;  %v4982_v19 = vpack.c.bf16 %v2924_v15, %v2924_v15  ;;  %v3052_v20 = vsel %vm2540_vm11, %v1949_v3, %v2796_v9  ;;  %vm2543_vm13 = vcmp.gt.f32.partialorder %v5512_v11, 0.0  ;;  %v2799_v21 = vmul.f32 0.2, %v5512_v11  ;;  %v1440_v22 = vpop.f32.mrf.mxu0  ;;  %v1952_v23 = vpop.f32.mrf.mxu1 }
 0x100   :  { %4335 = vst.msk [vmem:[%s7335_s2 + $0x248] sm:$0xf] %vm4188_vm5, %v5112_v14  ;;  %v5110_v24 = vpack.c.bf16 %v3052_v20, %v3052_v20  ;;  %v2927_v25 = vsel %vm2415_vm12, %v5384_v10, %v2671_v16  ;;  %vm2413_vm14 = vcmp.gt.f32.partialorder %v1440_v22, 0.0  ;;  %v2669_v26 = vmul.f32 0.2, %v1440_v22  ;;  %v5763_v20 = vld [vmem:[%s7334_s0 + $0x1f8] sm:$0xff]  }
 0x101   :  { %4205 = vst.msk [vmem:[%s7335_s2 + $0x40] sm:$0xf] %vm4188_vm5, %v4982_v19  ;;  %v4985_v27 = vpack.c.bf16 %v2927_v25, %v2927_v25  ;;  %v3055_v28 = vsel %vm2543_vm13, %v5512_v11, %v2799_v21  ;;  %vm2541_vm15 = vcmp.gt.f32.partialorder %v1952_v23, 0.0  ;;  %v2797_v29 = vmul.f32 0.2, %v1952_v23  ;;  %v5387_v30 = vpop.f32.mrf.mxu0  ;;  %5482 = vmatmul.mubr.msk.bf16.gmra.mxu0 %vm947_vm2, %v5755_v12  ;;  %v5515_v31 = vpop.f32.mrf.mxu1  ;;  %5610 = vmatmul.mubr.msk.bf16.gmra.mxu1 %vm947_vm2, %v5756_v13  ;;  %v5764_v21 = vld [vmem:[%s7334_s0 + $0x3f8] sm:$0xff]  }
 0x102   :  { %4333 = vst.msk [vmem:[%s7335_s2 + $0x240] sm:$0xf] %vm4188_vm5, %v5110_v24  ;;  %v5113_v32 = vpack.c.bf16 %v3055_v28, %v3055_v28  ;;  %v2925_v33 = vsel %vm2413_vm14, %v1440_v22, %v2669_v26  ;;  %vm2418_vm0 = vcmp.gt.f32.partialorder %v5387_v30, 0.0  ;;  %v2674_v34 = vmul.f32 0.2, %v5387_v30  ;;  %5485 = vmatprep.mubr.msk.bf16.mxu0 %vm947_vm2, %v5757_v17  ;;  %5613 = vmatprep.mubr.msk.bf16.mxu1 %vm947_vm2, %v5758_v18 }
 0x103   :  { %4208 = vst.msk [vmem:[%s7335_s2 + $0x4c] sm:$0xf] %vm4188_vm5, %v4985_v27  ;;  %v4983_v35 = vpack.c.bf16 %v2925_v33, %v2925_v33  ;;  %v3053_v36 = vsel %vm2541_vm15, %v1952_v23, %v2797_v29  ;;  %vm2546_vm1 = vcmp.gt.f32.partialorder %v5515_v31, 0.0  ;;  %v2802_v37 = vmul.f32 0.2, %v5515_v31  ;;  %v1453_v38 = vpop.f32.mrf.mxu0  ;;  %v1965_v39 = vpop.f32.mrf.mxu1 }
 0x104   :  { %4336 = vst.msk [vmem:[%s7335_s2 + $0x24c] sm:$0xf] %vm4188_vm5, %v5113_v32  ;;  %v5111_v40 = vpack.c.bf16 %v3053_v36, %v3053_v36  ;;  %v2930_v41 = vsel %vm2418_vm0, %v5387_v30, %v2674_v34  ;;  %vm2416_vm3 = vcmp.gt.f32.partialorder %v1453_v38, 0.0  ;;  %v2672_v42 = vmul.f32 0.2, %v1453_v38 }
 0x105   :  { %4206 = vst.msk [vmem:[%s7335_s2 + $0x44] sm:$0xf] %vm4188_vm5, %v4983_v35  ;;  %v4988_v43 = vpack.c.bf16 %v2930_v41, %v2930_v41  ;;  %v3058_v44 = vsel %vm2546_vm1, %v5515_v31, %v2802_v37  ;;  %vm2544_vm4 = vcmp.gt.f32.partialorder %v1965_v39, 0.0  ;;  %v2800_v45 = vmul.f32 0.2, %v1965_v39  ;;  %v5388_v46 = vpop.f32.mrf.mxu0  ;;  %v5516_v47 = vpop.f32.mrf.mxu1 }
 0x106   :  { %4334 = vst.msk [vmem:[%s7335_s2 + $0x244] sm:$0xf] %vm4188_vm5, %v5111_v40  ;;  %v5116_v50 = vpack.c.bf16 %v3058_v44, %v3058_v44  ;;  %v2928_v51 = vsel %vm2416_vm3, %v1453_v38, %v2672_v42  ;;  %vm2419_vm6 = vcmp.gt.f32.partialorder %v5388_v46, 0.0  ;;  %v2675_v52 = vmul.f32 0.2, %v5388_v46 }
 0x107   :  { %4211 = vst.msk [vmem:[%s7335_s2 + $0x58] sm:$0xf] %vm4188_vm5, %v4988_v43  ;;  %v4986_v55 = vpack.c.bf16 %v2928_v51, %v2928_v51  ;;  %v3056_v56 = vsel %vm2544_vm4, %v1965_v39, %v2800_v45  ;;  %vm2547_vm7 = vcmp.gt.f32.partialorder %v5516_v47, 0.0  ;;  %v2803_v57 = vmul.f32 0.2, %v5516_v47  ;;  %v1456_v58 = vpop.f32.mrf.mxu0  ;;  %v1968_v59 = vpop.f32.mrf.mxu1 }
 0x108   :  { %4339 = vst.msk [vmem:[%s7335_s2 + $0x258] sm:$0xf] %vm4188_vm5, %v5116_v50  ;;  %v5114_v60 = vpack.c.bf16 %v3056_v56, %v3056_v56  ;;  %v2931_v61 = vsel %vm2419_vm6, %v5388_v46, %v2675_v52  ;;  %vm2417_vm8 = vcmp.gt.f32.partialorder %v1456_v58, 0.0  ;;  %v2673_v62 = vmul.f32 0.2, %v1456_v58 }
 0x109   :  { %4209 = vst.msk [vmem:[%s7335_s2 + $0x50] sm:$0xf] %vm4188_vm5, %v4986_v55  ;;  %v4989_v63 = vpack.c.bf16 %v2931_v61, %v2931_v61  ;;  %v3059_v0 = vsel %vm2547_vm7, %v5516_v47, %v2803_v57  ;;  %vm2545_vm9 = vcmp.gt.f32.partialorder %v1968_v59, 0.0  ;;  %v2801_v1 = vmul.f32 0.2, %v1968_v59  ;;  %v5391_v2 = vpop.f32.mrf.mxu0  ;;  %5486 = vmatmul.mubr.msk.bf16.gmra.mxu0 %vm947_vm2, %v5759_v48  ;;  %v5519_v3 = vpop.f32.mrf.mxu1  ;;  %5614 = vmatmul.mubr.msk.bf16.gmra.mxu1 %vm947_vm2, %v5760_v49 }
 0x10a   :  { %4337 = vst.msk [vmem:[%s7335_s2 + $0x250] sm:$0xf] %vm4188_vm5, %v5114_v60  ;;  %v5117_v4 = vpack.c.bf16 %v3059_v0, %v3059_v0  ;;  %v2929_v5 = vsel %vm2417_vm8, %v1456_v58, %v2673_v62  ;;  %vm2422_vm10 = vcmp.gt.f32.partialorder %v5391_v2, 0.0  ;;  %v2678_v6 = vmul.f32 0.2, %v5391_v2  ;;  %5489 = vmatprep.mubr.msk.bf16.mxu0 %vm947_vm2, %v5761_v53  ;;  %5617 = vmatprep.mubr.msk.bf16.mxu1 %vm947_vm2, %v5762_v54 }
 0x10b   :  { %4212 = vst.msk [vmem:[%s7335_s2 + $0x5c] sm:$0xf] %vm4188_vm5, %v4989_v63  ;;  %v4987_v7 = vpack.c.bf16 %v2929_v5, %v2929_v5  ;;  %v3057_v8 = vsel %vm2545_vm9, %v1968_v59, %v2801_v1  ;;  %vm2550_vm11 = vcmp.gt.f32.partialorder %v5519_v3, 0.0  ;;  %v2806_v9 = vmul.f32 0.2, %v5519_v3  ;;  %v1469_v10 = vpop.f32.mrf.mxu0  ;;  %v1981_v11 = vpop.f32.mrf.mxu1 }
 0x10c   :  { %4340 = vst.msk [vmem:[%s7335_s2 + $0x25c] sm:$0xf] %vm4188_vm5, %v5117_v4  ;;  %v5115_v12 = vpack.c.bf16 %v3057_v8, %v3057_v8  ;;  %v2934_v13 = vsel %vm2422_vm10, %v5391_v2, %v2678_v6  ;;  %vm2420_vm12 = vcmp.gt.f32.partialorder %v1469_v10, 0.0  ;;  %v2676_v14 = vmul.f32 0.2, %v1469_v10 }
 0x10d   :  { %4210 = vst.msk [vmem:[%s7335_s2 + $0x54] sm:$0xf] %vm4188_vm5, %v4987_v7  ;;  %v4992_v15 = vpack.c.bf16 %v2934_v13, %v2934_v13  ;;  %v3062_v16 = vsel %vm2550_vm11, %v5519_v3, %v2806_v9  ;;  %vm2548_vm13 = vcmp.gt.f32.partialorder %v1981_v11, 0.0  ;;  %v2804_v17 = vmul.f32 0.2, %v1981_v11  ;;  %v5392_v18 = vpop.f32.mrf.mxu0  ;;  %v5520_v19 = vpop.f32.mrf.mxu1 }
 0x10e   :  { %4338 = vst.msk [vmem:[%s7335_s2 + $0x254] sm:$0xf] %vm4188_vm5, %v5115_v12  ;;  %v5120_v22 = vpack.c.bf16 %v3062_v16, %v3062_v16  ;;  %v2932_v23 = vsel %vm2420_vm12, %v1469_v10, %v2676_v14  ;;  %vm2423_vm14 = vcmp.gt.f32.partialorder %v5392_v18, 0.0  ;;  %v2679_v24 = vmul.f32 0.2, %v5392_v18 }
 0x10f   :  { %4215 = vst.msk [vmem:[%s7335_s2 + $0x68] sm:$0xf] %vm4188_vm5, %v4992_v15  ;;  %v4990_v25 = vpack.c.bf16 %v2932_v23, %v2932_v23  ;;  %v3060_v26 = vsel %vm2548_vm13, %v1981_v11, %v2804_v17  ;;  %vm2551_vm15 = vcmp.gt.f32.partialorder %v5520_v19, 0.0  ;;  %v2807_v27 = vmul.f32 0.2, %v5520_v19  ;;  %v1472_v28 = vpop.f32.mrf.mxu0  ;;  %v1984_v29 = vpop.f32.mrf.mxu1 }
 0x110   :  { %4343 = vst.msk [vmem:[%s7335_s2 + $0x268] sm:$0xf] %vm4188_vm5, %v5120_v22  ;;  %v5118_v30 = vpack.c.bf16 %v3060_v26, %v3060_v26  ;;  %v2935_v31 = vsel %vm2423_vm14, %v5392_v18, %v2679_v24  ;;  %vm2421_vm0 = vcmp.gt.f32.partialorder %v1472_v28, 0.0  ;;  %v2677_v32 = vmul.f32 0.2, %v1472_v28 }
 0x111   :  { %4213 = vst.msk [vmem:[%s7335_s2 + $0x60] sm:$0xf] %vm4188_vm5, %v4990_v25  ;;  %v4993_v33 = vpack.c.bf16 %v2935_v31, %v2935_v31  ;;  %v3063_v34 = vsel %vm2551_vm15, %v5520_v19, %v2807_v27  ;;  %vm2549_vm1 = vcmp.gt.f32.partialorder %v1984_v29, 0.0  ;;  %v2805_v35 = vmul.f32 0.2, %v1984_v29  ;;  %v5395_v36 = vpop.f32.mrf.mxu0  ;;  %5490 = vmatmul.mubr.msk.bf16.gmra.mxu0 %vm947_vm2, %v5763_v20  ;;  %v5523_v37 = vpop.f32.mrf.mxu1  ;;  %5618 = vmatmul.mubr.msk.bf16.gmra.mxu1 %vm947_vm2, %v5764_v21 }
 0x112   :  { %4341 = vst.msk [vmem:[%s7335_s2 + $0x260] sm:$0xf] %vm4188_vm5, %v5118_v30  ;;  %v5121_v38 = vpack.c.bf16 %v3063_v34, %v3063_v34  ;;  %v2933_v39 = vsel %vm2421_vm0, %v1472_v28, %v2677_v32  ;;  %vm2426_vm3 = vcmp.gt.f32.partialorder %v5395_v36, 0.0  ;;  %v2682_v40 = vmul.f32 0.2, %v5395_v36 }
 0x113   :  { %4216 = vst.msk [vmem:[%s7335_s2 + $0x6c] sm:$0xf] %vm4188_vm5, %v4993_v33  ;;  %v4991_v41 = vpack.c.bf16 %v2933_v39, %v2933_v39  ;;  %v3061_v42 = vsel %vm2549_vm1, %v1984_v29, %v2805_v35  ;;  %vm2554_vm4 = vcmp.gt.f32.partialorder %v5523_v37, 0.0  ;;  %v2810_v43 = vmul.f32 0.2, %v5523_v37  ;;  %v1485_v44 = vpop.f32.mrf.mxu0  ;;  %v1997_v45 = vpop.f32.mrf.mxu1 }
 0x114   :  { %4344 = vst.msk [vmem:[%s7335_s2 + $0x26c] sm:$0xf] %vm4188_vm5, %v5121_v38  ;;  %v5119_v46 = vpack.c.bf16 %v3061_v42, %v3061_v42  ;;  %v2938_v47 = vsel %vm2426_vm3, %v5395_v36, %v2682_v40  ;;  %vm2424_vm2 = vcmp.gt.f32.partialorder %v1485_v44, 0.0  ;;  %v2680_v48 = vmul.f32 0.2, %v1485_v44 }
 0x115   :  { %4214 = vst.msk [vmem:[%s7335_s2 + $0x64] sm:$0xf] %vm4188_vm5, %v4991_v41  ;;  %v4996_v49 = vpack.c.bf16 %v2938_v47, %v2938_v47  ;;  %v3066_v50 = vsel %vm2554_vm4, %v5523_v37, %v2810_v43  ;;  %vm2552_vm6 = vcmp.gt.f32.partialorder %v1997_v45, 0.0  ;;  %v2808_v51 = vmul.f32 0.2, %v1997_v45  ;;  %v5396_v52 = vpop.f32.mrf.mxu0  ;;  %v5524_v53 = vpop.f32.mrf.mxu1 }
 0x116   :  { %4342 = vst.msk [vmem:[%s7335_s2 + $0x264] sm:$0xf] %vm4188_vm5, %v5119_v46  ;;  %v5124_v54 = vpack.c.bf16 %v3066_v50, %v3066_v50  ;;  %v2936_v55 = vsel %vm2424_vm2, %v1485_v44, %v2680_v48  ;;  %vm2427_vm7 = vcmp.gt.f32.partialorder %v5396_v52, 0.0  ;;  %v2683_v56 = vmul.f32 0.2, %v5396_v52 }
 0x117   :  { %4219 = vst.msk [vmem:[%s7335_s2 + $0x78] sm:$0xf] %vm4188_vm5, %v4996_v49  ;;  %v4994_v57 = vpack.c.bf16 %v2936_v55, %v2936_v55  ;;  %v3064_v58 = vsel %vm2552_vm6, %v1997_v45, %v2808_v51  ;;  %vm2555_vm8 = vcmp.gt.f32.partialorder %v5524_v53, 0.0  ;;  %v2811_v59 = vmul.f32 0.2, %v5524_v53  ;;  %v1488_v60 = vpop.f32.mrf.mxu0  ;;  %v2000_v61 = vpop.f32.mrf.mxu1 }
 0x118   :  { %4347 = vst.msk [vmem:[%s7335_s2 + $0x278] sm:$0xf] %vm4188_vm5, %v5124_v54  ;;  %v5122_v62 = vpack.c.bf16 %v3064_v58, %v3064_v58  ;;  %v2939_v63 = vsel %vm2427_vm7, %v5396_v52, %v2683_v56  ;;  %vm2425_vm9 = vcmp.gt.f32.partialorder %v1488_v60, 0.0  ;;  %v2681_v0 = vmul.f32 0.2, %v1488_v60 }
 0x119   :  { %4217 = vst.msk [vmem:[%s7335_s2 + $0x70] sm:$0xf] %vm4188_vm5, %v4994_v57  ;;  %v4997_v1 = vpack.c.bf16 %v2939_v63, %v2939_v63  ;;  %v3067_v2 = vsel %vm2555_vm8, %v5524_v53, %v2811_v59  ;;  %vm2553_vm10 = vcmp.gt.f32.partialorder %v2000_v61, 0.0  ;;  %v2809_v3 = vmul.f32 0.2, %v2000_v61  ;;  %v5399_v4 = vpop.f32.mrf.mxu0  ;;  %v5527_v5 = vpop.f32.mrf.mxu1 }
 0x11a   :  { %4345 = vst.msk [vmem:[%s7335_s2 + $0x270] sm:$0xf] %vm4188_vm5, %v5122_v62  ;;  %v5125_v6 = vpack.c.bf16 %v3067_v2, %v3067_v2  ;;  %v2937_v7 = vsel %vm2425_vm9, %v1488_v60, %v2681_v0  ;;  %vm2430_vm11 = vcmp.gt.f32.partialorder %v5399_v4, 0.0  ;;  %v2686_v8 = vmul.f32 0.2, %v5399_v4 }
 0x11b   :  { %4220 = vst.msk [vmem:[%s7335_s2 + $0x7c] sm:$0xf] %vm4188_vm5, %v4997_v1  ;;  %v4995_v9 = vpack.c.bf16 %v2937_v7, %v2937_v7  ;;  %v3065_v10 = vsel %vm2553_vm10, %v2000_v61, %v2809_v3  ;;  %vm2558_vm12 = vcmp.gt.f32.partialorder %v5527_v5, 0.0  ;;  %v2814_v11 = vmul.f32 0.2, %v5527_v5  ;;  %v1501_v12 = vpop.f32.mrf.mxu0  ;;  %v2013_v13 = vpop.f32.mrf.mxu1 }
 0x11c   :  { %4348 = vst.msk [vmem:[%s7335_s2 + $0x27c] sm:$0xf] %vm4188_vm5, %v5125_v6  ;;  %v5123_v14 = vpack.c.bf16 %v3065_v10, %v3065_v10  ;;  %v2942_v15 = vsel %vm2430_vm11, %v5399_v4, %v2686_v8  ;;  %vm2428_vm13 = vcmp.gt.f32.partialorder %v1501_v12, 0.0  ;;  %v2684_v16 = vmul.f32 0.2, %v1501_v12 }
 0x11d   :  { %4218 = vst.msk [vmem:[%s7335_s2 + $0x74] sm:$0xf] %vm4188_vm5, %v4995_v9  ;;  %v5000_v17 = vpack.c.bf16 %v2942_v15, %v2942_v15  ;;  %v3070_v18 = vsel %vm2558_vm12, %v5527_v5, %v2814_v11  ;;  %vm2556_vm14 = vcmp.gt.f32.partialorder %v2013_v13, 0.0  ;;  %v2812_v19 = vmul.f32 0.2, %v2013_v13  ;;  %v5400_v20 = vpop.f32.mrf.mxu0  ;;  %v5528_v21 = vpop.f32.mrf.mxu1 }
 0x11e   :  { %4346 = vst.msk [vmem:[%s7335_s2 + $0x274] sm:$0xf] %vm4188_vm5, %v5123_v14  ;;  %v5128_v22 = vpack.c.bf16 %v3070_v18, %v3070_v18  ;;  %v2940_v23 = vsel %vm2428_vm13, %v1501_v12, %v2684_v16  ;;  %vm2431_vm15 = vcmp.gt.f32.partialorder %v5400_v20, 0.0  ;;  %v2687_v24 = vmul.f32 0.2, %v5400_v20 }
 0x11f   :  { %4223 = vst.msk [vmem:[%s7335_s2 + $0x88] sm:$0xf] %vm4188_vm5, %v5000_v17  ;;  %v4998_v25 = vpack.c.bf16 %v2940_v23, %v2940_v23  ;;  %v3068_v26 = vsel %vm2556_vm14, %v2013_v13, %v2812_v19  ;;  %vm2559_vm0 = vcmp.gt.f32.partialorder %v5528_v21, 0.0  ;;  %v2815_v27 = vmul.f32 0.2, %v5528_v21  ;;  %v1504_v28 = vpop.f32.mrf.mxu0  ;;  %v2016_v29 = vpop.f32.mrf.mxu1 }
 0x120   :  { %4351 = vst.msk [vmem:[%s7335_s2 + $0x288] sm:$0xf] %vm4188_vm5, %v5128_v22  ;;  %v5126_v30 = vpack.c.bf16 %v3068_v26, %v3068_v26  ;;  %v2943_v31 = vsel %vm2431_vm15, %v5400_v20, %v2687_v24  ;;  %vm2429_vm1 = vcmp.gt.f32.partialorder %v1504_v28, 0.0  ;;  %v2685_v32 = vmul.f32 0.2, %v1504_v28 }
 0x121   :  { %4221 = vst.msk [vmem:[%s7335_s2 + $0x80] sm:$0xf] %vm4188_vm5, %v4998_v25  ;;  %v5001_v33 = vpack.c.bf16 %v2943_v31, %v2943_v31  ;;  %v3071_v34 = vsel %vm2559_vm0, %v5528_v21, %v2815_v27  ;;  %vm2557_vm3 = vcmp.gt.f32.partialorder %v2016_v29, 0.0  ;;  %v2813_v35 = vmul.f32 0.2, %v2016_v29  ;;  %v5403_v36 = vpop.f32.mrf.mxu0  ;;  %v5531_v37 = vpop.f32.mrf.mxu1 }
 0x122   :  { %4349 = vst.msk [vmem:[%s7335_s2 + $0x280] sm:$0xf] %vm4188_vm5, %v5126_v30  ;;  %v5129_v38 = vpack.c.bf16 %v3071_v34, %v3071_v34  ;;  %v2941_v39 = vsel %vm2429_vm1, %v1504_v28, %v2685_v32  ;;  %vm2434_vm4 = vcmp.gt.f32.partialorder %v5403_v36, 0.0  ;;  %v2690_v40 = vmul.f32 0.2, %v5403_v36 }
 0x123   :  { %4224 = vst.msk [vmem:[%s7335_s2 + $0x8c] sm:$0xf] %vm4188_vm5, %v5001_v33  ;;  %v4999_v41 = vpack.c.bf16 %v2941_v39, %v2941_v39  ;;  %v3069_v42 = vsel %vm2557_vm3, %v2016_v29, %v2813_v35  ;;  %vm2562_vm2 = vcmp.gt.f32.partialorder %v5531_v37, 0.0  ;;  %v2818_v43 = vmul.f32 0.2, %v5531_v37  ;;  %v1517_v44 = vpop.f32.mrf.mxu0  ;;  %v2029_v45 = vpop.f32.mrf.mxu1 }
 0x124   :  { %4352 = vst.msk [vmem:[%s7335_s2 + $0x28c] sm:$0xf] %vm4188_vm5, %v5129_v38  ;;  %v5127_v46 = vpack.c.bf16 %v3069_v42, %v3069_v42  ;;  %v2946_v47 = vsel %vm2434_vm4, %v5403_v36, %v2690_v40  ;;  %vm2432_vm6 = vcmp.gt.f32.partialorder %v1517_v44, 0.0  ;;  %v2688_v48 = vmul.f32 0.2, %v1517_v44 }
 0x125   :  { %4222 = vst.msk [vmem:[%s7335_s2 + $0x84] sm:$0xf] %vm4188_vm5, %v4999_v41  ;;  %v5004_v49 = vpack.c.bf16 %v2946_v47, %v2946_v47  ;;  %v3074_v50 = vsel %vm2562_vm2, %v5531_v37, %v2818_v43  ;;  %vm2560_vm7 = vcmp.gt.f32.partialorder %v2029_v45, 0.0  ;;  %v2816_v51 = vmul.f32 0.2, %v2029_v45  ;;  %v5404_v52 = vpop.f32.mrf.mxu0  ;;  %v5532_v53 = vpop.f32.mrf.mxu1 }
 0x126   :  { %4350 = vst.msk [vmem:[%s7335_s2 + $0x284] sm:$0xf] %vm4188_vm5, %v5127_v46  ;;  %v5132_v54 = vpack.c.bf16 %v3074_v50, %v3074_v50  ;;  %v2944_v55 = vsel %vm2432_vm6, %v1517_v44, %v2688_v48  ;;  %vm2435_vm8 = vcmp.gt.f32.partialorder %v5404_v52, 0.0  ;;  %v2691_v56 = vmul.f32 0.2, %v5404_v52 }
 0x127   :  { %4227 = vst.msk [vmem:[%s7335_s2 + $0x98] sm:$0xf] %vm4188_vm5, %v5004_v49  ;;  %v5002_v57 = vpack.c.bf16 %v2944_v55, %v2944_v55  ;;  %v3072_v58 = vsel %vm2560_vm7, %v2029_v45, %v2816_v51  ;;  %vm2563_vm9 = vcmp.gt.f32.partialorder %v5532_v53, 0.0  ;;  %v2819_v59 = vmul.f32 0.2, %v5532_v53  ;;  %v1520_v60 = vpop.f32.mrf.mxu0  ;;  %v2032_v61 = vpop.f32.mrf.mxu1 }
 0x128   :  { %4355 = vst.msk [vmem:[%s7335_s2 + $0x298] sm:$0xf] %vm4188_vm5, %v5132_v54  ;;  %v5130_v62 = vpack.c.bf16 %v3072_v58, %v3072_v58  ;;  %v2947_v63 = vsel %vm2435_vm8, %v5404_v52, %v2691_v56  ;;  %vm2433_vm10 = vcmp.gt.f32.partialorder %v1520_v60, 0.0  ;;  %v2689_v0 = vmul.f32 0.2, %v1520_v60 }
 0x129   :  { %4225 = vst.msk [vmem:[%s7335_s2 + $0x90] sm:$0xf] %vm4188_vm5, %v5002_v57  ;;  %v5005_v1 = vpack.c.bf16 %v2947_v63, %v2947_v63  ;;  %v3075_v2 = vsel %vm2563_vm9, %v5532_v53, %v2819_v59  ;;  %vm2561_vm11 = vcmp.gt.f32.partialorder %v2032_v61, 0.0  ;;  %v2817_v3 = vmul.f32 0.2, %v2032_v61  ;;  %v5407_v4 = vpop.f32.mrf.mxu0  ;;  %v5535_v5 = vpop.f32.mrf.mxu1 }
 0x12a   :  { %4353 = vst.msk [vmem:[%s7335_s2 + $0x290] sm:$0xf] %vm4188_vm5, %v5130_v62  ;;  %v5133_v6 = vpack.c.bf16 %v3075_v2, %v3075_v2  ;;  %v2945_v7 = vsel %vm2433_vm10, %v1520_v60, %v2689_v0  ;;  %vm2438_vm12 = vcmp.gt.f32.partialorder %v5407_v4, 0.0  ;;  %v2694_v8 = vmul.f32 0.2, %v5407_v4 }
 0x12b   :  { %4228 = vst.msk [vmem:[%s7335_s2 + $0x9c] sm:$0xf] %vm4188_vm5, %v5005_v1  ;;  %v5003_v9 = vpack.c.bf16 %v2945_v7, %v2945_v7  ;;  %v3073_v10 = vsel %vm2561_vm11, %v2032_v61, %v2817_v3  ;;  %vm2566_vm13 = vcmp.gt.f32.partialorder %v5535_v5, 0.0  ;;  %v2822_v11 = vmul.f32 0.2, %v5535_v5  ;;  %v1533_v12 = vpop.f32.mrf.mxu0  ;;  %v2045_v13 = vpop.f32.mrf.mxu1 }
 0x12c   :  { %4356 = vst.msk [vmem:[%s7335_s2 + $0x29c] sm:$0xf] %vm4188_vm5, %v5133_v6  ;;  %v5131_v14 = vpack.c.bf16 %v3073_v10, %v3073_v10  ;;  %v2950_v15 = vsel %vm2438_vm12, %v5407_v4, %v2694_v8  ;;  %vm2436_vm14 = vcmp.gt.f32.partialorder %v1533_v12, 0.0  ;;  %v2692_v16 = vmul.f32 0.2, %v1533_v12 }
 0x12d   :  { %4226 = vst.msk [vmem:[%s7335_s2 + $0x94] sm:$0xf] %vm4188_vm5, %v5003_v9  ;;  %v5008_v17 = vpack.c.bf16 %v2950_v15, %v2950_v15  ;;  %v3078_v18 = vsel %vm2566_vm13, %v5535_v5, %v2822_v11  ;;  %vm2564_vm15 = vcmp.gt.f32.partialorder %v2045_v13, 0.0  ;;  %v2820_v19 = vmul.f32 0.2, %v2045_v13  ;;  %v5408_v20 = vpop.f32.mrf.mxu0  ;;  %v5536_v21 = vpop.f32.mrf.mxu1 }
 0x12e   :  { %4354 = vst.msk [vmem:[%s7335_s2 + $0x294] sm:$0xf] %vm4188_vm5, %v5131_v14  ;;  %v5136_v22 = vpack.c.bf16 %v3078_v18, %v3078_v18  ;;  %v2948_v23 = vsel %vm2436_vm14, %v1533_v12, %v2692_v16  ;;  %vm2439_vm0 = vcmp.gt.f32.partialorder %v5408_v20, 0.0  ;;  %v2695_v24 = vmul.f32 0.2, %v5408_v20 }
 0x12f   :  { %4231 = vst.msk [vmem:[%s7335_s2 + $0xa8] sm:$0xf] %vm4188_vm5, %v5008_v17  ;;  %v5006_v25 = vpack.c.bf16 %v2948_v23, %v2948_v23  ;;  %v3076_v26 = vsel %vm2564_vm15, %v2045_v13, %v2820_v19  ;;  %vm2567_vm1 = vcmp.gt.f32.partialorder %v5536_v21, 0.0  ;;  %v2823_v27 = vmul.f32 0.2, %v5536_v21  ;;  %v1536_v28 = vpop.f32.mrf.mxu0  ;;  %v2048_v29 = vpop.f32.mrf.mxu1 }
 0x130   :  { %4359 = vst.msk [vmem:[%s7335_s2 + $0x2a8] sm:$0xf] %vm4188_vm5, %v5136_v22  ;;  %v5134_v30 = vpack.c.bf16 %v3076_v26, %v3076_v26  ;;  %v2951_v31 = vsel %vm2439_vm0, %v5408_v20, %v2695_v24  ;;  %vm2437_vm3 = vcmp.gt.f32.partialorder %v1536_v28, 0.0  ;;  %v2693_v32 = vmul.f32 0.2, %v1536_v28 }
 0x131   :  { %4229 = vst.msk [vmem:[%s7335_s2 + $0xa0] sm:$0xf] %vm4188_vm5, %v5006_v25  ;;  %v5009_v33 = vpack.c.bf16 %v2951_v31, %v2951_v31  ;;  %v3079_v34 = vsel %vm2567_vm1, %v5536_v21, %v2823_v27  ;;  %vm2565_vm4 = vcmp.gt.f32.partialorder %v2048_v29, 0.0  ;;  %v2821_v35 = vmul.f32 0.2, %v2048_v29  ;;  %v5411_v36 = vpop.f32.mrf.mxu0  ;;  %v5539_v37 = vpop.f32.mrf.mxu1 }
 0x132   :  { %4357 = vst.msk [vmem:[%s7335_s2 + $0x2a0] sm:$0xf] %vm4188_vm5, %v5134_v30  ;;  %v5137_v38 = vpack.c.bf16 %v3079_v34, %v3079_v34  ;;  %v2949_v39 = vsel %vm2437_vm3, %v1536_v28, %v2693_v32  ;;  %vm2442_vm2 = vcmp.gt.f32.partialorder %v5411_v36, 0.0  ;;  %v2698_v40 = vmul.f32 0.2, %v5411_v36 }
 0x133   :  { %4232 = vst.msk [vmem:[%s7335_s2 + $0xac] sm:$0xf] %vm4188_vm5, %v5009_v33  ;;  %v5007_v41 = vpack.c.bf16 %v2949_v39, %v2949_v39  ;;  %v3077_v42 = vsel %vm2565_vm4, %v2048_v29, %v2821_v35  ;;  %vm2570_vm6 = vcmp.gt.f32.partialorder %v5539_v37, 0.0  ;;  %v2826_v43 = vmul.f32 0.2, %v5539_v37  ;;  %v1549_v44 = vpop.f32.mrf.mxu0  ;;  %v2061_v45 = vpop.f32.mrf.mxu1 }
 0x134   :  { %4360 = vst.msk [vmem:[%s7335_s2 + $0x2ac] sm:$0xf] %vm4188_vm5, %v5137_v38  ;;  %v5135_v46 = vpack.c.bf16 %v3077_v42, %v3077_v42  ;;  %v2954_v47 = vsel %vm2442_vm2, %v5411_v36, %v2698_v40  ;;  %vm2440_vm7 = vcmp.gt.f32.partialorder %v1549_v44, 0.0  ;;  %v2696_v48 = vmul.f32 0.2, %v1549_v44 }
 0x135   :  { %4230 = vst.msk [vmem:[%s7335_s2 + $0xa4] sm:$0xf] %vm4188_vm5, %v5007_v41  ;;  %v5012_v49 = vpack.c.bf16 %v2954_v47, %v2954_v47  ;;  %v3082_v50 = vsel %vm2570_vm6, %v5539_v37, %v2826_v43  ;;  %vm2568_vm8 = vcmp.gt.f32.partialorder %v2061_v45, 0.0  ;;  %v2824_v51 = vmul.f32 0.2, %v2061_v45  ;;  %v5412_v52 = vpop.f32.mrf.mxu0  ;;  %v5540_v53 = vpop.f32.mrf.mxu1 }
 0x136   :  { %4358 = vst.msk [vmem:[%s7335_s2 + $0x2a4] sm:$0xf] %vm4188_vm5, %v5135_v46  ;;  %v5140_v54 = vpack.c.bf16 %v3082_v50, %v3082_v50  ;;  %v2952_v55 = vsel %vm2440_vm7, %v1549_v44, %v2696_v48  ;;  %vm2443_vm9 = vcmp.gt.f32.partialorder %v5412_v52, 0.0  ;;  %v2699_v56 = vmul.f32 0.2, %v5412_v52 }
 0x137   :  { %4235 = vst.msk [vmem:[%s7335_s2 + $0xb8] sm:$0xf] %vm4188_vm5, %v5012_v49  ;;  %v5010_v57 = vpack.c.bf16 %v2952_v55, %v2952_v55  ;;  %v3080_v58 = vsel %vm2568_vm8, %v2061_v45, %v2824_v51  ;;  %vm2571_vm10 = vcmp.gt.f32.partialorder %v5540_v53, 0.0  ;;  %v2827_v59 = vmul.f32 0.2, %v5540_v53  ;;  %v1552_v60 = vpop.f32.mrf.mxu0  ;;  %v2064_v61 = vpop.f32.mrf.mxu1 }
 0x138   :  { %4363 = vst.msk [vmem:[%s7335_s2 + $0x2b8] sm:$0xf] %vm4188_vm5, %v5140_v54  ;;  %v5138_v62 = vpack.c.bf16 %v3080_v58, %v3080_v58  ;;  %v2955_v63 = vsel %vm2443_vm9, %v5412_v52, %v2699_v56  ;;  %vm2441_vm11 = vcmp.gt.f32.partialorder %v1552_v60, 0.0  ;;  %v2697_v0 = vmul.f32 0.2, %v1552_v60 }
 0x139   :  { %4233 = vst.msk [vmem:[%s7335_s2 + $0xb0] sm:$0xf] %vm4188_vm5, %v5010_v57  ;;  %v5013_v1 = vpack.c.bf16 %v2955_v63, %v2955_v63  ;;  %v3083_v2 = vsel %vm2571_vm10, %v5540_v53, %v2827_v59  ;;  %vm2569_vm12 = vcmp.gt.f32.partialorder %v2064_v61, 0.0  ;;  %v2825_v3 = vmul.f32 0.2, %v2064_v61  ;;  %v5415_v4 = vpop.f32.mrf.mxu0  ;;  %v5543_v5 = vpop.f32.mrf.mxu1 }
 0x13a   :  { %4361 = vst.msk [vmem:[%s7335_s2 + $0x2b0] sm:$0xf] %vm4188_vm5, %v5138_v62  ;;  %v5141_v6 = vpack.c.bf16 %v3083_v2, %v3083_v2  ;;  %v2953_v7 = vsel %vm2441_vm11, %v1552_v60, %v2697_v0  ;;  %vm2446_vm13 = vcmp.gt.f32.partialorder %v5415_v4, 0.0  ;;  %v2702_v8 = vmul.f32 0.2, %v5415_v4 }
 0x13b   :  { %4236 = vst.msk [vmem:[%s7335_s2 + $0xbc] sm:$0xf] %vm4188_vm5, %v5013_v1  ;;  %v5011_v9 = vpack.c.bf16 %v2953_v7, %v2953_v7  ;;  %v3081_v10 = vsel %vm2569_vm12, %v2064_v61, %v2825_v3  ;;  %vm2574_vm14 = vcmp.gt.f32.partialorder %v5543_v5, 0.0  ;;  %v2830_v11 = vmul.f32 0.2, %v5543_v5  ;;  %v1565_v12 = vpop.f32.mrf.mxu0  ;;  %v2077_v13 = vpop.f32.mrf.mxu1 }
 0x13c   :  { %4364 = vst.msk [vmem:[%s7335_s2 + $0x2bc] sm:$0xf] %vm4188_vm5, %v5141_v6  ;;  %v5139_v14 = vpack.c.bf16 %v3081_v10, %v3081_v10  ;;  %v2958_v15 = vsel %vm2446_vm13, %v5415_v4, %v2702_v8  ;;  %vm2444_vm15 = vcmp.gt.f32.partialorder %v1565_v12, 0.0  ;;  %v2700_v16 = vmul.f32 0.2, %v1565_v12 }
 0x13d   :  { %4234 = vst.msk [vmem:[%s7335_s2 + $0xb4] sm:$0xf] %vm4188_vm5, %v5011_v9  ;;  %v5016_v17 = vpack.c.bf16 %v2958_v15, %v2958_v15  ;;  %v3086_v18 = vsel %vm2574_vm14, %v5543_v5, %v2830_v11  ;;  %vm2572_vm0 = vcmp.gt.f32.partialorder %v2077_v13, 0.0  ;;  %v2828_v19 = vmul.f32 0.2, %v2077_v13  ;;  %v5416_v20 = vpop.f32.mrf.mxu0  ;;  %v5544_v21 = vpop.f32.mrf.mxu1 }
 0x13e   :  { %4362 = vst.msk [vmem:[%s7335_s2 + $0x2b4] sm:$0xf] %vm4188_vm5, %v5139_v14  ;;  %v5144_v22 = vpack.c.bf16 %v3086_v18, %v3086_v18  ;;  %v2956_v23 = vsel %vm2444_vm15, %v1565_v12, %v2700_v16  ;;  %vm2447_vm1 = vcmp.gt.f32.partialorder %v5416_v20, 0.0  ;;  %v2703_v24 = vmul.f32 0.2, %v5416_v20 }
 0x13f   :  { %4239 = vst.msk [vmem:[%s7335_s2 + $0xc8] sm:$0xf] %vm4188_vm5, %v5016_v17  ;;  %v5014_v25 = vpack.c.bf16 %v2956_v23, %v2956_v23  ;;  %v3084_v26 = vsel %vm2572_vm0, %v2077_v13, %v2828_v19  ;;  %vm2575_vm3 = vcmp.gt.f32.partialorder %v5544_v21, 0.0  ;;  %v2831_v27 = vmul.f32 0.2, %v5544_v21  ;;  %v1568_v28 = vpop.f32.mrf.mxu0  ;;  %v2080_v29 = vpop.f32.mrf.mxu1 }
 0x140   :  { %4367 = vst.msk [vmem:[%s7335_s2 + $0x2c8] sm:$0xf] %vm4188_vm5, %v5144_v22  ;;  %v5142_v30 = vpack.c.bf16 %v3084_v26, %v3084_v26  ;;  %v2959_v31 = vsel %vm2447_vm1, %v5416_v20, %v2703_v24  ;;  %vm2445_vm4 = vcmp.gt.f32.partialorder %v1568_v28, 0.0  ;;  %v2701_v32 = vmul.f32 0.2, %v1568_v28 }
 0x141   :  { %4237 = vst.msk [vmem:[%s7335_s2 + $0xc0] sm:$0xf] %vm4188_vm5, %v5014_v25  ;;  %v5017_v33 = vpack.c.bf16 %v2959_v31, %v2959_v31  ;;  %v3087_v34 = vsel %vm2575_vm3, %v5544_v21, %v2831_v27  ;;  %vm2573_vm2 = vcmp.gt.f32.partialorder %v2080_v29, 0.0  ;;  %v2829_v35 = vmul.f32 0.2, %v2080_v29  ;;  %v5419_v36 = vpop.f32.mrf.mxu0  ;;  %v5547_v37 = vpop.f32.mrf.mxu1 }
 0x142   :  { %4365 = vst.msk [vmem:[%s7335_s2 + $0x2c0] sm:$0xf] %vm4188_vm5, %v5142_v30  ;;  %v5145_v38 = vpack.c.bf16 %v3087_v34, %v3087_v34  ;;  %v2957_v39 = vsel %vm2445_vm4, %v1568_v28, %v2701_v32  ;;  %vm2450_vm6 = vcmp.gt.f32.partialorder %v5419_v36, 0.0  ;;  %v2706_v40 = vmul.f32 0.2, %v5419_v36 }
 0x143   :  { %4240 = vst.msk [vmem:[%s7335_s2 + $0xcc] sm:$0xf] %vm4188_vm5, %v5017_v33  ;;  %v5015_v41 = vpack.c.bf16 %v2957_v39, %v2957_v39  ;;  %v3085_v42 = vsel %vm2573_vm2, %v2080_v29, %v2829_v35  ;;  %vm2578_vm7 = vcmp.gt.f32.partialorder %v5547_v37, 0.0  ;;  %v2834_v43 = vmul.f32 0.2, %v5547_v37  ;;  %v1581_v44 = vpop.f32.mrf.mxu0  ;;  %v2093_v45 = vpop.f32.mrf.mxu1 }
 0x144   :  { %4368 = vst.msk [vmem:[%s7335_s2 + $0x2cc] sm:$0xf] %vm4188_vm5, %v5145_v38  ;;  %v5143_v46 = vpack.c.bf16 %v3085_v42, %v3085_v42  ;;  %v2962_v47 = vsel %vm2450_vm6, %v5419_v36, %v2706_v40  ;;  %vm2448_vm8 = vcmp.gt.f32.partialorder %v1581_v44, 0.0  ;;  %v2704_v48 = vmul.f32 0.2, %v1581_v44 }
 0x145   :  { %4238 = vst.msk [vmem:[%s7335_s2 + $0xc4] sm:$0xf] %vm4188_vm5, %v5015_v41  ;;  %v5020_v49 = vpack.c.bf16 %v2962_v47, %v2962_v47  ;;  %v3090_v50 = vsel %vm2578_vm7, %v5547_v37, %v2834_v43  ;;  %vm2576_vm9 = vcmp.gt.f32.partialorder %v2093_v45, 0.0  ;;  %v2832_v51 = vmul.f32 0.2, %v2093_v45  ;;  %v5420_v52 = vpop.f32.mrf.mxu0  ;;  %v5548_v53 = vpop.f32.mrf.mxu1 }
 0x146   :  { %4366 = vst.msk [vmem:[%s7335_s2 + $0x2c4] sm:$0xf] %vm4188_vm5, %v5143_v46  ;;  %v5148_v54 = vpack.c.bf16 %v3090_v50, %v3090_v50  ;;  %v2960_v55 = vsel %vm2448_vm8, %v1581_v44, %v2704_v48  ;;  %vm2451_vm10 = vcmp.gt.f32.partialorder %v5420_v52, 0.0  ;;  %v2707_v56 = vmul.f32 0.2, %v5420_v52 }
 0x147   :  { %4243 = vst.msk [vmem:[%s7335_s2 + $0xd8] sm:$0xf] %vm4188_vm5, %v5020_v49  ;;  %v5018_v57 = vpack.c.bf16 %v2960_v55, %v2960_v55  ;;  %v3088_v58 = vsel %vm2576_vm9, %v2093_v45, %v2832_v51  ;;  %vm2579_vm11 = vcmp.gt.f32.partialorder %v5548_v53, 0.0  ;;  %v2835_v59 = vmul.f32 0.2, %v5548_v53  ;;  %v1584_v60 = vpop.f32.mrf.mxu0  ;;  %v2096_v61 = vpop.f32.mrf.mxu1 }
 0x148   :  { %4371 = vst.msk [vmem:[%s7335_s2 + $0x2d8] sm:$0xf] %vm4188_vm5, %v5148_v54  ;;  %v5146_v62 = vpack.c.bf16 %v3088_v58, %v3088_v58  ;;  %v2963_v63 = vsel %vm2451_vm10, %v5420_v52, %v2707_v56  ;;  %vm2449_vm12 = vcmp.gt.f32.partialorder %v1584_v60, 0.0  ;;  %v2705_v0 = vmul.f32 0.2, %v1584_v60 }
 0x149   :  { %4241 = vst.msk [vmem:[%s7335_s2 + $0xd0] sm:$0xf] %vm4188_vm5, %v5018_v57  ;;  %v5021_v1 = vpack.c.bf16 %v2963_v63, %v2963_v63  ;;  %v3091_v2 = vsel %vm2579_vm11, %v5548_v53, %v2835_v59  ;;  %vm2577_vm13 = vcmp.gt.f32.partialorder %v2096_v61, 0.0  ;;  %v2833_v3 = vmul.f32 0.2, %v2096_v61  ;;  %v5423_v4 = vpop.f32.mrf.mxu0  ;;  %v5551_v5 = vpop.f32.mrf.mxu1 }
 0x14a   :  { %4369 = vst.msk [vmem:[%s7335_s2 + $0x2d0] sm:$0xf] %vm4188_vm5, %v5146_v62  ;;  %v5149_v6 = vpack.c.bf16 %v3091_v2, %v3091_v2  ;;  %v2961_v7 = vsel %vm2449_vm12, %v1584_v60, %v2705_v0  ;;  %vm2454_vm14 = vcmp.gt.f32.partialorder %v5423_v4, 0.0  ;;  %v2710_v8 = vmul.f32 0.2, %v5423_v4 }
 0x14b   :  { %4244 = vst.msk [vmem:[%s7335_s2 + $0xdc] sm:$0xf] %vm4188_vm5, %v5021_v1  ;;  %v5019_v9 = vpack.c.bf16 %v2961_v7, %v2961_v7  ;;  %v3089_v10 = vsel %vm2577_vm13, %v2096_v61, %v2833_v3  ;;  %vm2582_vm15 = vcmp.gt.f32.partialorder %v5551_v5, 0.0  ;;  %v2838_v11 = vmul.f32 0.2, %v5551_v5  ;;  %v1597_v12 = vpop.f32.mrf.mxu0  ;;  %v2109_v13 = vpop.f32.mrf.mxu1 }
 0x14c   :  { %4372 = vst.msk [vmem:[%s7335_s2 + $0x2dc] sm:$0xf] %vm4188_vm5, %v5149_v6  ;;  %v5147_v14 = vpack.c.bf16 %v3089_v10, %v3089_v10  ;;  %v2966_v15 = vsel %vm2454_vm14, %v5423_v4, %v2710_v8  ;;  %vm2452_vm0 = vcmp.gt.f32.partialorder %v1597_v12, 0.0  ;;  %v2708_v16 = vmul.f32 0.2, %v1597_v12 }
 0x14d   :  { %4242 = vst.msk [vmem:[%s7335_s2 + $0xd4] sm:$0xf] %vm4188_vm5, %v5019_v9  ;;  %v5024_v17 = vpack.c.bf16 %v2966_v15, %v2966_v15  ;;  %v3094_v18 = vsel %vm2582_vm15, %v5551_v5, %v2838_v11  ;;  %vm2580_vm1 = vcmp.gt.f32.partialorder %v2109_v13, 0.0  ;;  %v2836_v19 = vmul.f32 0.2, %v2109_v13  ;;  %v5424_v20 = vpop.f32.mrf.mxu0  ;;  %v5552_v21 = vpop.f32.mrf.mxu1 }
 0x14e   :  { %4370 = vst.msk [vmem:[%s7335_s2 + $0x2d4] sm:$0xf] %vm4188_vm5, %v5147_v14  ;;  %v5152_v22 = vpack.c.bf16 %v3094_v18, %v3094_v18  ;;  %v2964_v23 = vsel %vm2452_vm0, %v1597_v12, %v2708_v16  ;;  %vm2455_vm3 = vcmp.gt.f32.partialorder %v5424_v20, 0.0  ;;  %v2711_v24 = vmul.f32 0.2, %v5424_v20 }
 0x14f   :  { %4247 = vst.msk [vmem:[%s7335_s2 + $0xe8] sm:$0xf] %vm4188_vm5, %v5024_v17  ;;  %v5022_v25 = vpack.c.bf16 %v2964_v23, %v2964_v23  ;;  %v3092_v26 = vsel %vm2580_vm1, %v2109_v13, %v2836_v19  ;;  %vm2583_vm4 = vcmp.gt.f32.partialorder %v5552_v21, 0.0  ;;  %v2839_v27 = vmul.f32 0.2, %v5552_v21  ;;  %v1600_v28 = vpop.f32.mrf.mxu0  ;;  %v2112_v29 = vpop.f32.mrf.mxu1 }
 0x150   :  { %4375 = vst.msk [vmem:[%s7335_s2 + $0x2e8] sm:$0xf] %vm4188_vm5, %v5152_v22  ;;  %v5150_v30 = vpack.c.bf16 %v3092_v26, %v3092_v26  ;;  %v2967_v31 = vsel %vm2455_vm3, %v5424_v20, %v2711_v24  ;;  %vm2453_vm2 = vcmp.gt.f32.partialorder %v1600_v28, 0.0  ;;  %v2709_v32 = vmul.f32 0.2, %v1600_v28 }
 0x151   :  { %4245 = vst.msk [vmem:[%s7335_s2 + $0xe0] sm:$0xf] %vm4188_vm5, %v5022_v25  ;;  %v5025_v33 = vpack.c.bf16 %v2967_v31, %v2967_v31  ;;  %v3095_v34 = vsel %vm2583_vm4, %v5552_v21, %v2839_v27  ;;  %vm2581_vm6 = vcmp.gt.f32.partialorder %v2112_v29, 0.0  ;;  %v2837_v35 = vmul.f32 0.2, %v2112_v29  ;;  %v5427_v36 = vpop.f32.mrf.mxu0  ;;  %v5555_v37 = vpop.f32.mrf.mxu1 }
 0x152   :  { %4373 = vst.msk [vmem:[%s7335_s2 + $0x2e0] sm:$0xf] %vm4188_vm5, %v5150_v30  ;;  %v5153_v38 = vpack.c.bf16 %v3095_v34, %v3095_v34  ;;  %v2965_v39 = vsel %vm2453_vm2, %v1600_v28, %v2709_v32  ;;  %vm2458_vm7 = vcmp.gt.f32.partialorder %v5427_v36, 0.0  ;;  %v2714_v40 = vmul.f32 0.2, %v5427_v36 }
 0x153   :  { %4248 = vst.msk [vmem:[%s7335_s2 + $0xec] sm:$0xf] %vm4188_vm5, %v5025_v33  ;;  %v5023_v41 = vpack.c.bf16 %v2965_v39, %v2965_v39  ;;  %v3093_v42 = vsel %vm2581_vm6, %v2112_v29, %v2837_v35  ;;  %vm2586_vm8 = vcmp.gt.f32.partialorder %v5555_v37, 0.0  ;;  %v2842_v43 = vmul.f32 0.2, %v5555_v37  ;;  %v1613_v44 = vpop.f32.mrf.mxu0  ;;  %v2125_v45 = vpop.f32.mrf.mxu1 }
 0x154   :  { %4376 = vst.msk [vmem:[%s7335_s2 + $0x2ec] sm:$0xf] %vm4188_vm5, %v5153_v38  ;;  %v5151_v46 = vpack.c.bf16 %v3093_v42, %v3093_v42  ;;  %v2970_v47 = vsel %vm2458_vm7, %v5427_v36, %v2714_v40  ;;  %vm2456_vm9 = vcmp.gt.f32.partialorder %v1613_v44, 0.0  ;;  %v2712_v48 = vmul.f32 0.2, %v1613_v44 }
 0x155   :  { %4246 = vst.msk [vmem:[%s7335_s2 + $0xe4] sm:$0xf] %vm4188_vm5, %v5023_v41  ;;  %v5028_v49 = vpack.c.bf16 %v2970_v47, %v2970_v47  ;;  %v3098_v50 = vsel %vm2586_vm8, %v5555_v37, %v2842_v43  ;;  %vm2584_vm10 = vcmp.gt.f32.partialorder %v2125_v45, 0.0  ;;  %v2840_v51 = vmul.f32 0.2, %v2125_v45  ;;  %v5428_v52 = vpop.f32.mrf.mxu0  ;;  %v5556_v53 = vpop.f32.mrf.mxu1 }
 0x156   :  { %4374 = vst.msk [vmem:[%s7335_s2 + $0x2e4] sm:$0xf] %vm4188_vm5, %v5151_v46  ;;  %v5156_v54 = vpack.c.bf16 %v3098_v50, %v3098_v50  ;;  %v2968_v55 = vsel %vm2456_vm9, %v1613_v44, %v2712_v48  ;;  %vm2459_vm11 = vcmp.gt.f32.partialorder %v5428_v52, 0.0  ;;  %v2715_v56 = vmul.f32 0.2, %v5428_v52 }
 0x157   :  { %4251 = vst.msk [vmem:[%s7335_s2 + $0xf8] sm:$0xf] %vm4188_vm5, %v5028_v49  ;;  %v5026_v57 = vpack.c.bf16 %v2968_v55, %v2968_v55  ;;  %v3096_v58 = vsel %vm2584_vm10, %v2125_v45, %v2840_v51  ;;  %vm2587_vm12 = vcmp.gt.f32.partialorder %v5556_v53, 0.0  ;;  %v2843_v59 = vmul.f32 0.2, %v5556_v53  ;;  %v1616_v60 = vpop.f32.mrf.mxu0  ;;  %v2128_v61 = vpop.f32.mrf.mxu1 }
 0x158   :  { %4379 = vst.msk [vmem:[%s7335_s2 + $0x2f8] sm:$0xf] %vm4188_vm5, %v5156_v54  ;;  %v5154_v62 = vpack.c.bf16 %v3096_v58, %v3096_v58  ;;  %v2971_v63 = vsel %vm2459_vm11, %v5428_v52, %v2715_v56  ;;  %vm2457_vm13 = vcmp.gt.f32.partialorder %v1616_v60, 0.0  ;;  %v2713_v0 = vmul.f32 0.2, %v1616_v60 }
 0x159   :  { %4249 = vst.msk [vmem:[%s7335_s2 + $0xf0] sm:$0xf] %vm4188_vm5, %v5026_v57  ;;  %v5029_v1 = vpack.c.bf16 %v2971_v63, %v2971_v63  ;;  %v3099_v2 = vsel %vm2587_vm12, %v5556_v53, %v2843_v59  ;;  %vm2585_vm14 = vcmp.gt.f32.partialorder %v2128_v61, 0.0  ;;  %v2841_v3 = vmul.f32 0.2, %v2128_v61  ;;  %v5431_v4 = vpop.f32.mrf.mxu0  ;;  %v5559_v5 = vpop.f32.mrf.mxu1 }
 0x15a   :  { %4377 = vst.msk [vmem:[%s7335_s2 + $0x2f0] sm:$0xf] %vm4188_vm5, %v5154_v62  ;;  %v5157_v6 = vpack.c.bf16 %v3099_v2, %v3099_v2  ;;  %v2969_v7 = vsel %vm2457_vm13, %v1616_v60, %v2713_v0  ;;  %vm2462_vm15 = vcmp.gt.f32.partialorder %v5431_v4, 0.0  ;;  %v2718_v8 = vmul.f32 0.2, %v5431_v4 }
 0x15b   :  { %4252 = vst.msk [vmem:[%s7335_s2 + $0xfc] sm:$0xf] %vm4188_vm5, %v5029_v1  ;;  %v5027_v9 = vpack.c.bf16 %v2969_v7, %v2969_v7  ;;  %v3097_v10 = vsel %vm2585_vm14, %v2128_v61, %v2841_v3  ;;  %vm2590_vm0 = vcmp.gt.f32.partialorder %v5559_v5, 0.0  ;;  %v2846_v11 = vmul.f32 0.2, %v5559_v5  ;;  %v1629_v12 = vpop.f32.mrf.mxu0  ;;  %v2141_v13 = vpop.f32.mrf.mxu1 }
 0x15c   :  { %4380 = vst.msk [vmem:[%s7335_s2 + $0x2fc] sm:$0xf] %vm4188_vm5, %v5157_v6  ;;  %v5155_v14 = vpack.c.bf16 %v3097_v10, %v3097_v10  ;;  %v2974_v15 = vsel %vm2462_vm15, %v5431_v4, %v2718_v8  ;;  %vm2460_vm1 = vcmp.gt.f32.partialorder %v1629_v12, 0.0  ;;  %v2716_v16 = vmul.f32 0.2, %v1629_v12 }
 0x15d   :  { %4250 = vst.msk [vmem:[%s7335_s2 + $0xf4] sm:$0xf] %vm4188_vm5, %v5027_v9  ;;  %v5032_v17 = vpack.c.bf16 %v2974_v15, %v2974_v15  ;;  %v3102_v18 = vsel %vm2590_vm0, %v5559_v5, %v2846_v11  ;;  %vm2588_vm3 = vcmp.gt.f32.partialorder %v2141_v13, 0.0  ;;  %v2844_v19 = vmul.f32 0.2, %v2141_v13  ;;  %v5432_v20 = vpop.f32.mrf.mxu0  ;;  %v5560_v21 = vpop.f32.mrf.mxu1 }
 0x15e   :  { %4378 = vst.msk [vmem:[%s7335_s2 + $0x2f4] sm:$0xf] %vm4188_vm5, %v5155_v14  ;;  %v5160_v22 = vpack.c.bf16 %v3102_v18, %v3102_v18  ;;  %v2972_v23 = vsel %vm2460_vm1, %v1629_v12, %v2716_v16  ;;  %vm2463_vm4 = vcmp.gt.f32.partialorder %v5432_v20, 0.0  ;;  %v2719_v24 = vmul.f32 0.2, %v5432_v20 }
 0x15f   :  { %4255 = vst.msk [vmem:[%s7335_s2 + $0x108] sm:$0xf] %vm4188_vm5, %v5032_v17  ;;  %v5030_v25 = vpack.c.bf16 %v2972_v23, %v2972_v23  ;;  %v3100_v26 = vsel %vm2588_vm3, %v2141_v13, %v2844_v19  ;;  %vm2591_vm2 = vcmp.gt.f32.partialorder %v5560_v21, 0.0  ;;  %v2847_v27 = vmul.f32 0.2, %v5560_v21  ;;  %v1632_v28 = vpop.f32.mrf.mxu0  ;;  %v2144_v29 = vpop.f32.mrf.mxu1 }
 0x160   :  { %4383 = vst.msk [vmem:[%s7335_s2 + $0x308] sm:$0xf] %vm4188_vm5, %v5160_v22  ;;  %v5158_v30 = vpack.c.bf16 %v3100_v26, %v3100_v26  ;;  %v2975_v31 = vsel %vm2463_vm4, %v5432_v20, %v2719_v24  ;;  %vm2461_vm6 = vcmp.gt.f32.partialorder %v1632_v28, 0.0  ;;  %v2717_v32 = vmul.f32 0.2, %v1632_v28 }
 0x161   :  { %4253 = vst.msk [vmem:[%s7335_s2 + $0x100] sm:$0xf] %vm4188_vm5, %v5030_v25  ;;  %v5033_v33 = vpack.c.bf16 %v2975_v31, %v2975_v31  ;;  %v3103_v34 = vsel %vm2591_vm2, %v5560_v21, %v2847_v27  ;;  %vm2589_vm7 = vcmp.gt.f32.partialorder %v2144_v29, 0.0  ;;  %v2845_v35 = vmul.f32 0.2, %v2144_v29  ;;  %v5435_v36 = vpop.f32.mrf.mxu0  ;;  %v5563_v37 = vpop.f32.mrf.mxu1 }
 0x162   :  { %4381 = vst.msk [vmem:[%s7335_s2 + $0x300] sm:$0xf] %vm4188_vm5, %v5158_v30  ;;  %v5161_v38 = vpack.c.bf16 %v3103_v34, %v3103_v34  ;;  %v2973_v39 = vsel %vm2461_vm6, %v1632_v28, %v2717_v32  ;;  %vm2466_vm8 = vcmp.gt.f32.partialorder %v5435_v36, 0.0  ;;  %v2722_v40 = vmul.f32 0.2, %v5435_v36 }
 0x163   :  { %4256 = vst.msk [vmem:[%s7335_s2 + $0x10c] sm:$0xf] %vm4188_vm5, %v5033_v33  ;;  %v5031_v41 = vpack.c.bf16 %v2973_v39, %v2973_v39  ;;  %v3101_v42 = vsel %vm2589_vm7, %v2144_v29, %v2845_v35  ;;  %vm2594_vm9 = vcmp.gt.f32.partialorder %v5563_v37, 0.0  ;;  %v2850_v43 = vmul.f32 0.2, %v5563_v37  ;;  %v1645_v44 = vpop.f32.mrf.mxu0  ;;  %v2157_v45 = vpop.f32.mrf.mxu1 }
 0x164   :  { %4384 = vst.msk [vmem:[%s7335_s2 + $0x30c] sm:$0xf] %vm4188_vm5, %v5161_v38  ;;  %v5159_v46 = vpack.c.bf16 %v3101_v42, %v3101_v42  ;;  %v2978_v47 = vsel %vm2466_vm8, %v5435_v36, %v2722_v40  ;;  %vm2464_vm10 = vcmp.gt.f32.partialorder %v1645_v44, 0.0  ;;  %v2720_v48 = vmul.f32 0.2, %v1645_v44 }
 0x165   :  { %4254 = vst.msk [vmem:[%s7335_s2 + $0x104] sm:$0xf] %vm4188_vm5, %v5031_v41  ;;  %v5036_v49 = vpack.c.bf16 %v2978_v47, %v2978_v47  ;;  %v3106_v50 = vsel %vm2594_vm9, %v5563_v37, %v2850_v43  ;;  %vm2592_vm11 = vcmp.gt.f32.partialorder %v2157_v45, 0.0  ;;  %v2848_v51 = vmul.f32 0.2, %v2157_v45  ;;  %v5436_v52 = vpop.f32.mrf.mxu0  ;;  %v5564_v53 = vpop.f32.mrf.mxu1 }
 0x166   :  { %4382 = vst.msk [vmem:[%s7335_s2 + $0x304] sm:$0xf] %vm4188_vm5, %v5159_v46  ;;  %v5164_v54 = vpack.c.bf16 %v3106_v50, %v3106_v50  ;;  %v2976_v55 = vsel %vm2464_vm10, %v1645_v44, %v2720_v48  ;;  %vm2467_vm12 = vcmp.gt.f32.partialorder %v5436_v52, 0.0  ;;  %v2723_v56 = vmul.f32 0.2, %v5436_v52 }
 0x167   :  { %4259 = vst.msk [vmem:[%s7335_s2 + $0x118] sm:$0xf] %vm4188_vm5, %v5036_v49  ;;  %v5034_v57 = vpack.c.bf16 %v2976_v55, %v2976_v55  ;;  %v3104_v58 = vsel %vm2592_vm11, %v2157_v45, %v2848_v51  ;;  %vm2595_vm13 = vcmp.gt.f32.partialorder %v5564_v53, 0.0  ;;  %v2851_v59 = vmul.f32 0.2, %v5564_v53  ;;  %v1648_v60 = vpop.f32.mrf.mxu0  ;;  %v2160_v61 = vpop.f32.mrf.mxu1 }
 0x168   :  { %4387 = vst.msk [vmem:[%s7335_s2 + $0x318] sm:$0xf] %vm4188_vm5, %v5164_v54  ;;  %v5162_v62 = vpack.c.bf16 %v3104_v58, %v3104_v58  ;;  %v2979_v63 = vsel %vm2467_vm12, %v5436_v52, %v2723_v56  ;;  %vm2465_vm14 = vcmp.gt.f32.partialorder %v1648_v60, 0.0  ;;  %v2721_v0 = vmul.f32 0.2, %v1648_v60 }
 0x169   :  { %4257 = vst.msk [vmem:[%s7335_s2 + $0x110] sm:$0xf] %vm4188_vm5, %v5034_v57  ;;  %v5037_v1 = vpack.c.bf16 %v2979_v63, %v2979_v63  ;;  %v3107_v2 = vsel %vm2595_vm13, %v5564_v53, %v2851_v59  ;;  %vm2593_vm15 = vcmp.gt.f32.partialorder %v2160_v61, 0.0  ;;  %v2849_v3 = vmul.f32 0.2, %v2160_v61  ;;  %v5439_v4 = vpop.f32.mrf.mxu0  ;;  %v5567_v5 = vpop.f32.mrf.mxu1 }
 0x16a   :  { %4385 = vst.msk [vmem:[%s7335_s2 + $0x310] sm:$0xf] %vm4188_vm5, %v5162_v62  ;;  %v5165_v6 = vpack.c.bf16 %v3107_v2, %v3107_v2  ;;  %v2977_v7 = vsel %vm2465_vm14, %v1648_v60, %v2721_v0  ;;  %vm2470_vm0 = vcmp.gt.f32.partialorder %v5439_v4, 0.0  ;;  %v2726_v8 = vmul.f32 0.2, %v5439_v4 }
 0x16b   :  { %4260 = vst.msk [vmem:[%s7335_s2 + $0x11c] sm:$0xf] %vm4188_vm5, %v5037_v1  ;;  %v5035_v9 = vpack.c.bf16 %v2977_v7, %v2977_v7  ;;  %v3105_v10 = vsel %vm2593_vm15, %v2160_v61, %v2849_v3  ;;  %vm2598_vm1 = vcmp.gt.f32.partialorder %v5567_v5, 0.0  ;;  %v2854_v11 = vmul.f32 0.2, %v5567_v5  ;;  %v1661_v12 = vpop.f32.mrf.mxu0  ;;  %v2173_v13 = vpop.f32.mrf.mxu1 }
 0x16c   :  { %4388 = vst.msk [vmem:[%s7335_s2 + $0x31c] sm:$0xf] %vm4188_vm5, %v5165_v6  ;;  %v5163_v14 = vpack.c.bf16 %v3105_v10, %v3105_v10  ;;  %v2982_v15 = vsel %vm2470_vm0, %v5439_v4, %v2726_v8  ;;  %vm2468_vm3 = vcmp.gt.f32.partialorder %v1661_v12, 0.0  ;;  %v2724_v16 = vmul.f32 0.2, %v1661_v12 }
 0x16d   :  { %4258 = vst.msk [vmem:[%s7335_s2 + $0x114] sm:$0xf] %vm4188_vm5, %v5035_v9  ;;  %v5040_v17 = vpack.c.bf16 %v2982_v15, %v2982_v15  ;;  %v3110_v18 = vsel %vm2598_vm1, %v5567_v5, %v2854_v11  ;;  %vm2596_vm4 = vcmp.gt.f32.partialorder %v2173_v13, 0.0  ;;  %v2852_v19 = vmul.f32 0.2, %v2173_v13  ;;  %v5440_v20 = vpop.f32.mrf.mxu0  ;;  %v5568_v21 = vpop.f32.mrf.mxu1 }
 0x16e   :  { %4386 = vst.msk [vmem:[%s7335_s2 + $0x314] sm:$0xf] %vm4188_vm5, %v5163_v14  ;;  %v5168_v22 = vpack.c.bf16 %v3110_v18, %v3110_v18  ;;  %v2980_v23 = vsel %vm2468_vm3, %v1661_v12, %v2724_v16  ;;  %vm2471_vm2 = vcmp.gt.f32.partialorder %v5440_v20, 0.0  ;;  %v2727_v24 = vmul.f32 0.2, %v5440_v20 }
 0x16f   :  { %4263 = vst.msk [vmem:[%s7335_s2 + $0x128] sm:$0xf] %vm4188_vm5, %v5040_v17  ;;  %v5038_v25 = vpack.c.bf16 %v2980_v23, %v2980_v23  ;;  %v3108_v26 = vsel %vm2596_vm4, %v2173_v13, %v2852_v19  ;;  %vm2599_vm6 = vcmp.gt.f32.partialorder %v5568_v21, 0.0  ;;  %v2855_v27 = vmul.f32 0.2, %v5568_v21  ;;  %v1664_v28 = vpop.f32.mrf.mxu0  ;;  %v2176_v29 = vpop.f32.mrf.mxu1 }
 0x170   :  { %4391 = vst.msk [vmem:[%s7335_s2 + $0x328] sm:$0xf] %vm4188_vm5, %v5168_v22  ;;  %v5166_v30 = vpack.c.bf16 %v3108_v26, %v3108_v26  ;;  %v2983_v31 = vsel %vm2471_vm2, %v5440_v20, %v2727_v24  ;;  %vm2469_vm7 = vcmp.gt.f32.partialorder %v1664_v28, 0.0  ;;  %v2725_v32 = vmul.f32 0.2, %v1664_v28 }
 0x171   :  { %4261 = vst.msk [vmem:[%s7335_s2 + $0x120] sm:$0xf] %vm4188_vm5, %v5038_v25  ;;  %v5041_v33 = vpack.c.bf16 %v2983_v31, %v2983_v31  ;;  %v3111_v34 = vsel %vm2599_vm6, %v5568_v21, %v2855_v27  ;;  %vm2597_vm8 = vcmp.gt.f32.partialorder %v2176_v29, 0.0  ;;  %v2853_v35 = vmul.f32 0.2, %v2176_v29  ;;  %v5443_v36 = vpop.f32.mrf.mxu0  ;;  %v5571_v37 = vpop.f32.mrf.mxu1 }
 0x172   :  { %4389 = vst.msk [vmem:[%s7335_s2 + $0x320] sm:$0xf] %vm4188_vm5, %v5166_v30  ;;  %v5169_v38 = vpack.c.bf16 %v3111_v34, %v3111_v34  ;;  %v2981_v39 = vsel %vm2469_vm7, %v1664_v28, %v2725_v32  ;;  %vm2474_vm9 = vcmp.gt.f32.partialorder %v5443_v36, 0.0  ;;  %v2730_v40 = vmul.f32 0.2, %v5443_v36 }
 0x173   :  { %4264 = vst.msk [vmem:[%s7335_s2 + $0x12c] sm:$0xf] %vm4188_vm5, %v5041_v33  ;;  %v5039_v41 = vpack.c.bf16 %v2981_v39, %v2981_v39  ;;  %v3109_v42 = vsel %vm2597_vm8, %v2176_v29, %v2853_v35  ;;  %vm2602_vm10 = vcmp.gt.f32.partialorder %v5571_v37, 0.0  ;;  %v2858_v43 = vmul.f32 0.2, %v5571_v37  ;;  %v1677_v44 = vpop.f32.mrf.mxu0  ;;  %v2189_v45 = vpop.f32.mrf.mxu1 }
 0x174   :  { %4392 = vst.msk [vmem:[%s7335_s2 + $0x32c] sm:$0xf] %vm4188_vm5, %v5169_v38  ;;  %v5167_v46 = vpack.c.bf16 %v3109_v42, %v3109_v42  ;;  %v2986_v47 = vsel %vm2474_vm9, %v5443_v36, %v2730_v40  ;;  %vm2472_vm11 = vcmp.gt.f32.partialorder %v1677_v44, 0.0  ;;  %v2728_v48 = vmul.f32 0.2, %v1677_v44 }
 0x175   :  { %4262 = vst.msk [vmem:[%s7335_s2 + $0x124] sm:$0xf] %vm4188_vm5, %v5039_v41  ;;  %v5044_v49 = vpack.c.bf16 %v2986_v47, %v2986_v47  ;;  %v3114_v50 = vsel %vm2602_vm10, %v5571_v37, %v2858_v43  ;;  %vm2600_vm12 = vcmp.gt.f32.partialorder %v2189_v45, 0.0  ;;  %v2856_v51 = vmul.f32 0.2, %v2189_v45  ;;  %v5444_v52 = vpop.f32.mrf.mxu0  ;;  %v5572_v53 = vpop.f32.mrf.mxu1 }
 0x176   :  { %4390 = vst.msk [vmem:[%s7335_s2 + $0x324] sm:$0xf] %vm4188_vm5, %v5167_v46  ;;  %v5172_v54 = vpack.c.bf16 %v3114_v50, %v3114_v50  ;;  %v2984_v55 = vsel %vm2472_vm11, %v1677_v44, %v2728_v48  ;;  %vm2475_vm13 = vcmp.gt.f32.partialorder %v5444_v52, 0.0  ;;  %v2731_v56 = vmul.f32 0.2, %v5444_v52 }
 0x177   :  { %4267 = vst.msk [vmem:[%s7335_s2 + $0x138] sm:$0xf] %vm4188_vm5, %v5044_v49  ;;  %v5042_v57 = vpack.c.bf16 %v2984_v55, %v2984_v55  ;;  %v3112_v58 = vsel %vm2600_vm12, %v2189_v45, %v2856_v51  ;;  %vm2603_vm14 = vcmp.gt.f32.partialorder %v5572_v53, 0.0  ;;  %v2859_v59 = vmul.f32 0.2, %v5572_v53  ;;  %v1680_v60 = vpop.f32.mrf.mxu0  ;;  %v2192_v61 = vpop.f32.mrf.mxu1 }
 0x178   :  { %4395 = vst.msk [vmem:[%s7335_s2 + $0x338] sm:$0xf] %vm4188_vm5, %v5172_v54  ;;  %v5170_v62 = vpack.c.bf16 %v3112_v58, %v3112_v58  ;;  %v2987_v63 = vsel %vm2475_vm13, %v5444_v52, %v2731_v56  ;;  %vm2473_vm15 = vcmp.gt.f32.partialorder %v1680_v60, 0.0  ;;  %v2729_v0 = vmul.f32 0.2, %v1680_v60 }
 0x179   :  { %4265 = vst.msk [vmem:[%s7335_s2 + $0x130] sm:$0xf] %vm4188_vm5, %v5042_v57  ;;  %v5045_v1 = vpack.c.bf16 %v2987_v63, %v2987_v63  ;;  %v3115_v2 = vsel %vm2603_vm14, %v5572_v53, %v2859_v59  ;;  %vm2601_vm0 = vcmp.gt.f32.partialorder %v2192_v61, 0.0  ;;  %v2857_v3 = vmul.f32 0.2, %v2192_v61  ;;  %v5447_v4 = vpop.f32.mrf.mxu0  ;;  %v5575_v5 = vpop.f32.mrf.mxu1 }
 0x17a   :  { %4393 = vst.msk [vmem:[%s7335_s2 + $0x330] sm:$0xf] %vm4188_vm5, %v5170_v62  ;;  %v5173_v6 = vpack.c.bf16 %v3115_v2, %v3115_v2  ;;  %v2985_v7 = vsel %vm2473_vm15, %v1680_v60, %v2729_v0  ;;  %vm2478_vm1 = vcmp.gt.f32.partialorder %v5447_v4, 0.0  ;;  %v2734_v8 = vmul.f32 0.2, %v5447_v4 }
 0x17b   :  { %4268 = vst.msk [vmem:[%s7335_s2 + $0x13c] sm:$0xf] %vm4188_vm5, %v5045_v1  ;;  %v5043_v9 = vpack.c.bf16 %v2985_v7, %v2985_v7  ;;  %v3113_v10 = vsel %vm2601_vm0, %v2192_v61, %v2857_v3  ;;  %vm2606_vm3 = vcmp.gt.f32.partialorder %v5575_v5, 0.0  ;;  %v2862_v11 = vmul.f32 0.2, %v5575_v5  ;;  %v1693_v12 = vpop.f32.mrf.mxu0  ;;  %v2205_v13 = vpop.f32.mrf.mxu1 }
 0x17c   :  { %4396 = vst.msk [vmem:[%s7335_s2 + $0x33c] sm:$0xf] %vm4188_vm5, %v5173_v6  ;;  %v5171_v14 = vpack.c.bf16 %v3113_v10, %v3113_v10  ;;  %v2990_v15 = vsel %vm2478_vm1, %v5447_v4, %v2734_v8  ;;  %vm2476_vm4 = vcmp.gt.f32.partialorder %v1693_v12, 0.0  ;;  %v2732_v16 = vmul.f32 0.2, %v1693_v12 }
 0x17d   :  { %4266 = vst.msk [vmem:[%s7335_s2 + $0x134] sm:$0xf] %vm4188_vm5, %v5043_v9  ;;  %v5048_v17 = vpack.c.bf16 %v2990_v15, %v2990_v15  ;;  %v3118_v18 = vsel %vm2606_vm3, %v5575_v5, %v2862_v11  ;;  %vm2604_vm2 = vcmp.gt.f32.partialorder %v2205_v13, 0.0  ;;  %v2860_v19 = vmul.f32 0.2, %v2205_v13  ;;  %v5448_v20 = vpop.f32.mrf.mxu0  ;;  %v5576_v21 = vpop.f32.mrf.mxu1 }
 0x17e   :  { %4394 = vst.msk [vmem:[%s7335_s2 + $0x334] sm:$0xf] %vm4188_vm5, %v5171_v14  ;;  %v5176_v22 = vpack.c.bf16 %v3118_v18, %v3118_v18  ;;  %v2988_v23 = vsel %vm2476_vm4, %v1693_v12, %v2732_v16  ;;  %vm2479_vm6 = vcmp.gt.f32.partialorder %v5448_v20, 0.0  ;;  %v2735_v24 = vmul.f32 0.2, %v5448_v20 }
 0x17f   :  { %4271 = vst.msk [vmem:[%s7335_s2 + $0x148] sm:$0xf] %vm4188_vm5, %v5048_v17  ;;  %v5046_v25 = vpack.c.bf16 %v2988_v23, %v2988_v23  ;;  %v3116_v26 = vsel %vm2604_vm2, %v2205_v13, %v2860_v19  ;;  %vm2607_vm7 = vcmp.gt.f32.partialorder %v5576_v21, 0.0  ;;  %v2863_v27 = vmul.f32 0.2, %v5576_v21  ;;  %v1696_v28 = vpop.f32.mrf.mxu0  ;;  %v2208_v29 = vpop.f32.mrf.mxu1 }
 0x180   :  { %4399 = vst.msk [vmem:[%s7335_s2 + $0x348] sm:$0xf] %vm4188_vm5, %v5176_v22  ;;  %v5174_v30 = vpack.c.bf16 %v3116_v26, %v3116_v26  ;;  %v2991_v31 = vsel %vm2479_vm6, %v5448_v20, %v2735_v24  ;;  %vm2477_vm8 = vcmp.gt.f32.partialorder %v1696_v28, 0.0  ;;  %v2733_v32 = vmul.f32 0.2, %v1696_v28 }
 0x181   :  { %4269 = vst.msk [vmem:[%s7335_s2 + $0x140] sm:$0xf] %vm4188_vm5, %v5046_v25  ;;  %v5049_v33 = vpack.c.bf16 %v2991_v31, %v2991_v31  ;;  %v3119_v34 = vsel %vm2607_vm7, %v5576_v21, %v2863_v27  ;;  %vm2605_vm9 = vcmp.gt.f32.partialorder %v2208_v29, 0.0  ;;  %v2861_v35 = vmul.f32 0.2, %v2208_v29  ;;  %v5451_v36 = vpop.f32.mrf.mxu0  ;;  %v5579_v37 = vpop.f32.mrf.mxu1 }
 0x182   :  { %4397 = vst.msk [vmem:[%s7335_s2 + $0x340] sm:$0xf] %vm4188_vm5, %v5174_v30  ;;  %v5177_v38 = vpack.c.bf16 %v3119_v34, %v3119_v34  ;;  %v2989_v39 = vsel %vm2477_vm8, %v1696_v28, %v2733_v32  ;;  %vm2482_vm10 = vcmp.gt.f32.partialorder %v5451_v36, 0.0  ;;  %v2738_v40 = vmul.f32 0.2, %v5451_v36 }
 0x183   :  { %4272 = vst.msk [vmem:[%s7335_s2 + $0x14c] sm:$0xf] %vm4188_vm5, %v5049_v33  ;;  %v5047_v41 = vpack.c.bf16 %v2989_v39, %v2989_v39  ;;  %v3117_v42 = vsel %vm2605_vm9, %v2208_v29, %v2861_v35  ;;  %vm2610_vm11 = vcmp.gt.f32.partialorder %v5579_v37, 0.0  ;;  %v2866_v43 = vmul.f32 0.2, %v5579_v37  ;;  %v1709_v44 = vpop.f32.mrf.mxu0  ;;  %v2221_v45 = vpop.f32.mrf.mxu1 }
 0x184   :  { %4400 = vst.msk [vmem:[%s7335_s2 + $0x34c] sm:$0xf] %vm4188_vm5, %v5177_v38  ;;  %v5175_v46 = vpack.c.bf16 %v3117_v42, %v3117_v42  ;;  %v2994_v47 = vsel %vm2482_vm10, %v5451_v36, %v2738_v40  ;;  %vm2480_vm12 = vcmp.gt.f32.partialorder %v1709_v44, 0.0  ;;  %v2736_v48 = vmul.f32 0.2, %v1709_v44 }
 0x185   :  { %4270 = vst.msk [vmem:[%s7335_s2 + $0x144] sm:$0xf] %vm4188_vm5, %v5047_v41  ;;  %v5052_v49 = vpack.c.bf16 %v2994_v47, %v2994_v47  ;;  %v3122_v50 = vsel %vm2610_vm11, %v5579_v37, %v2866_v43  ;;  %vm2608_vm13 = vcmp.gt.f32.partialorder %v2221_v45, 0.0  ;;  %v2864_v51 = vmul.f32 0.2, %v2221_v45  ;;  %v5452_v52 = vpop.f32.mrf.mxu0  ;;  %v5580_v53 = vpop.f32.mrf.mxu1 }
 0x186   :  { %4398 = vst.msk [vmem:[%s7335_s2 + $0x344] sm:$0xf] %vm4188_vm5, %v5175_v46  ;;  %v5180_v54 = vpack.c.bf16 %v3122_v50, %v3122_v50  ;;  %v2992_v55 = vsel %vm2480_vm12, %v1709_v44, %v2736_v48  ;;  %vm2483_vm14 = vcmp.gt.f32.partialorder %v5452_v52, 0.0  ;;  %v2739_v56 = vmul.f32 0.2, %v5452_v52 }
 0x187   :  { %4275 = vst.msk [vmem:[%s7335_s2 + $0x158] sm:$0xf] %vm4188_vm5, %v5052_v49  ;;  %v5050_v57 = vpack.c.bf16 %v2992_v55, %v2992_v55  ;;  %v3120_v58 = vsel %vm2608_vm13, %v2221_v45, %v2864_v51  ;;  %vm2611_vm15 = vcmp.gt.f32.partialorder %v5580_v53, 0.0  ;;  %v2867_v59 = vmul.f32 0.2, %v5580_v53  ;;  %v1712_v60 = vpop.f32.mrf.mxu0  ;;  %v2224_v61 = vpop.f32.mrf.mxu1 }
 0x188   :  { %4403 = vst.msk [vmem:[%s7335_s2 + $0x358] sm:$0xf] %vm4188_vm5, %v5180_v54  ;;  %v5178_v62 = vpack.c.bf16 %v3120_v58, %v3120_v58  ;;  %v2995_v63 = vsel %vm2483_vm14, %v5452_v52, %v2739_v56  ;;  %vm2481_vm0 = vcmp.gt.f32.partialorder %v1712_v60, 0.0  ;;  %v2737_v0 = vmul.f32 0.2, %v1712_v60 }
 0x189   :  { %4273 = vst.msk [vmem:[%s7335_s2 + $0x150] sm:$0xf] %vm4188_vm5, %v5050_v57  ;;  %v5053_v1 = vpack.c.bf16 %v2995_v63, %v2995_v63  ;;  %v3123_v2 = vsel %vm2611_vm15, %v5580_v53, %v2867_v59  ;;  %vm2609_vm1 = vcmp.gt.f32.partialorder %v2224_v61, 0.0  ;;  %v2865_v3 = vmul.f32 0.2, %v2224_v61  ;;  %v5455_v4 = vpop.f32.mrf.mxu0  ;;  %v5583_v5 = vpop.f32.mrf.mxu1 }
 0x18a   :  { %4401 = vst.msk [vmem:[%s7335_s2 + $0x350] sm:$0xf] %vm4188_vm5, %v5178_v62  ;;  %v5181_v6 = vpack.c.bf16 %v3123_v2, %v3123_v2  ;;  %v2993_v7 = vsel %vm2481_vm0, %v1712_v60, %v2737_v0  ;;  %vm2486_vm3 = vcmp.gt.f32.partialorder %v5455_v4, 0.0  ;;  %v2742_v8 = vmul.f32 0.2, %v5455_v4 }
 0x18b   :  { %4276 = vst.msk [vmem:[%s7335_s2 + $0x15c] sm:$0xf] %vm4188_vm5, %v5053_v1  ;;  %v5051_v9 = vpack.c.bf16 %v2993_v7, %v2993_v7  ;;  %v3121_v10 = vsel %vm2609_vm1, %v2224_v61, %v2865_v3  ;;  %vm2614_vm4 = vcmp.gt.f32.partialorder %v5583_v5, 0.0  ;;  %v2870_v11 = vmul.f32 0.2, %v5583_v5  ;;  %v1725_v12 = vpop.f32.mrf.mxu0  ;;  %v2237_v13 = vpop.f32.mrf.mxu1 }
 0x18c   :  { %4404 = vst.msk [vmem:[%s7335_s2 + $0x35c] sm:$0xf] %vm4188_vm5, %v5181_v6  ;;  %v5179_v14 = vpack.c.bf16 %v3121_v10, %v3121_v10  ;;  %v2998_v15 = vsel %vm2486_vm3, %v5455_v4, %v2742_v8  ;;  %vm2484_vm2 = vcmp.gt.f32.partialorder %v1725_v12, 0.0  ;;  %v2740_v16 = vmul.f32 0.2, %v1725_v12 }
 0x18d   :  { %4274 = vst.msk [vmem:[%s7335_s2 + $0x154] sm:$0xf] %vm4188_vm5, %v5051_v9  ;;  %v5056_v17 = vpack.c.bf16 %v2998_v15, %v2998_v15  ;;  %v3126_v18 = vsel %vm2614_vm4, %v5583_v5, %v2870_v11  ;;  %vm2612_vm6 = vcmp.gt.f32.partialorder %v2237_v13, 0.0  ;;  %v2868_v19 = vmul.f32 0.2, %v2237_v13  ;;  %v5456_v20 = vpop.f32.mrf.mxu0  ;;  %v5584_v21 = vpop.f32.mrf.mxu1 }
 0x18e   :  { %4402 = vst.msk [vmem:[%s7335_s2 + $0x354] sm:$0xf] %vm4188_vm5, %v5179_v14  ;;  %v5184_v22 = vpack.c.bf16 %v3126_v18, %v3126_v18  ;;  %v2996_v23 = vsel %vm2484_vm2, %v1725_v12, %v2740_v16  ;;  %vm2487_vm7 = vcmp.gt.f32.partialorder %v5456_v20, 0.0  ;;  %v2743_v24 = vmul.f32 0.2, %v5456_v20 }
 0x18f   :  { %4279 = vst.msk [vmem:[%s7335_s2 + $0x168] sm:$0xf] %vm4188_vm5, %v5056_v17  ;;  %v5054_v25 = vpack.c.bf16 %v2996_v23, %v2996_v23  ;;  %v3124_v26 = vsel %vm2612_vm6, %v2237_v13, %v2868_v19  ;;  %vm2615_vm8 = vcmp.gt.f32.partialorder %v5584_v21, 0.0  ;;  %v2871_v27 = vmul.f32 0.2, %v5584_v21  ;;  %v1728_v28 = vpop.f32.mrf.mxu0  ;;  %v2240_v29 = vpop.f32.mrf.mxu1 }
 0x190   :  { %4407 = vst.msk [vmem:[%s7335_s2 + $0x368] sm:$0xf] %vm4188_vm5, %v5184_v22  ;;  %v5182_v30 = vpack.c.bf16 %v3124_v26, %v3124_v26  ;;  %v2999_v31 = vsel %vm2487_vm7, %v5456_v20, %v2743_v24  ;;  %vm2485_vm9 = vcmp.gt.f32.partialorder %v1728_v28, 0.0  ;;  %v2741_v32 = vmul.f32 0.2, %v1728_v28 }
 0x191   :  { %4277 = vst.msk [vmem:[%s7335_s2 + $0x160] sm:$0xf] %vm4188_vm5, %v5054_v25  ;;  %v5057_v33 = vpack.c.bf16 %v2999_v31, %v2999_v31  ;;  %v3127_v34 = vsel %vm2615_vm8, %v5584_v21, %v2871_v27  ;;  %vm2613_vm10 = vcmp.gt.f32.partialorder %v2240_v29, 0.0  ;;  %v2869_v35 = vmul.f32 0.2, %v2240_v29  ;;  %v5459_v36 = vpop.f32.mrf.mxu0  ;;  %v5587_v37 = vpop.f32.mrf.mxu1 }
 0x192   :  { %4405 = vst.msk [vmem:[%s7335_s2 + $0x360] sm:$0xf] %vm4188_vm5, %v5182_v30  ;;  %v5185_v38 = vpack.c.bf16 %v3127_v34, %v3127_v34  ;;  %v2997_v39 = vsel %vm2485_vm9, %v1728_v28, %v2741_v32  ;;  %vm2490_vm11 = vcmp.gt.f32.partialorder %v5459_v36, 0.0  ;;  %v2746_v40 = vmul.f32 0.2, %v5459_v36 }
 0x193   :  { %4280 = vst.msk [vmem:[%s7335_s2 + $0x16c] sm:$0xf] %vm4188_vm5, %v5057_v33  ;;  %v5055_v41 = vpack.c.bf16 %v2997_v39, %v2997_v39  ;;  %v3125_v42 = vsel %vm2613_vm10, %v2240_v29, %v2869_v35  ;;  %vm2618_vm12 = vcmp.gt.f32.partialorder %v5587_v37, 0.0  ;;  %v2874_v43 = vmul.f32 0.2, %v5587_v37  ;;  %v1741_v44 = vpop.f32.mrf.mxu0  ;;  %v2253_v45 = vpop.f32.mrf.mxu1 }
 0x194   :  { %4408 = vst.msk [vmem:[%s7335_s2 + $0x36c] sm:$0xf] %vm4188_vm5, %v5185_v38  ;;  %v5183_v46 = vpack.c.bf16 %v3125_v42, %v3125_v42  ;;  %v3002_v47 = vsel %vm2490_vm11, %v5459_v36, %v2746_v40  ;;  %vm2488_vm13 = vcmp.gt.f32.partialorder %v1741_v44, 0.0  ;;  %v2744_v48 = vmul.f32 0.2, %v1741_v44 }
 0x195   :  { %4278 = vst.msk [vmem:[%s7335_s2 + $0x164] sm:$0xf] %vm4188_vm5, %v5055_v41  ;;  %v5060_v49 = vpack.c.bf16 %v3002_v47, %v3002_v47  ;;  %v3130_v50 = vsel %vm2618_vm12, %v5587_v37, %v2874_v43  ;;  %vm2616_vm14 = vcmp.gt.f32.partialorder %v2253_v45, 0.0  ;;  %v2872_v51 = vmul.f32 0.2, %v2253_v45  ;;  %v5460_v52 = vpop.f32.mrf.mxu0  ;;  %v5588_v53 = vpop.f32.mrf.mxu1 }
 0x196   :  { %4406 = vst.msk [vmem:[%s7335_s2 + $0x364] sm:$0xf] %vm4188_vm5, %v5183_v46  ;;  %v5188_v54 = vpack.c.bf16 %v3130_v50, %v3130_v50  ;;  %v3000_v55 = vsel %vm2488_vm13, %v1741_v44, %v2744_v48  ;;  %vm2491_vm15 = vcmp.gt.f32.partialorder %v5460_v52, 0.0  ;;  %v2747_v56 = vmul.f32 0.2, %v5460_v52 }
 0x197   :  { %4283 = vst.msk [vmem:[%s7335_s2 + $0x178] sm:$0xf] %vm4188_vm5, %v5060_v49  ;;  %v5058_v57 = vpack.c.bf16 %v3000_v55, %v3000_v55  ;;  %v3128_v58 = vsel %vm2616_vm14, %v2253_v45, %v2872_v51  ;;  %vm2619_vm0 = vcmp.gt.f32.partialorder %v5588_v53, 0.0  ;;  %v2875_v59 = vmul.f32 0.2, %v5588_v53  ;;  %v1744_v60 = vpop.f32.mrf.mxu0  ;;  %v2256_v61 = vpop.f32.mrf.mxu1 }
 0x198   :  { %4411 = vst.msk [vmem:[%s7335_s2 + $0x378] sm:$0xf] %vm4188_vm5, %v5188_v54  ;;  %v5186_v62 = vpack.c.bf16 %v3128_v58, %v3128_v58  ;;  %v3003_v63 = vsel %vm2491_vm15, %v5460_v52, %v2747_v56  ;;  %vm2489_vm1 = vcmp.gt.f32.partialorder %v1744_v60, 0.0  ;;  %v2745_v0 = vmul.f32 0.2, %v1744_v60 }
 0x199   :  { %4281 = vst.msk [vmem:[%s7335_s2 + $0x170] sm:$0xf] %vm4188_vm5, %v5058_v57  ;;  %v5061_v1 = vpack.c.bf16 %v3003_v63, %v3003_v63  ;;  %v3131_v2 = vsel %vm2619_vm0, %v5588_v53, %v2875_v59  ;;  %vm2617_vm3 = vcmp.gt.f32.partialorder %v2256_v61, 0.0  ;;  %v2873_v3 = vmul.f32 0.2, %v2256_v61  ;;  %v5463_v4 = vpop.f32.mrf.mxu0  ;;  %v5591_v5 = vpop.f32.mrf.mxu1 }
 0x19a   :  { %4409 = vst.msk [vmem:[%s7335_s2 + $0x370] sm:$0xf] %vm4188_vm5, %v5186_v62  ;;  %v5189_v6 = vpack.c.bf16 %v3131_v2, %v3131_v2  ;;  %v3001_v7 = vsel %vm2489_vm1, %v1744_v60, %v2745_v0  ;;  %vm2494_vm4 = vcmp.gt.f32.partialorder %v5463_v4, 0.0  ;;  %v2750_v8 = vmul.f32 0.2, %v5463_v4 }
 0x19b   :  { %4284 = vst.msk [vmem:[%s7335_s2 + $0x17c] sm:$0xf] %vm4188_vm5, %v5061_v1  ;;  %v5059_v9 = vpack.c.bf16 %v3001_v7, %v3001_v7  ;;  %v3129_v10 = vsel %vm2617_vm3, %v2256_v61, %v2873_v3  ;;  %vm2622_vm2 = vcmp.gt.f32.partialorder %v5591_v5, 0.0  ;;  %v2878_v11 = vmul.f32 0.2, %v5591_v5  ;;  %v1757_v12 = vpop.f32.mrf.mxu0  ;;  %v2269_v13 = vpop.f32.mrf.mxu1 }
 0x19c   :  { %4412 = vst.msk [vmem:[%s7335_s2 + $0x37c] sm:$0xf] %vm4188_vm5, %v5189_v6  ;;  %v5187_v14 = vpack.c.bf16 %v3129_v10, %v3129_v10  ;;  %v3006_v15 = vsel %vm2494_vm4, %v5463_v4, %v2750_v8  ;;  %vm2492_vm6 = vcmp.gt.f32.partialorder %v1757_v12, 0.0  ;;  %v2748_v16 = vmul.f32 0.2, %v1757_v12 }
 0x19d   :  { %4282 = vst.msk [vmem:[%s7335_s2 + $0x174] sm:$0xf] %vm4188_vm5, %v5059_v9  ;;  %v5064_v17 = vpack.c.bf16 %v3006_v15, %v3006_v15  ;;  %v3134_v18 = vsel %vm2622_vm2, %v5591_v5, %v2878_v11  ;;  %vm2620_vm7 = vcmp.gt.f32.partialorder %v2269_v13, 0.0  ;;  %v2876_v19 = vmul.f32 0.2, %v2269_v13  ;;  %v5464_v20 = vpop.f32.mrf.mxu0  ;;  %v5592_v21 = vpop.f32.mrf.mxu1 }
 0x19e   :  { %4410 = vst.msk [vmem:[%s7335_s2 + $0x374] sm:$0xf] %vm4188_vm5, %v5187_v14  ;;  %v5192_v22 = vpack.c.bf16 %v3134_v18, %v3134_v18  ;;  %v3004_v23 = vsel %vm2492_vm6, %v1757_v12, %v2748_v16  ;;  %vm2495_vm8 = vcmp.gt.f32.partialorder %v5464_v20, 0.0  ;;  %v2751_v24 = vmul.f32 0.2, %v5464_v20 }
 0x19f   :  { %4287 = vst.msk [vmem:[%s7335_s2 + $0x188] sm:$0xf] %vm4188_vm5, %v5064_v17  ;;  %v5062_v25 = vpack.c.bf16 %v3004_v23, %v3004_v23  ;;  %v3132_v26 = vsel %vm2620_vm7, %v2269_v13, %v2876_v19  ;;  %vm2623_vm9 = vcmp.gt.f32.partialorder %v5592_v21, 0.0  ;;  %v2879_v27 = vmul.f32 0.2, %v5592_v21  ;;  %v1760_v28 = vpop.f32.mrf.mxu0  ;;  %v2272_v29 = vpop.f32.mrf.mxu1 }
 0x1a0   :  { %4415 = vst.msk [vmem:[%s7335_s2 + $0x388] sm:$0xf] %vm4188_vm5, %v5192_v22  ;;  %v5190_v30 = vpack.c.bf16 %v3132_v26, %v3132_v26  ;;  %v3007_v31 = vsel %vm2495_vm8, %v5464_v20, %v2751_v24  ;;  %vm2493_vm10 = vcmp.gt.f32.partialorder %v1760_v28, 0.0  ;;  %v2749_v32 = vmul.f32 0.2, %v1760_v28 }
 0x1a1   :  { %4285 = vst.msk [vmem:[%s7335_s2 + $0x180] sm:$0xf] %vm4188_vm5, %v5062_v25  ;;  %v5065_v33 = vpack.c.bf16 %v3007_v31, %v3007_v31  ;;  %v3135_v34 = vsel %vm2623_vm9, %v5592_v21, %v2879_v27  ;;  %vm2621_vm11 = vcmp.gt.f32.partialorder %v2272_v29, 0.0  ;;  %v2877_v35 = vmul.f32 0.2, %v2272_v29  ;;  %v5467_v36 = vpop.f32.mrf.mxu0  ;;  %v5595_v37 = vpop.f32.mrf.mxu1 }
 0x1a2   :  { %4413 = vst.msk [vmem:[%s7335_s2 + $0x380] sm:$0xf] %vm4188_vm5, %v5190_v30  ;;  %v5193_v38 = vpack.c.bf16 %v3135_v34, %v3135_v34  ;;  %v3005_v39 = vsel %vm2493_vm10, %v1760_v28, %v2749_v32  ;;  %vm2498_vm12 = vcmp.gt.f32.partialorder %v5467_v36, 0.0  ;;  %v2754_v40 = vmul.f32 0.2, %v5467_v36 }
 0x1a3   :  { %4288 = vst.msk [vmem:[%s7335_s2 + $0x18c] sm:$0xf] %vm4188_vm5, %v5065_v33  ;;  %v5063_v41 = vpack.c.bf16 %v3005_v39, %v3005_v39  ;;  %v3133_v42 = vsel %vm2621_vm11, %v2272_v29, %v2877_v35  ;;  %vm2626_vm13 = vcmp.gt.f32.partialorder %v5595_v37, 0.0  ;;  %v2882_v43 = vmul.f32 0.2, %v5595_v37  ;;  %v1773_v44 = vpop.f32.mrf.mxu0  ;;  %v2285_v45 = vpop.f32.mrf.mxu1 }
 0x1a4   :  { %4416 = vst.msk [vmem:[%s7335_s2 + $0x38c] sm:$0xf] %vm4188_vm5, %v5193_v38  ;;  %v5191_v46 = vpack.c.bf16 %v3133_v42, %v3133_v42  ;;  %v3010_v47 = vsel %vm2498_vm12, %v5467_v36, %v2754_v40  ;;  %vm2496_vm14 = vcmp.gt.f32.partialorder %v1773_v44, 0.0  ;;  %v2752_v48 = vmul.f32 0.2, %v1773_v44 }
 0x1a5   :  { %4286 = vst.msk [vmem:[%s7335_s2 + $0x184] sm:$0xf] %vm4188_vm5, %v5063_v41  ;;  %v5068_v49 = vpack.c.bf16 %v3010_v47, %v3010_v47  ;;  %v3138_v50 = vsel %vm2626_vm13, %v5595_v37, %v2882_v43  ;;  %vm2624_vm15 = vcmp.gt.f32.partialorder %v2285_v45, 0.0  ;;  %v2880_v51 = vmul.f32 0.2, %v2285_v45  ;;  %v5468_v52 = vpop.f32.mrf.mxu0  ;;  %v5596_v53 = vpop.f32.mrf.mxu1 }
 0x1a6   :  { %4414 = vst.msk [vmem:[%s7335_s2 + $0x384] sm:$0xf] %vm4188_vm5, %v5191_v46  ;;  %v5196_v54 = vpack.c.bf16 %v3138_v50, %v3138_v50  ;;  %v3008_v55 = vsel %vm2496_vm14, %v1773_v44, %v2752_v48  ;;  %vm2499_vm0 = vcmp.gt.f32.partialorder %v5468_v52, 0.0  ;;  %v2755_v56 = vmul.f32 0.2, %v5468_v52 }
 0x1a7   :  { %4291 = vst.msk [vmem:[%s7335_s2 + $0x198] sm:$0xf] %vm4188_vm5, %v5068_v49  ;;  %v5066_v57 = vpack.c.bf16 %v3008_v55, %v3008_v55  ;;  %v3136_v58 = vsel %vm2624_vm15, %v2285_v45, %v2880_v51  ;;  %vm2627_vm1 = vcmp.gt.f32.partialorder %v5596_v53, 0.0  ;;  %v2883_v59 = vmul.f32 0.2, %v5596_v53  ;;  %v1776_v60 = vpop.f32.mrf.mxu0  ;;  %v2288_v61 = vpop.f32.mrf.mxu1 }
 0x1a8   :  { %4419 = vst.msk [vmem:[%s7335_s2 + $0x398] sm:$0xf] %vm4188_vm5, %v5196_v54  ;;  %v5194_v62 = vpack.c.bf16 %v3136_v58, %v3136_v58  ;;  %v3011_v63 = vsel %vm2499_vm0, %v5468_v52, %v2755_v56  ;;  %vm2497_vm3 = vcmp.gt.f32.partialorder %v1776_v60, 0.0  ;;  %v2753_v0 = vmul.f32 0.2, %v1776_v60 }
 0x1a9   :  { %4289 = vst.msk [vmem:[%s7335_s2 + $0x190] sm:$0xf] %vm4188_vm5, %v5066_v57  ;;  %v5069_v1 = vpack.c.bf16 %v3011_v63, %v3011_v63  ;;  %v3139_v2 = vsel %vm2627_vm1, %v5596_v53, %v2883_v59  ;;  %vm2625_vm4 = vcmp.gt.f32.partialorder %v2288_v61, 0.0  ;;  %v2881_v3 = vmul.f32 0.2, %v2288_v61  ;;  %v5471_v4 = vpop.f32.mrf.mxu0  ;;  %v5599_v5 = vpop.f32.mrf.mxu1 }
 0x1aa   :  { %4417 = vst.msk [vmem:[%s7335_s2 + $0x390] sm:$0xf] %vm4188_vm5, %v5194_v62  ;;  %v5197_v6 = vpack.c.bf16 %v3139_v2, %v3139_v2  ;;  %v3009_v7 = vsel %vm2497_vm3, %v1776_v60, %v2753_v0  ;;  %vm2502_vm2 = vcmp.gt.f32.partialorder %v5471_v4, 0.0  ;;  %v2758_v8 = vmul.f32 0.2, %v5471_v4 }
 0x1ab   :  { %4292 = vst.msk [vmem:[%s7335_s2 + $0x19c] sm:$0xf] %vm4188_vm5, %v5069_v1  ;;  %v5067_v9 = vpack.c.bf16 %v3009_v7, %v3009_v7  ;;  %v3137_v10 = vsel %vm2625_vm4, %v2288_v61, %v2881_v3  ;;  %vm2630_vm6 = vcmp.gt.f32.partialorder %v5599_v5, 0.0  ;;  %v2886_v11 = vmul.f32 0.2, %v5599_v5  ;;  %v1789_v12 = vpop.f32.mrf.mxu0  ;;  %v2301_v13 = vpop.f32.mrf.mxu1 }
 0x1ac   :  { %4420 = vst.msk [vmem:[%s7335_s2 + $0x39c] sm:$0xf] %vm4188_vm5, %v5197_v6  ;;  %v5195_v14 = vpack.c.bf16 %v3137_v10, %v3137_v10  ;;  %v3014_v15 = vsel %vm2502_vm2, %v5471_v4, %v2758_v8  ;;  %vm2500_vm7 = vcmp.gt.f32.partialorder %v1789_v12, 0.0  ;;  %v2756_v16 = vmul.f32 0.2, %v1789_v12 }
 0x1ad   :  { %4290 = vst.msk [vmem:[%s7335_s2 + $0x194] sm:$0xf] %vm4188_vm5, %v5067_v9  ;;  %v5072_v17 = vpack.c.bf16 %v3014_v15, %v3014_v15  ;;  %v3142_v18 = vsel %vm2630_vm6, %v5599_v5, %v2886_v11  ;;  %vm2628_vm8 = vcmp.gt.f32.partialorder %v2301_v13, 0.0  ;;  %v2884_v19 = vmul.f32 0.2, %v2301_v13  ;;  %v5472_v20 = vpop.f32.mrf.mxu0  ;;  %v5600_v21 = vpop.f32.mrf.mxu1 }
 0x1ae   :  { %4418 = vst.msk [vmem:[%s7335_s2 + $0x394] sm:$0xf] %vm4188_vm5, %v5195_v14  ;;  %v5200_v22 = vpack.c.bf16 %v3142_v18, %v3142_v18  ;;  %v3012_v23 = vsel %vm2500_vm7, %v1789_v12, %v2756_v16  ;;  %vm2503_vm9 = vcmp.gt.f32.partialorder %v5472_v20, 0.0  ;;  %v2759_v24 = vmul.f32 0.2, %v5472_v20 }
 0x1af   :  { %4295 = vst.msk [vmem:[%s7335_s2 + $0x1a8] sm:$0xf] %vm4188_vm5, %v5072_v17  ;;  %v5070_v25 = vpack.c.bf16 %v3012_v23, %v3012_v23  ;;  %v3140_v26 = vsel %vm2628_vm8, %v2301_v13, %v2884_v19  ;;  %vm2631_vm10 = vcmp.gt.f32.partialorder %v5600_v21, 0.0  ;;  %v2887_v27 = vmul.f32 0.2, %v5600_v21  ;;  %v1792_v28 = vpop.f32.mrf.mxu0  ;;  %v2304_v29 = vpop.f32.mrf.mxu1 }
 0x1b0   :  { %4423 = vst.msk [vmem:[%s7335_s2 + $0x3a8] sm:$0xf] %vm4188_vm5, %v5200_v22  ;;  %v5198_v30 = vpack.c.bf16 %v3140_v26, %v3140_v26  ;;  %v3015_v31 = vsel %vm2503_vm9, %v5472_v20, %v2759_v24  ;;  %vm2501_vm11 = vcmp.gt.f32.partialorder %v1792_v28, 0.0  ;;  %v2757_v32 = vmul.f32 0.2, %v1792_v28 }
 0x1b1   :  { %4293 = vst.msk [vmem:[%s7335_s2 + $0x1a0] sm:$0xf] %vm4188_vm5, %v5070_v25  ;;  %v5073_v33 = vpack.c.bf16 %v3015_v31, %v3015_v31  ;;  %v3143_v34 = vsel %vm2631_vm10, %v5600_v21, %v2887_v27  ;;  %vm2629_vm12 = vcmp.gt.f32.partialorder %v2304_v29, 0.0  ;;  %v2885_v35 = vmul.f32 0.2, %v2304_v29  ;;  %v5475_v36 = vpop.f32.mrf.mxu0  ;;  %v5603_v37 = vpop.f32.mrf.mxu1 }
 0x1b2   :  { %4421 = vst.msk [vmem:[%s7335_s2 + $0x3a0] sm:$0xf] %vm4188_vm5, %v5198_v30  ;;  %v5201_v38 = vpack.c.bf16 %v3143_v34, %v3143_v34  ;;  %v3013_v39 = vsel %vm2501_vm11, %v1792_v28, %v2757_v32  ;;  %vm2506_vm13 = vcmp.gt.f32.partialorder %v5475_v36, 0.0  ;;  %v2762_v40 = vmul.f32 0.2, %v5475_v36 }
 0x1b3   :  { %4296 = vst.msk [vmem:[%s7335_s2 + $0x1ac] sm:$0xf] %vm4188_vm5, %v5073_v33  ;;  %v5071_v41 = vpack.c.bf16 %v3013_v39, %v3013_v39  ;;  %v3141_v42 = vsel %vm2629_vm12, %v2304_v29, %v2885_v35  ;;  %vm2634_vm14 = vcmp.gt.f32.partialorder %v5603_v37, 0.0  ;;  %v2890_v43 = vmul.f32 0.2, %v5603_v37  ;;  %v1805_v44 = vpop.f32.mrf.mxu0  ;;  %v2317_v45 = vpop.f32.mrf.mxu1 }
 0x1b4   :  { %4424 = vst.msk [vmem:[%s7335_s2 + $0x3ac] sm:$0xf] %vm4188_vm5, %v5201_v38  ;;  %v5199_v46 = vpack.c.bf16 %v3141_v42, %v3141_v42  ;;  %v3018_v47 = vsel %vm2506_vm13, %v5475_v36, %v2762_v40  ;;  %vm2504_vm15 = vcmp.gt.f32.partialorder %v1805_v44, 0.0  ;;  %v2760_v48 = vmul.f32 0.2, %v1805_v44 }
 0x1b5   :  { %4294 = vst.msk [vmem:[%s7335_s2 + $0x1a4] sm:$0xf] %vm4188_vm5, %v5071_v41  ;;  %v5076_v49 = vpack.c.bf16 %v3018_v47, %v3018_v47  ;;  %v3146_v50 = vsel %vm2634_vm14, %v5603_v37, %v2890_v43  ;;  %vm2632_vm0 = vcmp.gt.f32.partialorder %v2317_v45, 0.0  ;;  %v2888_v51 = vmul.f32 0.2, %v2317_v45  ;;  %v5476_v52 = vpop.f32.mrf.mxu0  ;;  %v5604_v53 = vpop.f32.mrf.mxu1 }
 0x1b6   :  { %4422 = vst.msk [vmem:[%s7335_s2 + $0x3a4] sm:$0xf] %vm4188_vm5, %v5199_v46  ;;  %v5204_v54 = vpack.c.bf16 %v3146_v50, %v3146_v50  ;;  %v3016_v55 = vsel %vm2504_vm15, %v1805_v44, %v2760_v48  ;;  %vm2507_vm1 = vcmp.gt.f32.partialorder %v5476_v52, 0.0  ;;  %v2763_v56 = vmul.f32 0.2, %v5476_v52 }
 0x1b7   :  { %4299 = vst.msk [vmem:[%s7335_s2 + $0x1b8] sm:$0xf] %vm4188_vm5, %v5076_v49  ;;  %v5074_v57 = vpack.c.bf16 %v3016_v55, %v3016_v55  ;;  %v3144_v58 = vsel %vm2632_vm0, %v2317_v45, %v2888_v51  ;;  %vm2635_vm3 = vcmp.gt.f32.partialorder %v5604_v53, 0.0  ;;  %v2891_v59 = vmul.f32 0.2, %v5604_v53  ;;  %v1808_v60 = vpop.f32.mrf.mxu0  ;;  %v2320_v61 = vpop.f32.mrf.mxu1 }
 0x1b8   :  { %4427 = vst.msk [vmem:[%s7335_s2 + $0x3b8] sm:$0xf] %vm4188_vm5, %v5204_v54  ;;  %v5202_v62 = vpack.c.bf16 %v3144_v58, %v3144_v58  ;;  %v3019_v63 = vsel %vm2507_vm1, %v5476_v52, %v2763_v56  ;;  %vm2505_vm4 = vcmp.gt.f32.partialorder %v1808_v60, 0.0  ;;  %v2761_v0 = vmul.f32 0.2, %v1808_v60 }
 0x1b9   :  { %4297 = vst.msk [vmem:[%s7335_s2 + $0x1b0] sm:$0xf] %vm4188_vm5, %v5074_v57  ;;  %v5077_v1 = vpack.c.bf16 %v3019_v63, %v3019_v63  ;;  %v3147_v2 = vsel %vm2635_vm3, %v5604_v53, %v2891_v59  ;;  %vm2633_vm2 = vcmp.gt.f32.partialorder %v2320_v61, 0.0  ;;  %v2889_v3 = vmul.f32 0.2, %v2320_v61  ;;  %v5479_v4 = vpop.f32.mrf.mxu0  ;;  %v5607_v5 = vpop.f32.mrf.mxu1 }
 0x1ba   :  { %4425 = vst.msk [vmem:[%s7335_s2 + $0x3b0] sm:$0xf] %vm4188_vm5, %v5202_v62  ;;  %v5205_v6 = vpack.c.bf16 %v3147_v2, %v3147_v2  ;;  %v3017_v7 = vsel %vm2505_vm4, %v1808_v60, %v2761_v0  ;;  %vm2510_vm6 = vcmp.gt.f32.partialorder %v5479_v4, 0.0  ;;  %v2766_v8 = vmul.f32 0.2, %v5479_v4 }
 0x1bb   :  { %4300 = vst.msk [vmem:[%s7335_s2 + $0x1bc] sm:$0xf] %vm4188_vm5, %v5077_v1  ;;  %v5075_v9 = vpack.c.bf16 %v3017_v7, %v3017_v7  ;;  %v3145_v10 = vsel %vm2633_vm2, %v2320_v61, %v2889_v3  ;;  %vm2638_vm7 = vcmp.gt.f32.partialorder %v5607_v5, 0.0  ;;  %v2894_v11 = vmul.f32 0.2, %v5607_v5  ;;  %v1821_v12 = vpop.f32.mrf.mxu0  ;;  %v2333_v13 = vpop.f32.mrf.mxu1 }
 0x1bc   :  { %4428 = vst.msk [vmem:[%s7335_s2 + $0x3bc] sm:$0xf] %vm4188_vm5, %v5205_v6  ;;  %v5203_v14 = vpack.c.bf16 %v3145_v10, %v3145_v10  ;;  %v3022_v15 = vsel %vm2510_vm6, %v5479_v4, %v2766_v8  ;;  %vm2508_vm8 = vcmp.gt.f32.partialorder %v1821_v12, 0.0  ;;  %v2764_v16 = vmul.f32 0.2, %v1821_v12 }
 0x1bd   :  { %4298 = vst.msk [vmem:[%s7335_s2 + $0x1b4] sm:$0xf] %vm4188_vm5, %v5075_v9  ;;  %v5080_v17 = vpack.c.bf16 %v3022_v15, %v3022_v15  ;;  %v3150_v18 = vsel %vm2638_vm7, %v5607_v5, %v2894_v11  ;;  %vm2636_vm9 = vcmp.gt.f32.partialorder %v2333_v13, 0.0  ;;  %v2892_v19 = vmul.f32 0.2, %v2333_v13  ;;  %v5480_v20 = vpop.f32.mrf.mxu0  ;;  %v5608_v21 = vpop.f32.mrf.mxu1 }
 0x1be   :  { %4426 = vst.msk [vmem:[%s7335_s2 + $0x3b4] sm:$0xf] %vm4188_vm5, %v5203_v14  ;;  %v5208_v22 = vpack.c.bf16 %v3150_v18, %v3150_v18  ;;  %v3020_v23 = vsel %vm2508_vm8, %v1821_v12, %v2764_v16  ;;  %vm2511_vm10 = vcmp.gt.f32.partialorder %v5480_v20, 0.0  ;;  %v2767_v24 = vmul.f32 0.2, %v5480_v20 }
 0x1bf   :  { %4303 = vst.msk [vmem:[%s7335_s2 + $0x1c8] sm:$0xf] %vm4188_vm5, %v5080_v17  ;;  %v5078_v25 = vpack.c.bf16 %v3020_v23, %v3020_v23  ;;  %v3148_v26 = vsel %vm2636_vm9, %v2333_v13, %v2892_v19  ;;  %vm2639_vm11 = vcmp.gt.f32.partialorder %v5608_v21, 0.0  ;;  %v2895_v27 = vmul.f32 0.2, %v5608_v21  ;;  %v1824_v28 = vpop.f32.mrf.mxu0  ;;  %v2336_v29 = vpop.f32.mrf.mxu1 }
 0x1c0   :  { %4431 = vst.msk [vmem:[%s7335_s2 + $0x3c8] sm:$0xf] %vm4188_vm5, %v5208_v22  ;;  %v5206_v30 = vpack.c.bf16 %v3148_v26, %v3148_v26  ;;  %v3023_v31 = vsel %vm2511_vm10, %v5480_v20, %v2767_v24  ;;  %vm2509_vm12 = vcmp.gt.f32.partialorder %v1824_v28, 0.0  ;;  %v2765_v32 = vmul.f32 0.2, %v1824_v28 }
 0x1c1   :  { %4301 = vst.msk [vmem:[%s7335_s2 + $0x1c0] sm:$0xf] %vm4188_vm5, %v5078_v25  ;;  %v5081_v33 = vpack.c.bf16 %v3023_v31, %v3023_v31  ;;  %v3151_v34 = vsel %vm2639_vm11, %v5608_v21, %v2895_v27  ;;  %vm2637_vm13 = vcmp.gt.f32.partialorder %v2336_v29, 0.0  ;;  %v2893_v35 = vmul.f32 0.2, %v2336_v29  ;;  %v5483_v36 = vpop.f32.mrf.mxu0  ;;  %v5611_v37 = vpop.f32.mrf.mxu1 }
 0x1c2   :  { %4429 = vst.msk [vmem:[%s7335_s2 + $0x3c0] sm:$0xf] %vm4188_vm5, %v5206_v30  ;;  %v5209_v38 = vpack.c.bf16 %v3151_v34, %v3151_v34  ;;  %v3021_v39 = vsel %vm2509_vm12, %v1824_v28, %v2765_v32  ;;  %vm2514_vm14 = vcmp.gt.f32.partialorder %v5483_v36, 0.0  ;;  %v2770_v40 = vmul.f32 0.2, %v5483_v36 }
 0x1c3   :  { %4304 = vst.msk [vmem:[%s7335_s2 + $0x1cc] sm:$0xf] %vm4188_vm5, %v5081_v33  ;;  %v5079_v41 = vpack.c.bf16 %v3021_v39, %v3021_v39  ;;  %v3149_v42 = vsel %vm2637_vm13, %v2336_v29, %v2893_v35  ;;  %vm2642_vm15 = vcmp.gt.f32.partialorder %v5611_v37, 0.0  ;;  %v2898_v43 = vmul.f32 0.2, %v5611_v37  ;;  %v1837_v44 = vpop.f32.mrf.mxu0  ;;  %v2349_v45 = vpop.f32.mrf.mxu1 }
 0x1c4   :  { %4432 = vst.msk [vmem:[%s7335_s2 + $0x3cc] sm:$0xf] %vm4188_vm5, %v5209_v38  ;;  %v5207_v46 = vpack.c.bf16 %v3149_v42, %v3149_v42  ;;  %v3026_v47 = vsel %vm2514_vm14, %v5483_v36, %v2770_v40  ;;  %vm2512_vm0 = vcmp.gt.f32.partialorder %v1837_v44, 0.0  ;;  %v2768_v48 = vmul.f32 0.2, %v1837_v44 }
 0x1c5   :  { %4302 = vst.msk [vmem:[%s7335_s2 + $0x1c4] sm:$0xf] %vm4188_vm5, %v5079_v41  ;;  %v5084_v49 = vpack.c.bf16 %v3026_v47, %v3026_v47  ;;  %v3154_v50 = vsel %vm2642_vm15, %v5611_v37, %v2898_v43  ;;  %vm2640_vm1 = vcmp.gt.f32.partialorder %v2349_v45, 0.0  ;;  %v2896_v51 = vmul.f32 0.2, %v2349_v45  ;;  %v5484_v52 = vpop.f32.mrf.mxu0  ;;  %v5612_v53 = vpop.f32.mrf.mxu1 }
 0x1c6   :  { %4430 = vst.msk [vmem:[%s7335_s2 + $0x3c4] sm:$0xf] %vm4188_vm5, %v5207_v46  ;;  %v5212_v54 = vpack.c.bf16 %v3154_v50, %v3154_v50  ;;  %v3024_v55 = vsel %vm2512_vm0, %v1837_v44, %v2768_v48  ;;  %vm2515_vm3 = vcmp.gt.f32.partialorder %v5484_v52, 0.0  ;;  %v2771_v56 = vmul.f32 0.2, %v5484_v52 }
 0x1c7   :  { %4307 = vst.msk [vmem:[%s7335_s2 + $0x1d8] sm:$0xf] %vm4188_vm5, %v5084_v49  ;;  %v5082_v57 = vpack.c.bf16 %v3024_v55, %v3024_v55  ;;  %v3152_v58 = vsel %vm2640_vm1, %v2349_v45, %v2896_v51  ;;  %vm2643_vm4 = vcmp.gt.f32.partialorder %v5612_v53, 0.0  ;;  %v2899_v59 = vmul.f32 0.2, %v5612_v53  ;;  %v1840_v60 = vpop.f32.mrf.mxu0  ;;  %v2352_v61 = vpop.f32.mrf.mxu1 }
 0x1c8   :  { %4435 = vst.msk [vmem:[%s7335_s2 + $0x3d8] sm:$0xf] %vm4188_vm5, %v5212_v54  ;;  %v5210_v62 = vpack.c.bf16 %v3152_v58, %v3152_v58  ;;  %v3027_v63 = vsel %vm2515_vm3, %v5484_v52, %v2771_v56  ;;  %vm2513_vm2 = vcmp.gt.f32.partialorder %v1840_v60, 0.0  ;;  %v2769_v0 = vmul.f32 0.2, %v1840_v60 }
 0x1c9   :  { %4305 = vst.msk [vmem:[%s7335_s2 + $0x1d0] sm:$0xf] %vm4188_vm5, %v5082_v57  ;;  %v5085_v1 = vpack.c.bf16 %v3027_v63, %v3027_v63  ;;  %v3155_v2 = vsel %vm2643_vm4, %v5612_v53, %v2899_v59  ;;  %vm2641_vm6 = vcmp.gt.f32.partialorder %v2352_v61, 0.0  ;;  %v2897_v3 = vmul.f32 0.2, %v2352_v61  ;;  %v5487_v4 = vpop.f32.mrf.mxu0  ;;  %v5615_v5 = vpop.f32.mrf.mxu1 }
 0x1ca   :  { %4433 = vst.msk [vmem:[%s7335_s2 + $0x3d0] sm:$0xf] %vm4188_vm5, %v5210_v62  ;;  %v5213_v6 = vpack.c.bf16 %v3155_v2, %v3155_v2  ;;  %v3025_v7 = vsel %vm2513_vm2, %v1840_v60, %v2769_v0  ;;  %vm2518_vm7 = vcmp.gt.f32.partialorder %v5487_v4, 0.0  ;;  %v2774_v8 = vmul.f32 0.2, %v5487_v4 }
 0x1cb   :  { %4308 = vst.msk [vmem:[%s7335_s2 + $0x1dc] sm:$0xf] %vm4188_vm5, %v5085_v1  ;;  %v5083_v9 = vpack.c.bf16 %v3025_v7, %v3025_v7  ;;  %v3153_v10 = vsel %vm2641_vm6, %v2352_v61, %v2897_v3  ;;  %vm2646_vm8 = vcmp.gt.f32.partialorder %v5615_v5, 0.0  ;;  %v2902_v11 = vmul.f32 0.2, %v5615_v5  ;;  %v1853_v12 = vpop.f32.mrf.mxu0  ;;  %v2365_v13 = vpop.f32.mrf.mxu1 }
 0x1cc   :  { %4436 = vst.msk [vmem:[%s7335_s2 + $0x3dc] sm:$0xf] %vm4188_vm5, %v5213_v6  ;;  %v5211_v14 = vpack.c.bf16 %v3153_v10, %v3153_v10  ;;  %v3030_v15 = vsel %vm2518_vm7, %v5487_v4, %v2774_v8  ;;  %vm2516_vm9 = vcmp.gt.f32.partialorder %v1853_v12, 0.0  ;;  %v2772_v16 = vmul.f32 0.2, %v1853_v12 }
 0x1cd   :  { %4306 = vst.msk [vmem:[%s7335_s2 + $0x1d4] sm:$0xf] %vm4188_vm5, %v5083_v9  ;;  %v5088_v17 = vpack.c.bf16 %v3030_v15, %v3030_v15  ;;  %v3158_v18 = vsel %vm2646_vm8, %v5615_v5, %v2902_v11  ;;  %vm2644_vm10 = vcmp.gt.f32.partialorder %v2365_v13, 0.0  ;;  %v2900_v19 = vmul.f32 0.2, %v2365_v13  ;;  %v5488_v20 = vpop.f32.mrf.mxu0  ;;  %v5616_v21 = vpop.f32.mrf.mxu1 }
 0x1ce   :  { %4434 = vst.msk [vmem:[%s7335_s2 + $0x3d4] sm:$0xf] %vm4188_vm5, %v5211_v14  ;;  %v5216_v22 = vpack.c.bf16 %v3158_v18, %v3158_v18  ;;  %v3028_v23 = vsel %vm2516_vm9, %v1853_v12, %v2772_v16  ;;  %vm2519_vm11 = vcmp.gt.f32.partialorder %v5488_v20, 0.0  ;;  %v2775_v24 = vmul.f32 0.2, %v5488_v20 }
 0x1cf   :  { %4311 = vst.msk [vmem:[%s7335_s2 + $0x1e8] sm:$0xf] %vm4188_vm5, %v5088_v17  ;;  %v5086_v25 = vpack.c.bf16 %v3028_v23, %v3028_v23  ;;  %v3156_v26 = vsel %vm2644_vm10, %v2365_v13, %v2900_v19  ;;  %vm2647_vm12 = vcmp.gt.f32.partialorder %v5616_v21, 0.0  ;;  %v2903_v27 = vmul.f32 0.2, %v5616_v21  ;;  %v1856_v28 = vpop.f32.mrf.mxu0  ;;  %v2368_v29 = vpop.f32.mrf.mxu1 }
 0x1d0   :  { %4439 = vst.msk [vmem:[%s7335_s2 + $0x3e8] sm:$0xf] %vm4188_vm5, %v5216_v22  ;;  %v5214_v30 = vpack.c.bf16 %v3156_v26, %v3156_v26  ;;  %v3031_v31 = vsel %vm2519_vm11, %v5488_v20, %v2775_v24  ;;  %vm2517_vm13 = vcmp.gt.f32.partialorder %v1856_v28, 0.0  ;;  %v2773_v32 = vmul.f32 0.2, %v1856_v28 }
 0x1d1   :  { %4309 = vst.msk [vmem:[%s7335_s2 + $0x1e0] sm:$0xf] %vm4188_vm5, %v5086_v25  ;;  %v5089_v33 = vpack.c.bf16 %v3031_v31, %v3031_v31  ;;  %v3159_v34 = vsel %vm2647_vm12, %v5616_v21, %v2903_v27  ;;  %vm2645_vm14 = vcmp.gt.f32.partialorder %v2368_v29, 0.0  ;;  %v2901_v35 = vmul.f32 0.2, %v2368_v29  ;;  %v5491_v36 = vpop.f32.mrf.mxu0  ;;  %v5619_v37 = vpop.f32.mrf.mxu1 }
 0x1d2   :  { %4437 = vst.msk [vmem:[%s7335_s2 + $0x3e0] sm:$0xf] %vm4188_vm5, %v5214_v30  ;;  %v5217_v38 = vpack.c.bf16 %v3159_v34, %v3159_v34  ;;  %v3029_v39 = vsel %vm2517_vm13, %v1856_v28, %v2773_v32  ;;  %vm2522_vm15 = vcmp.gt.f32.partialorder %v5491_v36, 0.0  ;;  %v2778_v40 = vmul.f32 0.2, %v5491_v36 }
 0x1d3   :  { %4312 = vst.msk [vmem:[%s7335_s2 + $0x1ec] sm:$0xf] %vm4188_vm5, %v5089_v33  ;;  %v5087_v41 = vpack.c.bf16 %v3029_v39, %v3029_v39  ;;  %v3157_v42 = vsel %vm2645_vm14, %v2368_v29, %v2901_v35  ;;  %vm2650_vm0 = vcmp.gt.f32.partialorder %v5619_v37, 0.0  ;;  %v2906_v43 = vmul.f32 0.2, %v5619_v37  ;;  %v1869_v44 = vpop.f32.mrf.mxu0  ;;  %v2381_v45 = vpop.f32.mrf.mxu1 }
 0x1d4   :  { %4440 = vst.msk [vmem:[%s7335_s2 + $0x3ec] sm:$0xf] %vm4188_vm5, %v5217_v38  ;;  %v5215_v46 = vpack.c.bf16 %v3157_v42, %v3157_v42  ;;  %v3034_v47 = vsel %vm2522_vm15, %v5491_v36, %v2778_v40  ;;  %vm2520_vm1 = vcmp.gt.f32.partialorder %v1869_v44, 0.0  ;;  %v2776_v48 = vmul.f32 0.2, %v1869_v44 }
 0x1d5   :  { %4310 = vst.msk [vmem:[%s7335_s2 + $0x1e4] sm:$0xf] %vm4188_vm5, %v5087_v41  ;;  %v5092_v49 = vpack.c.bf16 %v3034_v47, %v3034_v47  ;;  %v3162_v50 = vsel %vm2650_vm0, %v5619_v37, %v2906_v43  ;;  %vm2648_vm3 = vcmp.gt.f32.partialorder %v2381_v45, 0.0  ;;  %v2904_v51 = vmul.f32 0.2, %v2381_v45  ;;  %v5492_v52 = vpop.f32.mrf.mxu0  ;;  %v5620_v53 = vpop.f32.mrf.mxu1 }
 0x1d6   :  { %4438 = vst.msk [vmem:[%s7335_s2 + $0x3e4] sm:$0xf] %vm4188_vm5, %v5215_v46  ;;  %v5220_v54 = vpack.c.bf16 %v3162_v50, %v3162_v50  ;;  %v3032_v55 = vsel %vm2520_vm1, %v1869_v44, %v2776_v48  ;;  %vm2523_vm4 = vcmp.gt.f32.partialorder %v5492_v52, 0.0  ;;  %v2779_v56 = vmul.f32 0.2, %v5492_v52 }
 0x1d7   :  { %4315 = vst.msk [vmem:[%s7335_s2 + $0x1f8] sm:$0xf] %vm4188_vm5, %v5092_v49  ;;  %v5090_v57 = vpack.c.bf16 %v3032_v55, %v3032_v55  ;;  %v3160_v58 = vsel %vm2648_vm3, %v2381_v45, %v2904_v51  ;;  %vm2651_vm2 = vcmp.gt.f32.partialorder %v5620_v53, 0.0  ;;  %v2907_v59 = vmul.f32 0.2, %v5620_v53  ;;  %v1872_v60 = vpop.f32.mrf.mxu0  ;;  %v2384_v61 = vpop.f32.mrf.mxu1 }
 0x1d8   :  { %4443 = vst.msk [vmem:[%s7335_s2 + $0x3f8] sm:$0xf] %vm4188_vm5, %v5220_v54  ;;  %v5218_v62 = vpack.c.bf16 %v3160_v58, %v3160_v58  ;;  %v3035_v63 = vsel %vm2523_vm4, %v5492_v52, %v2779_v56  ;;  %vm2521_vm6 = vcmp.gt.f32.partialorder %v1872_v60, 0.0  ;;  %v2777_v0 = vmul.f32 0.2, %v1872_v60 }
 0x1d9   :  { %4313 = vst.msk [vmem:[%s7335_s2 + $0x1f0] sm:$0xf] %vm4188_vm5, %v5090_v57  ;;  %v5093_v1 = vpack.c.bf16 %v3035_v63, %v3035_v63  ;;  %v3163_v2 = vsel %vm2651_vm2, %v5620_v53, %v2907_v59  ;;  %vm2649_vm7 = vcmp.gt.f32.partialorder %v2384_v61, 0.0  ;;  %v2905_v3 = vmul.f32 0.2, %v2384_v61 }
 0x1da   :  { %4441 = vst.msk [vmem:[%s7335_s2 + $0x3f0] sm:$0xf] %vm4188_vm5, %v5218_v62  ;;  %v5221_v4 = vpack.c.bf16 %v3163_v2, %v3163_v2  ;;  %v3033_v5 = vsel %vm2521_vm6, %v1872_v60, %v2777_v0 }
 0x1db   :  { %4316 = vst.msk [vmem:[%s7335_s2 + $0x1fc] sm:$0xf] %vm4188_vm5, %v5093_v1  ;;  %v5091_v6 = vpack.c.bf16 %v3033_v5, %v3033_v5  ;;  %v3161_v7 = vsel %vm2649_vm7, %v2384_v61, %v2905_v3 }
 0x1dc   :  { %4444 = vst.msk [vmem:[%s7335_s2 + $0x3fc] sm:$0xf] %vm4188_vm5, %v5221_v4  ;;  %v5219_v8 = vpack.c.bf16 %v3161_v7, %v3161_v7 }
 0x1dd   :  { %4314 = vst.msk [vmem:[%s7335_s2 + $0x1f4] sm:$0xf] %vm4188_vm5, %v5091_v6 }
 0x1de   :  { %4442 = vst.msk [vmem:[%s7335_s2 + $0x3f4] sm:$0xf] %vm4188_vm5, %v5219_v8 }

// kernel: netd_forward.5
= control target key start
LH: loop header
LB: loop body
LE: loop exit
PB: predicated region body
PF: predicated region fallthrough
CT: control target
= control target key end

     0   :  { %vm627_vm0 = vcmask 130048   ;;  %s4363_s1 = inlined_call_operand.vmem [shape: bf16[128,16], index: 1, kind: input, shape index: {}]   ;;  %s4364_s0 = inlined_call_operand.vmem [shape: bf16[512,128], index: 0, kind: input, shape index: {}]   ;;  %s4365_s2 = inlined_call_operand.vmem [shape: f32[1,16], index: 2, kind: input, shape index: {}]   ;;  %s4366_s3 = inlined_call_operand.vmem [shape: f32[1,16], index: 3, kind: input, shape index: {}]   ;;  %s4367_s4 = inlined_call_operand.vmem [shape: bf16[512,16], index: 4, kind: output, shape index: {}]  }
   0x1   :  { %v1992_v0 = vld [vmem:[%s4363_s1 + $0x38] sm:$0xff]   ;;  %v1993_v1 = vld [vmem:[%s4363_s1 + $0x30] sm:$0xff]   ;;  %v1994_v2 = vld [vmem:[%s4363_s1 + $0x28] sm:$0xff]  }
   0x2   :  { %1896 = vmatprep.subr.bf16.mxu0 %v1992_v0  ;;  %1976 = vmatprep.subr.bf16.mxu1 %v1992_v0  ;;  %v1995_v3 = vld [vmem:[%s4363_s1 + $0x20] sm:$0xff]   ;;  %v1996_v5 = vld [vmem:[%s4363_s1 + $0x18] sm:$0xff]   ;;  %v1997_v6 = vld [vmem:[%s4363_s1 + $0x10] sm:$0xff]  }
   0x3   :  { %1897 = vmatpush3.bf16.msra.mxu0 %v1992_v0  ;;  %1984 = vmatpush3.bf16.msra.mxu1 %v1992_v0  ;;  %v2000_v4 = vld [vmem:[%s4364_s0] sm:$0xff]   ;;  %v1998_v7 = vld [vmem:[%s4363_s1 + $0x8] sm:$0xff]   ;;  %v2002_v11 = vld [vmem:[%s4364_s0 + $0x10] sm:$0xff]  }
   0x4   :  { %1898 = vmatprep.subr.bf16.mxu0 %v1993_v1  ;;  %1977 = vmatprep.subr.bf16.mxu1 %v1993_v1  ;;  %v1999_v8 = vld [vmem:[%s4363_s1] sm:$0xff]   ;;  %v2001_v10 = vld [vmem:[%s4364_s0 + $0x8] sm:$0xff]   ;;  %v2018_v13 = vld [vmem:[%s4364_s0 + $0x90] sm:$0xff]  }
   0x5   :  { %1912 = vmatprep.mubr.bf16.mxu0 %v2000_v4  ;;  %v2016_v9 = vld [vmem:[%s4364_s0 + $0x80] sm:$0xff]   ;;  %v2017_v12 = vld [vmem:[%s4364_s0 + $0x88] sm:$0xff]   ;;  %v2003_v14 = vld [vmem:[%s4364_s0 + $0x18] sm:$0xff]  }
   0x6   :  { %1944 = vmatprep.mubr.bf16.mxu1 %v2016_v9  ;;  %v2004_v15 = vld [vmem:[%s4364_s0 + $0x20] sm:$0xff]   ;;  %v2019_v16 = vld [vmem:[%s4364_s0 + $0x98] sm:$0xff]   ;;  %v2005_v18 = vld [vmem:[%s4364_s0 + $0x28] sm:$0xff]  }
   0x7   :  { %1899 = vmatpush3.bf16.msra.mxu0 %v1993_v1  ;;  %1985 = vmatpush3.bf16.msra.mxu1 %v1993_v1  ;;  %v2020_v17 = vld [vmem:[%s4364_s0 + $0xa0] sm:$0xff]   ;;  %v2021_v19 = vld [vmem:[%s4364_s0 + $0xa8] sm:$0xff]   ;;  %v2006_v20 = vld [vmem:[%s4364_s0 + $0x30] sm:$0xff]  }
   0x8   :  { %1900 = vmatprep.subr.bf16.mxu0 %v1994_v2  ;;  %1978 = vmatprep.subr.bf16.mxu1 %v1994_v2  ;;  %v2022_v21 = vld [vmem:[%s4364_s0 + $0xb0] sm:$0xff]   ;;  %v2007_v22 = vld [vmem:[%s4364_s0 + $0x38] sm:$0xff]   ;;  %v2008_v24 = vld [vmem:[%s4364_s0 + $0x40] sm:$0xff]  }
   0x9   :  { %v2023_v23 = vld [vmem:[%s4364_s0 + $0xb8] sm:$0xff]   ;;  %v2024_v25 = vld [vmem:[%s4364_s0 + $0xc0] sm:$0xff]   ;;  %v2009_v26 = vld [vmem:[%s4364_s0 + $0x48] sm:$0xff]  }
   0xa   :  { %v2025_v27 = vld [vmem:[%s4364_s0 + $0xc8] sm:$0xff]   ;;  %v2010_v28 = vld [vmem:[%s4364_s0 + $0x50] sm:$0xff]   ;;  %v2011_v30 = vld [vmem:[%s4364_s0 + $0x58] sm:$0xff]  }
   0xb   :  { %1901 = vmatpush3.bf16.msra.mxu0 %v1994_v2  ;;  %1986 = vmatpush3.bf16.msra.mxu1 %v1994_v2  ;;  %v2026_v29 = vld [vmem:[%s4364_s0 + $0xd0] sm:$0xff]   ;;  %v2027_v31 = vld [vmem:[%s4364_s0 + $0xd8] sm:$0xff]   ;;  %v2012_v32 = vld [vmem:[%s4364_s0 + $0x60] sm:$0xff]  }
   0xc   :  { %1902 = vmatprep.subr.bf16.mxu0 %v1995_v3  ;;  %1979 = vmatprep.subr.bf16.mxu1 %v1995_v3  ;;  %v2028_v33 = vld [vmem:[%s4364_s0 + $0xe0] sm:$0xff]   ;;  %v2013_v34 = vld [vmem:[%s4364_s0 + $0x68] sm:$0xff]   ;;  %v2014_v36 = vld [vmem:[%s4364_s0 + $0x70] sm:$0xff]  }
   0xd   :  { %v2029_v35 = vld [vmem:[%s4364_s0 + $0xe8] sm:$0xff]   ;;  %v2030_v37 = vld [vmem:[%s4364_s0 + $0xf0] sm:$0xff]   ;;  %v2015_v38 = vld [vmem:[%s4364_s0 + $0x78] sm:$0xff]  }
   0xe   :  { %v2031_v39 = vld [vmem:[%s4364_s0 + $0xf8] sm:$0xff]  }
   0xf   :  { %1903 = vmatpush3.bf16.msra.mxu0 %v1995_v3  ;;  %1987 = vmatpush3.bf16.msra.mxu1 %v1995_v3 }
  0x10   :  { %1904 = vmatprep.subr.bf16.mxu0 %v1996_v5  ;;  %1980 = vmatprep.subr.bf16.mxu1 %v1996_v5 }
  0x13   :  { %1905 = vmatpush3.bf16.msra.mxu0 %v1996_v5  ;;  %1988 = vmatpush3.bf16.msra.mxu1 %v1996_v5 }
  0x14   :  { %1906 = vmatprep.subr.bf16.mxu0 %v1997_v6  ;;  %1981 = vmatprep.subr.bf16.mxu1 %v1997_v6 }
  0x17   :  { %1907 = vmatpush3.bf16.msra.mxu0 %v1997_v6  ;;  %1989 = vmatpush3.bf16.msra.mxu1 %v1997_v6 }
  0x18   :  { %1908 = vmatprep.subr.bf16.mxu0 %v1998_v7  ;;  %1982 = vmatprep.subr.bf16.mxu1 %v1998_v7 }
  0x1b   :  { %1909 = vmatpush3.bf16.msra.mxu0 %v1998_v7  ;;  %1990 = vmatpush3.bf16.msra.mxu1 %v1998_v7 }
  0x1c   :  { %1910 = vmatprep.subr.bf16.mxu0 %v1999_v8  ;;  %1983 = vmatprep.subr.bf16.mxu1 %v1999_v8 }
  0x1f   :  { %1911 = vmatpush3.bf16.msra.mxu0 %v1999_v8  ;;  %1991 = vmatpush3.bf16.msra.mxu1 %v1999_v8 }
  0x22   :  { %1913 = vmatmul.mubr.bf16.vlgmr.msra.gmra.mxu0 %v2001_v10  ;;  %1945 = vmatmul.mubr.bf16.vlgmr.msra.gmra.mxu1 %v2017_v12 }
  0x23   :  { %1916 = vmatprep.mubr.bf16.mxu0 %v2002_v11  ;;  %1948 = vmatprep.mubr.bf16.mxu1 %v2018_v13 }
  0x2a   :  { %1917 = vmatmul.mubr.bf16.gmra.mxu0 %v2003_v14  ;;  %1949 = vmatmul.mubr.bf16.gmra.mxu1 %v2019_v16 }
  0x2b   :  { %1920 = vmatprep.mubr.bf16.mxu0 %v2004_v15  ;;  %1952 = vmatprep.mubr.bf16.mxu1 %v2020_v17 }
  0x32   :  { %1921 = vmatmul.mubr.bf16.gmra.mxu0 %v2005_v18  ;;  %1953 = vmatmul.mubr.bf16.gmra.mxu1 %v2021_v19 }
  0x33   :  { %1924 = vmatprep.mubr.bf16.mxu0 %v2006_v20  ;;  %1956 = vmatprep.mubr.bf16.mxu1 %v2022_v21 }
  0x3a   :  { %1925 = vmatmul.mubr.bf16.gmra.mxu0 %v2007_v22  ;;  %1957 = vmatmul.mubr.bf16.gmra.mxu1 %v2023_v23 }
  0x3b   :  { %1928 = vmatprep.mubr.bf16.mxu0 %v2008_v24  ;;  %1960 = vmatprep.mubr.bf16.mxu1 %v2024_v25 }
  0x42   :  { %1929 = vmatmul.mubr.bf16.gmra.mxu0 %v2009_v26  ;;  %1961 = vmatmul.mubr.bf16.gmra.mxu1 %v2025_v27 }
  0x43   :  { %1932 = vmatprep.mubr.bf16.mxu0 %v2010_v28  ;;  %1964 = vmatprep.mubr.bf16.mxu1 %v2026_v29 }
  0x4a   :  { %1933 = vmatmul.mubr.bf16.gmra.mxu0 %v2011_v30  ;;  %1965 = vmatmul.mubr.bf16.gmra.mxu1 %v2027_v31 }
  0x4b   :  { %1936 = vmatprep.mubr.bf16.mxu0 %v2012_v32  ;;  %1968 = vmatprep.mubr.bf16.mxu1 %v2028_v33 }
  0x52   :  { %1937 = vmatmul.mubr.bf16.gmra.mxu0 %v2013_v34  ;;  %1969 = vmatmul.mubr.bf16.gmra.mxu1 %v2029_v35 }
  0x53   :  { %1940 = vmatprep.mubr.bf16.mxu0 %v2014_v36  ;;  %1972 = vmatprep.mubr.bf16.mxu1 %v2030_v37 }
  0x5a   :  { %1941 = vmatmul.mubr.bf16.gmra.mxu0 %v2015_v38  ;;  %1973 = vmatmul.mubr.bf16.gmra.mxu1 %v2031_v39 }
  0xe2   :  { %v2179_v40 = vpop.f32.mrf.mxu0  ;;  %v2185_v43 = vpop.f32.mrf.mxu1 }
  0xe3   :  { %v631_v50 = vsel %vm627_vm0, %v2179_v40, 0.0 }
  0xe4   :  { %v2181_v41 = vpop.f32.mrf.mxu0  ;;  %v2195_v49 = vpop.f32.mrf.mxu1 }
  0xe5   :  { %v628_v45 = vsel %vm627_vm0, %v2181_v41, 0.0 }
  0xe6   :  { %v2183_v42 = vpop.f32.mrf.mxu0  ;;  %v2205_v56 = vpop.f32.mrf.mxu1 }
  0xe7   :  { %v633_v53 = vsel %vm627_vm0, %v2183_v42, 0.0 }
  0xe8   :  { %v2187_v44 = vpop.f32.mrf.mxu0  ;;  %v2215_v63 = vpop.f32.mrf.mxu1 }
  0xe9   :  { %v629_v46 = vsel %vm627_vm0, %v2187_v44, 0.0 }
  0xea   :  { %v630_v47 = vadd.f32 %v629_v46, %v628_v45  ;;  %v2193_v48 = vpop.f32.mrf.mxu0  ;;  %v2225_v6 = vpop.f32.mrf.mxu1 }
  0xeb   :  { %v639_v0 = vsel %vm627_vm0, %v2193_v48, 0.0 }
  0xec   :  { %v632_v51 = vadd.f32 %v631_v50, %v630_v47  ;;  %v2199_v52 = vpop.f32.mrf.mxu0  ;;  %v2235_v13 = vpop.f32.mrf.mxu1 }
  0xed   :  { %v635_v57 = vsel %vm627_vm0, %v2199_v52, 0.0 }
  0xee   :  { %v634_v54 = vadd.f32 %v633_v53, %v632_v51  ;;  %v2203_v55 = vpop.f32.mrf.mxu0  ;;  %v2245_v20 = vpop.f32.mrf.mxu1 }
  0xef   :  { %v641_v3 = vsel %vm627_vm0, %v2203_v55, 0.0 }
  0xf0   :  { %v636_v58 = vadd.f32 %v635_v57, %v634_v54  ;;  %v2209_v59 = vpop.f32.mrf.mxu0  ;;  %v2255_v27 = vpop.f32.mrf.mxu1 }
  0xf1   :  { %v637_v60 = vsel %vm627_vm0, %v2209_v59, 0.0 }
  0xf2   :  { %v638_v61 = vadd.f32 %v637_v60, %v636_v58  ;;  %v2213_v62 = vpop.f32.mrf.mxu0  ;;  %v2265_v34 = vpop.f32.mrf.mxu1 }
  0xf3   :  { %v647_v14 = vsel %vm627_vm0, %v2213_v62, 0.0  ;;  %4437 = vst [vmem:[#allocation2_spill] sm:$0xff] %v2265_v34 }
  0xf4   :  { %v640_v1 = vadd.f32 %v639_v0, %v638_v61  ;;  %v2219_v2 = vpop.f32.mrf.mxu0  ;;  %v2275_v46 = vpop.f32.mrf.mxu1 }
  0xf5   :  { %v643_v7 = vsel %vm627_vm0, %v2219_v2, 0.0  ;;  %4438 = vst [vmem:[#allocation3_spill] sm:$0xff] %v2275_v46 }
  0xf6   :  { %v642_v4 = vadd.f32 %v641_v3, %v640_v1  ;;  %v2223_v5 = vpop.f32.mrf.mxu0  ;;  %v2285_v58 = vpop.f32.mrf.mxu1 }
  0xf7   :  { %v649_v17 = vsel %vm627_vm0, %v2223_v5, 0.0 }
  0xf8   :  { %v644_v8 = vadd.f32 %v643_v7, %v642_v4  ;;  %v2229_v9 = vpop.f32.mrf.mxu0  ;;  %v2295_v7 = vpop.f32.mrf.mxu1 }
  0xf9   :  { %v645_v10 = vsel %vm627_vm0, %v2229_v9, 0.0 }
  0xfa   :  { %v646_v11 = vadd.f32 %v645_v10, %v644_v8  ;;  %v2233_v12 = vpop.f32.mrf.mxu0 }
  0xfb   :  { %v655_v28 = vsel %vm627_vm0, %v2233_v12, 0.0 }
  0xfc   :  { %v648_v15 = vadd.f32 %v647_v14, %v646_v11  ;;  %v2239_v16 = vpop.f32.mrf.mxu0 }
  0xfd   :  { %v651_v21 = vsel %vm627_vm0, %v2239_v16, 0.0 }
  0xfe   :  { %v650_v18 = vadd.f32 %v649_v17, %v648_v15  ;;  %v2243_v19 = vpop.f32.mrf.mxu0 }
  0xff   :  { %v657_v31 = vsel %vm627_vm0, %v2243_v19, 0.0 }
 0x100   :  { %v652_v22 = vadd.f32 %v651_v21, %v650_v18  ;;  %v2249_v23 = vpop.f32.mrf.mxu0  ;;  %v2305_v18 = vpop.f32.mrf.mxu1 }
 0x101   :  { %v653_v24 = vsel %vm627_vm0, %v2249_v23, 0.0  ;;  %4439 = vst [vmem:[#allocation4_spill] sm:$0xff] %v2305_v18 }
 0x102   :  { %v654_v25 = vadd.f32 %v653_v24, %v652_v22  ;;  %v2253_v26 = vpop.f32.mrf.mxu0 }
 0x103   :  { %v663_v47 = vsel %vm627_vm0, %v2253_v26, 0.0 }
 0x104   :  { %v656_v29 = vadd.f32 %v655_v28, %v654_v25  ;;  %v2259_v30 = vpop.f32.mrf.mxu0 }
 0x105   :  { %v659_v35 = vsel %vm627_vm0, %v2259_v30, 0.0 }
 0x106   :  { %v658_v32 = vadd.f32 %v657_v31, %v656_v29  ;;  %v2263_v33 = vpop.f32.mrf.mxu0  ;;  %v2315_v31 = vpop.f32.mrf.mxu1 }
 0x107   :  { %v665_v53 = vsel %vm627_vm0, %v2263_v33, 0.0  ;;  %4440 = vst [vmem:[#allocation5_spill] sm:$0xff] %v2315_v31 }
 0x108   :  { %v660_v36 = vadd.f32 %v659_v35, %v658_v32  ;;  %v2269_v37 = vpop.f32.mrf.mxu0 }
 0x109   :  { %v661_v38 = vsel %vm627_vm0, %v2269_v37, 0.0 }
 0x10a   :  { %v662_v39 = vadd.f32 %v661_v38, %v660_v36  ;;  %v2273_v45 = vpop.f32.mrf.mxu0 }
 0x10b   :  { %v671_v8 = vsel %vm627_vm0, %v2273_v45, 0.0 }
 0x10c   :  { %v664_v50 = vadd.f32 %v663_v47, %v662_v39  ;;  %v2279_v51 = vpop.f32.mrf.mxu0 }
 0x10d   :  { %v667_v60 = vsel %vm627_vm0, %v2279_v51, 0.0 }
 0x10e   :  { %v666_v54 = vadd.f32 %v665_v53, %v664_v50  ;;  %v2283_v57 = vpop.f32.mrf.mxu0  ;;  %v2325_v50 = vpop.f32.mrf.mxu1 }
 0x10f   :  { %v673_v14 = vsel %vm627_vm0, %v2283_v57, 0.0 }
 0x110   :  { %v668_v61 = vadd.f32 %v667_v60, %v666_v54  ;;  %v2289_v0 = vpop.f32.mrf.mxu0 }
 0x111   :  { %v669_v1 = vsel %vm627_vm0, %v2289_v0, 0.0 }
 0x112   :  { %v670_v3 = vadd.f32 %v669_v1, %v668_v61  ;;  %v2293_v4 = vpop.f32.mrf.mxu0 }
 0x113   :  { %v679_v32 = vsel %vm627_vm0, %v2293_v4, 0.0 }
 0x114   :  { %v672_v10 = vadd.f32 %v671_v8, %v670_v3  ;;  %v2299_v11 = vpop.f32.mrf.mxu0  ;;  %v2333_v3 = vpop.f32.mrf.mxu1 }
 0x115   :  { %v675_v21 = vsel %vm627_vm0, %v2299_v11, 0.0 }
 0x116   :  { %v674_v15 = vadd.f32 %v673_v14, %v672_v10  ;;  %v2303_v17 = vpop.f32.mrf.mxu0 }
 0x117   :  { %v681_v38 = vsel %vm627_vm0, %v2303_v17, 0.0 }
 0x118   :  { %v676_v22 = vadd.f32 %v675_v21, %v674_v15  ;;  %v2309_v24 = vpop.f32.mrf.mxu0  ;;  %v2339_v21 = vpop.f32.mrf.mxu1 }
 0x119   :  { %v677_v25 = vsel %vm627_vm0, %v2309_v24, 0.0  ;;  %4441 = vst [vmem:[#allocation6_spill] sm:$0xff] %v2339_v21 }
 0x11a   :  { %v678_v28 = vadd.f32 %v677_v25, %v676_v22  ;;  %v2313_v29 = vpop.f32.mrf.mxu0  ;;  %v691_v22 = vsel %vm627_vm0, %v2195_v49, 0.0 }
 0x11b   :  { %v687_v8 = vsel %vm627_vm0, %v2313_v29, 0.0 }
 0x11c   :  { %v680_v35 = vadd.f32 %v679_v32, %v678_v28  ;;  %v2319_v36 = vpop.f32.mrf.mxu0  ;;  %v693_v28 = vsel %vm627_vm0, %v2215_v63, 0.0 }
 0x11d   :  { %v683_v53 = vsel %vm627_vm0, %v2319_v36, 0.0 }
 0x11e   :  { %v682_v39 = vadd.f32 %v681_v38, %v680_v35  ;;  %v2323_v47 = vpop.f32.mrf.mxu0  ;;  %v2345_v35 = vpop.f32.mrf.mxu1  ;;  %v695_v38 = vsel %vm627_vm0, %v2185_v43, 0.0 }
 0x11f   :  { %v689_v14 = vsel %vm627_vm0, %v2323_v47, 0.0  ;;  %4442 = vst [vmem:[#allocation7_spill] sm:$0xff] %v2345_v35 }
 0x120   :  { %v684_v54 = vadd.f32 %v683_v53, %v682_v39  ;;  %v2329_v60 = vpop.f32.mrf.mxu0  ;;  %v697_v53 = vsel %vm627_vm0, %v2205_v56, 0.0 }
 0x121   :  { %v685_v61 = vsel %vm627_vm0, %v2329_v60, 0.0 }
 0x122   :  { %v686_v1 = vadd.f32 %v685_v61, %v684_v54  ;;  %v2351_v61 = vpop.f32.mrf.mxu1 }
 0x124   :  { %v688_v10 = vadd.f32 %v687_v8, %v686_v1  ;;  %v699_v1 = vsel %vm627_vm0, %v2235_v13, 0.0 }
 0x126   :  { %v690_v15 = vadd.f32 %v689_v14, %v688_v10  ;;  %v701_v10 = vsel %vm627_vm0, %v2255_v27, 0.0 }
 0x128   :  { %v692_v25 = vadd.f32 %v691_v22, %v690_v15  ;;  %v2357_v15 = vpop.f32.mrf.mxu1  ;;  %v703_v22 = vsel %vm627_vm0, %v2225_v6, 0.0 }
 0x12a   :  { %v694_v32 = vadd.f32 %v693_v28, %v692_v25  ;;  %v705_v28 = vsel %vm627_vm0, %v2245_v20, 0.0 }
 0x12c   :  { %v696_v39 = vadd.f32 %v695_v38, %v694_v32  ;;  %v2363_v38 = vpop.f32.mrf.mxu1 }
 0x12d   :  { %4443 = vst [vmem:[#allocation8_spill] sm:$0xff] %v2363_v38 }
 0x12e   :  { %v698_v54 = vadd.f32 %v697_v53, %v696_v39  ;;  %v707_v39 = vsel %vm627_vm0, %v2275_v46, 0.0  ;;  %v715_v46 = vsel %vm627_vm0, %v2315_v31, 0.0  ;;  %v723_v31 = vsel %vm627_vm0, %v2345_v35, 0.0 }
 0x130   :  { %v700_v8 = vadd.f32 %v699_v1, %v698_v54  ;;  %v709_v54 = vsel %vm627_vm0, %v2295_v7, 0.0 }
 0x132   :  { %v702_v14 = vadd.f32 %v701_v10, %v700_v8  ;;  %v2369_v8 = vpop.f32.mrf.mxu1  ;;  %v711_v10 = vsel %vm627_vm0, %v2265_v34, 0.0  ;;  %v719_v34 = vsel %vm627_vm0, %v2305_v18, 0.0  ;;  %v727_v18 = vsel %vm627_vm0, %v2339_v21, 0.0 }
 0x133   :  { %4444 = vst [vmem:[#allocation9_spill] sm:$0xff] %v2369_v8  ;;  %v731_v35 = vsel %vm627_vm0, %v2369_v8, 0.0  ;;  %v735_v21 = vsel %vm627_vm0, %v2363_v38, 0.0 }
 0x134   :  { %v704_v25 = vadd.f32 %v703_v22, %v702_v14  ;;  %v713_v22 = vsel %vm627_vm0, %v2285_v58, 0.0 }
 0x136   :  { %v706_v32 = vadd.f32 %v705_v28, %v704_v25  ;;  %v2375_v28 = vpop.f32.mrf.mxu1 }
 0x137   :  { %4445 = vst [vmem:[#allocation10_spill] sm:$0xff] %v2375_v28 }
 0x138   :  { %v708_v53 = vadd.f32 %v707_v39, %v706_v32  ;;  %v717_v39 = vsel %vm627_vm0, %v2333_v3, 0.0 }
 0x13a   :  { %v710_v1 = vadd.f32 %v709_v54, %v708_v53  ;;  %v2381_v54 = vpop.f32.mrf.mxu1 }
 0x13c   :  { %v712_v14 = vadd.f32 %v711_v10, %v710_v1  ;;  %v721_v10 = vsel %vm627_vm0, %v2325_v50, 0.0 }
 0x13e   :  { %v714_v25 = vadd.f32 %v713_v22, %v712_v14  ;;  %v2387_v22 = vpop.f32.mrf.mxu1 }
 0x13f   :  { %4446 = vst [vmem:[#allocation11_spill] sm:$0xff] %v2387_v22  ;;  %v743_v38 = vsel %vm627_vm0, %v2387_v22, 0.0 }
 0x140   :  { %v716_v32 = vadd.f32 %v715_v46, %v714_v25  ;;  %v725_v25 = vsel %vm627_vm0, %v2357_v15, 0.0 }
 0x142   :  { %v718_v53 = vadd.f32 %v717_v39, %v716_v32  ;;  %v2393_v39 = vpop.f32.mrf.mxu1 }
 0x143   :  { %4447 = vst [vmem:[#allocation12_spill] sm:$0xff] %v2393_v39  ;;  %v739_v8 = vsel %vm627_vm0, %v2393_v39, 0.0 }
 0x144   :  { %v720_v1 = vadd.f32 %v719_v34, %v718_v53  ;;  %v729_v53 = vsel %vm627_vm0, %v2351_v61, 0.0 }
 0x146   :  { %v722_v14 = vadd.f32 %v721_v10, %v720_v1  ;;  %v2399_v10 = vpop.f32.mrf.mxu1 }
 0x147   :  { %4448 = vst [vmem:[#allocation13_spill] sm:$0xff] %v2399_v10 }
 0x148   :  { %v724_v46 = vadd.f32 %v723_v31, %v722_v14  ;;  %v733_v14 = vsel %vm627_vm0, %v2381_v54, 0.0 }
 0x14a   :  { %v726_v32 = vadd.f32 %v725_v25, %v724_v46  ;;  %v2405_v25 = vpop.f32.mrf.mxu1 }
 0x14b   :  { %4449 = vst [vmem:[#allocation14_spill] sm:$0xff] %v2405_v25 }
 0x14c   :  { %v728_v34 = vadd.f32 %v727_v18, %v726_v32  ;;  %v737_v32 = vsel %vm627_vm0, %v2375_v28, 0.0 }
 0x14e   :  { %v730_v1 = vadd.f32 %v729_v53, %v728_v34  ;;  %v2411_v53 = vpop.f32.mrf.mxu1 }
 0x14f   :  { %v751_v22 = vsel %vm627_vm0, %v2411_v53, 0.0 }
 0x150   :  { %v732_v31 = vadd.f32 %v731_v35, %v730_v1  ;;  %v741_v1 = vsel %vm627_vm0, %v2405_v25, 0.0 }
 0x152   :  { %v734_v46 = vadd.f32 %v733_v14, %v732_v31  ;;  %v2417_v14 = vpop.f32.mrf.mxu1 }
 0x153   :  { %4450 = vst [vmem:[#allocation15_spill] sm:$0xff] %v2417_v14  ;;  %v747_v39 = vsel %vm627_vm0, %v2417_v14, 0.0 }
 0x154   :  { %v736_v18 = vadd.f32 %v735_v21, %v734_v46  ;;  %v745_v46 = vsel %vm627_vm0, %v2399_v10, 0.0 }
 0x156   :  { %v738_v34 = vadd.f32 %v737_v32, %v736_v18  ;;  %v2423_v32 = vpop.f32.mrf.mxu1 }
 0x158   :  { %v740_v35 = vadd.f32 %v739_v8, %v738_v34  ;;  %v2427_v34 = vpop.f32.mrf.mxu1 }
 0x159   :  { %4451 = vst [vmem:[#allocation16_spill] sm:$0xff] %v2427_v34 }
 0x15a   :  { %v742_v31 = vadd.f32 %v741_v1, %v740_v35  ;;  %v749_v35 = vsel %vm627_vm0, %v2427_v34, 0.0 }
 0x15c   :  { %v744_v21 = vadd.f32 %v743_v38, %v742_v31  ;;  %v753_v31 = vsel %vm627_vm0, %v2423_v32, 0.0 }
 0x15e   :  { %v746_v18 = vadd.f32 %v745_v46, %v744_v21 }
 0x160   :  { %v748_v8 = vadd.f32 %v747_v39, %v746_v18 }
 0x162   :  { %v750_v1 = vadd.f32 %v749_v35, %v748_v8 }
 0x164   :  { %v752_v38 = vadd.f32 %v751_v22, %v750_v1 }
 0x166   :  { %v754_v21 = vadd.f32 %v753_v31, %v752_v38 }
 0x168   :  { %v755_v46 = vrot.slane %v754_v21, 4 }
 0x16a   :  { %v756_v10 = vadd.f32 %v755_v46, %v754_v21 }
 0x16c   :  { %v757_v25 = vrot.slane %v756_v10, 2 }
 0x16e   :  { %v758_v28 = vadd.f32 %v757_v25, %v756_v10 }
 0x170   :  { %v759_v14 = vrot.slane %v758_v28, 1 }
 0x172   :  { %v760_v39 = vadd.f32 %v759_v14, %v758_v28 }
 0x174   :  { %v2435_v18 = vmul.f32 0.001953125, %v760_v39 }
 0x176   :  { %v2439_v34 = vsub.f32 %v2181_v41, %v2435_v18  ;;  %v2443_v8 = vsub.f32 %v2187_v44, %v2435_v18  ;;  %v2447_v22 = vsub.f32 %v2179_v40, %v2435_v18  ;;  %v2451_v35 = vsub.f32 %v2183_v42, %v2435_v18 }
 0x177   :  { %v2459_v41 = vsub.f32 %v2199_v52, %v2435_v18  ;;  %v2465_v40 = vsub.f32 %v2209_v59, %v2435_v18  ;;  %v2473_v38 = vsub.f32 %v2193_v48, %v2435_v18  ;;  %v2480_v59 = vsub.f32 %v2203_v55, %v2435_v18 }
 0x178   :  { %v827_v28 = vmul.f32 %v2439_v34, %v2439_v34  ;;  %v828_v10 = vmul.f32 %v2443_v8, %v2443_v8  ;;  %v829_v44 = vmul.f32 %v2447_v22, %v2447_v22  ;;  %v830_v42 = vmul.f32 %v2451_v35, %v2451_v35 }
 0x179   :  { %v831_v52 = vmul.f32 %v2459_v41, %v2459_v41  ;;  %v832_v46 = vmul.f32 %v2465_v40, %v2465_v40  ;;  %v2487_v48 = vsub.f32 %v2219_v2, %v2435_v18  ;;  %v2494_v55 = vsub.f32 %v2229_v9, %v2435_v18 }
 0x17a   :  { %v891_v25 = vsel %vm627_vm0, %v827_v28, 0.0  ;;  %v892_v14 = vsel %vm627_vm0, %v828_v10, 0.0  ;;  %v894_v31 = vsel %vm627_vm0, %v829_v44, 0.0  ;;  %v896_v39 = vsel %vm627_vm0, %v830_v42, 0.0 }
 0x17b   :  { %v893_v1 = vadd.f32 %v892_v14, %v891_v25  ;;  %v833_v10 = vmul.f32 %v2473_v38, %v2473_v38  ;;  %v898_v44 = vsel %vm627_vm0, %v831_v52, 0.0  ;;  %v834_v14 = vmul.f32 %v2480_v59, %v2480_v59 }
 0x17c   :  { %v900_v42 = vsel %vm627_vm0, %v832_v46, 0.0  ;;  %v2501_v2 = vsub.f32 %v2213_v62, %v2435_v18  ;;  %v2508_v9 = vsub.f32 %v2223_v5, %v2435_v18  ;;  %v2515_v62 = vsub.f32 %v2239_v16, %v2435_v18 }
 0x17d   :  { %v895_v21 = vadd.f32 %v894_v31, %v893_v1  ;;  %v835_v31 = vmul.f32 %v2487_v48, %v2487_v48  ;;  %v902_v52 = vsel %vm627_vm0, %v833_v10, 0.0  ;;  %v904_v46 = vsel %vm627_vm0, %v834_v14, 0.0 }
 0x17e   :  { %v2522_v5 = vsub.f32 %v2249_v23, %v2435_v18  ;;  %v2529_v16 = vsub.f32 %v2233_v12, %v2435_v18  ;;  %v2536_v23 = vsub.f32 %v2243_v19, %v2435_v18  ;;  %v2543_v12 = vsub.f32 %v2259_v30, %v2435_v18 }
 0x17f   :  { %v897_v28 = vadd.f32 %v896_v39, %v895_v21  ;;  %v836_v39 = vmul.f32 %v2494_v55, %v2494_v55  ;;  %v906_v10 = vsel %vm627_vm0, %v835_v31, 0.0  ;;  %v2550_v19 = vsub.f32 %v2269_v37, %v2435_v18 }
 0x180   :  { %v2557_v30 = vsub.f32 %v2253_v26, %v2435_v18  ;;  %v2564_v37 = vsub.f32 %v2263_v33, %v2435_v18  ;;  %v2571_v26 = vsub.f32 %v2279_v51, %v2435_v18  ;;  %v2578_v33 = vsub.f32 %v2289_v0, %v2435_v18 }
 0x181   :  { %v899_v25 = vadd.f32 %v898_v44, %v897_v28  ;;  %v837_v44 = vmul.f32 %v2501_v2, %v2501_v2  ;;  %v908_v14 = vsel %vm627_vm0, %v836_v39, 0.0  ;;  %v2585_v51 = vsub.f32 %v2273_v45, %v2435_v18 }
 0x182   :  { %v2592_v0 = vsub.f32 %v2283_v57, %v2435_v18  ;;  %v2599_v45 = vsub.f32 %v2299_v11, %v2435_v18  ;;  %v2606_v57 = vsub.f32 %v2309_v24, %v2435_v18  ;;  %v2613_v11 = vsub.f32 %v2293_v4, %v2435_v18 }
 0x183   :  { %v901_v1 = vadd.f32 %v900_v42, %v899_v25  ;;  %v838_v42 = vmul.f32 %v2508_v9, %v2508_v9  ;;  %v910_v31 = vsel %vm627_vm0, %v837_v44, 0.0  ;;  %v2620_v24 = vsub.f32 %v2303_v17, %v2435_v18 }
 0x184   :  { %v2627_v4 = vsub.f32 %v2319_v36, %v2435_v18  ;;  %v2634_v17 = vsub.f32 %v2329_v60, %v2435_v18  ;;  %v2641_v36 = vsub.f32 %v2313_v29, %v2435_v18  ;;  %v2648_v60 = vsub.f32 %v2323_v47, %v2435_v18 }
 0x185   :  { %v903_v21 = vadd.f32 %v902_v52, %v901_v1  ;;  %v839_v52 = vmul.f32 %v2515_v62, %v2515_v62  ;;  %v912_v39 = vsel %vm627_vm0, %v838_v42, 0.0  ;;  %v2655_v29 = vsub.f32 %v2195_v49, %v2435_v18 }
 0x186   :  { %v2662_v47 = vsub.f32 %v2215_v63, %v2435_v18  ;;  %v2669_v49 = vsub.f32 %v2185_v43, %v2435_v18  ;;  %v2676_v63 = vsub.f32 %v2205_v56, %v2435_v18  ;;  %v2683_v43 = vsub.f32 %v2235_v13, %v2435_v18 }
 0x187   :  { %v905_v28 = vadd.f32 %v904_v46, %v903_v21  ;;  %v840_v46 = vmul.f32 %v2522_v5, %v2522_v5  ;;  %v914_v44 = vsel %vm627_vm0, %v839_v52, 0.0  ;;  %v2690_v56 = vsub.f32 %v2255_v27, %v2435_v18 }
 0x188   :  { %v2697_v13 = vsub.f32 %v2225_v6, %v2435_v18  ;;  %v2704_v27 = vsub.f32 %v2245_v20, %v2435_v18  ;;  %v2718_v20 = vsub.f32 %v2295_v7, %v2435_v18  ;;  %v2732_v7 = vsub.f32 %v2285_v58, %v2435_v18 }
 0x189   :  { %v907_v25 = vadd.f32 %v906_v10, %v905_v28  ;;  %v841_v10 = vmul.f32 %v2529_v16, %v2529_v16  ;;  %v916_v42 = vsel %vm627_vm0, %v840_v46, 0.0  ;;  %v2746_v58 = vsub.f32 %v2333_v3, %v2435_v18 }
 0x18a   :  { %v2760_v3 = vsub.f32 %v2325_v50, %v2435_v18  ;;  %v2774_v50 = vsub.f32 %v2357_v15, %v2435_v18  ;;  %v2788_v15 = vsub.f32 %v2351_v61, %v2435_v18  ;;  %v2802_v61 = vsub.f32 %v2381_v54, %v2435_v18 }
 0x18b   :  { %v909_v1 = vadd.f32 %v908_v14, %v907_v25  ;;  %v842_v14 = vmul.f32 %v2536_v23, %v2536_v23  ;;  %v918_v52 = vsel %vm627_vm0, %v841_v10, 0.0  ;;  %4458 = vst [vmem:[#allocation17_spill] sm:$0xff] %v2746_v58 }
 0x18c   :  { %4461 = vst [vmem:[#allocation18_spill] sm:$0xff] %v2760_v3  ;;  %4464 = vst [vmem:[#allocation19_spill] sm:$0xff] %v2774_v50 }
 0x18d   :  { %v911_v21 = vadd.f32 %v910_v31, %v909_v1  ;;  %v843_v31 = vmul.f32 %v2543_v12, %v2543_v12  ;;  %v920_v46 = vsel %vm627_vm0, %v842_v14, 0.0  ;;  %4467 = vst [vmem:[#allocation20_spill] sm:$0xff] %v2788_v15  ;;  %4470 = vst [vmem:[#allocation21_spill] sm:$0xff] %v2802_v61 }
 0x18f   :  { %v913_v28 = vadd.f32 %v912_v39, %v911_v21  ;;  %v844_v39 = vmul.f32 %v2550_v19, %v2550_v19  ;;  %v922_v10 = vsel %vm627_vm0, %v843_v31, 0.0 }
 0x191   :  { %v915_v25 = vadd.f32 %v914_v44, %v913_v28  ;;  %v845_v44 = vmul.f32 %v2557_v30, %v2557_v30  ;;  %v924_v14 = vsel %vm627_vm0, %v844_v39, 0.0 }
 0x193   :  { %v917_v1 = vadd.f32 %v916_v42, %v915_v25  ;;  %v846_v42 = vmul.f32 %v2564_v37, %v2564_v37  ;;  %v926_v31 = vsel %vm627_vm0, %v845_v44, 0.0 }
 0x195   :  { %v919_v21 = vadd.f32 %v918_v52, %v917_v1  ;;  %v847_v52 = vmul.f32 %v2571_v26, %v2571_v26  ;;  %v928_v39 = vsel %vm627_vm0, %v846_v42, 0.0 }
 0x197   :  { %v921_v28 = vadd.f32 %v920_v46, %v919_v21  ;;  %v848_v46 = vmul.f32 %v2578_v33, %v2578_v33  ;;  %v930_v44 = vsel %vm627_vm0, %v847_v52, 0.0 }
 0x199   :  { %v923_v25 = vadd.f32 %v922_v10, %v921_v28  ;;  %v849_v10 = vmul.f32 %v2585_v51, %v2585_v51  ;;  %v932_v42 = vsel %vm627_vm0, %v848_v46, 0.0 }
 0x19b   :  { %v925_v1 = vadd.f32 %v924_v14, %v923_v25  ;;  %v850_v14 = vmul.f32 %v2592_v0, %v2592_v0  ;;  %v934_v52 = vsel %vm627_vm0, %v849_v10, 0.0 }
 0x19d   :  { %v927_v21 = vadd.f32 %v926_v31, %v925_v1  ;;  %v851_v31 = vmul.f32 %v2599_v45, %v2599_v45  ;;  %v936_v46 = vsel %vm627_vm0, %v850_v14, 0.0 }
 0x19f   :  { %v929_v28 = vadd.f32 %v928_v39, %v927_v21  ;;  %v852_v39 = vmul.f32 %v2606_v57, %v2606_v57  ;;  %v938_v10 = vsel %vm627_vm0, %v851_v31, 0.0 }
 0x1a1   :  { %v931_v25 = vadd.f32 %v930_v44, %v929_v28  ;;  %v853_v44 = vmul.f32 %v2613_v11, %v2613_v11  ;;  %v940_v14 = vsel %vm627_vm0, %v852_v39, 0.0 }
 0x1a3   :  { %v933_v1 = vadd.f32 %v932_v42, %v931_v25  ;;  %v854_v42 = vmul.f32 %v2620_v24, %v2620_v24  ;;  %v942_v31 = vsel %vm627_vm0, %v853_v44, 0.0 }
 0x1a5   :  { %v935_v21 = vadd.f32 %v934_v52, %v933_v1  ;;  %v855_v52 = vmul.f32 %v2627_v4, %v2627_v4  ;;  %v944_v39 = vsel %vm627_vm0, %v854_v42, 0.0 }
 0x1a7   :  { %v937_v28 = vadd.f32 %v936_v46, %v935_v21  ;;  %v856_v46 = vmul.f32 %v2634_v17, %v2634_v17  ;;  %v946_v44 = vsel %vm627_vm0, %v855_v52, 0.0 }
 0x1a9   :  { %v939_v25 = vadd.f32 %v938_v10, %v937_v28  ;;  %v857_v10 = vmul.f32 %v2641_v36, %v2641_v36  ;;  %v948_v42 = vsel %vm627_vm0, %v856_v46, 0.0 }
 0x1ab   :  { %v941_v1 = vadd.f32 %v940_v14, %v939_v25  ;;  %v858_v14 = vmul.f32 %v2648_v60, %v2648_v60  ;;  %v950_v52 = vsel %vm627_vm0, %v857_v10, 0.0 }
 0x1ad   :  { %v943_v21 = vadd.f32 %v942_v31, %v941_v1  ;;  %v859_v31 = vmul.f32 %v2655_v29, %v2655_v29  ;;  %v952_v46 = vsel %vm627_vm0, %v858_v14, 0.0 }
 0x1af   :  { %v945_v28 = vadd.f32 %v944_v39, %v943_v21  ;;  %v860_v39 = vmul.f32 %v2662_v47, %v2662_v47  ;;  %v954_v10 = vsel %vm627_vm0, %v859_v31, 0.0 }
 0x1b1   :  { %v947_v25 = vadd.f32 %v946_v44, %v945_v28  ;;  %v861_v44 = vmul.f32 %v2669_v49, %v2669_v49  ;;  %v956_v14 = vsel %vm627_vm0, %v860_v39, 0.0 }
 0x1b3   :  { %v949_v1 = vadd.f32 %v948_v42, %v947_v25  ;;  %v862_v42 = vmul.f32 %v2676_v63, %v2676_v63  ;;  %v958_v31 = vsel %vm627_vm0, %v861_v44, 0.0 }
 0x1b5   :  { %v951_v21 = vadd.f32 %v950_v52, %v949_v1  ;;  %v863_v52 = vmul.f32 %v2683_v43, %v2683_v43  ;;  %v960_v39 = vsel %vm627_vm0, %v862_v42, 0.0 }
 0x1b7   :  { %v953_v28 = vadd.f32 %v952_v46, %v951_v21  ;;  %v864_v46 = vmul.f32 %v2690_v56, %v2690_v56  ;;  %v962_v44 = vsel %vm627_vm0, %v863_v52, 0.0 }
 0x1b9   :  { %v955_v25 = vadd.f32 %v954_v10, %v953_v28  ;;  %v4452_v10 = vld [vmem:[#allocation3_spill] sm:$0xff]  ;;  %v964_v42 = vsel %vm627_vm0, %v864_v46, 0.0 }
 0x1ba   :  { %v2711_v6 = vsub.f32 %v4452_v10, %v2435_v18 }
 0x1bb   :  { %v957_v1 = vadd.f32 %v956_v14, %v955_v25  ;;  %v865_v25 = vmul.f32 %v2697_v13, %v2697_v13 }
 0x1bc   :  { %4453 = vst [vmem:[#allocation3_spill] sm:$0xff] %v2711_v6  ;;  %v867_v10 = vmul.f32 %v2711_v6, %v2711_v6 }
 0x1bd   :  { %v959_v21 = vadd.f32 %v958_v31, %v957_v1  ;;  %v866_v1 = vmul.f32 %v2704_v27, %v2704_v27  ;;  %v966_v52 = vsel %vm627_vm0, %v865_v25, 0.0 }
 0x1be   :  { %v970_v25 = vsel %vm627_vm0, %v867_v10, 0.0 }
 0x1bf   :  { %v961_v28 = vadd.f32 %v960_v39, %v959_v21  ;;  %v4454_v21 = vld [vmem:[#allocation2_spill] sm:$0xff]  ;;  %v968_v46 = vsel %vm627_vm0, %v866_v1, 0.0 }
 0x1c0   :  { %v2725_v39 = vsub.f32 %v4454_v21, %v2435_v18 }
 0x1c1   :  { %v963_v14 = vadd.f32 %v962_v44, %v961_v28  ;;  %v868_v44 = vmul.f32 %v2718_v20, %v2718_v20 }
 0x1c2   :  { %4455 = vst [vmem:[#allocation2_spill] sm:$0xff] %v2725_v39  ;;  %v869_v6 = vmul.f32 %v2725_v39, %v2725_v39 }
 0x1c3   :  { %v965_v31 = vadd.f32 %v964_v42, %v963_v14  ;;  %v4456_v42 = vld [vmem:[#allocation5_spill] sm:$0xff]  ;;  %v972_v1 = vsel %vm627_vm0, %v868_v44, 0.0 }
 0x1c4   :  { %v2739_v21 = vsub.f32 %v4456_v42, %v2435_v18  ;;  %v974_v10 = vsel %vm627_vm0, %v869_v6, 0.0 }
 0x1c5   :  { %v967_v28 = vadd.f32 %v966_v52, %v965_v31  ;;  %v870_v52 = vmul.f32 %v2732_v7, %v2732_v7 }
 0x1c6   :  { %4457 = vst [vmem:[#allocation5_spill] sm:$0xff] %v2739_v21  ;;  %v871_v39 = vmul.f32 %v2739_v21, %v2739_v21 }
 0x1c7   :  { %v969_v14 = vadd.f32 %v968_v46, %v967_v28  ;;  %v4459_v46 = vld [vmem:[#allocation4_spill] sm:$0xff]  ;;  %v976_v44 = vsel %vm627_vm0, %v870_v52, 0.0 }
 0x1c8   :  { %v2753_v42 = vsub.f32 %v4459_v46, %v2435_v18  ;;  %v978_v6 = vsel %vm627_vm0, %v871_v39, 0.0 }
 0x1c9   :  { %v971_v31 = vadd.f32 %v970_v25, %v969_v14  ;;  %v872_v25 = vmul.f32 %v2746_v58, %v2746_v58 }
 0x1ca   :  { %4460 = vst [vmem:[#allocation4_spill] sm:$0xff] %v2753_v42  ;;  %v873_v21 = vmul.f32 %v2753_v42, %v2753_v42 }
 0x1cb   :  { %v973_v28 = vadd.f32 %v972_v1, %v971_v31  ;;  %v4462_v1 = vld [vmem:[#allocation7_spill] sm:$0xff]  ;;  %v980_v52 = vsel %vm627_vm0, %v872_v25, 0.0 }
 0x1cc   :  { %v2767_v46 = vsub.f32 %v4462_v1, %v2435_v18  ;;  %v982_v39 = vsel %vm627_vm0, %v873_v21, 0.0 }
 0x1cd   :  { %v975_v14 = vadd.f32 %v974_v10, %v973_v28  ;;  %v874_v10 = vmul.f32 %v2760_v3, %v2760_v3 }
 0x1ce   :  { %4463 = vst [vmem:[#allocation7_spill] sm:$0xff] %v2767_v46  ;;  %v875_v42 = vmul.f32 %v2767_v46, %v2767_v46 }
 0x1cf   :  { %v977_v31 = vadd.f32 %v976_v44, %v975_v14  ;;  %v4465_v44 = vld [vmem:[#allocation6_spill] sm:$0xff]  ;;  %v984_v25 = vsel %vm627_vm0, %v874_v10, 0.0 }
 0x1d0   :  { %v2781_v1 = vsub.f32 %v4465_v44, %v2435_v18  ;;  %v986_v21 = vsel %vm627_vm0, %v875_v42, 0.0 }
 0x1d1   :  { %v979_v28 = vadd.f32 %v978_v6, %v977_v31  ;;  %v876_v6 = vmul.f32 %v2774_v50, %v2774_v50 }
 0x1d2   :  { %4466 = vst [vmem:[#allocation6_spill] sm:$0xff] %v2781_v1  ;;  %v877_v46 = vmul.f32 %v2781_v1, %v2781_v1 }
 0x1d3   :  { %v981_v14 = vadd.f32 %v980_v52, %v979_v28  ;;  %v4468_v52 = vld [vmem:[#allocation9_spill] sm:$0xff]  ;;  %v988_v10 = vsel %vm627_vm0, %v876_v6, 0.0 }
 0x1d4   :  { %v2795_v44 = vsub.f32 %v4468_v52, %v2435_v18  ;;  %v990_v42 = vsel %vm627_vm0, %v877_v46, 0.0 }
 0x1d5   :  { %v983_v31 = vadd.f32 %v982_v39, %v981_v14  ;;  %v878_v39 = vmul.f32 %v2788_v15, %v2788_v15  ;;  %v880_v15 = vmul.f32 %v2802_v61, %v2802_v61 }
 0x1d6   :  { %4469 = vst [vmem:[#allocation9_spill] sm:$0xff] %v2795_v44  ;;  %v879_v1 = vmul.f32 %v2795_v44, %v2795_v44 }
 0x1d7   :  { %v985_v28 = vadd.f32 %v984_v25, %v983_v31  ;;  %v4471_v25 = vld [vmem:[#allocation8_spill] sm:$0xff]  ;;  %v992_v6 = vsel %vm627_vm0, %v878_v39, 0.0  ;;  %v996_v39 = vsel %vm627_vm0, %v880_v15, 0.0 }
 0x1d8   :  { %v2809_v52 = vsub.f32 %v4471_v25, %v2435_v18  ;;  %v994_v46 = vsel %vm627_vm0, %v879_v1, 0.0 }
 0x1d9   :  { %v987_v14 = vadd.f32 %v986_v21, %v985_v28  ;;  %v4473_v21 = vld [vmem:[#allocation10_spill] sm:$0xff] }
 0x1da   :  { %4472 = vst [vmem:[#allocation8_spill] sm:$0xff] %v2809_v52  ;;  %v2816_v54 = vsub.f32 %v4473_v21, %v2435_v18  ;;  %v881_v44 = vmul.f32 %v2809_v52, %v2809_v52 }
 0x1db   :  { %v989_v31 = vadd.f32 %v988_v10, %v987_v14  ;;  %v4475_v10 = vld [vmem:[#allocation12_spill] sm:$0xff] }
 0x1dc   :  { %4474 = vst [vmem:[#allocation10_spill] sm:$0xff] %v2816_v54  ;;  %v2823_v25 = vsub.f32 %v4475_v10, %v2435_v18  ;;  %v882_v61 = vmul.f32 %v2816_v54, %v2816_v54  ;;  %v998_v52 = vsel %vm627_vm0, %v881_v44, 0.0  ;;  %v4484_v44 = vld [vmem:[#allocation16_spill] sm:$0xff] }
 0x1dd   :  { %v991_v28 = vadd.f32 %v990_v42, %v989_v31  ;;  %v4477_v42 = vld [vmem:[#allocation14_spill] sm:$0xff] }
 0x1de   :  { %4476 = vst [vmem:[#allocation12_spill] sm:$0xff] %v2823_v25  ;;  %v2830_v21 = vsub.f32 %v4477_v42, %v2435_v18  ;;  %v883_v50 = vmul.f32 %v2823_v25, %v2823_v25  ;;  %v1000_v54 = vsel %vm627_vm0, %v882_v61, 0.0  ;;  %v2861_v61 = vsub.f32 %v2411_v53, %v2435_v18 }
 0x1df   :  { %v993_v14 = vadd.f32 %v992_v6, %v991_v28  ;;  %v4479_v6 = vld [vmem:[#allocation11_spill] sm:$0xff] }
 0x1e0   :  { %4478 = vst [vmem:[#allocation14_spill] sm:$0xff] %v2830_v21  ;;  %v821_v10 = vsub.f32 %v4479_v6, %v2435_v18  ;;  %v884_v42 = vmul.f32 %v2830_v21, %v2830_v21  ;;  %v1002_v25 = vsel %vm627_vm0, %v883_v50, 0.0  ;;  %4486 = vst [vmem:[#allocation16_spill] sm:$0xff] %v2861_v61  ;;  %v889_v53 = vmul.f32 %v2861_v61, %v2861_v61 }
 0x1e1   :  { %v995_v31 = vadd.f32 %v994_v46, %v993_v14  ;;  %v4480_v14 = vld [vmem:[#allocation13_spill] sm:$0xff] }
 0x1e2   :  { %v2842_v46 = vsub.f32 %v4480_v14, %v2435_v18  ;;  %v885_v6 = vmul.f32 %v821_v10, %v821_v10  ;;  %v1004_v14 = vsel %vm627_vm0, %v884_v42, 0.0 }
 0x1e3   :  { %v997_v28 = vadd.f32 %v996_v39, %v995_v31  ;;  %v4482_v31 = vld [vmem:[#allocation15_spill] sm:$0xff] }
 0x1e4   :  { %4481 = vst [vmem:[#allocation11_spill] sm:$0xff] %v2842_v46  ;;  %v2849_v39 = vsub.f32 %v4482_v31, %v2435_v18  ;;  %v1006_v50 = vsel %vm627_vm0, %v885_v6, 0.0 }
 0x1e5   :  { %v999_v1 = vadd.f32 %v998_v52, %v997_v28  ;;  %v2854_v52 = vsub.f32 %v4484_v44, %v2435_v18  ;;  %v886_v28 = vmul.f32 %v2842_v46, %v2842_v46 }
 0x1e6   :  { %4483 = vst [vmem:[#allocation13_spill] sm:$0xff] %v2849_v39 }
 0x1e7   :  { %v1001_v15 = vadd.f32 %v1000_v54, %v999_v1  ;;  %4485 = vst [vmem:[#allocation15_spill] sm:$0xff] %v2854_v52  ;;  %v887_v54 = vmul.f32 %v2849_v39, %v2849_v39  ;;  %v2868_v1 = vsub.f32 %v2423_v32, %v2435_v18  ;;  %v1008_v42 = vsel %vm627_vm0, %v886_v28, 0.0 }
 0x1e8   :  { %v1014_v32 = vsel %vm627_vm0, %v889_v53, 0.0 }
 0x1e9   :  { %v1003_v3 = vadd.f32 %v1002_v25, %v1001_v15  ;;  %4487 = vst [vmem:[#allocation22_spill] sm:$0xff] %v2868_v1  ;;  %v888_v15 = vmul.f32 %v2854_v52, %v2854_v52  ;;  %v1010_v31 = vsel %vm627_vm0, %v887_v54, 0.0  ;;  %v890_v6 = vmul.f32 %v2868_v1, %v2868_v1 }
 0x1eb   :  { %v1005_v21 = vadd.f32 %v1004_v14, %v1003_v3 }
 0x1ed   :  { %v1007_v25 = vadd.f32 %v1006_v50, %v1005_v21  ;;  %v1012_v21 = vsel %vm627_vm0, %v888_v15, 0.0  ;;  %v1016_v50 = vsel %vm627_vm0, %v890_v6, 0.0  ;;  %v1025_v15 = vld [vmem:[%s4365_s2] sm:$0x1] }
 0x1ef   :  { %v1009_v3 = vadd.f32 %v1008_v42, %v1007_v25 }
 0x1f1   :  { %v1011_v44 = vadd.f32 %v1010_v31, %v1009_v3  ;;  %v1030_v31 = vlaneseq }
 0x1f3   :  { %v1013_v14 = vadd.f32 %v1012_v21, %v1011_v44  ;;  %v1031_v1 = vshrl.u32 %v1030_v31, 7  ;;  %v4490_v21 = vld [vmem:[#allocation2_spill] sm:$0xff] }
 0x1f4   :  { %v4497_v31 = vld [vmem:[#allocation6_spill] sm:$0xff] }
 0x1f5   :  { %v1015_v18 = vadd.f32 %v1014_v32, %v1013_v14  ;;  %v1032_v44 = vsub.s32 0, %v1031_v1  ;;  %v4491_v14 = vld [vmem:[#allocation5_spill] sm:$0xff] }
 0x1f6   :  { %v4492_v32 = vld [vmem:[#allocation17_spill] sm:$0xff] }
 0x1f7   :  { %v1017_v52 = vadd.f32 %v1016_v50, %v1015_v18  ;;  %v4493_v50 = vld [vmem:[#allocation4_spill] sm:$0xff] }
 0x1f9   :  { %v1018_v28 = vrot.slane %v1017_v52, 4 }
 0x1fb   :  { %v1019_v25 = vadd.f32 %v1018_v28, %v1017_v52  ;;  %v4494_v28 = vld [vmem:[#allocation18_spill] sm:$0xff] }
 0x1fd   :  { %v1020_v42 = vrot.slane %v1019_v25, 2 }
 0x1ff   :  { %v1021_v39 = vadd.f32 %v1020_v42, %v1019_v25  ;;  %v4495_v42 = vld [vmem:[#allocation7_spill] sm:$0xff] }
 0x201   :  { %v1022_v61 = vrot.slane %v1021_v39, 1 }
 0x203   :  { %v1023_v46 = vadd.f32 %v1022_v61, %v1021_v39 }
 0x205   :  { %v1024_v54 = vmul.f32 0.001953125, %v1023_v46 }
 0x207   :  { %v1026_v3 = vadd.f32 1e-05, %v1024_v54  ;;  %v4496_v54 = vld [vmem:[#allocation19_spill] sm:$0xff] }
 0x209   :  { %2032 = vrsqrt.f32 %v1026_v3 }
 0x216   :  { %v2033_v58 = vpop.eup %2032 }
 0x217   :  { %v1028_v53 = vmul.f32 %v2033_v58, %v1025_v15 }
 0x219   :  { %v2884_v6 = vrot.slane %v1028_v53, %v1032_v44  ;;  %v4498_v53 = vld [vmem:[#allocation20_spill] sm:$0xff] }
 0x21b   :  { %v2888_v52 = vmul.f32 %v2884_v6, %v2439_v34  ;;  %v2892_v46 = vmul.f32 %v2884_v6, %v2443_v8  ;;  %v2895_v39 = vmul.f32 %v2884_v6, %v821_v10  ;;  %v2899_v61 = vmul.f32 %v2884_v6, %v2447_v22  ;;  %v4489_v10 = vld [vmem:[#allocation3_spill] sm:$0xff] }
 0x21c   :  { %v2903_v58 = vmul.f32 %v2884_v6, %v2451_v35  ;;  %v2907_v1 = vmul.f32 %v2884_v6, %v2459_v41  ;;  %v2911_v34 = vmul.f32 %v2884_v6, %v2465_v40  ;;  %v2915_v8 = vmul.f32 %v2884_v6, %v2473_v38 }
 0x21d   :  { %4488 = vst [vmem:[#allocation23_spill] sm:$0xff] %v2895_v39  ;;  %v2919_v22 = vmul.f32 %v2884_v6, %v2480_v59  ;;  %v2923_v35 = vmul.f32 %v2884_v6, %v2487_v48  ;;  %v2927_v41 = vmul.f32 %v2884_v6, %v2494_v55  ;;  %v2931_v40 = vmul.f32 %v2884_v6, %v2501_v2  ;;  %v4510_v39 = vld [vmem:[#allocation14_spill] sm:$0xff] }
 0x21e   :  { %v2935_v38 = vmul.f32 %v2884_v6, %v2508_v9  ;;  %v2939_v59 = vmul.f32 %v2884_v6, %v2515_v62  ;;  %v2943_v48 = vmul.f32 %v2884_v6, %v2522_v5  ;;  %v2947_v55 = vmul.f32 %v2884_v6, %v2529_v16 }
 0x21f   :  { %v2951_v2 = vmul.f32 %v2884_v6, %v2536_v23  ;;  %v2955_v9 = vmul.f32 %v2884_v6, %v2543_v12  ;;  %v2959_v62 = vmul.f32 %v2884_v6, %v2550_v19  ;;  %v2963_v5 = vmul.f32 %v2884_v6, %v2557_v30 }
 0x220   :  { %v2967_v16 = vmul.f32 %v2884_v6, %v2564_v37  ;;  %v2971_v23 = vmul.f32 %v2884_v6, %v2571_v26  ;;  %v2975_v12 = vmul.f32 %v2884_v6, %v2578_v33  ;;  %v2979_v19 = vmul.f32 %v2884_v6, %v2585_v51 }
 0x221   :  { %v2983_v30 = vmul.f32 %v2884_v6, %v2592_v0  ;;  %v2987_v37 = vmul.f32 %v2884_v6, %v2599_v45  ;;  %v2991_v26 = vmul.f32 %v2884_v6, %v2606_v57  ;;  %v2995_v33 = vmul.f32 %v2884_v6, %v2613_v11 }
 0x222   :  { %v2999_v51 = vmul.f32 %v2884_v6, %v2620_v24  ;;  %v3003_v0 = vmul.f32 %v2884_v6, %v2627_v4  ;;  %v3007_v45 = vmul.f32 %v2884_v6, %v2634_v17  ;;  %v3011_v57 = vmul.f32 %v2884_v6, %v2641_v36 }
 0x223   :  { %v3015_v11 = vmul.f32 %v2884_v6, %v2648_v60  ;;  %v3019_v24 = vmul.f32 %v2884_v6, %v2655_v29  ;;  %v3023_v4 = vmul.f32 %v2884_v6, %v2662_v47  ;;  %v3027_v17 = vmul.f32 %v2884_v6, %v2669_v49 }
 0x224   :  { %v3031_v36 = vmul.f32 %v2884_v6, %v2676_v63  ;;  %v3035_v60 = vmul.f32 %v2884_v6, %v2683_v43  ;;  %v3039_v29 = vmul.f32 %v2884_v6, %v2690_v56  ;;  %v3043_v47 = vmul.f32 %v2884_v6, %v2697_v13 }
 0x225   :  { %v3047_v49 = vmul.f32 %v2884_v6, %v2704_v27  ;;  %v3051_v63 = vmul.f32 %v2884_v6, %v4489_v10  ;;  %v3055_v43 = vmul.f32 %v2884_v6, %v2718_v20  ;;  %v3059_v56 = vmul.f32 %v2884_v6, %v4490_v21  ;;  %v4500_v10 = vld [vmem:[#allocation9_spill] sm:$0xff] }
 0x226   :  { %v3063_v13 = vmul.f32 %v2884_v6, %v2732_v7  ;;  %v3067_v27 = vmul.f32 %v2884_v6, %v4491_v14  ;;  %v3071_v18 = vmul.f32 %v2884_v6, %v4492_v32  ;;  %v3075_v20 = vmul.f32 %v2884_v6, %v4493_v50  ;;  %v4502_v14 = vld [vmem:[#allocation21_spill] sm:$0xff]  ;;  %v3108_v50 = vld [vmem:[%s4366_s3] ss:$0 sm:$0xff] }
 0x227   :  { %v3079_v25 = vmul.f32 %v2884_v6, %v4494_v28  ;;  %v3083_v7 = vmul.f32 %v2884_v6, %v4495_v42  ;;  %v3087_v3 = vmul.f32 %v2884_v6, %v4496_v54  ;;  %v3091_v15 = vmul.f32 %v2884_v6, %v4497_v31  ;;  %v4504_v28 = vld [vmem:[#allocation8_spill] sm:$0xff]  ;;  %v4506_v54 = vld [vmem:[#allocation10_spill] sm:$0xff] }
 0x228   :  { %v3095_v44 = vmul.f32 %v2884_v6, %v4498_v53  ;;  %v3099_v21 = vmul.f32 %v2884_v6, %v4500_v10  ;;  %v3103_v32 = vmul.f32 %v2884_v6, %v4502_v14  ;;  %v3112_v42 = vmul.f32 %v2884_v6, %v4504_v28  ;;  %v4508_v53 = vld [vmem:[#allocation12_spill] sm:$0xff] }
 0x229   :  { %v3116_v31 = vmul.f32 %v2884_v6, %v4506_v54  ;;  %v3120_v10 = vmul.f32 %v2884_v6, %v4508_v53  ;;  %v3124_v14 = vmul.f32 %v2884_v6, %v4510_v39 }
 0x22a   :  { %4499 = vst [vmem:[#allocation3_spill] sm:$0xff] %v3095_v44  ;;  %4501 = vst [vmem:[#allocation2_spill] sm:$0xff] %v3099_v21  ;;  %v4512_v44 = vld [vmem:[#allocation13_spill] sm:$0xff] }
 0x22b   :  { %4503 = vst [vmem:[#allocation5_spill] sm:$0xff] %v3103_v32  ;;  %4505 = vst [vmem:[#allocation17_spill] sm:$0xff] %v3112_v42  ;;  %v4511_v32 = vld [vmem:[#allocation11_spill] sm:$0xff]  ;;  %v3132_v28 = vmul.f32 %v2884_v6, %v4512_v44  ;;  %v3152_v44 = vadd.f32 %v3108_v50, %v2892_v46  ;;  %v3172_v46 = vadd.f32 %v3108_v50, %v2915_v8 }
 0x22c   :  { %4507 = vst [vmem:[#allocation4_spill] sm:$0xff] %v3116_v31  ;;  %4509 = vst [vmem:[#allocation18_spill] sm:$0xff] %v3120_v10  ;;  %v3128_v21 = vmul.f32 %v2884_v6, %v4511_v32  ;;  %v4513_v42 = vld [vmem:[#allocation15_spill] sm:$0xff]  ;;  %v4514_v31 = vld [vmem:[#allocation16_spill] sm:$0xff]  ;;  %v3148_v32 = vadd.f32 %v3108_v50, %v2888_v52  ;;  %v3168_v52 = vadd.f32 %v3108_v50, %v2911_v34 }
 0x22d   :  { %v3136_v54 = vmul.f32 %v2884_v6, %v4513_v42  ;;  %v3140_v53 = vmul.f32 %v2884_v6, %v4514_v31  ;;  %v4515_v10 = vld [vmem:[#allocation22_spill] sm:$0xff]  ;;  %v3156_v42 = vadd.f32 %v3108_v50, %v2899_v61  ;;  %v3160_v31 = vadd.f32 %v3108_v50, %v2903_v58 }
 0x22e   :  { %v3144_v39 = vmul.f32 %v2884_v6, %v4515_v10  ;;  %v3164_v6 = vadd.f32 %v3108_v50, %v2907_v1  ;;  %v3176_v61 = vadd.f32 %v3108_v50, %v2919_v22  ;;  %v3180_v58 = vadd.f32 %v3108_v50, %v2923_v35 }
 0x22f   :  { %v3184_v1 = vadd.f32 %v3108_v50, %v2927_v41  ;;  %v3188_v34 = vadd.f32 %v3108_v50, %v2931_v40  ;;  %v3192_v8 = vadd.f32 %v3108_v50, %v2935_v38  ;;  %v3196_v22 = vadd.f32 %v3108_v50, %v2939_v59 }
 0x230   :  { %v3200_v35 = vadd.f32 %v3108_v50, %v2943_v48  ;;  %v3204_v41 = vadd.f32 %v3108_v50, %v2947_v55  ;;  %v3208_v40 = vadd.f32 %v3108_v50, %v2951_v2  ;;  %v3212_v38 = vadd.f32 %v3108_v50, %v2955_v9 }
 0x231   :  { %v3216_v59 = vadd.f32 %v3108_v50, %v2959_v62  ;;  %v3220_v48 = vadd.f32 %v3108_v50, %v2963_v5  ;;  %v3224_v55 = vadd.f32 %v3108_v50, %v2967_v16  ;;  %v3228_v2 = vadd.f32 %v3108_v50, %v2971_v23  ;;  %v4522_v10 = vld [vmem:[#allocation3_spill] sm:$0xff] }
 0x232   :  { %v3232_v9 = vadd.f32 %v3108_v50, %v2975_v12  ;;  %v3236_v62 = vadd.f32 %v3108_v50, %v2979_v19  ;;  %v3240_v5 = vadd.f32 %v3108_v50, %v2983_v30  ;;  %v3244_v16 = vadd.f32 %v3108_v50, %v2987_v37 }
 0x233   :  { %v3248_v23 = vadd.f32 %v3108_v50, %v2991_v26  ;;  %v3252_v12 = vadd.f32 %v3108_v50, %v2995_v33  ;;  %v3256_v19 = vadd.f32 %v3108_v50, %v2999_v51  ;;  %v3260_v30 = vadd.f32 %v3108_v50, %v3003_v0 }
 0x234   :  { %v3264_v37 = vadd.f32 %v3108_v50, %v3007_v45  ;;  %v3268_v26 = vadd.f32 %v3108_v50, %v3011_v57  ;;  %v3272_v33 = vadd.f32 %v3108_v50, %v3015_v11  ;;  %v3276_v51 = vadd.f32 %v3108_v50, %v3019_v24 }
 0x235   :  { %v3280_v0 = vadd.f32 %v3108_v50, %v3023_v4  ;;  %v3284_v45 = vadd.f32 %v3108_v50, %v3027_v17  ;;  %v3288_v57 = vadd.f32 %v3108_v50, %v3031_v36  ;;  %v3292_v11 = vadd.f32 %v3108_v50, %v3035_v60 }
 0x236   :  { %v3296_v24 = vadd.f32 %v3108_v50, %v3039_v29  ;;  %v3300_v4 = vadd.f32 %v3108_v50, %v3043_v47  ;;  %v3304_v17 = vadd.f32 %v3108_v50, %v3047_v49  ;;  %v3308_v36 = vadd.f32 %v3108_v50, %v3051_v63 }
 0x237   :  { %v3312_v60 = vadd.f32 %v3108_v50, %v3055_v43  ;;  %v3316_v29 = vadd.f32 %v3108_v50, %v3059_v56  ;;  %v3320_v47 = vadd.f32 %v3108_v50, %v3063_v13  ;;  %v3324_v49 = vadd.f32 %v3108_v50, %v3067_v27 }
 0x238   :  { %v3328_v63 = vadd.f32 %v3108_v50, %v3071_v18  ;;  %v3332_v43 = vadd.f32 %v3108_v50, %v3075_v20  ;;  %v3336_v56 = vadd.f32 %v3108_v50, %v3079_v25  ;;  %v3340_v13 = vadd.f32 %v3108_v50, %v3083_v7 }
 0x239   :  { %4516 = vst [vmem:[#allocation7_spill] sm:$0xff] %v3312_v60  ;;  %v3344_v27 = vadd.f32 %v3108_v50, %v3087_v3  ;;  %v3348_v18 = vadd.f32 %v3108_v50, %v3091_v15  ;;  %v3352_v20 = vadd.f32 %v3108_v50, %v4522_v10  ;;  %vm1170_vm1 = vcmp.gt.f32.partialorder %v3148_v32, 0.0 }
 0x23a   :  { %4517 = vst [vmem:[#allocation19_spill] sm:$0xff] %v3332_v43  ;;  %4518 = vst [vmem:[#allocation6_spill] sm:$0xff] %v3336_v56  ;;  %v4524_v43 = vld [vmem:[#allocation2_spill] sm:$0xff]  ;;  %v4526_v56 = vld [vmem:[#allocation5_spill] sm:$0xff]  ;;  %vm1171_vm2 = vcmp.gt.f32.partialorder %v3152_v44, 0.0  ;;  %vm1172_vm3 = vcmp.gt.f32.partialorder %v3156_v42, 0.0 }
 0x23b   :  { %4519 = vst [vmem:[#allocation20_spill] sm:$0xff] %v3340_v13  ;;  %4520 = vst [vmem:[#allocation9_spill] sm:$0xff] %v3344_v27  ;;  %v3356_v25 = vadd.f32 %v3108_v50, %v4524_v43  ;;  %v3360_v7 = vadd.f32 %v3108_v50, %v4526_v56  ;;  %v4528_v13 = vld [vmem:[#allocation17_spill] sm:$0xff]  ;;  %v4530_v27 = vld [vmem:[#allocation4_spill] sm:$0xff]  ;;  %v3376_v43 = vadd.f32 %v3108_v50, %v3124_v14  ;;  %vm1173_vm4 = vcmp.gt.f32.partialorder %v3160_v31, 0.0 }
 0x23c   :  { %4521 = vst [vmem:[#allocation21_spill] sm:$0xff] %v3348_v18  ;;  %4523 = vst [vmem:[#allocation8_spill] sm:$0xff] %v3352_v20  ;;  %v3364_v3 = vadd.f32 %v3108_v50, %v4528_v13  ;;  %v3368_v15 = vadd.f32 %v3108_v50, %v4530_v27  ;;  %v4532_v18 = vld [vmem:[#allocation18_spill] sm:$0xff]  ;;  %v3384_v13 = vadd.f32 %v3108_v50, %v3128_v21  ;;  %vm1174_vm5 = vcmp.gt.f32.partialorder %v3164_v6, 0.0 }
 0x23d   :  { %4525 = vst [vmem:[#allocation10_spill] sm:$0xff] %v3356_v25  ;;  %4527 = vst [vmem:[#allocation12_spill] sm:$0xff] %v3360_v7  ;;  %v3372_v10 = vadd.f32 %v3108_v50, %v4532_v18  ;;  %v4535_v25 = vld [vmem:[#allocation23_spill] sm:$0xff]  ;;  %v3388_v27 = vadd.f32 %v3108_v50, %v3132_v28  ;;  %v3392_v18 = vadd.f32 %v3108_v50, %v3136_v54  ;;  %vm1175_vm6 = vcmp.gt.f32.partialorder %v3168_v52, 0.0 }
 0x23e   :  { %4529 = vst [vmem:[#allocation14_spill] sm:$0xff] %v3364_v3  ;;  %4531 = vst [vmem:[#allocation11_spill] sm:$0xff] %v3368_v15  ;;  %v3380_v56 = vadd.f32 %v3108_v50, %v4535_v25  ;;  %vm1176_vm7 = vcmp.gt.f32.partialorder %v3172_v46, 0.0  ;;  %vm1177_vm8 = vcmp.gt.f32.partialorder %v3176_v61, 0.0  ;;  %vm1178_vm9 = vcmp.gt.f32.partialorder %v3180_v58, 0.0 }
 0x23f   :  { %4533 = vst [vmem:[#allocation13_spill] sm:$0xff] %v3372_v10  ;;  %4534 = vst [vmem:[#allocation15_spill] sm:$0xff] %v3376_v43  ;;  %v3405_v21 = vadd.f32 %v3108_v50, %v3140_v53  ;;  %vm1179_vm10 = vcmp.gt.f32.partialorder %v3184_v1, 0.0  ;;  %v1234_v14 = vmul.f32 0.2, %v3148_v32  ;;  %v3413_v25 = vadd.f32 %v3108_v50, %v3144_v39 }
 0x240   :  { %4536 = vst [vmem:[#allocation16_spill] sm:$0xff] %v3380_v56  ;;  %4537 = vst [vmem:[#allocation22_spill] sm:$0xff] %v3384_v13  ;;  %v1235_v28 = vmul.f32 0.2, %v3152_v44  ;;  %v1236_v54 = vmul.f32 0.2, %v3156_v42 }
 0x241   :  { %4538 = vst [vmem:[#allocation3_spill] sm:$0xff] %v3388_v27  ;;  %4539 = vst [vmem:[#allocation2_spill] sm:$0xff] %v3392_v18  ;;  %vm1180_vm11 = vcmp.gt.f32.partialorder %v3188_v34, 0.0  ;;  %v1237_v18 = vmul.f32 0.2, %v3160_v31  ;;  %vm1181_vm12 = vcmp.gt.f32.partialorder %v3192_v8, 0.0  ;;  %v3426_v50 = vsel %vm1170_vm1, %v3148_v32, %v1234_v14 }
 0x242   :  { %4540 = vst [vmem:[#allocation5_spill] sm:$0xff] %v3405_v21  ;;  %4541 = vst [vmem:[#allocation17_spill] sm:$0xff] %v3413_v25  ;;  %v1238_v27 = vmul.f32 0.2, %v3164_v6  ;;  %v1239_v53 = vmul.f32 0.2, %v3168_v52  ;;  %v3437_v10 = vsel %vm1171_vm2, %v3152_v44, %v1235_v28 }
 0x243   :  { %v1240_v21 = vmul.f32 0.2, %v3172_v46  ;;  %v1241_v13 = vmul.f32 0.2, %v3176_v61  ;;  %v1242_v56 = vmul.f32 0.2, %v3180_v58  ;;  %v3467_v3 = vsel %vm1173_vm4, %v3160_v31, %v1237_v18 }
 0x244   :  { %4542 = vst [vmem:[#allocation4_spill] sm:$0xff] %v3426_v50  ;;  %vm1182_vm13 = vcmp.gt.f32.partialorder %v3196_v22, 0.0  ;;  %v1243_v39 = vmul.f32 0.2, %v3184_v1  ;;  %v1244_v25 = vmul.f32 0.2, %v3188_v34  ;;  %v3452_v50 = vsel %vm1172_vm3, %v3156_v42, %v1236_v54 }
 0x245   :  { %v3432_v43 = vmul.f32 0.2, %v3192_v8  ;;  %4543 = vst [vmem:[#allocation18_spill] sm:$0xff] %v3437_v10  ;;  %vm1183_vm14 = vcmp.gt.f32.partialorder %v3200_v35, 0.0  ;;  %v3441_v15 = vmul.f32 0.2, %v3196_v22 }
 0x246   :  { %v3444_v32 = vmul.f32 0.2, %v3200_v35  ;;  %v3447_v14 = vmul.f32 0.2, %v3204_v41  ;;  %4544 = vst [vmem:[#allocation23_spill] sm:$0xff] %v3452_v50  ;;  %vm1184_vm15 = vcmp.gt.f32.partialorder %v3204_v41, 0.0 }
 0x247   :  { %v3456_v44 = vmul.f32 0.2, %v3208_v40  ;;  %v3459_v28 = vmul.f32 0.2, %v3212_v38  ;;  %v3462_v10 = vmul.f32 0.2, %v3216_v59 }
 0x248   :  { %4546 = vst [vmem:[#allocation25_spill] sm:$0xff] %v3467_v3  ;;  %vm1185_vm0 = vcmp.gt.f32.partialorder %v3208_v40, 0.0  ;;  %v3471_v42 = vmul.f32 0.2, %v3220_v48  ;;  %v3474_v54 = vmul.f32 0.2, %v3224_v55 }
 0x249   :  { %4545 = vst [vmem:[#allocation24_spill] sm:$0xff] %v3462_v10  ;;  %v3477_v50 = vmul.f32 0.2, %v3228_v2  ;;  %v3482_v10 = vsel %vm1174_vm5, %v3164_v6, %v1238_v27  ;;  %vm1186_vm1 = vcmp.gt.f32.partialorder %v3212_v38, 0.0  ;;  %v3486_v31 = vmul.f32 0.2, %v3232_v9 }
 0x24a   :  { %4548 = vst [vmem:[#allocation27_spill] sm:$0xff] %v3482_v10  ;;  %v3489_v18 = vmul.f32 0.2, %v3236_v62  ;;  %v3492_v3 = vmul.f32 0.2, %v3240_v5  ;;  %vm1187_vm2 = vcmp.gt.f32.partialorder %v3216_v59, 0.0 }
 0x24b   :  { %4547 = vst [vmem:[#allocation26_spill] sm:$0xff] %v3477_v50  ;;  %v3497_v50 = vsel %vm1175_vm6, %v3168_v52, %v1239_v53  ;;  %v3501_v6 = vmul.f32 0.2, %v3244_v16  ;;  %v3504_v27 = vmul.f32 0.2, %v3248_v23  ;;  %vm1188_vm3 = vcmp.gt.f32.partialorder %v3220_v48, 0.0 }
 0x24c   :  { %4549 = vst [vmem:[#allocation28_spill] sm:$0xff] %v3492_v3  ;;  %4550 = vst [vmem:[#allocation29_spill] sm:$0xff] %v3497_v50  ;;  %v3507_v10 = vmul.f32 0.2, %v3252_v12  ;;  %v3512_v3 = vsel %vm1176_vm7, %v3172_v46, %v1240_v21  ;;  %v3516_v52 = vmul.f32 0.2, %v3256_v19 }
 0x24d   :  { %4552 = vst [vmem:[#allocation31_spill] sm:$0xff] %v3512_v3  ;;  %v3519_v53 = vmul.f32 0.2, %v3260_v30  ;;  %v3522_v50 = vmul.f32 0.2, %v3264_v37  ;;  %vm1189_vm4 = vcmp.gt.f32.partialorder %v3224_v55, 0.0 }
 0x24e   :  { %4551 = vst [vmem:[#allocation30_spill] sm:$0xff] %v3507_v10  ;;  %v3527_v10 = vsel %vm1177_vm8, %v3176_v61, %v1241_v13  ;;  %v3533_v46 = vmul.f32 0.2, %v3268_v26  ;;  %v3536_v21 = vmul.f32 0.2, %v3272_v33  ;;  %v3544_v61 = vsel %vm1178_vm9, %v3180_v58, %v1242_v56 }
 0x24f   :  { %4553 = vst [vmem:[#allocation32_spill] sm:$0xff] %v3527_v10  ;;  %v3539_v3 = vmul.f32 0.2, %v3276_v51  ;;  %4555 = vst [vmem:[#allocation34_spill] sm:$0xff] %v3544_v61  ;;  %vm1192_vm7 = vcmp.gt.f32.partialorder %v3236_v62, 0.0  ;;  %v3562_v58 = vsel %vm1179_vm10, %v3184_v1, %v1243_v39  ;;  %vm1196_vm9 = vcmp.gt.f32.partialorder %v3252_v12, 0.0 }
 0x250   :  { %v3551_v13 = vmul.f32 0.2, %v3280_v0  ;;  %v3554_v10 = vmul.f32 0.2, %v3284_v45  ;;  %4557 = vst [vmem:[#allocation36_spill] sm:$0xff] %v3562_v58  ;;  %v3580_v1 = vsel %vm1180_vm11, %v3188_v34, %v1244_v25  ;;  %vm1200_vm10 = vcmp.gt.f32.partialorder %v3268_v26, 0.0 }
 0x251   :  { %4554 = vst [vmem:[#allocation33_spill] sm:$0xff] %v3539_v3  ;;  %v3557_v3 = vmul.f32 0.2, %v3288_v57  ;;  %v3569_v56 = vmul.f32 0.2, %v3292_v11  ;;  %4559 = vst [vmem:[#allocation38_spill] sm:$0xff] %v3580_v1  ;;  %v3599_v34 = vsel %vm1181_vm12, %v3192_v8, %v3432_v43  ;;  %v3618_v8 = vsel %vm1182_vm13, %v3196_v22, %v3441_v15 }
 0x252   :  { %v3572_v61 = vmul.f32 0.2, %v3296_v24  ;;  %v3587_v39 = vmul.f32 0.2, %v3304_v17  ;;  %v3590_v58 = vmul.f32 0.2, %v3308_v36  ;;  %v3637_v22 = vsel %vm1183_vm14, %v3200_v35, %v3444_v32 }
 0x253   :  { %4556 = vst [vmem:[#allocation35_spill] sm:$0xff] %v3557_v3  ;;  %v3575_v3 = vmul.f32 0.2, %v3300_v4  ;;  %4561 = vst [vmem:[#allocation40_spill] sm:$0xff] %v3599_v34  ;;  %vm1204_vm11 = vcmp.gt.f32.partialorder %v3284_v45, 0.0  ;;  %vm1208_vm12 = vcmp.gt.f32.partialorder %v3300_v4, 0.0  ;;  %v3656_v35 = vsel %vm1184_vm15, %v3204_v41, %v3447_v14 }
 0x254   :  { %v3606_v25 = vmul.f32 0.2, %v3316_v29  ;;  %v3609_v1 = vmul.f32 0.2, %v3320_v47  ;;  %4565 = vst [vmem:[#allocation44_spill] sm:$0xff] %v3618_v8  ;;  %v4567_v34 = vld [vmem:[#allocation19_spill] sm:$0xff]  ;;  %v3675_v41 = vsel %vm1185_vm0, %v3208_v40, %v3456_v44  ;;  %v3688_v40 = vsel %vm1186_vm1, %v3212_v38, %v3459_v28 }
 0x255   :  { %4558 = vst [vmem:[#allocation37_spill] sm:$0xff] %v3575_v3  ;;  %v3593_v3 = vmul.f32 0.2, %v3312_v60  ;;  %v3625_v43 = vmul.f32 0.2, %v3328_v63  ;;  %4571 = vst [vmem:[#allocation46_spill] sm:$0xff] %v3637_v22 }
 0x256   :  { %4562 = vst [vmem:[#allocation41_spill] sm:$0xff] %v3606_v25  ;;  %4563 = vst [vmem:[#allocation42_spill] sm:$0xff] %v3609_v1  ;;  %v3628_v1 = vmul.f32 0.2, %v4567_v34  ;;  %vm1212_vm13 = vcmp.gt.f32.partialorder %v3316_v29, 0.0  ;;  %v4572_v15 = vld [vmem:[#allocation20_spill] sm:$0xff] }
 0x257   :  { %4560 = vst [vmem:[#allocation39_spill] sm:$0xff] %v3593_v3  ;;  %v3612_v3 = vmul.f32 0.2, %v3324_v49  ;;  %4566 = vst [vmem:[#allocation45_spill] sm:$0xff] %v3625_v43  ;;  %v3644_v8 = vmul.f32 0.2, %v4572_v15 }
 0x258   :  { %4568 = vst [vmem:[#allocation19_spill] sm:$0xff] %v3628_v1  ;;  %v4573_v1 = vld [vmem:[#allocation9_spill] sm:$0xff]  ;;  %4577 = vst [vmem:[#allocation49_spill] sm:$0xff] %v3656_v35  ;;  %vm1216_vm14 = vcmp.gt.f32.partialorder %v4567_v34, 0.0  ;;  %v3663_v32 = vmul.f32 0.2, %v3352_v20 }
 0x259   :  { %4564 = vst [vmem:[#allocation43_spill] sm:$0xff] %v3612_v3  ;;  %v4569_v3 = vld [vmem:[#allocation6_spill] sm:$0xff]  ;;  %v3647_v43 = vmul.f32 0.2, %v4573_v1  ;;  %4582 = vst [vmem:[#allocation53_spill] sm:$0xff] %v3675_v41  ;;  %v4585_v1 = vld [vmem:[#allocation13_spill] sm:$0xff] }
 0x25a   :  { %v3631_v25 = vmul.f32 0.2, %v4569_v3  ;;  %4578 = vst [vmem:[#allocation50_spill] sm:$0xff] %v3663_v32  ;;  %v4579_v22 = vld [vmem:[#allocation10_spill] sm:$0xff]  ;;  %4586 = vst [vmem:[#allocation54_spill] sm:$0xff] %v3688_v40  ;;  %v4587_v44 = vld [vmem:[#allocation15_spill] sm:$0xff] }
 0x25b   :  { %4574 = vst [vmem:[#allocation47_spill] sm:$0xff] %v3647_v43  ;;  %v3666_v43 = vmul.f32 0.2, %v4579_v22  ;;  %v4583_v14 = vld [vmem:[#allocation14_spill] sm:$0xff]  ;;  %v1291_v41 = vmul.f32 0.2, %v4587_v44 }
 0x25c   :  { %4570 = vst [vmem:[#allocation6_spill] sm:$0xff] %v3631_v25  ;;  %v4575_v25 = vld [vmem:[#allocation21_spill] sm:$0xff]  ;;  %v1288_v35 = vmul.f32 0.2, %v4583_v14  ;;  %vm1224_vm0 = vcmp.gt.f32.partialorder %v4583_v14, 0.0  ;;  %v4589_v20 = vld [vmem:[#allocation22_spill] sm:$0xff] }
 0x25d   :  { %v3650_v60 = vmul.f32 0.2, %v4575_v25  ;;  %4580 = vst [vmem:[#allocation51_spill] sm:$0xff] %v3666_v43  ;;  %vm1220_vm15 = vcmp.gt.f32.partialorder %v4575_v25, 0.0  ;;  %v4584_v43 = vld [vmem:[#allocation11_spill] sm:$0xff]  ;;  %v4590_v15 = vld [vmem:[#allocation24_spill] sm:$0xff] }
 0x25e   :  { %v1289_v32 = vmul.f32 0.2, %v4584_v43  ;;  %v1293_v25 = vmul.f32 0.2, %v4589_v20  ;;  %v3701_v38 = vsel %vm1187_vm2, %v3216_v59, %v4590_v15  ;;  %v4592_v28 = vld [vmem:[#allocation3_spill] sm:$0xff]  ;;  %v4593_v40 = vld [vmem:[#allocation2_spill] sm:$0xff]  ;;  %v3714_v59 = vsel %vm1188_vm3, %v3220_v48, %v3471_v42 }
 0x25f   :  { %4576 = vst [vmem:[#allocation48_spill] sm:$0xff] %v3650_v60  ;;  %v3669_v60 = vmul.f32 0.2, %v3360_v7  ;;  %v4588_v7 = vld [vmem:[#allocation16_spill] sm:$0xff]  ;;  %vm1230_vm5 = vcmp.gt.f32.partialorder %v4592_v28, 0.0  ;;  %v4594_v43 = vld [vmem:[#allocation5_spill] sm:$0xff]  ;;  %v3741_v42 = vsel %vm1192_vm7, %v3236_v62, %v3489_v18 }
 0x260   :  { %v1292_v22 = vmul.f32 0.2, %v4588_v7  ;;  %4591 = vst [vmem:[#allocation16_spill] sm:$0xff] %v3701_v38  ;;  %vm1228_vm1 = vcmp.gt.f32.partialorder %v4588_v7, 0.0  ;;  %v1294_v44 = vmul.f32 0.2, %v4592_v28  ;;  %v3723_v28 = vsel %vm1189_vm4, %v3224_v55, %v3474_v54 }
 0x261   :  { %4581 = vst [vmem:[#allocation52_spill] sm:$0xff] %v3669_v60  ;;  %v1290_v60 = vmul.f32 0.2, %v4585_v1  ;;  %v1295_v1 = vmul.f32 0.2, %v4593_v40  ;;  %vm1232_vm2 = vcmp.gt.f32.partialorder %v4594_v43, 0.0 }
 0x262   :  { %v1296_v14 = vmul.f32 0.2, %v4594_v43  ;;  %v4595_v15 = vld [vmem:[#allocation17_spill] sm:$0xff]  ;;  %v4596_v40 = vld [vmem:[#allocation26_spill] sm:$0xff]  ;;  %vm4597_vm8 = vcmp.gt.f32.partialorder %v3228_v2, 0.0  ;;  %vm4598_vm3 = vcmp.gt.f32.partialorder %v3232_v9, 0.0 }
 0x263   :  { %vm1233_vm6 = vcmp.gt.f32.partialorder %v4595_v15, 0.0  ;;  %v1297_v38 = vmul.f32 0.2, %v4595_v15  ;;  %v3729_v20 = vsel %vm4597_vm8, %v3228_v2, %v4596_v40  ;;  %v3735_v48 = vsel %vm4598_vm3, %v3232_v9, %v3486_v31  ;;  %v4599_v55 = vld [vmem:[#allocation28_spill] sm:$0xff]  ;;  %v4603_v62 = vld [vmem:[#allocation30_spill] sm:$0xff] }
 0x264   :  { %vm4600_vm4 = vcmp.gt.f32.partialorder %v3240_v5, 0.0  ;;  %vm4601_vm8 = vcmp.gt.f32.partialorder %v3244_v16, 0.0  ;;  %vm4602_vm3 = vcmp.gt.f32.partialorder %v3248_v23, 0.0  ;;  %v3765_v31 = vsel %vm1196_vm9, %v3252_v12, %v4603_v62 }
 0x265   :  { %v3747_v54 = vsel %vm4600_vm4, %v3240_v5, %v4599_v55  ;;  %v3753_v2 = vsel %vm4601_vm8, %v3244_v16, %v3501_v6  ;;  %v3759_v9 = vsel %vm4602_vm3, %v3248_v23, %v3504_v27  ;;  %vm4604_vm7 = vcmp.gt.f32.partialorder %v3256_v19, 0.0  ;;  %v4619_v6 = vld [vmem:[#allocation7_spill] sm:$0xff]  ;;  %v4637_v55 = vld [vmem:[#allocation21_spill] sm:$0xff] }
 0x266   :  { %v3771_v5 = vsel %vm4604_vm7, %v3256_v19, %v3516_v52  ;;  %vm4605_vm4 = vcmp.gt.f32.partialorder %v3260_v30, 0.0  ;;  %vm4606_vm8 = vcmp.gt.f32.partialorder %v3264_v37, 0.0  ;;  %vm1618_vm9 = vcmask 125952  }
 0x267   :  { %v3777_v16 = vsel %vm4605_vm4, %v3260_v30, %v3519_v53  ;;  %v3783_v23 = vsel %vm4606_vm8, %v3264_v37, %v3522_v50  ;;  %v3789_v12 = vsel %vm1200_vm10, %v3268_v26, %v3533_v46  ;;  %vm4607_vm3 = vcmp.gt.f32.partialorder %v3272_v33, 0.0  ;;  %v4608_v30 = vld [vmem:[#allocation33_spill] sm:$0xff] }
 0x268   :  { %v3795_v19 = vsel %vm4607_vm3, %v3272_v33, %v3536_v21  ;;  %vm4609_vm7 = vcmp.gt.f32.partialorder %v3276_v51, 0.0  ;;  %vm4610_vm4 = vcmp.gt.f32.partialorder %v3280_v0, 0.0  ;;  %v3813_v26 = vsel %vm1204_vm11, %v3284_v45, %v3554_v10  ;;  %v4611_v33 = vld [vmem:[#allocation35_spill] sm:$0xff]  ;;  %v4615_v45 = vld [vmem:[#allocation37_spill] sm:$0xff] }
 0x269   :  { %v3801_v18 = vsel %vm4609_vm7, %v3276_v51, %v4608_v30  ;;  %v3807_v37 = vsel %vm4610_vm4, %v3280_v0, %v3551_v13  ;;  %vm4612_vm10 = vcmp.gt.f32.partialorder %v3288_v57, 0.0  ;;  %vm4613_vm8 = vcmp.gt.f32.partialorder %v3292_v11, 0.0  ;;  %v4626_v21 = vld [vmem:[#allocation45_spill] sm:$0xff]  ;;  %v4639_v30 = vld [vmem:[#allocation8_spill] sm:$0xff] }
 0x26a   :  { %v3819_v50 = vsel %vm4612_vm10, %v3288_v57, %v4611_v33  ;;  %v3825_v51 = vsel %vm4613_vm8, %v3292_v11, %v3569_v56  ;;  %vm4614_vm3 = vcmp.gt.f32.partialorder %v3296_v24, 0.0  ;;  %v3837_v10 = vsel %vm1208_vm12, %v3300_v4, %v4615_v45  ;;  %v4621_v4 = vld [vmem:[#allocation41_spill] sm:$0xff]  ;;  %v4642_v45 = vld [vmem:[#allocation10_spill] sm:$0xff] }
 0x26b   :  { %v3831_v0 = vsel %vm4614_vm3, %v3296_v24, %v3572_v61  ;;  %vm4616_vm11 = vcmp.gt.f32.partialorder %v3304_v17, 0.0  ;;  %vm4617_vm7 = vcmp.gt.f32.partialorder %v3308_v36, 0.0  ;;  %v4618_v24 = vld [vmem:[#allocation39_spill] sm:$0xff]  ;;  %vm4620_vm4 = vcmp.gt.f32.partialorder %v4619_v6, 0.0 }
 0x26c   :  { %v3843_v57 = vsel %vm4616_vm11, %v3304_v17, %v3587_v39  ;;  %v3849_v11 = vsel %vm4617_vm7, %v3308_v36, %v3590_v58  ;;  %v3855_v27 = vsel %vm4620_vm4, %v4619_v6, %v4618_v24  ;;  %v3861_v52 = vsel %vm1212_vm13, %v3316_v29, %v4621_v4  ;;  %v4622_v17 = vld [vmem:[#allocation42_spill] sm:$0xff]  ;;  %v4624_v36 = vld [vmem:[#allocation43_spill] sm:$0xff]  ;;  %v4634_v39 = vld [vmem:[#allocation9_spill] sm:$0xff] }
 0x26d   :  { %vm4623_vm12 = vcmp.gt.f32.partialorder %v3320_v47, 0.0  ;;  %vm4625_vm10 = vcmp.gt.f32.partialorder %v3324_v49, 0.0  ;;  %vm4627_vm8 = vcmp.gt.f32.partialorder %v3328_v63, 0.0  ;;  %v4628_v29 = vld [vmem:[#allocation19_spill] sm:$0xff]  ;;  %vm4630_vm13 = vcmp.gt.f32.partialorder %v4569_v3, 0.0  ;;  %v4644_v6 = vld [vmem:[#allocation52_spill] sm:$0xff] }
 0x26e   :  { %v3867_v53 = vsel %vm4623_vm12, %v3320_v47, %v4622_v17  ;;  %v3873_v46 = vsel %vm4625_vm10, %v3324_v49, %v4624_v36  ;;  %v3879_v61 = vsel %vm4627_vm8, %v3328_v63, %v4626_v21  ;;  %v3885_v13 = vsel %vm1216_vm14, %v4567_v34, %v4628_v29  ;;  %v4629_v47 = vld [vmem:[#allocation6_spill] sm:$0xff]  ;;  %v4631_v49 = vld [vmem:[#allocation20_spill] sm:$0xff]  ;;  %v4633_v63 = vld [vmem:[#allocation47_spill] sm:$0xff] }
 0x26f   :  { %v3891_v58 = vsel %vm4630_vm13, %v4569_v3, %v4629_v47  ;;  %vm4632_vm3 = vcmp.gt.f32.partialorder %v4631_v49, 0.0  ;;  %vm4635_vm11 = vcmp.gt.f32.partialorder %v4634_v39, 0.0  ;;  %v4636_v34 = vld [vmem:[#allocation48_spill] sm:$0xff]  ;;  %v4638_v3 = vld [vmem:[#allocation50_spill] sm:$0xff]  ;;  %vm4640_vm14 = vcmp.gt.f32.partialorder %v4639_v30, 0.0  ;;  %v4648_v29 = vld [vmem:[#allocation11_spill] sm:$0xff] }
 0x270   :  { %v3897_v56 = vsel %vm4632_vm3, %v4631_v49, %v3644_v8  ;;  %v3903_v40 = vsel %vm4635_vm11, %v4634_v39, %v4633_v63  ;;  %v3909_v62 = vsel %vm1220_vm15, %v4637_v55, %v4636_v34  ;;  %v3915_v33 = vsel %vm4640_vm14, %v4639_v30, %v4638_v3  ;;  %v4641_v8 = vld [vmem:[#allocation51_spill] sm:$0xff]  ;;  %v4645_v4 = vld [vmem:[#allocation12_spill] sm:$0xff]  ;;  %v4647_v36 = vld [vmem:[#allocation14_spill] sm:$0xff] }
 0x271   :  { %vm4643_vm7 = vcmp.gt.f32.partialorder %v4642_v45, 0.0  ;;  %vm4646_vm4 = vcmp.gt.f32.partialorder %v4645_v4, 0.0  ;;  %v3932_v21 = vsel %vm1224_vm0, %v4647_v36, %v1288_v35  ;;  %vm4649_vm15 = vcmp.gt.f32.partialorder %v4648_v29, 0.0  ;;  %v4650_v49 = vld [vmem:[#allocation13_spill] sm:$0xff]  ;;  %v4652_v39 = vld [vmem:[#allocation15_spill] sm:$0xff]  ;;  %v4654_v55 = vld [vmem:[#allocation22_spill] sm:$0xff] }
 0x272   :  { %v3921_v24 = vsel %vm4643_vm7, %v4642_v45, %v4641_v8  ;;  %v3927_v17 = vsel %vm4646_vm4, %v4645_v4, %v4644_v6  ;;  %v3937_v47 = vsel %vm4649_vm15, %v4648_v29, %v1289_v32  ;;  %vm4651_vm12 = vcmp.gt.f32.partialorder %v4650_v49, 0.0  ;;  %v4656_v3 = vld [vmem:[#allocation3_spill] sm:$0xff]  ;;  %v4657_v30 = vld [vmem:[#allocation2_spill] sm:$0xff]  ;;  %v4662_v4 = vld [vmem:[#allocation25_spill] sm:$0xff] }
 0x273   :  { %v3942_v63 = vsel %vm4651_vm12, %v4650_v49, %v1290_v60  ;;  %vm4653_vm10 = vcmp.gt.f32.partialorder %v4652_v39, 0.0  ;;  %v3952_v35 = vsel %vm1228_vm1, %v4588_v7, %v1292_v22  ;;  %vm4655_vm0 = vcmp.gt.f32.partialorder %v4654_v55, 0.0  ;;  %v4659_v22 = vld [vmem:[#allocation4_spill] sm:$0xff]  ;;  %v4661_v6 = vld [vmem:[#allocation23_spill] sm:$0xff] }
 0x274   :  { %v3947_v34 = vsel %vm4653_vm10, %v4652_v39, %v1291_v41  ;;  %v3957_v32 = vsel %vm4655_vm0, %v4654_v55, %v1293_v25  ;;  %v3962_v60 = vsel %vm1230_vm5, %v4656_v3, %v1294_v44  ;;  %vm4658_vm8 = vcmp.gt.f32.partialorder %v4657_v30, 0.0  ;;  %v4660_v44 = vld [vmem:[#allocation18_spill] sm:$0xff]  ;;  %v4663_v29 = vld [vmem:[#allocation27_spill] sm:$0xff]  ;;  %v4666_v39 = vld [vmem:[#allocation32_spill] sm:$0xff] }
 0x275   :  { %v3967_v41 = vsel %vm4658_vm8, %v4657_v30, %v1295_v1  ;;  %v3972_v7 = vsel %vm1232_vm2, %v4594_v43, %v1296_v14  ;;  %v3977_v25 = vsel %vm1233_vm6, %v4595_v15, %v1297_v38  ;;  %v1792_v8 = vpack.c.bf16 %v4659_v22, %v4659_v22  ;;  %v4664_v14 = vld [vmem:[#allocation29_spill] sm:$0xff]  ;;  %v4665_v38 = vld [vmem:[#allocation31_spill] sm:$0xff]  ;;  %v4667_v3 = vld [vmem:[#allocation34_spill] sm:$0xff] }
 0x276   :  { %v1793_v45 = vpack.c.bf16 %v4660_v44, %v4660_v44  ;;  %v1794_v1 = vpack.c.bf16 %v4661_v6, %v4661_v6  ;;  %v1795_v36 = vpack.c.bf16 %v4662_v4, %v4662_v4  ;;  %v1796_v43 = vpack.c.bf16 %v4663_v29, %v4663_v29  ;;  %v4668_v22 = vld [vmem:[#allocation36_spill] sm:$0xff]  ;;  %v4669_v6 = vld [vmem:[#allocation38_spill] sm:$0xff] }
 0x277   :  { %v1797_v49 = vpack.c.bf16 %v4664_v14, %v4664_v14  ;;  %v1798_v15 = vpack.c.bf16 %v4665_v38, %v4665_v38  ;;  %v1799_v55 = vpack.c.bf16 %v4666_v39, %v4666_v39  ;;  %v1800_v30 = vpack.c.bf16 %v4667_v3, %v4667_v3  ;;  %1619 = vst.msk [vmem:[%s4367_s4] sm:$0xf] %vm1618_vm9, %v1792_v8  ;;  %v4670_v29 = vld [vmem:[#allocation40_spill] sm:$0xff]  ;;  %v4672_v3 = vld [vmem:[#allocation46_spill] sm:$0xff]  ;;  %v4673_v8 = vld [vmem:[#allocation49_spill] sm:$0xff] }
 0x278   :  { %v1801_v44 = vpack.c.bf16 %v4668_v22, %v4668_v22  ;;  %1620 = vst.msk [vmem:[%s4367_s4 + $0x4] sm:$0xf] %vm1618_vm9, %v1793_v45  ;;  %v1802_v4 = vpack.c.bf16 %v4669_v6, %v4669_v6  ;;  %v1803_v14 = vpack.c.bf16 %v4670_v29, %v4670_v29  ;;  %v4671_v38 = vld [vmem:[#allocation44_spill] sm:$0xff]  ;;  %v1805_v22 = vpack.c.bf16 %v4672_v3, %v4672_v3  ;;  %v4674_v6 = vld [vmem:[#allocation53_spill] sm:$0xff]  ;;  %v4675_v29 = vld [vmem:[#allocation54_spill] sm:$0xff] }
 0x279   :  { %v1804_v39 = vpack.c.bf16 %v4671_v38, %v4671_v38  ;;  %1621 = vst.msk [vmem:[%s4367_s4 + $0x8] sm:$0xf] %vm1618_vm9, %v1794_v1  ;;  %1622 = vst.msk [vmem:[%s4367_s4 + $0xc] sm:$0xf] %vm1618_vm9, %v1795_v36  ;;  %v1806_v45 = vpack.c.bf16 %v4673_v8, %v4673_v8  ;;  %v1807_v1 = vpack.c.bf16 %v4674_v6, %v4674_v6  ;;  %v4676_v36 = vld [vmem:[#allocation16_spill] sm:$0xff] }
 0x27a   :  { %1623 = vst.msk [vmem:[%s4367_s4 + $0x10] sm:$0xf] %vm1618_vm9, %v1796_v43  ;;  %1624 = vst.msk [vmem:[%s4367_s4 + $0x14] sm:$0xf] %vm1618_vm9, %v1797_v49  ;;  %v1808_v38 = vpack.c.bf16 %v4675_v29, %v4675_v29  ;;  %v1809_v3 = vpack.c.bf16 %v4676_v36, %v4676_v36  ;;  %v1810_v43 = vpack.c.bf16 %v3714_v59, %v3714_v59 }
 0x27b   :  { %1625 = vst.msk [vmem:[%s4367_s4 + $0x18] sm:$0xf] %vm1618_vm9, %v1798_v15  ;;  %1626 = vst.msk [vmem:[%s4367_s4 + $0x1c] sm:$0xf] %vm1618_vm9, %v1799_v55  ;;  %v1811_v49 = vpack.c.bf16 %v3723_v28, %v3723_v28  ;;  %v1812_v15 = vpack.c.bf16 %v3729_v20, %v3729_v20  ;;  %v1813_v55 = vpack.c.bf16 %v3735_v48, %v3735_v48 }
 0x27c   :  { %1627 = vst.msk [vmem:[%s4367_s4 + $0x20] sm:$0xf] %vm1618_vm9, %v1800_v30  ;;  %1628 = vst.msk [vmem:[%s4367_s4 + $0x24] sm:$0xf] %vm1618_vm9, %v1801_v44  ;;  %v1814_v20 = vpack.c.bf16 %v3741_v42, %v3741_v42  ;;  %v1815_v28 = vpack.c.bf16 %v3747_v54, %v3747_v54  ;;  %v1816_v59 = vpack.c.bf16 %v3753_v2, %v3753_v2 }
 0x27d   :  { %1629 = vst.msk [vmem:[%s4367_s4 + $0x28] sm:$0xf] %vm1618_vm9, %v1802_v4  ;;  %1630 = vst.msk [vmem:[%s4367_s4 + $0x2c] sm:$0xf] %vm1618_vm9, %v1803_v14  ;;  %v1817_v48 = vpack.c.bf16 %v3759_v9, %v3759_v9  ;;  %v1818_v42 = vpack.c.bf16 %v3765_v31, %v3765_v31  ;;  %v1819_v54 = vpack.c.bf16 %v3771_v5, %v3771_v5 }
 0x27e   :  { %1631 = vst.msk [vmem:[%s4367_s4 + $0x30] sm:$0xf] %vm1618_vm9, %v1804_v39  ;;  %1632 = vst.msk [vmem:[%s4367_s4 + $0x34] sm:$0xf] %vm1618_vm9, %v1805_v22  ;;  %v1820_v2 = vpack.c.bf16 %v3777_v16, %v3777_v16  ;;  %v1821_v9 = vpack.c.bf16 %v3783_v23, %v3783_v23  ;;  %v1822_v31 = vpack.c.bf16 %v3789_v12, %v3789_v12 }
 0x27f   :  { %1633 = vst.msk [vmem:[%s4367_s4 + $0x38] sm:$0xf] %vm1618_vm9, %v1806_v45  ;;  %1634 = vst.msk [vmem:[%s4367_s4 + $0x3c] sm:$0xf] %vm1618_vm9, %v1807_v1  ;;  %v1823_v5 = vpack.c.bf16 %v3795_v19, %v3795_v19  ;;  %v1824_v16 = vpack.c.bf16 %v3801_v18, %v3801_v18  ;;  %v1825_v23 = vpack.c.bf16 %v3807_v37, %v3807_v37 }
 0x280   :  { %1635 = vst.msk [vmem:[%s4367_s4 + $0x40] sm:$0xf] %vm1618_vm9, %v1808_v38  ;;  %1636 = vst.msk [vmem:[%s4367_s4 + $0x44] sm:$0xf] %vm1618_vm9, %v1809_v3  ;;  %v1826_v12 = vpack.c.bf16 %v3813_v26, %v3813_v26  ;;  %v1827_v19 = vpack.c.bf16 %v3819_v50, %v3819_v50  ;;  %v1828_v18 = vpack.c.bf16 %v3825_v51, %v3825_v51 }
 0x281   :  { %1637 = vst.msk [vmem:[%s4367_s4 + $0x48] sm:$0xf] %vm1618_vm9, %v1810_v43  ;;  %1638 = vst.msk [vmem:[%s4367_s4 + $0x4c] sm:$0xf] %vm1618_vm9, %v1811_v49  ;;  %v1829_v37 = vpack.c.bf16 %v3831_v0, %v3831_v0  ;;  %v1830_v26 = vpack.c.bf16 %v3837_v10, %v3837_v10  ;;  %v1831_v50 = vpack.c.bf16 %v3843_v57, %v3843_v57 }
 0x282   :  { %1639 = vst.msk [vmem:[%s4367_s4 + $0x50] sm:$0xf] %vm1618_vm9, %v1812_v15  ;;  %1640 = vst.msk [vmem:[%s4367_s4 + $0x54] sm:$0xf] %vm1618_vm9, %v1813_v55  ;;  %v1832_v51 = vpack.c.bf16 %v3849_v11, %v3849_v11  ;;  %v1833_v0 = vpack.c.bf16 %v3855_v27, %v3855_v27  ;;  %v1834_v10 = vpack.c.bf16 %v3861_v52, %v3861_v52 }
 0x283   :  { %1641 = vst.msk [vmem:[%s4367_s4 + $0x58] sm:$0xf] %vm1618_vm9, %v1814_v20  ;;  %1642 = vst.msk [vmem:[%s4367_s4 + $0x5c] sm:$0xf] %vm1618_vm9, %v1815_v28  ;;  %v1835_v57 = vpack.c.bf16 %v3867_v53, %v3867_v53  ;;  %v1836_v11 = vpack.c.bf16 %v3873_v46, %v3873_v46  ;;  %v1837_v27 = vpack.c.bf16 %v3879_v61, %v3879_v61 }
 0x284   :  { %1643 = vst.msk [vmem:[%s4367_s4 + $0x60] sm:$0xf] %vm1618_vm9, %v1816_v59  ;;  %1644 = vst.msk [vmem:[%s4367_s4 + $0x64] sm:$0xf] %vm1618_vm9, %v1817_v48  ;;  %v1838_v52 = vpack.c.bf16 %v3885_v13, %v3885_v13  ;;  %v1839_v53 = vpack.c.bf16 %v3891_v58, %v3891_v58  ;;  %v1840_v46 = vpack.c.bf16 %v3897_v56, %v3897_v56 }
 0x285   :  { %1645 = vst.msk [vmem:[%s4367_s4 + $0x68] sm:$0xf] %vm1618_vm9, %v1818_v42  ;;  %1646 = vst.msk [vmem:[%s4367_s4 + $0x6c] sm:$0xf] %vm1618_vm9, %v1819_v54  ;;  %v1841_v61 = vpack.c.bf16 %v3903_v40, %v3903_v40  ;;  %v1842_v13 = vpack.c.bf16 %v3909_v62, %v3909_v62  ;;  %v1843_v58 = vpack.c.bf16 %v3915_v33, %v3915_v33 }
 0x286   :  { %1647 = vst.msk [vmem:[%s4367_s4 + $0x70] sm:$0xf] %vm1618_vm9, %v1820_v2  ;;  %1648 = vst.msk [vmem:[%s4367_s4 + $0x74] sm:$0xf] %vm1618_vm9, %v1821_v9  ;;  %v1844_v56 = vpack.c.bf16 %v3921_v24, %v3921_v24  ;;  %v1845_v40 = vpack.c.bf16 %v3927_v17, %v3927_v17  ;;  %v1846_v62 = vpack.c.bf16 %v3932_v21, %v3932_v21 }
 0x287   :  { %1649 = vst.msk [vmem:[%s4367_s4 + $0x78] sm:$0xf] %vm1618_vm9, %v1822_v31  ;;  %1650 = vst.msk [vmem:[%s4367_s4 + $0x7c] sm:$0xf] %vm1618_vm9, %v1823_v5  ;;  %v1847_v33 = vpack.c.bf16 %v3937_v47, %v3937_v47  ;;  %v1848_v24 = vpack.c.bf16 %v3942_v63, %v3942_v63  ;;  %v1849_v17 = vpack.c.bf16 %v3947_v34, %v3947_v34 }
 0x288   :  { %1651 = vst.msk [vmem:[%s4367_s4 + $0x80] sm:$0xf] %vm1618_vm9, %v1824_v16  ;;  %1652 = vst.msk [vmem:[%s4367_s4 + $0x84] sm:$0xf] %vm1618_vm9, %v1825_v23  ;;  %v1850_v21 = vpack.c.bf16 %v3952_v35, %v3952_v35  ;;  %v1851_v47 = vpack.c.bf16 %v3957_v32, %v3957_v32  ;;  %v1852_v63 = vpack.c.bf16 %v3962_v60, %v3962_v60 }
 0x289   :  { %1653 = vst.msk [vmem:[%s4367_s4 + $0x88] sm:$0xf] %vm1618_vm9, %v1826_v12  ;;  %1654 = vst.msk [vmem:[%s4367_s4 + $0x8c] sm:$0xf] %vm1618_vm9, %v1827_v19  ;;  %v1853_v34 = vpack.c.bf16 %v3967_v41, %v3967_v41  ;;  %v1854_v35 = vpack.c.bf16 %v3972_v7, %v3972_v7  ;;  %v1855_v32 = vpack.c.bf16 %v3977_v25, %v3977_v25 }
 0x28a   :  { %1655 = vst.msk [vmem:[%s4367_s4 + $0x90] sm:$0xf] %vm1618_vm9, %v1828_v18  ;;  %1656 = vst.msk [vmem:[%s4367_s4 + $0x94] sm:$0xf] %vm1618_vm9, %v1829_v37 }
 0x28b   :  { %1657 = vst.msk [vmem:[%s4367_s4 + $0x98] sm:$0xf] %vm1618_vm9, %v1830_v26  ;;  %1658 = vst.msk [vmem:[%s4367_s4 + $0x9c] sm:$0xf] %vm1618_vm9, %v1831_v50 }
 0x28c   :  { %1659 = vst.msk [vmem:[%s4367_s4 + $0xa0] sm:$0xf] %vm1618_vm9, %v1832_v51  ;;  %1660 = vst.msk [vmem:[%s4367_s4 + $0xa4] sm:$0xf] %vm1618_vm9, %v1833_v0 }
 0x28d   :  { %1661 = vst.msk [vmem:[%s4367_s4 + $0xa8] sm:$0xf] %vm1618_vm9, %v1834_v10  ;;  %1662 = vst.msk [vmem:[%s4367_s4 + $0xac] sm:$0xf] %vm1618_vm9, %v1835_v57 }
 0x28e   :  { %1663 = vst.msk [vmem:[%s4367_s4 + $0xb0] sm:$0xf] %vm1618_vm9, %v1836_v11  ;;  %1664 = vst.msk [vmem:[%s4367_s4 + $0xb4] sm:$0xf] %vm1618_vm9, %v1837_v27 }
 0x28f   :  { %1665 = vst.msk [vmem:[%s4367_s4 + $0xb8] sm:$0xf] %vm1618_vm9, %v1838_v52  ;;  %1666 = vst.msk [vmem:[%s4367_s4 + $0xbc] sm:$0xf] %vm1618_vm9, %v1839_v53 }
 0x290   :  { %1667 = vst.msk [vmem:[%s4367_s4 + $0xc0] sm:$0xf] %vm1618_vm9, %v1840_v46  ;;  %1668 = vst.msk [vmem:[%s4367_s4 + $0xc4] sm:$0xf] %vm1618_vm9, %v1841_v61 }
 0x291   :  { %1669 = vst.msk [vmem:[%s4367_s4 + $0xc8] sm:$0xf] %vm1618_vm9, %v1842_v13  ;;  %1670 = vst.msk [vmem:[%s4367_s4 + $0xcc] sm:$0xf] %vm1618_vm9, %v1843_v58 }
 0x292   :  { %1671 = vst.msk [vmem:[%s4367_s4 + $0xd0] sm:$0xf] %vm1618_vm9, %v1844_v56  ;;  %1672 = vst.msk [vmem:[%s4367_s4 + $0xd4] sm:$0xf] %vm1618_vm9, %v1845_v40 }
 0x293   :  { %1673 = vst.msk [vmem:[%s4367_s4 + $0xd8] sm:$0xf] %vm1618_vm9, %v1846_v62  ;;  %1674 = vst.msk [vmem:[%s4367_s4 + $0xdc] sm:$0xf] %vm1618_vm9, %v1847_v33 }
 0x294   :  { %1675 = vst.msk [vmem:[%s4367_s4 + $0xe0] sm:$0xf] %vm1618_vm9, %v1848_v24  ;;  %1676 = vst.msk [vmem:[%s4367_s4 + $0xe4] sm:$0xf] %vm1618_vm9, %v1849_v17 }
 0x295   :  { %1677 = vst.msk [vmem:[%s4367_s4 + $0xe8] sm:$0xf] %vm1618_vm9, %v1850_v21  ;;  %1678 = vst.msk [vmem:[%s4367_s4 + $0xec] sm:$0xf] %vm1618_vm9, %v1851_v47 }
 0x296   :  { %1679 = vst.msk [vmem:[%s4367_s4 + $0xf0] sm:$0xf] %vm1618_vm9, %v1852_v63  ;;  %1680 = vst.msk [vmem:[%s4367_s4 + $0xf4] sm:$0xf] %vm1618_vm9, %v1853_v34 }
 0x297   :  { %1681 = vst.msk [vmem:[%s4367_s4 + $0xf8] sm:$0xf] %vm1618_vm9, %v1854_v35  ;;  %1682 = vst.msk [vmem:[%s4367_s4 + $0xfc] sm:$0xf] %vm1618_vm9, %v1855_v32 }

// kernel: netd_forward.6
= control target key start
LH: loop header
LB: loop body
LE: loop exit
PB: predicated region body
PF: predicated region fallthrough
CT: control target
= control target key end

     0   :  { %vm339_vm0 = vcmask 261120   ;;  %s1132_s1 = inlined_call_operand.vmem [shape: bf16[256,32], index: 1, kind: input, shape index: {}]   ;;  %s1133_s0 = inlined_call_operand.vmem [shape: bf16[128,256], index: 0, kind: input, shape index: {}]   ;;  %s1134_s2 = inlined_call_operand.vmem [shape: f32[1,32], index: 2, kind: input, shape index: {}]   ;;  %s1135_s3 = inlined_call_operand.vmem [shape: f32[1,32], index: 3, kind: input, shape index: {}]   ;;  %s1136_s4 = inlined_call_operand.vmem [shape: bf16[128,32], index: 4, kind: output, shape index: {}]  }
   0x1   :  { %v776_v0 = vld [vmem:[%s1132_s1 + $0x78] sm:$0xff]   ;;  %v778_v2 = vld [vmem:[%s1132_s1 + $0x70] sm:$0xff]   ;;  %v780_v4 = vld [vmem:[%s1132_s1 + $0x68] sm:$0xff]  }
   0x2   :  { %v777_v1 = vld [vmem:[%s1132_s1 + $0x38] sm:$0xff]   ;;  %696 = vmatprep.subr.bf16.mxu0 %v776_v0  ;;  %760 = vmatprep.subr.bf16.mxu1 %v776_v0  ;;  %v779_v3 = vld [vmem:[%s1132_s1 + $0x30] sm:$0xff]   ;;  %v781_v5 = vld [vmem:[%s1132_s1 + $0x28] sm:$0xff]  }
   0x3   :  { %697 = vmatpush3.bf16.msra.mxu0 %v777_v1  ;;  %768 = vmatpush3.bf16.msra.mxu1 %v777_v1  ;;  %v782_v6 = vld [vmem:[%s1132_s1 + $0x60] sm:$0xff]   ;;  %v784_v8 = vld [vmem:[%s1132_s1 + $0x58] sm:$0xff]   ;;  %v786_v10 = vld [vmem:[%s1132_s1 + $0x50] sm:$0xff]  }
   0x4   :  { %698 = vmatprep.subr.bf16.mxu0 %v778_v2  ;;  %761 = vmatprep.subr.bf16.mxu1 %v778_v2  ;;  %v783_v7 = vld [vmem:[%s1132_s1 + $0x20] sm:$0xff]   ;;  %v785_v9 = vld [vmem:[%s1132_s1 + $0x18] sm:$0xff]   ;;  %v787_v12 = vld [vmem:[%s1132_s1 + $0x10] sm:$0xff]  }
   0x5   :  { %v794_v11 = vld [vmem:[%s1133_s0 + $0x4] ss:$8 sps:$4 sm:$0xff]   ;;  %v792_v18 = vld [vmem:[%s1133_s0] ss:$8 sps:$4 sm:$0xff]   ;;  %v795_v20 = vld [vmem:[%s1133_s0 + $0x14] ss:$8 sps:$4 sm:$0xff]  }
   0x6   :  { %v800_v13 = vld [vmem:[%s1133_s0 + $0x44] ss:$8 sps:$4 sm:$0xff]   ;;  %274 = vmatprep.mubr.bf16.mxu0 %v794_v11  ;;  %v798_v19 = vld [vmem:[%s1133_s0 + $0x40] ss:$8 sps:$4 sm:$0xff]   ;;  %v804_v21 = vld [vmem:[%s1133_s0 + $0x54] ss:$8 sps:$4 sm:$0xff]  }
   0x7   :  { %699 = vmatpush3.bf16.msra.mxu0 %v779_v3  ;;  %769 = vmatpush3.bf16.msra.mxu1 %v779_v3  ;;  %v788_v14 = vld [vmem:[%s1132_s1 + $0x48] sm:$0xff]   ;;  %v790_v16 = vld [vmem:[%s1132_s1 + $0x40] sm:$0xff]   ;;  %v797_v22 = vld [vmem:[%s1133_s0 + $0x10] ss:$8 sps:$4 sm:$0xff]  }
   0x8   :  { %700 = vmatprep.subr.bf16.mxu0 %v780_v4  ;;  %762 = vmatprep.subr.bf16.mxu1 %v780_v4  ;;  %v789_v15 = vld [vmem:[%s1132_s1 + $0x8] sm:$0xff]   ;;  %v791_v17 = vld [vmem:[%s1132_s1] sm:$0xff]   ;;  %v806_v23 = vld [vmem:[%s1133_s0 + $0x50] ss:$8 sps:$4 sm:$0xff]  }
   0x9   :  { %306 = vmatprep.mubr.bf16.mxu1 %v800_v13  ;;  %v801_v24 = vld [vmem:[%s1133_s0 + $0x24] ss:$8 sps:$4 sm:$0xff]   ;;  %v803_v26 = vld [vmem:[%s1133_s0 + $0x20] ss:$8 sps:$4 sm:$0xff]   ;;  %v807_v28 = vld [vmem:[%s1133_s0 + $0x34] ss:$8 sps:$4 sm:$0xff]  }
   0xa   :  { %v810_v25 = vld [vmem:[%s1133_s0 + $0x64] ss:$8 sps:$4 sm:$0xff]   ;;  %v812_v27 = vld [vmem:[%s1133_s0 + $0x60] ss:$8 sps:$4 sm:$0xff]   ;;  %v813_v29 = vld [vmem:[%s1133_s0 + $0x74] ss:$8 sps:$4 sm:$0xff]  }
   0xb   :  { %701 = vmatpush3.bf16.msra.mxu0 %v781_v5  ;;  %770 = vmatpush3.bf16.msra.mxu1 %v781_v5  ;;  %v809_v30 = vld [vmem:[%s1133_s0 + $0x30] ss:$8 sps:$4 sm:$0xff]  }
   0xc   :  { %702 = vmatprep.subr.bf16.mxu0 %v782_v6  ;;  %763 = vmatprep.subr.bf16.mxu1 %v782_v6  ;;  %v815_v31 = vld [vmem:[%s1133_s0 + $0x70] ss:$8 sps:$4 sm:$0xff]  }
   0xf   :  { %703 = vmatpush3.bf16.msra.mxu0 %v783_v7  ;;  %771 = vmatpush3.bf16.msra.mxu1 %v783_v7 }
  0x10   :  { %704 = vmatprep.subr.bf16.mxu0 %v784_v8  ;;  %764 = vmatprep.subr.bf16.mxu1 %v784_v8 }
  0x13   :  { %705 = vmatpush3.bf16.msra.mxu0 %v785_v9  ;;  %772 = vmatpush3.bf16.msra.mxu1 %v785_v9 }
  0x14   :  { %706 = vmatprep.subr.bf16.mxu0 %v786_v10  ;;  %765 = vmatprep.subr.bf16.mxu1 %v786_v10 }
  0x17   :  { %707 = vmatpush3.bf16.msra.mxu0 %v787_v12  ;;  %773 = vmatpush3.bf16.msra.mxu1 %v787_v12 }
  0x18   :  { %708 = vmatprep.subr.bf16.mxu0 %v788_v14  ;;  %766 = vmatprep.subr.bf16.mxu1 %v788_v14 }
  0x1b   :  { %709 = vmatpush3.bf16.msra.mxu0 %v789_v15  ;;  %774 = vmatpush3.bf16.msra.mxu1 %v789_v15 }
  0x1c   :  { %710 = vmatprep.subr.bf16.mxu0 %v790_v16  ;;  %767 = vmatprep.subr.bf16.mxu1 %v790_v16 }
  0x1f   :  { %711 = vmatpush3.bf16.msra.mxu0 %v791_v17  ;;  %775 = vmatpush3.bf16.msra.mxu1 %v791_v17 }
  0x22   :  { %275 = vmatmul.mubr.bf16.vlgmr.msra.gmra.mxu0 %v792_v18  ;;  %307 = vmatmul.mubr.bf16.vlgmr.msra.gmra.mxu1 %v798_v19 }
  0x23   :  { %282 = vmatprep.mubr.bf16.mxu0 %v795_v20  ;;  %314 = vmatprep.mubr.bf16.mxu1 %v804_v21 }
  0x2a   :  { %283 = vmatmul.mubr.bf16.gmra.mxu0 %v797_v22  ;;  %315 = vmatmul.mubr.bf16.gmra.mxu1 %v806_v23 }
  0x2b   :  { %290 = vmatprep.mubr.bf16.mxu0 %v801_v24  ;;  %322 = vmatprep.mubr.bf16.mxu1 %v810_v25 }
  0x32   :  { %291 = vmatmul.mubr.bf16.gmra.mxu0 %v803_v26  ;;  %323 = vmatmul.mubr.bf16.gmra.mxu1 %v812_v27 }
  0x33   :  { %298 = vmatprep.mubr.bf16.mxu0 %v807_v28  ;;  %330 = vmatprep.mubr.bf16.mxu1 %v813_v29 }
  0x3a   :  { %299 = vmatmul.mubr.bf16.gmra.mxu0 %v809_v30  ;;  %331 = vmatmul.mubr.bf16.gmra.mxu1 %v815_v31 }
  0xe2   :  { %v712_v32 = vpop.f32.mrf.mxu0  ;;  %v736_v33 = vpop.f32.mrf.mxu1 }
  0xe4   :  { %v713_v34 = vpop.f32.mrf.mxu0  ;;  %v737_v35 = vpop.f32.mrf.mxu1 }
  0xe5   :  { %v941_v51 = vadd.f32 %v713_v34, %v712_v32  ;;  %v738_v16 = vadd.f32 %v737_v35, %v736_v33 }
  0xe6   :  { %v715_v36 = vpop.f32.mrf.mxu0  ;;  %v739_v37 = vpop.f32.mrf.mxu1 }
  0xe7   :  { %v340_v58 = vsel %vm339_vm0, %v941_v51, 0.0  ;;  %v355_v23 = vsel %vm339_vm0, %v738_v16, 0.0 }
  0xe8   :  { %v716_v38 = vpop.f32.mrf.mxu0  ;;  %v740_v39 = vpop.f32.mrf.mxu1 }
  0xe9   :  { %v939_v48 = vadd.f32 %v716_v38, %v715_v36  ;;  %v741_v19 = vadd.f32 %v740_v39, %v739_v37 }
  0xea   :  { %v718_v40 = vpop.f32.mrf.mxu0  ;;  %v742_v41 = vpop.f32.mrf.mxu1 }
  0xeb   :  { %v341_v55 = vsel %vm339_vm0, %v939_v48, 0.0  ;;  %v357_v26 = vsel %vm339_vm0, %v741_v19, 0.0 }
  0xec   :  { %v719_v42 = vpop.f32.mrf.mxu0  ;;  %v743_v43 = vpop.f32.mrf.mxu1  ;;  %v342_v61 = vadd.f32 %v341_v55, %v340_v58 }
  0xed   :  { %v943_v52 = vadd.f32 %v719_v42, %v718_v40  ;;  %v744_v24 = vadd.f32 %v743_v43, %v742_v41 }
  0xee   :  { %v721_v44 = vpop.f32.mrf.mxu0  ;;  %v745_v45 = vpop.f32.mrf.mxu1 }
  0xef   :  { %v343_v59 = vsel %vm339_vm0, %v943_v52, 0.0  ;;  %v359_v30 = vsel %vm339_vm0, %v744_v24, 0.0 }
  0xf0   :  { %v722_v46 = vpop.f32.mrf.mxu0  ;;  %v746_v47 = vpop.f32.mrf.mxu1  ;;  %v344_v2 = vadd.f32 %v343_v59, %v342_v61 }
  0xf1   :  { %v947_v56 = vadd.f32 %v722_v46, %v721_v44  ;;  %v747_v27 = vadd.f32 %v746_v47, %v745_v45 }
  0xf2   :  { %v724_v49 = vpop.f32.mrf.mxu0  ;;  %v748_v50 = vpop.f32.mrf.mxu1 }
  0xf3   :  { %v345_v0 = vsel %vm339_vm0, %v947_v56, 0.0  ;;  %v361_v33 = vsel %vm339_vm0, %v747_v27, 0.0 }
  0xf4   :  { %v725_v53 = vpop.f32.mrf.mxu0  ;;  %v749_v54 = vpop.f32.mrf.mxu1  ;;  %v346_v5 = vadd.f32 %v345_v0, %v344_v2 }
  0xf5   :  { %v953_v60 = vadd.f32 %v725_v53, %v724_v49  ;;  %v750_v31 = vadd.f32 %v749_v54, %v748_v50 }
  0xf6   :  { %v727_v57 = vpop.f32.mrf.mxu0  ;;  %v751_v63 = vpop.f32.mrf.mxu1 }
  0xf7   :  { %v347_v4 = vsel %vm339_vm0, %v953_v60, 0.0  ;;  %v363_v37 = vsel %vm339_vm0, %v750_v31, 0.0 }
  0xf8   :  { %v728_v62 = vpop.f32.mrf.mxu0  ;;  %v752_v7 = vpop.f32.mrf.mxu1  ;;  %v348_v10 = vadd.f32 %v347_v4, %v346_v5 }
  0xf9   :  { %v729_v1 = vadd.f32 %v728_v62, %v727_v57  ;;  %v753_v34 = vadd.f32 %v752_v7, %v751_v63 }
  0xfa   :  { %v730_v3 = vpop.f32.mrf.mxu0  ;;  %v754_v15 = vpop.f32.mrf.mxu1 }
  0xfb   :  { %v349_v8 = vsel %vm339_vm0, %v729_v1, 0.0  ;;  %v365_v40 = vsel %vm339_vm0, %v753_v34, 0.0 }
  0xfc   :  { %v731_v6 = vpop.f32.mrf.mxu0  ;;  %v350_v13 = vadd.f32 %v349_v8, %v348_v10  ;;  %v755_v22 = vpop.f32.mrf.mxu1 }
  0xfd   :  { %v732_v9 = vadd.f32 %v731_v6, %v730_v3  ;;  %v756_v38 = vadd.f32 %v755_v22, %v754_v15 }
  0xfe   :  { %v733_v11 = vpop.f32.mrf.mxu0  ;;  %v757_v29 = vpop.f32.mrf.mxu1 }
  0xff   :  { %v351_v12 = vsel %vm339_vm0, %v732_v9, 0.0  ;;  %v367_v43 = vsel %vm339_vm0, %v756_v38, 0.0 }
 0x100   :  { %v734_v14 = vpop.f32.mrf.mxu0  ;;  %v352_v18 = vadd.f32 %v351_v12, %v350_v13  ;;  %v758_v36 = vpop.f32.mrf.mxu1 }
 0x101   :  { %v735_v17 = vadd.f32 %v734_v14, %v733_v11  ;;  %v759_v41 = vadd.f32 %v758_v36, %v757_v29 }
 0x103   :  { %v353_v20 = vsel %vm339_vm0, %v735_v17, 0.0  ;;  %v369_v45 = vsel %vm339_vm0, %v759_v41, 0.0 }
 0x104   :  { %v354_v21 = vadd.f32 %v353_v20, %v352_v18 }
 0x106   :  { %v356_v25 = vadd.f32 %v355_v23, %v354_v21 }
 0x108   :  { %v358_v28 = vadd.f32 %v357_v26, %v356_v25 }
 0x10a   :  { %v360_v32 = vadd.f32 %v359_v30, %v358_v28 }
 0x10c   :  { %v362_v35 = vadd.f32 %v361_v33, %v360_v32 }
 0x10e   :  { %v364_v39 = vadd.f32 %v363_v37, %v362_v35 }
 0x110   :  { %v366_v42 = vadd.f32 %v365_v40, %v364_v39 }
 0x112   :  { %v368_v44 = vadd.f32 %v367_v43, %v366_v42 }
 0x114   :  { %v370_v46 = vadd.f32 %v369_v45, %v368_v44 }
 0x116   :  { %v371_v47 = vrot.slane %v370_v46, 4 }
 0x118   :  { %v372_v49 = vadd.f32 %v371_v47, %v370_v46 }
 0x11a   :  { %v373_v50 = vrot.slane %v372_v49, 2 }
 0x11c   :  { %v374_v53 = vadd.f32 %v373_v50, %v372_v49 }
 0x11e   :  { %v375_v54 = vrot.slane %v374_v53, 1 }
 0x120   :  { %v376_v55 = vadd.f32 %v375_v54, %v374_v53 }
 0x122   :  { %v378_v57 = vmul.f32 0.0078125, %v376_v55 }
 0x124   :  { %v971_v58 = vsub.f32 %v941_v51, %v378_v57  ;;  %v974_v59 = vsub.f32 %v939_v48, %v378_v57  ;;  %v977_v61 = vsub.f32 %v943_v52, %v378_v57  ;;  %v980_v62 = vsub.f32 %v947_v56, %v378_v57 }
 0x125   :  { %v987_v2 = vsub.f32 %v953_v60, %v378_v57  ;;  %v991_v48 = vsub.f32 %v729_v1, %v378_v57  ;;  %v997_v5 = vsub.f32 %v732_v9, %v378_v57  ;;  %v1002_v8 = vsub.f32 %v735_v17, %v378_v57 }
 0x126   :  { %v395_v63 = vmul.f32 %v971_v58, %v971_v58  ;;  %v396_v0 = vmul.f32 %v974_v59, %v974_v59  ;;  %v397_v51 = vmul.f32 %v977_v61, %v977_v61  ;;  %v398_v52 = vmul.f32 %v980_v62, %v980_v62 }
 0x127   :  { %v399_v6 = vmul.f32 %v987_v2, %v987_v2  ;;  %v400_v1 = vmul.f32 %v991_v48, %v991_v48  ;;  %v1007_v12 = vsub.f32 %v738_v16, %v378_v57  ;;  %v401_v9 = vmul.f32 %v997_v5, %v997_v5 }
 0x128   :  { %v411_v56 = vsel %vm339_vm0, %v395_v63, 0.0  ;;  %v412_v3 = vsel %vm339_vm0, %v396_v0, 0.0  ;;  %v414_v60 = vsel %vm339_vm0, %v397_v51, 0.0  ;;  %v416_v10 = vsel %vm339_vm0, %v398_v52, 0.0 }
 0x129   :  { %v413_v4 = vadd.f32 %v412_v3, %v411_v56  ;;  %v418_v13 = vsel %vm339_vm0, %v399_v6, 0.0  ;;  %v1012_v15 = vsub.f32 %v741_v19, %v378_v57  ;;  %v402_v17 = vmul.f32 %v1002_v8, %v1002_v8 }
 0x12a   :  { %v420_v18 = vsel %vm339_vm0, %v400_v1, 0.0  ;;  %v1017_v21 = vsub.f32 %v744_v24, %v378_v57  ;;  %v403_v16 = vmul.f32 %v1007_v12, %v1007_v12  ;;  %v422_v22 = vsel %vm339_vm0, %v401_v9, 0.0 }
 0x12b   :  { %v415_v7 = vadd.f32 %v414_v60, %v413_v4  ;;  %v390_v25 = vsub.f32 %v747_v27, %v378_v57  ;;  %v404_v26 = vmul.f32 %v1012_v15, %v1012_v15  ;;  %v424_v19 = vsel %vm339_vm0, %v402_v17, 0.0 }
 0x12c   :  { %v391_v29 = vsub.f32 %v750_v31, %v378_v57  ;;  %v405_v30 = vmul.f32 %v1017_v21, %v1017_v21  ;;  %v426_v24 = vsel %vm339_vm0, %v403_v16, 0.0  ;;  %v392_v33 = vsub.f32 %v753_v34, %v378_v57 }
 0x12d   :  { %v417_v11 = vadd.f32 %v416_v10, %v415_v7  ;;  %v406_v35 = vmul.f32 %v390_v25, %v390_v25  ;;  %v428_v36 = vsel %vm339_vm0, %v404_v26, 0.0  ;;  %v393_v39 = vsub.f32 %v756_v38, %v378_v57  ;;  %v449_v7 = vld [vmem:[%s1134_s2] sm:$0x1] }
 0x12e   :  { %v407_v27 = vmul.f32 %v391_v29, %v391_v29  ;;  %v430_v40 = vsel %vm339_vm0, %v405_v30, 0.0  ;;  %v394_v43 = vsub.f32 %v759_v41, %v378_v57  ;;  %v408_v44 = vmul.f32 %v392_v33, %v392_v33  ;;  %v663_v26 = vld [vmem:[%s1135_s3] ss:$0 sm:$0xff] }
 0x12f   :  { %v419_v14 = vadd.f32 %v418_v13, %v417_v11  ;;  %v432_v31 = vsel %vm339_vm0, %v406_v35, 0.0  ;;  %v409_v46 = vmul.f32 %v393_v39, %v393_v39  ;;  %v454_v6 = vlaneseq }
 0x130   :  { %v434_v47 = vsel %vm339_vm0, %v407_v27, 0.0  ;;  %v410_v50 = vmul.f32 %v394_v43, %v394_v43  ;;  %v436_v34 = vsel %vm339_vm0, %v408_v44, 0.0 }
 0x131   :  { %v421_v20 = vadd.f32 %v420_v18, %v419_v14  ;;  %v438_v54 = vsel %vm339_vm0, %v409_v46, 0.0  ;;  %v455_v60 = vshrl.u32 %v454_v6, 7 }
 0x132   :  { %v440_v55 = vsel %vm339_vm0, %v410_v50, 0.0 }
 0x133   :  { %v423_v23 = vadd.f32 %v422_v22, %v421_v20  ;;  %v456_v1 = vsub.s32 0, %v455_v60 }
 0x135   :  { %v425_v28 = vadd.f32 %v424_v19, %v423_v23 }
 0x137   :  { %v427_v32 = vadd.f32 %v426_v24, %v425_v28 }
 0x139   :  { %v429_v37 = vadd.f32 %v428_v36, %v427_v32 }
 0x13b   :  { %v431_v42 = vadd.f32 %v430_v40, %v429_v37 }
 0x13d   :  { %v433_v45 = vadd.f32 %v432_v31, %v431_v42 }
 0x13f   :  { %v435_v49 = vadd.f32 %v434_v47, %v433_v45 }
 0x141   :  { %v437_v53 = vadd.f32 %v436_v34, %v435_v49 }
 0x143   :  { %v439_v38 = vadd.f32 %v438_v54, %v437_v53 }
 0x145   :  { %v441_v63 = vadd.f32 %v440_v55, %v439_v38 }
 0x147   :  { %v442_v0 = vrot.slane %v441_v63, 4 }
 0x149   :  { %v443_v41 = vadd.f32 %v442_v0, %v441_v63 }
 0x14b   :  { %v444_v57 = vrot.slane %v443_v41, 2 }
 0x14d   :  { %v445_v51 = vadd.f32 %v444_v57, %v443_v41 }
 0x14f   :  { %v446_v52 = vrot.slane %v445_v51, 1 }
 0x151   :  { %v447_v56 = vadd.f32 %v446_v52, %v445_v51 }
 0x153   :  { %v448_v3 = vmul.f32 0.0078125, %v447_v56 }
 0x155   :  { %v450_v4 = vadd.f32 1e-05, %v448_v3 }
 0x157   :  { %816 = vrsqrt.f32 %v450_v4 }
 0x164   :  { %v817_v10 = vpop.eup %816 }
 0x165   :  { %v452_v11 = vmul.f32 %v817_v10, %v449_v7 }
 0x167   :  { %v457_v9 = vrot.slane %v452_v11, %v456_v1 }
 0x169   :  { %v459_v13 = vmul.f32 %v457_v9, %v971_v58  ;;  %v460_v14 = vmul.f32 %v457_v9, %v974_v59  ;;  %v461_v17 = vmul.f32 %v457_v9, %v977_v61  ;;  %v462_v18 = vmul.f32 %v457_v9, %v980_v62 }
 0x16a   :  { %v463_v20 = vmul.f32 %v457_v9, %v987_v2  ;;  %v464_v16 = vmul.f32 %v457_v9, %v991_v48  ;;  %v465_v22 = vmul.f32 %v457_v9, %v997_v5  ;;  %v466_v23 = vmul.f32 %v457_v9, %v1002_v8 }
 0x16b   :  { %v467_v58 = vmul.f32 %v457_v9, %v1007_v12  ;;  %v468_v59 = vmul.f32 %v457_v9, %v1012_v15  ;;  %v469_v61 = vmul.f32 %v457_v9, %v1017_v21  ;;  %v470_v19 = vmul.f32 %v457_v9, %v390_v25 }
 0x16c   :  { %v471_v62 = vmul.f32 %v457_v9, %v391_v29  ;;  %v472_v28 = vmul.f32 %v457_v9, %v392_v33  ;;  %v473_v2 = vmul.f32 %v457_v9, %v393_v39  ;;  %v474_v30 = vmul.f32 %v457_v9, %v394_v43 }
 0x16d   :  { %v482_v48 = vadd.f32 %v663_v26, %v459_v13  ;;  %v483_v24 = vadd.f32 %v663_v26, %v460_v14  ;;  %v484_v5 = vadd.f32 %v663_v26, %v461_v17  ;;  %v485_v32 = vadd.f32 %v663_v26, %v462_v18 }
 0x16e   :  { %v486_v8 = vadd.f32 %v663_v26, %v463_v20  ;;  %v487_v35 = vadd.f32 %v663_v26, %v464_v16  ;;  %v488_v36 = vadd.f32 %v663_v26, %v465_v22  ;;  %v489_v37 = vadd.f32 %v663_v26, %v466_v23 }
 0x16f   :  { %v490_v27 = vadd.f32 %v663_v26, %v467_v58  ;;  %v491_v40 = vadd.f32 %v663_v26, %v468_v59  ;;  %v492_v12 = vadd.f32 %v663_v26, %v469_v61  ;;  %v493_v42 = vadd.f32 %v663_v26, %v470_v19 }
 0x170   :  { %v494_v15 = vadd.f32 %v663_v26, %v471_v62  ;;  %v495_v44 = vadd.f32 %v663_v26, %v472_v28  ;;  %v496_v21 = vadd.f32 %v663_v26, %v473_v2  ;;  %v497_v25 = vadd.f32 %v663_v26, %v474_v30 }
 0x171   :  { %vm499_vm2 = vcmp.gt.f32.partialorder %v483_v24, 0.0  ;;  %vm500_vm3 = vcmp.gt.f32.partialorder %v484_v5, 0.0  ;;  %vm501_vm4 = vcmp.gt.f32.partialorder %v485_v32, 0.0  ;;  %vm502_vm5 = vcmp.gt.f32.partialorder %v486_v8, 0.0 }
 0x172   :  { %vm503_vm6 = vcmp.gt.f32.partialorder %v487_v35, 0.0  ;;  %vm505_vm8 = vcmp.gt.f32.partialorder %v489_v37, 0.0  ;;  %vm506_vm9 = vcmp.gt.f32.partialorder %v490_v27, 0.0  ;;  %vm507_vm10 = vcmp.gt.f32.partialorder %v491_v40, 0.0 }
 0x173   :  { %vm508_vm11 = vcmp.gt.f32.partialorder %v492_v12, 0.0  ;;  %vm509_vm12 = vcmp.gt.f32.partialorder %v493_v42, 0.0  ;;  %vm510_vm13 = vcmp.gt.f32.partialorder %v494_v15, 0.0  ;;  %vm511_vm14 = vcmp.gt.f32.partialorder %v495_v44, 0.0 }
 0x174   :  { %vm512_vm15 = vcmp.gt.f32.partialorder %v496_v21, 0.0  ;;  %vm513_vm0 = vcmp.gt.f32.partialorder %v497_v25, 0.0  ;;  %v514_v29 = vmul.f32 0.2, %v482_v48  ;;  %v515_v33 = vmul.f32 0.2, %v483_v24 }
 0x175   :  { %v516_v39 = vmul.f32 0.2, %v484_v5  ;;  %v517_v43 = vmul.f32 0.2, %v485_v32  ;;  %v518_v31 = vmul.f32 0.2, %v486_v8 }
 0x176   :  { %v519_v45 = vmul.f32 0.2, %v487_v35  ;;  %v520_v46 = vmul.f32 0.2, %v488_v36  ;;  %v521_v47 = vmul.f32 0.2, %v489_v37  ;;  %v531_v38 = vsel %vm499_vm2, %v483_v24, %v515_v33 }
 0x177   :  { %v522_v49 = vmul.f32 0.2, %v490_v27  ;;  %vm1137_vm7 = vcmp.gt.f32.partialorder %v482_v48, 0.0  ;;  %v523_v34 = vmul.f32 0.2, %v491_v40  ;;  %v532_v41 = vsel %vm500_vm3, %v484_v5, %v516_v39 }
 0x178   :  { %v530_v50 = vsel %vm1137_vm7, %v482_v48, %v514_v29  ;;  %v524_v53 = vmul.f32 0.2, %v492_v12  ;;  %v525_v54 = vmul.f32 0.2, %v493_v42  ;;  %v526_v55 = vmul.f32 0.2, %v494_v15 }
 0x179   :  { %v527_v63 = vmul.f32 0.2, %v495_v44  ;;  %v528_v0 = vmul.f32 0.2, %v496_v21  ;;  %v529_v57 = vmul.f32 0.2, %v497_v25  ;;  %v533_v51 = vsel %vm501_vm4, %v485_v32, %v517_v43 }
 0x17a   :  { %v534_v52 = vsel %vm502_vm5, %v486_v8, %v518_v31  ;;  %v535_v56 = vsel %vm503_vm6, %v487_v35, %v519_v45  ;;  %vm1138_vm1 = vcmp.gt.f32.partialorder %v488_v36, 0.0  ;;  %v537_v4 = vsel %vm505_vm8, %v489_v37, %v521_v47 }
 0x17b   :  { %v536_v3 = vsel %vm1138_vm1, %v488_v36, %v520_v46  ;;  %v538_v6 = vsel %vm506_vm9, %v490_v27, %v522_v49  ;;  %v539_v60 = vsel %vm507_vm10, %v491_v40, %v523_v34  ;;  %v540_v7 = vsel %vm508_vm11, %v492_v12, %v524_v53 }
 0x17c   :  { %v541_v1 = vsel %vm509_vm12, %v493_v42, %v525_v54  ;;  %v542_v10 = vsel %vm510_vm13, %v494_v15, %v526_v55  ;;  %v543_v11 = vsel %vm511_vm14, %v495_v44, %v527_v63  ;;  %v544_v9 = vsel %vm512_vm15, %v496_v21, %v528_v0 }
 0x17d   :  { %v545_v13 = vsel %vm513_vm0, %v497_v25, %v529_v57  ;;  %v680_v14 = vpack.c.bf16 %v530_v50, %v530_v50  ;;  %v681_v17 = vpack.c.bf16 %v531_v38, %v531_v38  ;;  %v682_v18 = vpack.c.bf16 %v532_v41, %v532_v41 }
 0x17e   :  { %v683_v20 = vpack.c.bf16 %v533_v51, %v533_v51  ;;  %v684_v16 = vpack.c.bf16 %v534_v52, %v534_v52  ;;  %v685_v22 = vpack.c.bf16 %v535_v56, %v535_v56  ;;  %v686_v23 = vpack.c.bf16 %v536_v3, %v536_v3 }
 0x17f   :  { %v687_v26 = vpack.c.bf16 %v537_v4, %v537_v4  ;;  %v688_v58 = vpack.c.bf16 %v538_v6, %v538_v6  ;;  %v689_v59 = vpack.c.bf16 %v539_v60, %v539_v60  ;;  %vm1139_vm1 = vcmask 257024  }
 0x180   :  { %611 = vst.msk [vmem:[%s1136_s4] sm:$0xf] %vm1139_vm1, %v680_v14  ;;  %vm1140_vm2 = vmmov %vm1139_vm1  ;;  %v690_v61 = vpack.c.bf16 %v540_v7, %v540_v7  ;;  %v691_v19 = vpack.c.bf16 %v541_v1, %v541_v1  ;;  %v692_v62 = vpack.c.bf16 %v542_v10, %v542_v10  ;;  %v693_v28 = vpack.c.bf16 %v543_v11, %v543_v11 }
 0x181   :  { %612 = vst.msk [vmem:[%s1136_s4 + $0x4] sm:$0xf] %vm1140_vm2, %v681_v17  ;;  %vm1141_vm3 = vmmov %vm1139_vm1  ;;  %v694_v2 = vpack.c.bf16 %v544_v9, %v544_v9  ;;  %v695_v30 = vpack.c.bf16 %v545_v13, %v545_v13 }
 0x182   :  { %613 = vst.msk [vmem:[%s1136_s4 + $0x8] sm:$0xf] %vm1141_vm3, %v682_v18  ;;  %vm1142_vm4 = vmmov %vm1139_vm1 }
 0x183   :  { %614 = vst.msk [vmem:[%s1136_s4 + $0xc] sm:$0xf] %vm1142_vm4, %v683_v20  ;;  %vm1143_vm5 = vmmov %vm1139_vm1 }
 0x184   :  { %615 = vst.msk [vmem:[%s1136_s4 + $0x10] sm:$0xf] %vm1143_vm5, %v684_v16  ;;  %vm1144_vm6 = vmmov %vm1139_vm1 }
 0x185   :  { %616 = vst.msk [vmem:[%s1136_s4 + $0x14] sm:$0xf] %vm1144_vm6, %v685_v22  ;;  %vm1145_vm7 = vmmov %vm1139_vm1 }
 0x186   :  { %617 = vst.msk [vmem:[%s1136_s4 + $0x18] sm:$0xf] %vm1145_vm7, %v686_v23  ;;  %vm1146_vm8 = vmmov %vm1139_vm1 }
 0x187   :  { %618 = vst.msk [vmem:[%s1136_s4 + $0x1c] sm:$0xf] %vm1146_vm8, %v687_v26  ;;  %vm1147_vm9 = vmmov %vm1139_vm1 }
 0x188   :  { %619 = vst.msk [vmem:[%s1136_s4 + $0x20] sm:$0xf] %vm1147_vm9, %v688_v58  ;;  %vm1148_vm10 = vmmov %vm1139_vm1 }
 0x189   :  { %620 = vst.msk [vmem:[%s1136_s4 + $0x24] sm:$0xf] %vm1148_vm10, %v689_v59  ;;  %vm1149_vm11 = vmmov %vm1139_vm1 }
 0x18a   :  { %621 = vst.msk [vmem:[%s1136_s4 + $0x28] sm:$0xf] %vm1149_vm11, %v690_v61  ;;  %vm1150_vm12 = vmmov %vm1139_vm1 }
 0x18b   :  { %622 = vst.msk [vmem:[%s1136_s4 + $0x2c] sm:$0xf] %vm1150_vm12, %v691_v19  ;;  %vm1151_vm13 = vmmov %vm1139_vm1 }
 0x18c   :  { %623 = vst.msk [vmem:[%s1136_s4 + $0x30] sm:$0xf] %vm1151_vm13, %v692_v62  ;;  %vm1152_vm14 = vmmov %vm1139_vm1 }
 0x18d   :  { %624 = vst.msk [vmem:[%s1136_s4 + $0x34] sm:$0xf] %vm1152_vm14, %v693_v28  ;;  %vm1153_vm15 = vmmov %vm1139_vm1 }
 0x18e   :  { %625 = vst.msk [vmem:[%s1136_s4 + $0x38] sm:$0xf] %vm1153_vm15, %v694_v2  ;;  %vm1154_vm0 = vmmov %vm1139_vm1 }
 0x18f   :  { %626 = vst.msk [vmem:[%s1136_s4 + $0x3c] sm:$0xf] %vm1154_vm0, %v695_v30 }

// kernel: netd_forward.7
= control target key start
LH: loop header
LB: loop body
LE: loop exit
PB: predicated region body
PF: predicated region fallthrough
CT: control target
= control target key end

     0   :  { %v756_v40 = vmov 0.0   ;;  %vm757_vm0 = vmmov 0   ;;  %vm426_vm1 = vcmask 523264   ;;  %vm510_vm6 = vcmask 261120   ;;  %s950_s1 = inlined_call_operand.vmem [shape: bf16[512,64], index: 1, kind: input, shape index: {}]   ;;  %s951_s0 = inlined_call_operand.vmem [shape: bf16[32,512], index: 0, kind: input, shape index: {}]   ;;  %s952_s2 = inlined_call_operand.vmem [shape: f32[1,64], index: 2, kind: input, shape index: {}]   ;;  %s953_s3 = inlined_call_operand.vmem [shape: f32[1,64], index: 3, kind: input, shape index: {}]   ;;  %s954_s4 = inlined_call_operand.vmem [shape: f32[32,64], index: 4, kind: input, shape index: {}]   ;;  %s955_s5 = inlined_call_operand.vmem [shape: f32[2,32], index: 5, kind: input, shape index: {}]   ;;  %s956_s6 = inlined_call_operand.vmem [shape: f32[2,1], index: 6, kind: output, shape index: {}]  }
   0x1   :  { %v710_v0 = vld [vmem:[%s950_s1 + $0x78] sm:$0xff]   ;;  %v714_v4 = vld [vmem:[%s950_s1 + $0x70] sm:$0xff]   ;;  %v718_v8 = vld [vmem:[%s950_s1 + $0x68] sm:$0xff]   ;;  %vm584_vm7 = vcmask 517120   ;;  %vm588_vm8 = vcmask 1024  }
   0x2   :  { %v711_v1 = vld [vmem:[%s950_s1 + $0xf8] sm:$0xff]   ;;  %636 = vmatprep.subr.bf16.mxu0 %v710_v0  ;;  %v715_v5 = vld [vmem:[%s950_s1 + $0xf0] sm:$0xff]   ;;  %v719_v9 = vld [vmem:[%s950_s1 + $0xe8] sm:$0xff]  }
   0x3   :  { %v712_v2 = vld [vmem:[%s950_s1 + $0x38] sm:$0xff]   ;;  %664 = vmatprep.subr.bf16.mxu1 %v711_v1  ;;  %v716_v6 = vld [vmem:[%s950_s1 + $0x30] sm:$0xff]   ;;  %v720_v10 = vld [vmem:[%s950_s1 + $0x28] sm:$0xff]  }
   0x4   :  { %v713_v3 = vld [vmem:[%s950_s1 + $0xb8] sm:$0xff]   ;;  %637 = vmatpush3.bf16.msra.mxu0 %v712_v2  ;;  %v717_v7 = vld [vmem:[%s950_s1 + $0xb0] sm:$0xff]   ;;  %v721_v11 = vld [vmem:[%s950_s1 + $0xa8] sm:$0xff]  }
   0x5   :  { %665 = vmatpush3.bf16.msra.mxu1 %v713_v3  ;;  %638 = vmatprep.subr.bf16.mxu0 %v714_v4  ;;  %v722_v12 = vld [vmem:[%s950_s1 + $0x60] sm:$0xff]   ;;  %v726_v16 = vld [vmem:[%s950_s1 + $0x58] sm:$0xff]   ;;  %v730_v20 = vld [vmem:[%s950_s1 + $0x50] sm:$0xff]  }
   0x6   :  { %666 = vmatprep.subr.bf16.mxu1 %v715_v5  ;;  %v723_v13 = vld [vmem:[%s950_s1 + $0xe0] sm:$0xff]   ;;  %v727_v17 = vld [vmem:[%s950_s1 + $0xd8] sm:$0xff]   ;;  %v731_v21 = vld [vmem:[%s950_s1 + $0xd0] sm:$0xff]  }
   0x7   :  { %v724_v14 = vld [vmem:[%s950_s1 + $0x20] sm:$0xff]   ;;  %v728_v18 = vld [vmem:[%s950_s1 + $0x18] sm:$0xff]   ;;  %v732_v22 = vld [vmem:[%s950_s1 + $0x10] sm:$0xff]  }
   0x8   :  { %639 = vmatpush3.bf16.msra.mxu0 %v716_v6  ;;  %v725_v15 = vld [vmem:[%s950_s1 + $0xa0] sm:$0xff]   ;;  %v729_v19 = vld [vmem:[%s950_s1 + $0x98] sm:$0xff]   ;;  %v733_v23 = vld [vmem:[%s950_s1 + $0x90] sm:$0xff]  }
   0x9   :  { %667 = vmatpush3.bf16.msra.mxu1 %v717_v7  ;;  %640 = vmatprep.subr.bf16.mxu0 %v718_v8  ;;  %v734_v24 = vld [vmem:[%s950_s1 + $0x48] sm:$0xff]   ;;  %v738_v28 = vld [vmem:[%s950_s1 + $0x40] sm:$0xff]  }
   0xa   :  { %668 = vmatprep.subr.bf16.mxu1 %v719_v9  ;;  %v735_v25 = vld [vmem:[%s950_s1 + $0xc8] sm:$0xff]   ;;  %v739_v29 = vld [vmem:[%s950_s1 + $0xc0] sm:$0xff]  }
   0xb   :  { %v736_v26 = vld [vmem:[%s950_s1 + $0x8] sm:$0xff]   ;;  %v740_v30 = vld [vmem:[%s950_s1] sm:$0xff]  }
   0xc   :  { %641 = vmatpush3.bf16.msra.mxu0 %v720_v10  ;;  %v737_v27 = vld [vmem:[%s950_s1 + $0x88] sm:$0xff]   ;;  %v741_v31 = vld [vmem:[%s950_s1 + $0x80] sm:$0xff]  }
   0xd   :  { %669 = vmatpush3.bf16.msra.mxu1 %v721_v11  ;;  %642 = vmatprep.subr.bf16.mxu0 %v722_v12  ;;  %v742_v32 = vld [vmem:[%s951_s0] ss:$16 sps:$4 sm:$0xff]   ;;  %v744_v33 = vld [vmem:[%s951_s0 + $0x4] ss:$16 sps:$4 sm:$0xff]   ;;  %v745_v34 = vld [vmem:[%s951_s0 + $0x8] ss:$16 sps:$4 sm:$0xff]  }
   0xe   :  { %670 = vmatprep.subr.bf16.mxu1 %v723_v13  ;;  %v747_v35 = vld [vmem:[%s951_s0 + $0xc] ss:$16 sps:$4 sm:$0xff]   ;;  %360 = vmatprep.mubr.bf16.mxu0 %v744_v33  ;;  %v748_v36 = vld [vmem:[%s951_s0 + $0x24] ss:$16 sps:$4 sm:$0xff]   ;;  %v752_v38 = vld [vmem:[%s951_s0 + $0x20] ss:$16 sps:$4 sm:$0xff]  }
   0xf   :  { %409 = vmatprep.mubr.bf16.mxu1 %v747_v35  ;;  %v750_v37 = vld [vmem:[%s951_s0 + $0x2c] ss:$16 sps:$4 sm:$0xff]   ;;  %v753_v39 = vld [vmem:[%s951_s0 + $0x28] ss:$16 sps:$4 sm:$0xff]  }
  0x10   :  { %643 = vmatpush3.bf16.msra.mxu0 %v724_v14 }
  0x11   :  { %671 = vmatpush3.bf16.msra.mxu1 %v725_v15  ;;  %644 = vmatprep.subr.bf16.mxu0 %v726_v16 }
  0x12   :  { %672 = vmatprep.subr.bf16.mxu1 %v727_v17 }
  0x14   :  { %645 = vmatpush3.bf16.msra.mxu0 %v728_v18 }
  0x15   :  { %673 = vmatpush3.bf16.msra.mxu1 %v729_v19  ;;  %646 = vmatprep.subr.bf16.mxu0 %v730_v20 }
  0x16   :  { %674 = vmatprep.subr.bf16.mxu1 %v731_v21 }
  0x18   :  { %647 = vmatpush3.bf16.msra.mxu0 %v732_v22 }
  0x19   :  { %675 = vmatpush3.bf16.msra.mxu1 %v733_v23  ;;  %648 = vmatprep.subr.bf16.mxu0 %v734_v24 }
  0x1a   :  { %676 = vmatprep.subr.bf16.mxu1 %v735_v25 }
  0x1c   :  { %649 = vmatpush3.bf16.msra.mxu0 %v736_v26 }
  0x1d   :  { %677 = vmatpush3.bf16.msra.mxu1 %v737_v27  ;;  %650 = vmatprep.subr.bf16.mxu0 %v738_v28 }
  0x1e   :  { %678 = vmatprep.subr.bf16.mxu1 %v739_v29 }
  0x20   :  { %651 = vmatpush3.bf16.msra.mxu0 %v740_v30 }
  0x21   :  { %679 = vmatpush3.bf16.msra.mxu1 %v741_v31  ;;  %697 = vmatprep.subr.mxu0 %v756_v40 }
  0x23   :  { %361 = vmatmul.mubr.bf16.vlgmr.msra.gmra.mxu0 %v742_v32 }
  0x24   :  { %410 = vmatmul.mubr.bf16.vlgmr.msra.gmra.mxu1 %v745_v34  ;;  %368 = vmatprep.mubr.bf16.mxu0 %v748_v36 }
  0x25   :  { %417 = vmatprep.mubr.bf16.mxu1 %v750_v37 }
  0x2b   :  { %369 = vmatmul.mubr.bf16.gmra.mxu0 %v752_v38 }
  0x2c   :  { %418 = vmatmul.mubr.bf16.gmra.mxu1 %v753_v39  ;;  %705 = vmatprep.mubr.msk.f32.mxu0 %vm757_vm0, %v756_v40 }
  0xe3   :  { %v652_v41 = vpop.f32.mrf.mxu0 }
  0xe4   :  { %v680_v42 = vpop.f32.mrf.mxu1 }
  0xe5   :  { %v653_v43 = vpop.f32.mrf.mxu0 }
  0xe6   :  { %v681_v44 = vpop.f32.mrf.mxu1  ;;  %v654_v50 = vadd.f32 %v653_v43, %v652_v41  ;;  %v469_v43 = vlaneseq }
  0xe7   :  { %v655_v45 = vpop.f32.mrf.mxu0  ;;  %v682_v51 = vadd.f32 %v681_v44, %v680_v42 }
  0xe8   :  { %v683_v46 = vpop.f32.mrf.mxu1  ;;  %v470_v44 = vshrl.u32 %v469_v43, 7 }
  0xe9   :  { %v656_v47 = vpop.f32.mrf.mxu0  ;;  %v412_v59 = vadd.f32 %v682_v51, %v654_v50  ;;  %v634_v50 = vld [vmem:[%s953_s3] ss:$0 sm:$0xff] }
  0xea   :  { %v657_v48 = vadd.f32 %v656_v47, %v655_v45  ;;  %v684_v49 = vpop.f32.mrf.mxu1  ;;  %v464_v45 = vld [vmem:[%s952_s2] sm:$0x1] }
  0xeb   :  { %v685_v52 = vadd.f32 %v684_v49, %v683_v46  ;;  %v658_v53 = vpop.f32.mrf.mxu0  ;;  %v427_v4 = vsel %vm426_vm1, %v412_v59, 0.0  ;;  %v471_v46 = vsub.s32 0, %v470_v44 }
  0xec   :  { %v686_v54 = vpop.f32.mrf.mxu1 }
  0xed   :  { %v415_v55 = vadd.f32 %v685_v52, %v657_v48  ;;  %v659_v56 = vpop.f32.mrf.mxu0 }
  0xee   :  { %v660_v57 = vadd.f32 %v659_v56, %v658_v53  ;;  %v687_v58 = vpop.f32.mrf.mxu1 }
  0xef   :  { %v688_v60 = vadd.f32 %v687_v58, %v686_v54  ;;  %v661_v61 = vpop.f32.mrf.mxu0  ;;  %v428_v63 = vsel %vm426_vm1, %v415_v55, 0.0 }
  0xf0   :  { %v689_v62 = vpop.f32.mrf.mxu1  ;;  %v429_v7 = vadd.f32 %v428_v63, %v427_v4 }
  0xf1   :  { %v420_v0 = vadd.f32 %v688_v60, %v660_v57  ;;  %v662_v1 = vpop.f32.mrf.mxu0 }
  0xf2   :  { %v663_v2 = vadd.f32 %v662_v1, %v661_v61  ;;  %v690_v3 = vpop.f32.mrf.mxu1  ;;  %v503_v1 = vld [vmem:[%s954_s4 + $0x10] sm:$0xff] }
  0xf3   :  { %v430_v5 = vsel %vm426_vm1, %v420_v0, 0.0  ;;  %v691_v6 = vadd.f32 %v690_v3, %v689_v62 }
  0xf4   :  { %v431_v9 = vadd.f32 %v430_v5, %v429_v7  ;;  %v502_v5 = vld [vmem:[%s954_s4 + $0x8] sm:$0xff] }
  0xf5   :  { %v423_v8 = vadd.f32 %v691_v6, %v663_v2 }
  0xf7   :  { %v432_v10 = vsel %vm426_vm1, %v423_v8, 0.0 }
  0xf8   :  { %v433_v11 = vadd.f32 %v432_v10, %v431_v9 }
  0xfa   :  { %v434_v12 = vrot.slane %v433_v11, 4 }
  0xfc   :  { %v435_v13 = vadd.f32 %v434_v12, %v433_v11  ;;  %v509_v11 = vld [vmem:[%s955_s5] sm:$0x3] }
  0xfe   :  { %v436_v14 = vrot.slane %v435_v13, 2 }
 0x100   :  { %v437_v15 = vadd.f32 %v436_v14, %v435_v13 }
 0x102   :  { %v438_v16 = vrot.slane %v437_v15, 1 }
 0x104   :  { %v439_v17 = vadd.f32 %v438_v16, %v437_v15 }
 0x106   :  { %v441_v18 = vmul.f32 0.03125, %v439_v17 }
 0x108   :  { %v442_v19 = vsub.f32 %v412_v59, %v441_v18  ;;  %v443_v20 = vsub.f32 %v415_v55, %v441_v18  ;;  %v444_v21 = vsub.f32 %v420_v0, %v441_v18  ;;  %v445_v22 = vsub.f32 %v423_v8, %v441_v18  ;;  %v504_v59 = vld [vmem:[%s954_s4 + $0x18] sm:$0xff]  ;;  %v501_v8 = vld [vmem:[%s954_s4] sm:$0xff] }
 0x10a   :  { %v446_v23 = vmul.f32 %v442_v19, %v442_v19  ;;  %v447_v24 = vmul.f32 %v443_v20, %v443_v20  ;;  %v448_v25 = vmul.f32 %v444_v21, %v444_v21  ;;  %v449_v26 = vmul.f32 %v445_v22, %v445_v22 }
 0x10c   :  { %v450_v27 = vsel %vm426_vm1, %v446_v23, 0.0  ;;  %v451_v28 = vsel %vm426_vm1, %v447_v24, 0.0  ;;  %v453_v30 = vsel %vm426_vm1, %v448_v25, 0.0  ;;  %v455_v32 = vsel %vm426_vm1, %v449_v26, 0.0 }
 0x10d   :  { %v452_v29 = vadd.f32 %v451_v28, %v450_v27 }
 0x10f   :  { %v454_v31 = vadd.f32 %v453_v30, %v452_v29 }
 0x111   :  { %v456_v33 = vadd.f32 %v455_v32, %v454_v31 }
 0x113   :  { %v457_v34 = vrot.slane %v456_v33, 4 }
 0x115   :  { %v458_v35 = vadd.f32 %v457_v34, %v456_v33 }
 0x117   :  { %v459_v36 = vrot.slane %v458_v35, 2 }
 0x119   :  { %v460_v37 = vadd.f32 %v459_v36, %v458_v35 }
 0x11b   :  { %v461_v38 = vrot.slane %v460_v37, 1 }
 0x11d   :  { %v462_v39 = vadd.f32 %v461_v38, %v460_v37 }
 0x11f   :  { %v463_v41 = vmul.f32 0.03125, %v462_v39 }
 0x121   :  { %v465_v42 = vadd.f32 1e-05, %v463_v41 }
 0x123   :  { %754 = vrsqrt.f32 %v465_v42 }
 0x130   :  { %v755_v47 = vpop.eup %754 }
 0x131   :  { %v467_v48 = vmul.f32 %v755_v47, %v464_v45 }
 0x133   :  { %v472_v49 = vrot.slane %v467_v48, %v471_v46 }
 0x135   :  { %v477_v51 = vmul.f32 %v472_v49, %v445_v22  ;;  %v476_v52 = vmul.f32 %v472_v49, %v444_v21  ;;  %v475_v53 = vmul.f32 %v472_v49, %v443_v20  ;;  %v474_v54 = vmul.f32 %v472_v49, %v442_v19 }
 0x137   :  { %v488_v55 = vadd.f32 %v634_v50, %v477_v51  ;;  %v487_v56 = vadd.f32 %v634_v50, %v476_v52  ;;  %v486_v57 = vadd.f32 %v634_v50, %v475_v53  ;;  %v485_v58 = vadd.f32 %v634_v50, %v474_v54 }
 0x139   :  { %vm492_vm2 = vcmp.gt.f32.partialorder %v488_v55, 0.0  ;;  %v496_v60 = vmul.f32 0.2, %v488_v55  ;;  %vm491_vm3 = vcmp.gt.f32.partialorder %v487_v56, 0.0  ;;  %v495_v61 = vmul.f32 0.2, %v487_v56 }
 0x13a   :  { %vm490_vm4 = vcmp.gt.f32.partialorder %v486_v57, 0.0  ;;  %v494_v62 = vmul.f32 0.2, %v486_v57  ;;  %v493_v2 = vmul.f32 0.2, %v485_v58  ;;  %vm489_vm5 = vcmp.gt.f32.partialorder %v485_v58, 0.0 }
 0x13b   :  { %v500_v63 = vsel %vm492_vm2, %v488_v55, %v496_v60  ;;  %v499_v0 = vsel %vm491_vm3, %v487_v56, %v495_v61 }
 0x13c   :  { %v508_v3 = vmul.f32 %v504_v59, %v500_v63  ;;  %v498_v4 = vsel %vm490_vm4, %v486_v57, %v494_v62  ;;  %v507_v6 = vmul.f32 %v503_v1, %v499_v0  ;;  %v497_v7 = vsel %vm489_vm5, %v485_v58, %v493_v2 }
 0x13d   :  { %v506_v9 = vmul.f32 %v502_v5, %v498_v4  ;;  %v505_v10 = vmul.f32 %v501_v8, %v497_v7 }
 0x13e   :  { %698 = vmatpush3.msra.mxu0 %v508_v3 }
 0x13f   :  { %699 = vmatprep.subr.mxu0 %v756_v40 }
 0x140   :  { %700 = vmatpush3.msra.mxu0 %v507_v6 }
 0x141   :  { %701 = vmatprep.subr.mxu0 %v756_v40 }
 0x142   :  { %702 = vmatpush3.msra.mxu0 %v506_v9 }
 0x143   :  { %703 = vmatprep.subr.mxu0 %v756_v40 }
 0x144   :  { %704 = vmatpush3.msra.mxu0 %v505_v10 }
 0x145   :  { %706 = vmatmul.mubr.msk.f32.vlgmr.msra.gmra.mxu0 %vm510_vm6, %v509_v11 }
 0x205   :  { %v580_v12 = vpop.f32.mrf.mxu0 }
 0x206   :  { %v585_v13 = vsel %vm584_vm7, %v580_v12, 0.0 }
 0x207   :  { %v707_v14 = vpop.f32.mrf.mxu0  ;;  %586 = vadd.xlane.f32.xlu0 %v585_v13 }
 0x290   :  { %v587_v15 = vpop.xlane.xlu0 %586 }
 0x291   :  { %589 = vst.msk [vmem:[%s956_s6] sm:$0x3] %vm588_vm8, %v587_v15 }

</bundles_post_ra>
